<compile_context>
chip_gen: v7x
topology: tpu7x:2x2x1
jax: 0.10.0
libtpu: 0.0.40
codegen_flags: <defaults>
</compile_context>

<pallas_src>
import numpy as np

import jax
import jax.numpy as jnp
from jax.experimental import pallas as pl
from jax.experimental.pallas import tpu as pltpu


# ---------------------------------------------------------------------------
# Layout constants
# ---------------------------------------------------------------------------
_TB = 8          # batch tile per grid step
_C1P = 16        # conv1 out-channels padded 10 -> 16
_C2P = 32        # conv2 out-channels padded 24 -> 32
_FC2P = 128      # fc2 out padded 60 -> 128
_OUTP = 128      # fc3 out padded 10 -> 128 (lane-dense final store)

_C1_LANES = 2 * 12 * _C1P        # 384: (w-parity, pooled-w, channel) of conv1
_C2_LANES = 2 * 4 * _C2P         # 256: (w-parity, pooled-w, channel) of conv2


# ---------------------------------------------------------------------------
# Fused whole-network kernel (one batch tile per grid step)
# ---------------------------------------------------------------------------
def _convnet_kernel(x_ref, t1_ref, b1_ref, t2_ref, b2_ref,
                    fc1w_ref, fc1b_ref, fc2w_ref, fc2b_ref,
                    fc3w_ref, fc3b_ref, o_ref):
    tb = x_ref.shape[0]
    f32 = jnp.float32

    # ---- conv1 (5x5, 1->10) + bias + ReLU + 2x2 maxpool --------------------
    # Input arrives as 4 row-residue planes (rows h = 4*j + p), zero padded.
    x2 = x_ref[...].reshape(tb * 4 * 16, 32)                        # (512, 32)
    # One wide matmul against the 5 concatenated Toeplitz blocks (per kernel row).
    y_all = jnp.dot(x2, t1_ref[...], preferred_element_type=f32)   # (512, 5*384)
    y_all = y_all.reshape(tb, 4, 16, 5 * _C1_LANES)
    bias1 = b1_ref[...]
    conv_g = []
    for r0 in range(4):                       # conv rows h with h % 4 == r0
        acc = bias1
        for ki in range(5):
            p = (r0 + ki) % 4
            m0 = (r0 + ki) // 4
            acc = acc + y_all[:, p, m0:m0 + 8,
                              ki * _C1_LANES:(ki + 1) * _C1_LANES]  # (tb, 8, 384)
        conv_g.append(jnp.maximum(acc, 0.0))
    a0 = jnp.maximum(conv_g[0], conv_g[1])    # pooled rows 0,2,4,...  (H-pool)
    a1 = jnp.maximum(conv_g[2], conv_g[3])    # pooled rows 1,3,5,...
    a0 = jnp.maximum(a0[..., :12 * _C1P], a0[..., 12 * _C1P:])      # W-pool
    a1 = jnp.maximum(a1[..., :12 * _C1P], a1[..., 12 * _C1P:])
    # a0/a1: (tb, 8, 192); rows 0..5 hold the pooled 12x12x16 activation,
    # split by pooled-row parity (exactly what conv2 needs below).

    # ---- conv2 (5x5, 10->24) + bias + ReLU + 2x2 maxpool -------------------
    a = jnp.concatenate([a0, a1], axis=0).reshape(2 * tb * 8, 12 * _C1P)
    z_all = jnp.dot(a, t2_ref[...], preferred_element_type=f32)    # (128, 5*256)
    z_all = z_all.reshape(2, tb, 8, 5 * _C2_LANES)
    bias2 = b2_ref[...]
    c2 = []
    for s2 in range(2):                       # conv2 rows h2 with h2 % 2 == s2
        acc = bias2
        for ki in range(5):
            s = (s2 + ki) % 2
            q0 = (s2 + ki) // 2
            acc = acc + z_all[s][:, q0:q0 + 4,
                                 ki * _C2_LANES:(ki + 1) * _C2_LANES]  # (tb, 4, 256)
        c2.append(jnp.maximum(acc, 0.0))
    p2 = jnp.maximum(c2[0], c2[1])                                  # H-pool
    p2 = jnp.maximum(p2[..., :4 * _C2P], p2[..., 4 * _C2P:])        # W-pool -> (tb,4,128)

    # ---- flatten (permutation folded into fc1 weights) + fc1/fc2/fc3 -------
    flat = jnp.concatenate([p2[:, i, :] for i in range(4)], axis=-1)    # (tb, 512)
    h = jnp.maximum(
        jnp.dot(flat, fc1w_ref[...], preferred_element_type=f32) + fc1b_ref[...],
        0.0)                                                            # (tb, 320)
    h = jnp.maximum(
        jnp.dot(h, fc2w_ref[...], preferred_element_type=f32) + fc2b_ref[...],
        0.0)                                                            # (tb, 128)
    out = jnp.dot(h, fc3w_ref[...], preferred_element_type=f32) + fc3b_ref[...]
    o_ref[...] = out.astype(o_ref.dtype)                                # (tb, 128)


# ---------------------------------------------------------------------------
# Weight preparation (host-side, once): Toeplitz expansion, padding, flatten
# permutation -- all folded into the arrays the kernel consumes.
# ---------------------------------------------------------------------------
def _build_conv1(w1, b1):
    """w1: (10,1,5,5) torch layout, b1: (10,).  Returns (32, 5*384) Toeplitz."""
    w1 = np.asarray(w1, np.float32)
    t = np.zeros((32, 5 * _C1_LANES), np.float32)
    for ki in range(5):
        base = ki * _C1_LANES
        for wpar in range(2):
            for wp in range(12):
                w_out = 2 * wp + wpar
                col0 = base + (wpar * 12 + wp) * _C1P
                for kj in range(5):
                    t[w_out + kj, col0:col0 + 10] = w1[:, 0, ki, kj]
    br = np.zeros((1, _C1_LANES), np.float32)
    for wpar in range(2):
        for wp in range(12):
            col0 = (wpar * 12 + wp) * _C1P
            br[0, col0:col0 + 10] = np.asarray(b1, np.float32)
    return jnp.asarray(t), jnp.asarray(br)


def _build_conv2(w2, b2):
    """w2: (24,10,5,5) torch layout, b2: (24,).  Returns (192, 5*256) Toeplitz."""
    w2 = np.asarray(w2, np.float32)
    t = np.zeros((12 * _C1P, 5 * _C2_LANES), np.float32)
    for ki in range(5):
        base = ki * _C2_LANES
        for wpar in range(2):
            for wp in range(4):
                w_out = 2 * wp + wpar
                col0 = base + (wpar * 4 + wp) * _C2P
                for kj in range(5):
                    w_in = w_out + kj
                    for c in range(10):
                        t[w_in * _C1P + c, col0:col0 + 24] = w2[:, c, ki, kj]
    br = np.zeros((1, _C2_LANES), np.float32)
    for wpar in range(2):
        for wp in range(4):
            col0 = (wpar * 4 + wp) * _C2P
            br[0, col0:col0 + 24] = np.asarray(b2, np.float32)
    return jnp.asarray(t), jnp.asarray(br)


def _build_fc1(w, b):
    """w: (320, 384) torch layout (col index = c*16 + h*4 + w), b: (320,)."""
    w = np.asarray(w, np.float32).reshape(320, 24, 4, 4)          # (o, c, h, w)
    wp_ = np.zeros((320, _C2P, 4, 4), np.float32)
    wp_[:, :24] = w
    wp_ = np.transpose(wp_, (2, 3, 1, 0)).reshape(4 * 4 * _C2P, 320)
    return jnp.asarray(wp_), jnp.asarray(np.asarray(b, np.float32).reshape(1, 320))


def _build_fc2(w, b):
    wp_ = np.zeros((320, _FC2P), np.float32)
    wp_[:, :60] = np.asarray(w, np.float32).T
    bp = np.zeros((1, _FC2P), np.float32)
    bp[0, :60] = np.asarray(b, np.float32)
    return jnp.asarray(wp_), jnp.asarray(bp)


def _build_fc3(w, b):
    wp_ = np.zeros((_FC2P, _OUTP), np.float32)
    wp_[:60, :10] = np.asarray(w, np.float32).T
    bp = np.zeros((1, _OUTP), np.float32)
    bp[0, :10] = np.asarray(b, np.float32)
    return jnp.asarray(wp_), jnp.asarray(bp)


def init_params(key):
    ks = jax.random.split(key, 10)
    scale = 0.05

    def nrm(k, shape):
        return np.asarray(scale * jax.random.normal(k, shape, dtype=jnp.float32))

    w1, b1 = nrm(ks[0], (10, 1, 5, 5)), nrm(ks[1], (10,))
    w2, b2 = nrm(ks[2], (24, 10, 5, 5)), nrm(ks[3], (24,))
    f1w, f1b = nrm(ks[4], (320, 24 * 4 * 4)), nrm(ks[5], (320,))
    f2w, f2b = nrm(ks[6], (60, 320)), nrm(ks[7], (60,))
    f3w, f3b = nrm(ks[8], (10, 60)), nrm(ks[9], (10,))

    t1, b1r = _build_conv1(w1, b1)
    t2, b2r = _build_conv2(w2, b2)
    fc1w, fc1b = _build_fc1(f1w, f1b)
    fc2w, fc2b = _build_fc2(f2w, f2b)
    fc3w, fc3b = _build_fc3(f3w, f3b)
    params = {"t1": t1, "b1r": b1r, "t2": t2, "b2r": b2r,
              "fc1w": fc1w, "fc1b": fc1b, "fc2w": fc2w, "fc2b": fc2b,
              "fc3w": fc3w, "fc3b": fc3b}
    raw = {"w1": jnp.asarray(w1), "b1": jnp.asarray(b1),
           "w2": jnp.asarray(w2), "b2": jnp.asarray(b2),
           "f1w": jnp.asarray(f1w), "f1b": jnp.asarray(f1b),
           "f2w": jnp.asarray(f2w), "f2b": jnp.asarray(f2b),
           "f3w": jnp.asarray(f3w), "f3b": jnp.asarray(f3b)}
    return params, raw


# ---------------------------------------------------------------------------
# Forward pass
# ---------------------------------------------------------------------------
@jax.jit
def convnet_forward(x_nchw, params):
    n = x_nchw.shape[0]
    x2 = x_nchw[:, 0].astype(jnp.float32)                                # (N,28,28)
    # Row-residue planes (h mod 4), zero padded to tile-friendly (N,4,16,32).
    planes = jnp.stack([x2[:, r::4, :] for r in range(4)], axis=1)       # (N,4,7,28)
    planes = jnp.pad(planes, ((0, 0), (0, 0), (0, 9), (0, 4)))           # (N,4,16,32)
    n_pad = ((n + _TB - 1) // _TB) * _TB
    if n_pad != n:
        planes = jnp.pad(planes, ((0, n_pad - n), (0, 0), (0, 0), (0, 0)))

    def full(shape):
        return pl.BlockSpec(shape, lambda i: (0,) * len(shape))

    out = pl.pallas_call(
        _convnet_kernel,
        out_shape=jax.ShapeDtypeStruct((n_pad, _OUTP), jnp.float32),
        grid_spec=pltpu.PrefetchScalarGridSpec(
            num_scalar_prefetch=0,
            grid=(n_pad // _TB,),
            in_specs=[
                pl.BlockSpec((_TB, 4, 16, 32), lambda i: (i, 0, 0, 0)),
                full((32, 5 * _C1_LANES)),
                full((1, _C1_LANES)),
                full((12 * _C1P, 5 * _C2_LANES)),
                full((1, _C2_LANES)),
                full((4 * 4 * _C2P, 320)),
                full((1, 320)),
                full((320, _FC2P)),
                full((1, _FC2P)),
                full((_FC2P, _OUTP)),
                full((1, _OUTP)),
            ],
            out_specs=pl.BlockSpec((_TB, _OUTP), lambda i: (i, 0)),
        ),
        compiler_params=pltpu.CompilerParams(
            dimension_semantics=("parallel",),
            vmem_limit_bytes=32 * 1024 * 1024,
        ),
    )(planes, params["t1"], params["b1r"], params["t2"], params["b2r"],
      params["fc1w"], params["fc1b"], params["fc2w"], params["fc2b"],
      params["fc3w"], params["fc3b"])

    return out[:n, :10]


# ---------------------------------------------------------------------------
# Pure-JAX reference (mirrors the PyTorch module) for a sanity check
# ---------------------------------------------------------------------------
def _reference_forward(x, raw):
    def maxpool2(y):
        n, c, h, w = y.shape
        return y.reshape(n, c, h // 2, 2, w // 2, 2).max(axis=(3, 5))

    y = jax.lax.conv_general_dilated(
        x, raw["w1"], window_strides=(1, 1), padding="VALID",
        dimension_numbers=("NCHW", "OIHW", "NCHW"))
    y = maxpool2(jax.nn.relu(y + raw["b1"][None, :, None, None]))
    y = jax.lax.conv_general_dilated(
        y, raw["w2"], window_strides=(1, 1), padding="VALID",
        dimension_numbers=("NCHW", "OIHW", "NCHW"))
    y = maxpool2(jax.nn.relu(y + raw["b2"][None, :, None, None]))
    y = y.reshape(y.shape[0], -1)
    y = jax.nn.relu(y @ raw["f1w"].T + raw["f1b"])
    y = jax.nn.relu(y @ raw["f2w"].T + raw["f2b"])
    return y @ raw["f3w"].T + raw["f3b"]


if __name__ == "__main__":
    key = jax.random.PRNGKey(0)
    k_params, k_x = jax.random.split(key)

    params, raw = init_params(k_params)
    # Architecture fixes the spatial size: 28x28, 1 channel (MNIST-style).
    x = jax.random.normal(k_x, (2, 1, 28, 28), dtype=jnp.float32)

    out = jax.block_until_ready(convnet_forward(x, params))
    assert out.shape == (2, 10), out.shape

    ref = jax.block_until_ready(_reference_forward(x, raw))
    err = float(jnp.max(jnp.abs(out - ref)))
    assert err < 1e-2, f"max abs error vs reference: {err}"
    print("KERNEL_OK")
</pallas_src>

<mosaic_0001>
module attributes {stable_mosaic.version = 11 : i64} {
  func.func @_convnet_kernel(%arg0: i32, %arg1: memref<8x4x16x32xf32, #tpu.memory_space<vmem>>, %arg2: memref<32x1920xf32, #tpu.memory_space<vmem>>, %arg3: memref<1x384xf32, #tpu.memory_space<vmem>>, %arg4: memref<192x1280xf32, #tpu.memory_space<vmem>>, %arg5: memref<1x256xf32, #tpu.memory_space<vmem>>, %arg6: memref<512x320xf32, #tpu.memory_space<vmem>>, %arg7: memref<1x320xf32, #tpu.memory_space<vmem>>, %arg8: memref<320x128xf32, #tpu.memory_space<vmem>>, %arg9: memref<1x128xf32, #tpu.memory_space<vmem>>, %arg10: memref<128x128xf32, #tpu.memory_space<vmem>>, %arg11: memref<1x128xf32, #tpu.memory_space<vmem>>, %arg12: memref<8x128xf32, #tpu.memory_space<vmem>>) attributes {dimension_semantics = [#tpu.dimension_semantics<parallel>], iteration_bounds = array<i64: 1>, scalar_prefetch = 0 : i64, scratch_operands = 0 : i64, tpu.core_type = #tpu.core_type<tc>, window_params = [{transform_indices = @transform_0, window_bounds = array<i64: 8, 4, 16, 32>}, {pipeline_mode = #tpu.pipeline_mode<synchronous>, transform_indices = @transform_1, window_bounds = array<i64: 32, 1920>}, {pipeline_mode = #tpu.pipeline_mode<synchronous>, transform_indices = @transform_2, window_bounds = array<i64: 1, 384>}, {pipeline_mode = #tpu.pipeline_mode<synchronous>, transform_indices = @transform_3, window_bounds = array<i64: 192, 1280>}, {pipeline_mode = #tpu.pipeline_mode<synchronous>, transform_indices = @transform_4, window_bounds = array<i64: 1, 256>}, {pipeline_mode = #tpu.pipeline_mode<synchronous>, transform_indices = @transform_5, window_bounds = array<i64: 512, 320>}, {pipeline_mode = #tpu.pipeline_mode<synchronous>, transform_indices = @transform_6, window_bounds = array<i64: 1, 320>}, {pipeline_mode = #tpu.pipeline_mode<synchronous>, transform_indices = @transform_7, window_bounds = array<i64: 320, 128>}, {pipeline_mode = #tpu.pipeline_mode<synchronous>, transform_indices = @transform_8, window_bounds = array<i64: 1, 128>}, {pipeline_mode = #tpu.pipeline_mode<synchronous>, transform_indices = @transform_9, window_bounds = array<i64: 128, 128>}, {pipeline_mode = #tpu.pipeline_mode<synchronous>, transform_indices = @transform_10, window_bounds = array<i64: 1, 128>}, {transform_indices = @transform_11, window_bounds = array<i64: 8, 128>}]} {
    %c0 = arith.constant 0 : index
    %c0_0 = arith.constant 0 : index
    %c0_1 = arith.constant 0 : index
    %c0_2 = arith.constant 0 : index
    %0 = vector.load %arg1[%c0, %c0_0, %c0_1, %c0_2] : memref<8x4x16x32xf32, #tpu.memory_space<vmem>>, vector<8x4x16x32xf32>
    %1 = vector.shape_cast %0 : vector<8x4x16x32xf32> to vector<512x32xf32>
    %c0_3 = arith.constant 0 : index
    %c0_4 = arith.constant 0 : index
    %2 = vector.load %arg2[%c0_3, %c0_4] : memref<32x1920xf32, #tpu.memory_space<vmem>>, vector<32x1920xf32>
    %cst = arith.constant dense<0.000000e+00> : vector<512x1920xf32>
    %3 = tpu.matmul %1, %2, %cst {dimension_numbers = #tpu.dot_dimension_numbers<[1], [0], [0], [1], [0, 0, 1, 1], [], []>} : vector<512x32xf32>, vector<32x1920xf32>, vector<512x1920xf32> -> vector<512x1920xf32>
    %4 = vector.shape_cast %3 : vector<512x1920xf32> to vector<8x4x16x1920xf32>
    %c0_5 = arith.constant 0 : index
    %c0_6 = arith.constant 0 : index
    %5 = vector.load %arg3[%c0_5, %c0_6] : memref<1x384xf32, #tpu.memory_space<vmem>>, vector<1x384xf32>
    %6 = vector.extract_strided_slice %4 {offsets = [0, 0, 0, 0], sizes = [8, 1, 8, 384], strides = [1, 1, 1, 1]} : vector<8x4x16x1920xf32> to vector<8x1x8x384xf32>
    %7 = vector.shape_cast %6 : vector<8x1x8x384xf32> to vector<8x8x384xf32>
    %8 = vector.shape_cast %5 : vector<1x384xf32> to vector<1x1x384xf32>
    %9 = vector.broadcast %8 : vector<1x1x384xf32> to vector<8x8x384xf32>
    %10 = arith.addf %9, %7 : vector<8x8x384xf32>
    %11 = vector.extract_strided_slice %4 {offsets = [0, 1, 0, 384], sizes = [8, 1, 8, 384], strides = [1, 1, 1, 1]} : vector<8x4x16x1920xf32> to vector<8x1x8x384xf32>
    %12 = vector.shape_cast %11 : vector<8x1x8x384xf32> to vector<8x8x384xf32>
    %13 = arith.addf %10, %12 : vector<8x8x384xf32>
    %14 = vector.extract_strided_slice %4 {offsets = [0, 2, 0, 768], sizes = [8, 1, 8, 384], strides = [1, 1, 1, 1]} : vector<8x4x16x1920xf32> to vector<8x1x8x384xf32>
    %15 = vector.shape_cast %14 : vector<8x1x8x384xf32> to vector<8x8x384xf32>
    %16 = arith.addf %13, %15 : vector<8x8x384xf32>
    %17 = vector.extract_strided_slice %4 {offsets = [0, 3, 0, 1152], sizes = [8, 1, 8, 384], strides = [1, 1, 1, 1]} : vector<8x4x16x1920xf32> to vector<8x1x8x384xf32>
    %18 = vector.shape_cast %17 : vector<8x1x8x384xf32> to vector<8x8x384xf32>
    %19 = arith.addf %16, %18 : vector<8x8x384xf32>
    %20 = vector.extract_strided_slice %4 {offsets = [0, 0, 1, 1536], sizes = [8, 1, 8, 384], strides = [1, 1, 1, 1]} : vector<8x4x16x1920xf32> to vector<8x1x8x384xf32>
    %21 = vector.shape_cast %20 : vector<8x1x8x384xf32> to vector<8x8x384xf32>
    %22 = arith.addf %19, %21 : vector<8x8x384xf32>
    %cst_7 = arith.constant 0.000000e+00 : f32
    %23 = vector.broadcast %cst_7 : f32 to vector<8x8x384xf32>
    %24 = arith.maximumf %22, %23 : vector<8x8x384xf32>
    %25 = vector.extract_strided_slice %4 {offsets = [0, 1, 0, 0], sizes = [8, 1, 8, 384], strides = [1, 1, 1, 1]} : vector<8x4x16x1920xf32> to vector<8x1x8x384xf32>
    %26 = vector.shape_cast %25 : vector<8x1x8x384xf32> to vector<8x8x384xf32>
    %27 = vector.shape_cast %5 : vector<1x384xf32> to vector<1x1x384xf32>
    %28 = vector.broadcast %27 : vector<1x1x384xf32> to vector<8x8x384xf32>
    %29 = arith.addf %28, %26 : vector<8x8x384xf32>
    %30 = vector.extract_strided_slice %4 {offsets = [0, 2, 0, 384], sizes = [8, 1, 8, 384], strides = [1, 1, 1, 1]} : vector<8x4x16x1920xf32> to vector<8x1x8x384xf32>
    %31 = vector.shape_cast %30 : vector<8x1x8x384xf32> to vector<8x8x384xf32>
    %32 = arith.addf %29, %31 : vector<8x8x384xf32>
    %33 = vector.extract_strided_slice %4 {offsets = [0, 3, 0, 768], sizes = [8, 1, 8, 384], strides = [1, 1, 1, 1]} : vector<8x4x16x1920xf32> to vector<8x1x8x384xf32>
    %34 = vector.shape_cast %33 : vector<8x1x8x384xf32> to vector<8x8x384xf32>
    %35 = arith.addf %32, %34 : vector<8x8x384xf32>
    %36 = vector.extract_strided_slice %4 {offsets = [0, 0, 1, 1152], sizes = [8, 1, 8, 384], strides = [1, 1, 1, 1]} : vector<8x4x16x1920xf32> to vector<8x1x8x384xf32>
    %37 = vector.shape_cast %36 : vector<8x1x8x384xf32> to vector<8x8x384xf32>
    %38 = arith.addf %35, %37 : vector<8x8x384xf32>
    %39 = vector.extract_strided_slice %4 {offsets = [0, 1, 1, 1536], sizes = [8, 1, 8, 384], strides = [1, 1, 1, 1]} : vector<8x4x16x1920xf32> to vector<8x1x8x384xf32>
    %40 = vector.shape_cast %39 : vector<8x1x8x384xf32> to vector<8x8x384xf32>
    %41 = arith.addf %38, %40 : vector<8x8x384xf32>
    %cst_8 = arith.constant 0.000000e+00 : f32
    %42 = vector.broadcast %cst_8 : f32 to vector<8x8x384xf32>
    %43 = arith.maximumf %41, %42 : vector<8x8x384xf32>
    %44 = vector.extract_strided_slice %4 {offsets = [0, 2, 0, 0], sizes = [8, 1, 8, 384], strides = [1, 1, 1, 1]} : vector<8x4x16x1920xf32> to vector<8x1x8x384xf32>
    %45 = vector.shape_cast %44 : vector<8x1x8x384xf32> to vector<8x8x384xf32>
    %46 = vector.shape_cast %5 : vector<1x384xf32> to vector<1x1x384xf32>
    %47 = vector.broadcast %46 : vector<1x1x384xf32> to vector<8x8x384xf32>
    %48 = arith.addf %47, %45 : vector<8x8x384xf32>
    %49 = vector.extract_strided_slice %4 {offsets = [0, 3, 0, 384], sizes = [8, 1, 8, 384], strides = [1, 1, 1, 1]} : vector<8x4x16x1920xf32> to vector<8x1x8x384xf32>
    %50 = vector.shape_cast %49 : vector<8x1x8x384xf32> to vector<8x8x384xf32>
    %51 = arith.addf %48, %50 : vector<8x8x384xf32>
    %52 = vector.extract_strided_slice %4 {offsets = [0, 0, 1, 768], sizes = [8, 1, 8, 384], strides = [1, 1, 1, 1]} : vector<8x4x16x1920xf32> to vector<8x1x8x384xf32>
    %53 = vector.shape_cast %52 : vector<8x1x8x384xf32> to vector<8x8x384xf32>
    %54 = arith.addf %51, %53 : vector<8x8x384xf32>
    %55 = vector.extract_strided_slice %4 {offsets = [0, 1, 1, 1152], sizes = [8, 1, 8, 384], strides = [1, 1, 1, 1]} : vector<8x4x16x1920xf32> to vector<8x1x8x384xf32>
    %56 = vector.shape_cast %55 : vector<8x1x8x384xf32> to vector<8x8x384xf32>
    %57 = arith.addf %54, %56 : vector<8x8x384xf32>
    %58 = vector.extract_strided_slice %4 {offsets = [0, 2, 1, 1536], sizes = [8, 1, 8, 384], strides = [1, 1, 1, 1]} : vector<8x4x16x1920xf32> to vector<8x1x8x384xf32>
    %59 = vector.shape_cast %58 : vector<8x1x8x384xf32> to vector<8x8x384xf32>
    %60 = arith.addf %57, %59 : vector<8x8x384xf32>
    %cst_9 = arith.constant 0.000000e+00 : f32
    %61 = vector.broadcast %cst_9 : f32 to vector<8x8x384xf32>
    %62 = arith.maximumf %60, %61 : vector<8x8x384xf32>
    %63 = vector.extract_strided_slice %4 {offsets = [0, 3, 0, 0], sizes = [8, 1, 8, 384], strides = [1, 1, 1, 1]} : vector<8x4x16x1920xf32> to vector<8x1x8x384xf32>
    %64 = vector.shape_cast %63 : vector<8x1x8x384xf32> to vector<8x8x384xf32>
    %65 = vector.shape_cast %5 : vector<1x384xf32> to vector<1x1x384xf32>
    %66 = vector.broadcast %65 : vector<1x1x384xf32> to vector<8x8x384xf32>
    %67 = arith.addf %66, %64 : vector<8x8x384xf32>
    %68 = vector.extract_strided_slice %4 {offsets = [0, 0, 1, 384], sizes = [8, 1, 8, 384], strides = [1, 1, 1, 1]} : vector<8x4x16x1920xf32> to vector<8x1x8x384xf32>
    %69 = vector.shape_cast %68 : vector<8x1x8x384xf32> to vector<8x8x384xf32>
    %70 = arith.addf %67, %69 : vector<8x8x384xf32>
    %71 = vector.extract_strided_slice %4 {offsets = [0, 1, 1, 768], sizes = [8, 1, 8, 384], strides = [1, 1, 1, 1]} : vector<8x4x16x1920xf32> to vector<8x1x8x384xf32>
    %72 = vector.shape_cast %71 : vector<8x1x8x384xf32> to vector<8x8x384xf32>
    %73 = arith.addf %70, %72 : vector<8x8x384xf32>
    %74 = vector.extract_strided_slice %4 {offsets = [0, 2, 1, 1152], sizes = [8, 1, 8, 384], strides = [1, 1, 1, 1]} : vector<8x4x16x1920xf32> to vector<8x1x8x384xf32>
    %75 = vector.shape_cast %74 : vector<8x1x8x384xf32> to vector<8x8x384xf32>
    %76 = arith.addf %73, %75 : vector<8x8x384xf32>
    %77 = vector.extract_strided_slice %4 {offsets = [0, 3, 1, 1536], sizes = [8, 1, 8, 384], strides = [1, 1, 1, 1]} : vector<8x4x16x1920xf32> to vector<8x1x8x384xf32>
    %78 = vector.shape_cast %77 : vector<8x1x8x384xf32> to vector<8x8x384xf32>
    %79 = arith.addf %76, %78 : vector<8x8x384xf32>
    %cst_10 = arith.constant 0.000000e+00 : f32
    %80 = vector.broadcast %cst_10 : f32 to vector<8x8x384xf32>
    %81 = arith.maximumf %79, %80 : vector<8x8x384xf32>
    %82 = arith.maximumf %24, %43 : vector<8x8x384xf32>
    %83 = arith.maximumf %62, %81 : vector<8x8x384xf32>
    %84 = vector.extract_strided_slice %82 {offsets = [0, 0, 0], sizes = [8, 8, 192], strides = [1, 1, 1]} : vector<8x8x384xf32> to vector<8x8x192xf32>
    %85 = vector.extract_strided_slice %82 {offsets = [0, 0, 192], sizes = [8, 8, 192], strides = [1, 1, 1]} : vector<8x8x384xf32> to vector<8x8x192xf32>
    %86 = arith.maximumf %84, %85 : vector<8x8x192xf32>
    %87 = vector.extract_strided_slice %83 {offsets = [0, 0, 0], sizes = [8, 8, 192], strides = [1, 1, 1]} : vector<8x8x384xf32> to vector<8x8x192xf32>
    %88 = vector.extract_strided_slice %83 {offsets = [0, 0, 192], sizes = [8, 8, 192], strides = [1, 1, 1]} : vector<8x8x384xf32> to vector<8x8x192xf32>
    %89 = arith.maximumf %87, %88 : vector<8x8x192xf32>
    %90 = tpu.concatenate %86, %89 in 0 : vector<8x8x192xf32>, vector<8x8x192xf32> -> vector<16x8x192xf32>
    %91 = vector.shape_cast %90 : vector<16x8x192xf32> to vector<128x192xf32>
    %c0_11 = arith.constant 0 : index
    %c0_12 = arith.constant 0 : index
    %92 = vector.load %arg4[%c0_11, %c0_12] : memref<192x1280xf32, #tpu.memory_space<vmem>>, vector<192x1280xf32>
    %cst_13 = arith.constant dense<0.000000e+00> : vector<128x1280xf32>
    %93 = tpu.matmul %91, %92, %cst_13 {dimension_numbers = #tpu.dot_dimension_numbers<[1], [0], [0], [1], [0, 0, 1, 1], [], []>} : vector<128x192xf32>, vector<192x1280xf32>, vector<128x1280xf32> -> vector<128x1280xf32>
    %94 = vector.shape_cast %93 : vector<128x1280xf32> to vector<2x8x8x1280xf32>
    %c0_14 = arith.constant 0 : index
    %c0_15 = arith.constant 0 : index
    %95 = vector.load %arg5[%c0_14, %c0_15] : memref<1x256xf32, #tpu.memory_space<vmem>>, vector<1x256xf32>
    %96 = vector.extract_strided_slice %94 {offsets = [0, 0, 0, 0], sizes = [1, 8, 8, 1280], strides = [1, 1, 1, 1]} : vector<2x8x8x1280xf32> to vector<1x8x8x1280xf32>
    %97 = vector.shape_cast %96 : vector<1x8x8x1280xf32> to vector<8x8x1280xf32>
    %98 = vector.extract_strided_slice %97 {offsets = [0, 0, 0], sizes = [8, 4, 256], strides = [1, 1, 1]} : vector<8x8x1280xf32> to vector<8x4x256xf32>
    %99 = vector.shape_cast %95 : vector<1x256xf32> to vector<1x1x256xf32>
    %100 = vector.broadcast %99 : vector<1x1x256xf32> to vector<8x4x256xf32>
    %101 = arith.addf %100, %98 : vector<8x4x256xf32>
    %102 = vector.extract_strided_slice %94 {offsets = [1, 0, 0, 0], sizes = [1, 8, 8, 1280], strides = [1, 1, 1, 1]} : vector<2x8x8x1280xf32> to vector<1x8x8x1280xf32>
    %103 = vector.shape_cast %102 : vector<1x8x8x1280xf32> to vector<8x8x1280xf32>
    %104 = vector.extract_strided_slice %103 {offsets = [0, 0, 256], sizes = [8, 4, 256], strides = [1, 1, 1]} : vector<8x8x1280xf32> to vector<8x4x256xf32>
    %105 = arith.addf %101, %104 : vector<8x4x256xf32>
    %106 = vector.extract_strided_slice %94 {offsets = [0, 0, 0, 0], sizes = [1, 8, 8, 1280], strides = [1, 1, 1, 1]} : vector<2x8x8x1280xf32> to vector<1x8x8x1280xf32>
    %107 = vector.shape_cast %106 : vector<1x8x8x1280xf32> to vector<8x8x1280xf32>
    %108 = vector.extract_strided_slice %107 {offsets = [0, 1, 512], sizes = [8, 4, 256], strides = [1, 1, 1]} : vector<8x8x1280xf32> to vector<8x4x256xf32>
    %109 = arith.addf %105, %108 : vector<8x4x256xf32>
    %110 = vector.extract_strided_slice %94 {offsets = [1, 0, 0, 0], sizes = [1, 8, 8, 1280], strides = [1, 1, 1, 1]} : vector<2x8x8x1280xf32> to vector<1x8x8x1280xf32>
    %111 = vector.shape_cast %110 : vector<1x8x8x1280xf32> to vector<8x8x1280xf32>
    %112 = vector.extract_strided_slice %111 {offsets = [0, 1, 768], sizes = [8, 4, 256], strides = [1, 1, 1]} : vector<8x8x1280xf32> to vector<8x4x256xf32>
    %113 = arith.addf %109, %112 : vector<8x4x256xf32>
    %114 = vector.extract_strided_slice %94 {offsets = [0, 0, 0, 0], sizes = [1, 8, 8, 1280], strides = [1, 1, 1, 1]} : vector<2x8x8x1280xf32> to vector<1x8x8x1280xf32>
    %115 = vector.shape_cast %114 : vector<1x8x8x1280xf32> to vector<8x8x1280xf32>
    %116 = vector.extract_strided_slice %115 {offsets = [0, 2, 1024], sizes = [8, 4, 256], strides = [1, 1, 1]} : vector<8x8x1280xf32> to vector<8x4x256xf32>
    %117 = arith.addf %113, %116 : vector<8x4x256xf32>
    %cst_16 = arith.constant 0.000000e+00 : f32
    %118 = vector.broadcast %cst_16 : f32 to vector<8x4x256xf32>
    %119 = arith.maximumf %117, %118 : vector<8x4x256xf32>
    %120 = vector.extract_strided_slice %94 {offsets = [1, 0, 0, 0], sizes = [1, 8, 8, 1280], strides = [1, 1, 1, 1]} : vector<2x8x8x1280xf32> to vector<1x8x8x1280xf32>
    %121 = vector.shape_cast %120 : vector<1x8x8x1280xf32> to vector<8x8x1280xf32>
    %122 = vector.extract_strided_slice %121 {offsets = [0, 0, 0], sizes = [8, 4, 256], strides = [1, 1, 1]} : vector<8x8x1280xf32> to vector<8x4x256xf32>
    %123 = vector.shape_cast %95 : vector<1x256xf32> to vector<1x1x256xf32>
    %124 = vector.broadcast %123 : vector<1x1x256xf32> to vector<8x4x256xf32>
    %125 = arith.addf %124, %122 : vector<8x4x256xf32>
    %126 = vector.extract_strided_slice %94 {offsets = [0, 0, 0, 0], sizes = [1, 8, 8, 1280], strides = [1, 1, 1, 1]} : vector<2x8x8x1280xf32> to vector<1x8x8x1280xf32>
    %127 = vector.shape_cast %126 : vector<1x8x8x1280xf32> to vector<8x8x1280xf32>
    %128 = vector.extract_strided_slice %127 {offsets = [0, 1, 256], sizes = [8, 4, 256], strides = [1, 1, 1]} : vector<8x8x1280xf32> to vector<8x4x256xf32>
    %129 = arith.addf %125, %128 : vector<8x4x256xf32>
    %130 = vector.extract_strided_slice %94 {offsets = [1, 0, 0, 0], sizes = [1, 8, 8, 1280], strides = [1, 1, 1, 1]} : vector<2x8x8x1280xf32> to vector<1x8x8x1280xf32>
    %131 = vector.shape_cast %130 : vector<1x8x8x1280xf32> to vector<8x8x1280xf32>
    %132 = vector.extract_strided_slice %131 {offsets = [0, 1, 512], sizes = [8, 4, 256], strides = [1, 1, 1]} : vector<8x8x1280xf32> to vector<8x4x256xf32>
    %133 = arith.addf %129, %132 : vector<8x4x256xf32>
    %134 = vector.extract_strided_slice %94 {offsets = [0, 0, 0, 0], sizes = [1, 8, 8, 1280], strides = [1, 1, 1, 1]} : vector<2x8x8x1280xf32> to vector<1x8x8x1280xf32>
    %135 = vector.shape_cast %134 : vector<1x8x8x1280xf32> to vector<8x8x1280xf32>
    %136 = vector.extract_strided_slice %135 {offsets = [0, 2, 768], sizes = [8, 4, 256], strides = [1, 1, 1]} : vector<8x8x1280xf32> to vector<8x4x256xf32>
    %137 = arith.addf %133, %136 : vector<8x4x256xf32>
    %138 = vector.extract_strided_slice %94 {offsets = [1, 0, 0, 0], sizes = [1, 8, 8, 1280], strides = [1, 1, 1, 1]} : vector<2x8x8x1280xf32> to vector<1x8x8x1280xf32>
    %139 = vector.shape_cast %138 : vector<1x8x8x1280xf32> to vector<8x8x1280xf32>
    %140 = vector.extract_strided_slice %139 {offsets = [0, 2, 1024], sizes = [8, 4, 256], strides = [1, 1, 1]} : vector<8x8x1280xf32> to vector<8x4x256xf32>
    %141 = arith.addf %137, %140 : vector<8x4x256xf32>
    %cst_17 = arith.constant 0.000000e+00 : f32
    %142 = vector.broadcast %cst_17 : f32 to vector<8x4x256xf32>
    %143 = arith.maximumf %141, %142 : vector<8x4x256xf32>
    %144 = arith.maximumf %119, %143 : vector<8x4x256xf32>
    %145 = vector.extract_strided_slice %144 {offsets = [0, 0, 0], sizes = [8, 4, 128], strides = [1, 1, 1]} : vector<8x4x256xf32> to vector<8x4x128xf32>
    %146 = vector.extract_strided_slice %144 {offsets = [0, 0, 128], sizes = [8, 4, 128], strides = [1, 1, 1]} : vector<8x4x256xf32> to vector<8x4x128xf32>
    %147 = arith.maximumf %145, %146 : vector<8x4x128xf32>
    %148 = vector.extract_strided_slice %147 {offsets = [0, 0, 0], sizes = [8, 1, 128], strides = [1, 1, 1]} : vector<8x4x128xf32> to vector<8x1x128xf32>
    %149 = vector.shape_cast %148 : vector<8x1x128xf32> to vector<8x128xf32>
    %150 = vector.extract_strided_slice %147 {offsets = [0, 1, 0], sizes = [8, 1, 128], strides = [1, 1, 1]} : vector<8x4x128xf32> to vector<8x1x128xf32>
    %151 = vector.shape_cast %150 : vector<8x1x128xf32> to vector<8x128xf32>
    %152 = vector.extract_strided_slice %147 {offsets = [0, 2, 0], sizes = [8, 1, 128], strides = [1, 1, 1]} : vector<8x4x128xf32> to vector<8x1x128xf32>
    %153 = vector.shape_cast %152 : vector<8x1x128xf32> to vector<8x128xf32>
    %154 = vector.extract_strided_slice %147 {offsets = [0, 3, 0], sizes = [8, 1, 128], strides = [1, 1, 1]} : vector<8x4x128xf32> to vector<8x1x128xf32>
    %155 = vector.shape_cast %154 : vector<8x1x128xf32> to vector<8x128xf32>
    %156 = tpu.concatenate %149, %151, %153, %155 in 1 : vector<8x128xf32>, vector<8x128xf32>, vector<8x128xf32>, vector<8x128xf32> -> vector<8x512xf32>
    %c0_18 = arith.constant 0 : index
    %c0_19 = arith.constant 0 : index
    %157 = vector.load %arg6[%c0_18, %c0_19] : memref<512x320xf32, #tpu.memory_space<vmem>>, vector<512x320xf32>
    %cst_20 = arith.constant dense<0.000000e+00> : vector<8x320xf32>
    %158 = tpu.matmul %156, %157, %cst_20 {dimension_numbers = #tpu.dot_dimension_numbers<[1], [0], [0], [1], [0, 0, 1, 1], [], []>} : vector<8x512xf32>, vector<512x320xf32>, vector<8x320xf32> -> vector<8x320xf32>
    %c0_21 = arith.constant 0 : index
    %c0_22 = arith.constant 0 : index
    %159 = vector.load %arg7[%c0_21, %c0_22] : memref<1x320xf32, #tpu.memory_space<vmem>>, vector<1x320xf32>
    %160 = vector.broadcast %159 : vector<1x320xf32> to vector<8x320xf32>
    %161 = arith.addf %158, %160 : vector<8x320xf32>
    %cst_23 = arith.constant 0.000000e+00 : f32
    %162 = vector.broadcast %cst_23 : f32 to vector<8x320xf32>
    %163 = arith.maximumf %161, %162 : vector<8x320xf32>
    %c0_24 = arith.constant 0 : index
    %c0_25 = arith.constant 0 : index
    %164 = vector.load %arg8[%c0_24, %c0_25] : memref<320x128xf32, #tpu.memory_space<vmem>>, vector<320x128xf32>
    %cst_26 = arith.constant dense<0.000000e+00> : vector<8x128xf32>
    %165 = tpu.matmul %163, %164, %cst_26 {dimension_numbers = #tpu.dot_dimension_numbers<[1], [0], [0], [1], [0, 0, 1, 1], [], []>} : vector<8x320xf32>, vector<320x128xf32>, vector<8x128xf32> -> vector<8x128xf32>
    %c0_27 = arith.constant 0 : index
    %c0_28 = arith.constant 0 : index
    %166 = vector.load %arg9[%c0_27, %c0_28] : memref<1x128xf32, #tpu.memory_space<vmem>>, vector<1x128xf32>
    %167 = vector.broadcast %166 : vector<1x128xf32> to vector<8x128xf32>
    %168 = arith.addf %165, %167 : vector<8x128xf32>
    %cst_29 = arith.constant 0.000000e+00 : f32
    %169 = vector.broadcast %cst_29 : f32 to vector<8x128xf32>
    %170 = arith.maximumf %168, %169 : vector<8x128xf32>
    %c0_30 = arith.constant 0 : index
    %c0_31 = arith.constant 0 : index
    %171 = vector.load %arg10[%c0_30, %c0_31] : memref<128x128xf32, #tpu.memory_space<vmem>>, vector<128x128xf32>
    %cst_32 = arith.constant dense<0.000000e+00> : vector<8x128xf32>
    %172 = tpu.matmul %170, %171, %cst_32 {dimension_numbers = #tpu.dot_dimension_numbers<[1], [0], [0], [1], [0, 0, 1, 1], [], []>} : vector<8x128xf32>, vector<128x128xf32>, vector<8x128xf32> -> vector<8x128xf32>
    %c0_33 = arith.constant 0 : index
    %c0_34 = arith.constant 0 : index
    %173 = vector.load %arg11[%c0_33, %c0_34] : memref<1x128xf32, #tpu.memory_space<vmem>>, vector<1x128xf32>
    %174 = vector.broadcast %173 : vector<1x128xf32> to vector<8x128xf32>
    %175 = arith.addf %172, %174 : vector<8x128xf32>
    %c0_35 = arith.constant 0 : index
    %c0_36 = arith.constant 0 : index
    %176 = vector.load %arg12[%c0_35, %c0_36] : memref<8x128xf32, #tpu.memory_space<vmem>>, vector<8x128xf32>
    tpu.vector_store %arg12[%c0_35, %c0_36], %175 {strides = array<i32>} : memref<8x128xf32, #tpu.memory_space<vmem>>, vector<8x128xf32>,
    return
  }
  func.func @transform_0(%arg0: i32) -> (i32, i32, i32, i32) {
    %c0_i32 = arith.constant 0 : i32
    %c0_i32_0 = arith.constant 0 : i32
    %c0_i32_1 = arith.constant 0 : i32
    %c0_i32_2 = arith.constant 0 : i32
    return %arg0, %c0_i32, %c0_i32_0, %c0_i32_1 : i32, i32, i32, i32
  }
  func.func @transform_1(%arg0: i32) -> (i32, i32) {
    %c0_i32 = arith.constant 0 : i32
    %c0_i32_0 = arith.constant 0 : i32
    %c0_i32_1 = arith.constant 0 : i32
    return %c0_i32, %c0_i32_0 : i32, i32
  }
  func.func @transform_2(%arg0: i32) -> (i32, i32) {
    %c0_i32 = arith.constant 0 : i32
    %c0_i32_0 = arith.constant 0 : i32
    %c0_i32_1 = arith.constant 0 : i32
    return %c0_i32, %c0_i32_0 : i32, i32
  }
  func.func @transform_3(%arg0: i32) -> (i32, i32) {
    %c0_i32 = arith.constant 0 : i32
    %c0_i32_0 = arith.constant 0 : i32
    %c0_i32_1 = arith.constant 0 : i32
    return %c0_i32, %c0_i32_0 : i32, i32
  }
  func.func @transform_4(%arg0: i32) -> (i32, i32) {
    %c0_i32 = arith.constant 0 : i32
    %c0_i32_0 = arith.constant 0 : i32
    %c0_i32_1 = arith.constant 0 : i32
    return %c0_i32, %c0_i32_0 : i32, i32
  }
  func.func @transform_5(%arg0: i32) -> (i32, i32) {
    %c0_i32 = arith.constant 0 : i32
    %c0_i32_0 = arith.constant 0 : i32
    %c0_i32_1 = arith.constant 0 : i32
    return %c0_i32, %c0_i32_0 : i32, i32
  }
  func.func @transform_6(%arg0: i32) -> (i32, i32) {
    %c0_i32 = arith.constant 0 : i32
    %c0_i32_0 = arith.constant 0 : i32
    %c0_i32_1 = arith.constant 0 : i32
    return %c0_i32, %c0_i32_0 : i32, i32
  }
  func.func @transform_7(%arg0: i32) -> (i32, i32) {
    %c0_i32 = arith.constant 0 : i32
    %c0_i32_0 = arith.constant 0 : i32
    %c0_i32_1 = arith.constant 0 : i32
    return %c0_i32, %c0_i32_0 : i32, i32
  }
  func.func @transform_8(%arg0: i32) -> (i32, i32) {
    %c0_i32 = arith.constant 0 : i32
    %c0_i32_0 = arith.constant 0 : i32
    %c0_i32_1 = arith.constant 0 : i32
    return %c0_i32, %c0_i32_0 : i32, i32
  }
  func.func @transform_9(%arg0: i32) -> (i32, i32) {
    %c0_i32 = arith.constant 0 : i32
    %c0_i32_0 = arith.constant 0 : i32
    %c0_i32_1 = arith.constant 0 : i32
    return %c0_i32, %c0_i32_0 : i32, i32
  }
  func.func @transform_10(%arg0: i32) -> (i32, i32) {
    %c0_i32 = arith.constant 0 : i32
    %c0_i32_0 = arith.constant 0 : i32
    %c0_i32_1 = arith.constant 0 : i32
    return %c0_i32, %c0_i32_0 : i32, i32
  }
  func.func @transform_11(%arg0: i32) -> (i32, i32) {
    %c0_i32 = arith.constant 0 : i32
    %c0_i32_0 = arith.constant 0 : i32
    return %arg0, %c0_i32 : i32, i32
  }
}

</mosaic_0001>

<bundles_post_ra>
// kernel: convnet_forward.1
= control target key start
LH: loop header
LB: loop body
LE: loop exit
PB: predicated region body
PF: predicated region fallthrough
CT: control target
= control target key end

     0   :  { %v16340_v3 = vmov 0.0   ;;  %vm162_vm0 = vcmask 261120   ;;  %vm3804_vm1 = vcmask 1046528   ;;  %s10161_s29 = smov 64   ;;  %vm5773_vm2 = vcmask 523264   ;;  %s16326_s1 = inlined_call_operand.vmem [shape: f32[32,1920], index: 1, kind: input, shape index: {}]   ;;  %s16327_s0 = inlined_call_operand.vmem [shape: f32[8,4,16,32], index: 0, kind: input, shape index: {}]   ;;  %s16328_s2 = inlined_call_operand.vmem [shape: f32[1,384], index: 2, kind: input, shape index: {}]   ;;  %s16329_s3 = inlined_call_operand.vmem [shape: f32[192,1280], index: 3, kind: input, shape index: {}]   ;;  %s16330_s5 = inlined_call_operand.vmem [shape: f32[512,320], index: 5, kind: input, shape index: {}]   ;;  %s16331_s4 = inlined_call_operand.vmem [shape: f32[1,256], index: 4, kind: input, shape index: {}]   ;;  %s16332_s7 = inlined_call_operand.vmem [shape: f32[320,128], index: 7, kind: input, shape index: {}]   ;;  %s16333_s6 = inlined_call_operand.vmem [shape: f32[1,320], index: 6, kind: input, shape index: {}]   ;;  %s16334_s9 = inlined_call_operand.vmem [shape: f32[128,128], index: 9, kind: input, shape index: {}]   ;;  %s16335_s8 = inlined_call_operand.vmem [shape: f32[1,128], index: 8, kind: input, shape index: {}]   ;;  %s16336_s10 = inlined_call_operand.vmem [shape: f32[1,128], index: 10, kind: input, shape index: {}]   ;;  %s16337_s11 = inlined_call_operand.vmem [shape: f32[8,128], index: 11, kind: output, shape index: {}]  }
   0x1   :  { %v103_v0 = vld [vmem:[%s16326_s1 + $0x8] sm:$0xff]  ;;  %v118_v1 = vld [vmem:[%s16326_s1 + $0x80] sm:$0xff]  ;;  %v105_v2 = vld [vmem:[%s16326_s1 + $0x18] sm:$0xff]  ;;  %419 = vmatprep.mubr.f32.mxu0 %v16340_v3  ;;  %815 = vmatprep.mubr.f32.mxu1 %v16340_v3  ;;  %vm7568_vm3 = vcmask 1041409   ;;  %vm7571_vm4 = vcmask 1042434   ;;  %vm7574_vm5 = vcmask 1043459  }
   0x2   :  { %v9369_v4 = vpack.c.bf16 %v118_v1, %v103_v0  ;;  %v120_v5 = vld [vmem:[%s16326_s1 + $0x90] sm:$0xff]  ;;  %v102_v6 = vld [vmem:[%s16326_s1] sm:$0xff]  ;;  %v117_v7 = vld [vmem:[%s16326_s1 + $0x78] sm:$0xff]  ;;  %vm7577_vm6 = vcmask 1044484   ;;  %vm7580_vm7 = vcmask 1045509   ;;  %vm7583_vm8 = vcmask 1046534  }
   0x3   :  { %v9377_v8 = vpack.c.bf16 %v120_v5, %v105_v2  ;;  %v9371_v9 = vpack.c.bf16 %v117_v7, %v102_v6  ;;  %v104_v10 = vld [vmem:[%s16326_s1 + $0x10] sm:$0xff]  ;;  %v119_v11 = vld [vmem:[%s16326_s1 + $0x88] sm:$0xff]  ;;  %v133_v12 = vld [vmem:[%s16326_s1 + $0xf8] sm:$0xff]  ;;  %vm7586_vm9 = vcmask 1047559   ;;  %vm10163_vm10 = vmmov 0  }
   0x4   :  { %9370 = vmatprep.subr.bf16.mxu0 %v9369_v4  ;;  %v9379_v13 = vpack.c.bf16 %v119_v11, %v104_v10  ;;  %v148_v14 = vld [vmem:[%s16326_s1 + $0x170] sm:$0xff]  ;;  %v135_v15 = vld [vmem:[%s16326_s1 + $0x108] sm:$0xff]  ;;  %v150_v16 = vld [vmem:[%s16326_s1 + $0x180] sm:$0xff] }
   0x5   :  { %9933 = vmatprep.subr.bf16.mxu1 %v9377_v8  ;;  %9372 = vmatpush1.bf16.msra.mxu0 %v9371_v9  ;;  %v9373_v17 = vpack.c.bf16 %v148_v14, %v133_v12  ;;  %v9381_v18 = vpack.c.bf16 %v150_v16, %v135_v15  ;;  %v132_v19 = vld [vmem:[%s16326_s1 + $0xf0] sm:$0xff]  ;;  %v147_v20 = vld [vmem:[%s16326_s1 + $0x168] sm:$0xff]  ;;  %v134_v21 = vld [vmem:[%s16326_s1 + $0x100] sm:$0xff] }
   0x6   :  { %9935 = vmatpush1.bf16.msra.mxu1 %v9379_v13  ;;  %v9375_v22 = vpack.c.bf16 %v147_v20, %v132_v19  ;;  %v149_v23 = vld [vmem:[%s16326_s1 + $0x178] sm:$0xff]  ;;  %v10277_v25 = vld [vmem:[%s16327_s0] sm:$0xff]  ;;  %v10282_v26 = vld [vmem:[%s16327_s0 + $0x10] sm:$0xff] }
   0x7   :  { %9374 = vmatprep.subr.bf16.mxu0 %v9373_v17  ;;  %9934 = vmatprep.subr.bf16.mxu1 %v9381_v18  ;;  %v9383_v24 = vpack.c.bf16 %v149_v23, %v134_v21  ;;  %v10291_v27 = vld [vmem:[%s16327_s0 + $0x8] sm:$0xff]  ;;  %v10298_v28 = vld [vmem:[%s16327_s0 + $0x18] sm:$0xff]  ;;  %v10309_v29 = vld [vmem:[%s16327_s0 + $0x20] sm:$0xff] }
   0x8   :  { %v109_v30 = vld [vmem:[%s16326_s1 + $0x38] sm:$0xff]  ;;  %v124_v31 = vld [vmem:[%s16326_s1 + $0xb0] sm:$0xff]  ;;  %v10329_v33 = vld [vmem:[%s16327_s0 + $0x28] sm:$0xff] }
   0x9   :  { %9376 = vmatpush1.bf16.msra.mxu0 %v9375_v22  ;;  %v108_v32 = vld [vmem:[%s16326_s1 + $0x30] sm:$0xff]  ;;  %v9393_v34 = vpack.c.bf16 %v124_v31, %v109_v30  ;;  %v123_v35 = vld [vmem:[%s16326_s1 + $0xa8] sm:$0xff]  ;;  %v10354_v38 = vld [vmem:[%s16327_s0 + $0x38] sm:$0xff] }
   0xa   :  { %9936 = vmatpush1.bf16.msra.mxu1 %v9383_v24  ;;  %9378 = vmatprep.subr.bf16.mxu0 %v9377_v8  ;;  %v9395_v36 = vpack.c.bf16 %v123_v35, %v108_v32  ;;  %v10343_v37 = vld [vmem:[%s16327_s0 + $0x30] sm:$0xff]  ;;  %v10365_v39 = vld [vmem:[%s16327_s0 + $0x40] sm:$0xff]  ;;  %v10376_v40 = vld [vmem:[%s16327_s0 + $0x48] sm:$0xff]  ;;  %v3645_v35 = vlaneseq }
   0xb   :  { %9394 = vmatprep.subr.bf16.mxu1 %v9393_v34  ;;  %v10387_v41 = vld [vmem:[%s16327_s0 + $0x50] sm:$0xff]  ;;  %v10398_v42 = vld [vmem:[%s16327_s0 + $0x58] sm:$0xff]  ;;  %v10409_v43 = vld [vmem:[%s16327_s0 + $0x60] sm:$0xff] }
   0xc   :  { %8417 = vmatmul.mubr.msk.f32.vlgmr.msra.gmra.mrb[0].mxu0 %vm162_vm0, %v10277_v25  ;;  %v10420_v44 = vld [vmem:[%s16327_s0 + $0x68] sm:$0xff]  ;;  %v10431_v45 = vld [vmem:[%s16327_s0 + $0x70] sm:$0xff]  ;;  %v10442_v46 = vld [vmem:[%s16327_s0 + $0x78] sm:$0xff] }
   0xd   :  { %8483 = vmatmul.mubr.msk.f32.vlgmr.msra.gmra.mrb[0].mxu1 %vm162_vm0, %v10282_v26  ;;  %9380 = vmatpush1.bf16.msra.mxu0 %v9379_v13  ;;  %v10453_v47 = vld [vmem:[%s16327_s0 + $0x80] sm:$0xff]  ;;  %v10464_v48 = vld [vmem:[%s16327_s0 + $0x88] sm:$0xff]  ;;  %v10475_v49 = vld [vmem:[%s16327_s0 + $0x90] sm:$0xff] }
   0xe   :  { %425 = vmatprep.mubr.f32.mxu0 %v16340_v3  ;;  %821 = vmatprep.mubr.f32.mxu1 %v16340_v3  ;;  %v10486_v50 = vld [vmem:[%s16327_s0 + $0x98] sm:$0xff]  ;;  %v58_v51 = vld [vmem:[%s16327_s0 + $0xa0] sm:$0xff]  ;;  %v59_v52 = vld [vmem:[%s16327_s0 + $0xa8] sm:$0xff] }
   0xf   :  { %9382 = vmatprep.subr.bf16.mxu0 %v9381_v18  ;;  %9396 = vmatpush1.bf16.msra.mxu1 %v9395_v36  ;;  %v60_v53 = vld [vmem:[%s16327_s0 + $0xb0] sm:$0xff]  ;;  %v61_v54 = vld [vmem:[%s16327_s0 + $0xb8] sm:$0xff]  ;;  %v62_v55 = vld [vmem:[%s16327_s0 + $0xc0] sm:$0xff] }
  0x10   :  { %8418 = vmatmul.mubr.msk.f32.gmra.mrb[2].mxu0 %vm162_vm0, %v10291_v27  ;;  %v63_v56 = vld [vmem:[%s16327_s0 + $0xc8] sm:$0xff]  ;;  %v64_v57 = vld [vmem:[%s16327_s0 + $0xd0] sm:$0xff]  ;;  %v65_v58 = vld [vmem:[%s16327_s0 + $0xd8] sm:$0xff] }
  0x11   :  { %8484 = vmatmul.mubr.msk.f32.gmra.mrb[2].mxu1 %vm162_vm0, %v10298_v28  ;;  %429 = vmatprep.mubr.f32.mxu0 %v16340_v3  ;;  %v66_v59 = vld [vmem:[%s16327_s0 + $0xe0] sm:$0xff]  ;;  %v67_v60 = vld [vmem:[%s16327_s0 + $0xe8] sm:$0xff]  ;;  %v68_v61 = vld [vmem:[%s16327_s0 + $0xf0] sm:$0xff] }
  0x12   :  { %825 = vmatprep.mubr.f32.mxu1 %v16340_v3  ;;  %9384 = vmatpush1.bf16.msra.mxu0 %v9383_v24  ;;  %v69_v62 = vld [vmem:[%s16327_s0 + $0xf8] sm:$0xff]  ;;  %v139_v63 = vld [vmem:[%s16326_s1 + $0x128] sm:$0xff]  ;;  %v154_v0 = vld [vmem:[%s16326_s1 + $0x1a0] sm:$0xff] }
  0x13   :  { %v9397_v1 = vpack.c.bf16 %v154_v0, %v139_v63  ;;  %v138_v2 = vld [vmem:[%s16326_s1 + $0x120] sm:$0xff]  ;;  %v153_v4 = vld [vmem:[%s16326_s1 + $0x198] sm:$0xff]  ;;  %v71_v7 = vld [vmem:[%s16327_s0 + $0x108] sm:$0xff] }
  0x14   :  { %8419 = vmatmul.mubr.msk.f32.gmra.mrb[4].mxu0 %vm162_vm0, %v10282_v26  ;;  %v9399_v5 = vpack.c.bf16 %v153_v4, %v138_v2  ;;  %v70_v6 = vld [vmem:[%s16327_s0 + $0x100] sm:$0xff]  ;;  %v72_v8 = vld [vmem:[%s16327_s0 + $0x110] sm:$0xff]  ;;  %v107_v9 = vld [vmem:[%s16326_s1 + $0x28] sm:$0xff] }
  0x15   :  { %8485 = vmatmul.mubr.msk.f32.gmra.mrb[4].mxu1 %vm162_vm0, %v10309_v29  ;;  %435 = vmatprep.mubr.f32.mxu0 %v16340_v3  ;;  %v122_v10 = vld [vmem:[%s16326_s1 + $0xa0] sm:$0xff]  ;;  %v73_v12 = vld [vmem:[%s16327_s0 + $0x118] sm:$0xff]  ;;  %v75_v14 = vld [vmem:[%s16327_s0 + $0x128] sm:$0xff] }
  0x16   :  { %831 = vmatprep.mubr.f32.mxu1 %v16340_v3  ;;  %9398 = vmatprep.subr.bf16.mxu1 %v9397_v1  ;;  %v9385_v11 = vpack.c.bf16 %v122_v10, %v107_v9  ;;  %v74_v13 = vld [vmem:[%s16327_s0 + $0x120] sm:$0xff]  ;;  %v76_v15 = vld [vmem:[%s16327_s0 + $0x130] sm:$0xff]  ;;  %v77_v16 = vld [vmem:[%s16327_s0 + $0x138] sm:$0xff] }
  0x17   :  { %9400 = vmatpush1.bf16.msra.mxu1 %v9399_v5  ;;  %v78_v17 = vld [vmem:[%s16327_s0 + $0x140] sm:$0xff]  ;;  %v79_v18 = vld [vmem:[%s16327_s0 + $0x148] sm:$0xff]  ;;  %v80_v19 = vld [vmem:[%s16327_s0 + $0x150] sm:$0xff] }
  0x18   :  { %8420 = vmatmul.mubr.msk.f32.gmra.mrb[6].mxu0 %vm162_vm0, %v10298_v28  ;;  %9386 = vmatprep.subr.bf16.mxu0 %v9385_v11  ;;  %v81_v20 = vld [vmem:[%s16327_s0 + $0x158] sm:$0xff]  ;;  %v82_v21 = vld [vmem:[%s16327_s0 + $0x160] sm:$0xff]  ;;  %v83_v22 = vld [vmem:[%s16327_s0 + $0x168] sm:$0xff] }
  0x19   :  { %8486 = vmatmul.mubr.msk.f32.gmra.mrb[6].mxu1 %vm162_vm0, %v10329_v33  ;;  %439 = vmatprep.mubr.f32.mxu0 %v16340_v3  ;;  %v84_v23 = vld [vmem:[%s16327_s0 + $0x170] sm:$0xff]  ;;  %v85_v24 = vld [vmem:[%s16327_s0 + $0x178] sm:$0xff]  ;;  %v86_v30 = vld [vmem:[%s16327_s0 + $0x180] sm:$0xff] }
  0x1a   :  { %835 = vmatprep.mubr.f32.mxu1 %v16340_v3  ;;  %v87_v31 = vld [vmem:[%s16327_s0 + $0x188] sm:$0xff]  ;;  %v88_v32 = vld [vmem:[%s16327_s0 + $0x190] sm:$0xff]  ;;  %v89_v34 = vld [vmem:[%s16327_s0 + $0x198] sm:$0xff] }
  0x1b   :  { %v90_v36 = vld [vmem:[%s16327_s0 + $0x1a0] sm:$0xff] }
  0x1c   :  { %8421 = vmatmul.mubr.msk.f32.gmra.mrb[8].mxu0 %vm162_vm0, %v10309_v29  ;;  %v94_v0 = vld [vmem:[%s16327_s0 + $0x1c0] sm:$0xff] }
  0x1d   :  { %8487 = vmatmul.mubr.msk.f32.gmra.mrb[8].mxu1 %vm162_vm0, %v10343_v37  ;;  %445 = vmatprep.mubr.f32.mxu0 %v16340_v3 }
  0x1e   :  { %841 = vmatprep.mubr.f32.mxu1 %v16340_v3 }
  0x20   :  { %8422 = vmatmul.mubr.msk.f32.gmra.mrb[10].mxu0 %vm162_vm0, %v10329_v33 }
  0x21   :  { %8488 = vmatmul.mubr.msk.f32.gmra.mrb[10].mxu1 %vm162_vm0, %v10354_v38  ;;  %449 = vmatprep.mubr.f32.mxu0 %v16340_v3 }
  0x22   :  { %845 = vmatprep.mubr.f32.mxu1 %v16340_v3 }
  0x24   :  { %8423 = vmatmul.mubr.msk.f32.gmra.mrb[12].mxu0 %vm162_vm0, %v10343_v37 }
  0x25   :  { %8489 = vmatmul.mubr.msk.f32.gmra.mrb[12].mxu1 %vm162_vm0, %v10365_v39  ;;  %455 = vmatprep.mubr.f32.mxu0 %v16340_v3 }
  0x26   :  { %851 = vmatprep.mubr.f32.mxu1 %v16340_v3 }
  0x28   :  { %8424 = vmatmul.mubr.msk.f32.gmra.mrb[14].mxu0 %vm162_vm0, %v10354_v38 }
  0x29   :  { %8490 = vmatmul.mubr.msk.f32.gmra.mrb[14].mxu1 %vm162_vm0, %v10376_v40  ;;  %459 = vmatprep.mubr.f32.mxu0 %v16340_v3 }
  0x2a   :  { %856 = vmatprep.mubr.f32.mxu1 %v16340_v3 }
  0x2c   :  { %8425 = vmatmul.mubr.msk.f32.gmra.mrb[16].mxu0 %vm162_vm0, %v10365_v39 }
  0x2d   :  { %8491 = vmatmul.mubr.msk.f32.gmra.mrb[16].mxu1 %vm162_vm0, %v10387_v41  ;;  %465 = vmatprep.mubr.f32.mxu0 %v16340_v3 }
  0x2e   :  { %862 = vmatprep.mubr.f32.mxu1 %v16340_v3 }
  0x30   :  { %8426 = vmatmul.mubr.msk.f32.gmra.mrb[18].mxu0 %vm162_vm0, %v10376_v40 }
  0x31   :  { %8492 = vmatmul.mubr.msk.f32.gmra.mrb[18].mxu1 %vm162_vm0, %v10398_v42  ;;  %469 = vmatprep.mubr.f32.mxu0 %v16340_v3 }
  0x32   :  { %866 = vmatprep.mubr.f32.mxu1 %v16340_v3 }
  0x34   :  { %8427 = vmatmul.mubr.msk.f32.gmra.mrb[20].mxu0 %vm162_vm0, %v10387_v41 }
  0x35   :  { %8493 = vmatmul.mubr.msk.f32.gmra.mrb[20].mxu1 %vm162_vm0, %v10409_v43  ;;  %475 = vmatprep.mubr.f32.mxu0 %v16340_v3 }
  0x36   :  { %872 = vmatprep.mubr.f32.mxu1 %v16340_v3 }
  0x38   :  { %8428 = vmatmul.mubr.msk.f32.gmra.mrb[22].mxu0 %vm162_vm0, %v10398_v42 }
  0x39   :  { %8494 = vmatmul.mubr.msk.f32.gmra.mrb[22].mxu1 %vm162_vm0, %v10420_v44  ;;  %479 = vmatprep.mubr.f32.mxu0 %v16340_v3 }
  0x3a   :  { %876 = vmatprep.mubr.f32.mxu1 %v16340_v3 }
  0x3c   :  { %8429 = vmatmul.mubr.msk.f32.gmra.mrb[24].mxu0 %vm162_vm0, %v10409_v43 }
  0x3d   :  { %8495 = vmatmul.mubr.msk.f32.gmra.mrb[24].mxu1 %vm162_vm0, %v10431_v45  ;;  %485 = vmatprep.mubr.f32.mxu0 %v16340_v3 }
  0x3e   :  { %882 = vmatprep.mubr.f32.mxu1 %v16340_v3 }
  0x40   :  { %8430 = vmatmul.mubr.msk.f32.gmra.mrb[26].mxu0 %vm162_vm0, %v10420_v44 }
  0x41   :  { %8496 = vmatmul.mubr.msk.f32.gmra.mrb[26].mxu1 %vm162_vm0, %v10442_v46  ;;  %489 = vmatprep.mubr.f32.mxu0 %v16340_v3 }
  0x42   :  { %886 = vmatprep.mubr.f32.mxu1 %v16340_v3 }
  0x44   :  { %8431 = vmatmul.mubr.msk.f32.gmra.mrb[28].mxu0 %vm162_vm0, %v10431_v45 }
  0x45   :  { %8497 = vmatmul.mubr.msk.f32.gmra.mrb[28].mxu1 %vm162_vm0, %v10453_v47  ;;  %495 = vmatprep.mubr.f32.mxu0 %v16340_v3 }
  0x46   :  { %892 = vmatprep.mubr.f32.mxu1 %v16340_v3 }
  0x48   :  { %8432 = vmatmul.mubr.msk.f32.gmra.mrb[30].mxu0 %vm162_vm0, %v10442_v46 }
  0x49   :  { %8498 = vmatmul.mubr.msk.f32.gmra.mrb[30].mxu1 %vm162_vm0, %v10464_v48  ;;  %499 = vmatprep.mubr.f32.mxu0 %v16340_v3 }
  0x4a   :  { %897 = vmatprep.mubr.f32.mxu1 %v16340_v3 }
  0x4c   :  { %8433 = vmatmul.mubr.msk.f32.gmra.mrb[32].mxu0 %vm162_vm0, %v10453_v47 }
  0x4d   :  { %8499 = vmatmul.mubr.msk.f32.gmra.mrb[32].mxu1 %vm162_vm0, %v10475_v49  ;;  %505 = vmatprep.mubr.f32.mxu0 %v16340_v3 }
  0x4e   :  { %903 = vmatprep.mubr.f32.mxu1 %v16340_v3 }
  0x50   :  { %8434 = vmatmul.mubr.msk.f32.gmra.mrb[34].mxu0 %vm162_vm0, %v10464_v48 }
  0x51   :  { %8500 = vmatmul.mubr.msk.f32.gmra.mrb[34].mxu1 %vm162_vm0, %v10486_v50  ;;  %509 = vmatprep.mubr.f32.mxu0 %v16340_v3 }
  0x52   :  { %907 = vmatprep.mubr.f32.mxu1 %v16340_v3 }
  0x54   :  { %8435 = vmatmul.mubr.msk.f32.gmra.mrb[36].mxu0 %vm162_vm0, %v10475_v49 }
  0x55   :  { %8501 = vmatmul.mubr.msk.f32.gmra.mrb[36].mxu1 %vm162_vm0, %v58_v51  ;;  %515 = vmatprep.mubr.f32.mxu0 %v16340_v3 }
  0x56   :  { %913 = vmatprep.mubr.f32.mxu1 %v16340_v3 }
  0x58   :  { %8436 = vmatmul.mubr.msk.f32.gmra.mrb[38].mxu0 %vm162_vm0, %v10486_v50 }
  0x59   :  { %8502 = vmatmul.mubr.msk.f32.gmra.mrb[38].mxu1 %vm162_vm0, %v59_v52  ;;  %519 = vmatprep.mubr.f32.mxu0 %v16340_v3 }
  0x5a   :  { %917 = vmatprep.mubr.f32.mxu1 %v16340_v3 }
  0x5c   :  { %8437 = vmatmul.mubr.msk.f32.gmra.mrb[40].mxu0 %vm162_vm0, %v58_v51  ;;  %v10742_v51 = vshrl.u32 %v3645_v35, 7 }
  0x5d   :  { %8503 = vmatmul.mubr.msk.f32.gmra.mrb[40].mxu1 %vm162_vm0, %v60_v53  ;;  %525 = vmatprep.mubr.f32.mxu0 %v16340_v3 }
  0x5e   :  { %923 = vmatprep.mubr.f32.mxu1 %v16340_v3  ;;  %16353 = vst [vmem:[#allocation2_spill] sm:$0xff] %v10742_v51 }
  0x60   :  { %8438 = vmatmul.mubr.msk.f32.gmra.mrb[42].mxu0 %vm162_vm0, %v59_v52  ;;  %v91_v52 = vld [vmem:[%s16327_s0 + $0x1a8] sm:$0xff] }
  0x61   :  { %8504 = vmatmul.mubr.msk.f32.gmra.mrb[42].mxu1 %vm162_vm0, %v61_v54  ;;  %529 = vmatprep.mubr.f32.mxu0 %v16340_v3 }
  0x62   :  { %927 = vmatprep.mubr.f32.mxu1 %v16340_v3 }
  0x64   :  { %8439 = vmatmul.mubr.msk.f32.gmra.mrb[44].mxu0 %vm162_vm0, %v60_v53  ;;  %v10752_v53 = vsub.s32 0, %v10742_v51 }
  0x65   :  { %8505 = vmatmul.mubr.msk.f32.gmra.mrb[44].mxu1 %vm162_vm0, %v62_v55  ;;  %535 = vmatprep.mubr.f32.mxu0 %v16340_v3 }
  0x66   :  { %933 = vmatprep.mubr.f32.mxu1 %v16340_v3  ;;  %16354 = vst [vmem:[#allocation3_spill] sm:$0xff] %v10752_v53 }
  0x68   :  { %8440 = vmatmul.mubr.msk.f32.gmra.mrb[46].mxu0 %vm162_vm0, %v61_v54  ;;  %v3643_v54 = vld [vmem:[%s16328_s2] sm:$0x7] }
  0x69   :  { %8506 = vmatmul.mubr.msk.f32.gmra.mrb[46].mxu1 %vm162_vm0, %v63_v56  ;;  %539 = vmatprep.mubr.f32.mxu0 %v16340_v3 }
  0x6a   :  { %938 = vmatprep.mubr.f32.mxu1 %v16340_v3 }
  0x6c   :  { %8441 = vmatmul.mubr.msk.f32.gmra.mrb[48].mxu0 %vm162_vm0, %v62_v55  ;;  %v92_v55 = vld [vmem:[%s16327_s0 + $0x1b0] sm:$0xff] }
  0x6d   :  { %8507 = vmatmul.mubr.msk.f32.gmra.mrb[48].mxu1 %vm162_vm0, %v64_v57  ;;  %545 = vmatprep.mubr.f32.mxu0 %v16340_v3 }
  0x6e   :  { %944 = vmatprep.mubr.f32.mxu1 %v16340_v3 }
  0x70   :  { %8442 = vmatmul.mubr.msk.f32.gmra.mrb[50].mxu0 %vm162_vm0, %v63_v56  ;;  %v10765_v56 = vrot.slane %v3643_v54, %v10752_v53 }
  0x71   :  { %8508 = vmatmul.mubr.msk.f32.gmra.mrb[50].mxu1 %vm162_vm0, %v65_v58  ;;  %549 = vmatprep.mubr.f32.mxu0 %v16340_v3 }
  0x72   :  { %948 = vmatprep.mubr.f32.mxu1 %v16340_v3 }
  0x74   :  { %8443 = vmatmul.mubr.msk.f32.gmra.mrb[52].mxu0 %vm162_vm0, %v64_v57  ;;  %v93_v57 = vld [vmem:[%s16327_s0 + $0x1b8] sm:$0xff] }
  0x75   :  { %8509 = vmatmul.mubr.msk.f32.gmra.mrb[52].mxu1 %vm162_vm0, %v66_v59  ;;  %555 = vmatprep.mubr.f32.mxu0 %v16340_v3 }
  0x76   :  { %954 = vmatprep.mubr.f32.mxu1 %v16340_v3 }
  0x78   :  { %8444 = vmatmul.mubr.msk.f32.gmra.mrb[54].mxu0 %vm162_vm0, %v65_v58 }
  0x79   :  { %8510 = vmatmul.mubr.msk.f32.gmra.mrb[54].mxu1 %vm162_vm0, %v67_v60  ;;  %559 = vmatprep.mubr.f32.mxu0 %v16340_v3 }
  0x7a   :  { %958 = vmatprep.mubr.f32.mxu1 %v16340_v3 }
  0x7c   :  { %8445 = vmatmul.mubr.msk.f32.gmra.mrb[56].mxu0 %vm162_vm0, %v66_v59 }
  0x7d   :  { %8511 = vmatmul.mubr.msk.f32.gmra.mrb[56].mxu1 %vm162_vm0, %v68_v61  ;;  %565 = vmatprep.mubr.f32.mxu0 %v16340_v3 }
  0x7e   :  { %964 = vmatprep.mubr.f32.mxu1 %v16340_v3 }
  0x80   :  { %8446 = vmatmul.mubr.msk.f32.gmra.mrb[58].mxu0 %vm162_vm0, %v67_v60 }
  0x81   :  { %8512 = vmatmul.mubr.msk.f32.gmra.mrb[58].mxu1 %vm162_vm0, %v69_v62  ;;  %569 = vmatprep.mubr.f32.mxu0 %v16340_v3 }
  0x82   :  { %968 = vmatprep.mubr.f32.mxu1 %v16340_v3 }
  0x84   :  { %8447 = vmatmul.mubr.msk.f32.gmra.mrb[60].mxu0 %vm162_vm0, %v68_v61 }
  0x85   :  { %8513 = vmatmul.mubr.msk.f32.gmra.mrb[60].mxu1 %vm162_vm0, %v70_v6  ;;  %575 = vmatprep.mubr.f32.mxu0 %v16340_v3 }
  0x86   :  { %974 = vmatprep.mubr.f32.mxu1 %v16340_v3 }
  0x88   :  { %8448 = vmatmul.mubr.msk.f32.gmra.mrb[62].mxu0 %vm162_vm0, %v69_v62 }
  0x89   :  { %8514 = vmatmul.mubr.msk.f32.gmra.mrb[62].mxu1 %vm162_vm0, %v71_v7  ;;  %579 = vmatprep.mubr.f32.mxu0 %v16340_v3 }
  0x8a   :  { %979 = vmatprep.mubr.f32.mxu1 %v16340_v3 }
  0x8c   :  { %8449 = vmatmul.mubr.msk.f32.gmra.mrb[64].mxu0 %vm162_vm0, %v70_v6  ;;  %v95_v6 = vld [vmem:[%s16327_s0 + $0x1c8] sm:$0xff] }
  0x8d   :  { %8515 = vmatmul.mubr.msk.f32.gmra.mrb[64].mxu1 %vm162_vm0, %v72_v8  ;;  %585 = vmatprep.mubr.f32.mxu0 %v16340_v3 }
  0x8e   :  { %985 = vmatprep.mubr.f32.mxu1 %v16340_v3 }
  0x90   :  { %8450 = vmatmul.mubr.msk.f32.gmra.mrb[66].mxu0 %vm162_vm0, %v71_v7 }
  0x91   :  { %8516 = vmatmul.mubr.msk.f32.gmra.mrb[66].mxu1 %vm162_vm0, %v73_v12  ;;  %589 = vmatprep.mubr.f32.mxu0 %v16340_v3 }
  0x92   :  { %989 = vmatprep.mubr.f32.mxu1 %v16340_v3 }
  0x94   :  { %8451 = vmatmul.mubr.msk.f32.gmra.mrb[68].mxu0 %vm162_vm0, %v72_v8 }
  0x95   :  { %8517 = vmatmul.mubr.msk.f32.gmra.mrb[68].mxu1 %vm162_vm0, %v74_v13  ;;  %595 = vmatprep.mubr.f32.mxu0 %v16340_v3 }
  0x96   :  { %995 = vmatprep.mubr.f32.mxu1 %v16340_v3 }
  0x98   :  { %8452 = vmatmul.mubr.msk.f32.gmra.mrb[70].mxu0 %vm162_vm0, %v73_v12 }
  0x99   :  { %8518 = vmatmul.mubr.msk.f32.gmra.mrb[70].mxu1 %vm162_vm0, %v75_v14  ;;  %599 = vmatprep.mubr.f32.mxu0 %v16340_v3 }
  0x9a   :  { %999 = vmatprep.mubr.f32.mxu1 %v16340_v3 }
  0x9c   :  { %8453 = vmatmul.mubr.msk.f32.gmra.mrb[72].mxu0 %vm162_vm0, %v74_v13  ;;  %v96_v13 = vld [vmem:[%s16327_s0 + $0x1d0] sm:$0xff] }
  0x9d   :  { %8519 = vmatmul.mubr.msk.f32.gmra.mrb[72].mxu1 %vm162_vm0, %v76_v15  ;;  %605 = vmatprep.mubr.f32.mxu0 %v16340_v3 }
  0x9e   :  { %1005 = vmatprep.mubr.f32.mxu1 %v16340_v3 }
  0xa0   :  { %8454 = vmatmul.mubr.msk.f32.gmra.mrb[74].mxu0 %vm162_vm0, %v75_v14 }
  0xa1   :  { %8520 = vmatmul.mubr.msk.f32.gmra.mrb[74].mxu1 %vm162_vm0, %v77_v16  ;;  %609 = vmatprep.mubr.f32.mxu0 %v16340_v3 }
  0xa2   :  { %1009 = vmatprep.mubr.f32.mxu1 %v16340_v3 }
  0xa4   :  { %8455 = vmatmul.mubr.msk.f32.gmra.mrb[76].mxu0 %vm162_vm0, %v76_v15 }
  0xa5   :  { %8521 = vmatmul.mubr.msk.f32.gmra.mrb[76].mxu1 %vm162_vm0, %v78_v17  ;;  %615 = vmatprep.mubr.f32.mxu0 %v16340_v3 }
  0xa6   :  { %1015 = vmatprep.mubr.f32.mxu1 %v16340_v3 }
  0xa8   :  { %8456 = vmatmul.mubr.msk.f32.gmra.mrb[78].mxu0 %vm162_vm0, %v77_v16 }
  0xa9   :  { %8522 = vmatmul.mubr.msk.f32.gmra.mrb[78].mxu1 %vm162_vm0, %v79_v18  ;;  %619 = vmatprep.mubr.f32.mxu0 %v16340_v3 }
  0xaa   :  { %1020 = vmatprep.mubr.f32.mxu1 %v16340_v3 }
  0xac   :  { %8457 = vmatmul.mubr.msk.f32.gmra.mrb[80].mxu0 %vm162_vm0, %v78_v17 }
  0xad   :  { %8523 = vmatmul.mubr.msk.f32.gmra.mrb[80].mxu1 %vm162_vm0, %v80_v19  ;;  %625 = vmatprep.mubr.f32.mxu0 %v16340_v3 }
  0xae   :  { %1026 = vmatprep.mubr.f32.mxu1 %v16340_v3 }
  0xb0   :  { %8458 = vmatmul.mubr.msk.f32.gmra.mrb[82].mxu0 %vm162_vm0, %v79_v18  ;;  %v97_v18 = vld [vmem:[%s16327_s0 + $0x1d8] sm:$0xff] }
  0xb1   :  { %8524 = vmatmul.mubr.msk.f32.gmra.mrb[82].mxu1 %vm162_vm0, %v81_v20  ;;  %629 = vmatprep.mubr.f32.mxu0 %v16340_v3 }
  0xb2   :  { %1030 = vmatprep.mubr.f32.mxu1 %v16340_v3 }
  0xb4   :  { %8459 = vmatmul.mubr.msk.f32.gmra.mrb[84].mxu0 %vm162_vm0, %v80_v19 }
  0xb5   :  { %8525 = vmatmul.mubr.msk.f32.gmra.mrb[84].mxu1 %vm162_vm0, %v82_v21  ;;  %635 = vmatprep.mubr.f32.mxu0 %v16340_v3 }
  0xb6   :  { %1036 = vmatprep.mubr.f32.mxu1 %v16340_v3 }
  0xb8   :  { %8460 = vmatmul.mubr.msk.f32.gmra.mrb[86].mxu0 %vm162_vm0, %v81_v20 }
  0xb9   :  { %8526 = vmatmul.mubr.msk.f32.gmra.mrb[86].mxu1 %vm162_vm0, %v83_v22  ;;  %639 = vmatprep.mubr.f32.mxu0 %v16340_v3 }
  0xba   :  { %1040 = vmatprep.mubr.f32.mxu1 %v16340_v3 }
  0xbc   :  { %8461 = vmatmul.mubr.msk.f32.gmra.mrb[88].mxu0 %vm162_vm0, %v82_v21 }
  0xbd   :  { %8527 = vmatmul.mubr.msk.f32.gmra.mrb[88].mxu1 %vm162_vm0, %v84_v23  ;;  %645 = vmatprep.mubr.f32.mxu0 %v16340_v3 }
  0xbe   :  { %1046 = vmatprep.mubr.f32.mxu1 %v16340_v3 }
  0xc0   :  { %8462 = vmatmul.mubr.msk.f32.gmra.mrb[90].mxu0 %vm162_vm0, %v83_v22 }
  0xc1   :  { %8528 = vmatmul.mubr.msk.f32.gmra.mrb[90].mxu1 %vm162_vm0, %v85_v24  ;;  %649 = vmatprep.mubr.f32.mxu0 %v16340_v3 }
  0xc2   :  { %1050 = vmatprep.mubr.f32.mxu1 %v16340_v3 }
  0xc4   :  { %8463 = vmatmul.mubr.msk.f32.gmra.mrb[92].mxu0 %vm162_vm0, %v84_v23 }
  0xc5   :  { %8529 = vmatmul.mubr.msk.f32.gmra.mrb[92].mxu1 %vm162_vm0, %v86_v30  ;;  %655 = vmatprep.mubr.f32.mxu0 %v16340_v3 }
  0xc6   :  { %1056 = vmatprep.mubr.f32.mxu1 %v16340_v3 }
  0xc8   :  { %8464 = vmatmul.mubr.msk.f32.gmra.mrb[94].mxu0 %vm162_vm0, %v85_v24 }
  0xc9   :  { %8530 = vmatmul.mubr.msk.f32.gmra.mrb[94].mxu1 %vm162_vm0, %v87_v31  ;;  %659 = vmatprep.mubr.f32.mxu0 %v16340_v3 }
  0xca   :  { %1061 = vmatprep.mubr.f32.mxu1 %v16340_v3 }
  0xcc   :  { %8465 = vmatmul.mubr.msk.f32.gmra.mrb[96].mxu0 %vm162_vm0, %v86_v30  ;;  %v98_v30 = vld [vmem:[%s16327_s0 + $0x1e0] sm:$0xff] }
  0xcd   :  { %8531 = vmatmul.mubr.msk.f32.gmra.mrb[96].mxu1 %vm162_vm0, %v88_v32  ;;  %665 = vmatprep.mubr.f32.mxu0 %v16340_v3 }
  0xce   :  { %1067 = vmatprep.mubr.f32.mxu1 %v16340_v3 }
  0xd0   :  { %8466 = vmatmul.mubr.msk.f32.gmra.mrb[98].mxu0 %vm162_vm0, %v87_v31 }
  0xd1   :  { %8532 = vmatmul.mubr.msk.f32.gmra.mrb[98].mxu1 %vm162_vm0, %v89_v34  ;;  %669 = vmatprep.mubr.f32.mxu0 %v16340_v3 }
  0xd2   :  { %1071 = vmatprep.mubr.f32.mxu1 %v16340_v3 }
  0xd4   :  { %8467 = vmatmul.mubr.msk.f32.gmra.mrb[100].mxu0 %vm162_vm0, %v88_v32 }
  0xd5   :  { %8533 = vmatmul.mubr.msk.f32.gmra.mrb[100].mxu1 %vm162_vm0, %v90_v36  ;;  %675 = vmatprep.mubr.f32.mxu0 %v16340_v3 }
  0xd6   :  { %1077 = vmatprep.mubr.f32.mxu1 %v16340_v3 }
  0xd8   :  { %8468 = vmatmul.mubr.msk.f32.gmra.mrb[102].mxu0 %vm162_vm0, %v89_v34 }
  0xd9   :  { %8534 = vmatmul.mubr.msk.f32.gmra.mrb[102].mxu1 %vm162_vm0, %v91_v52  ;;  %679 = vmatprep.mubr.f32.mxu0 %v16340_v3 }
  0xda   :  { %1081 = vmatprep.mubr.f32.mxu1 %v16340_v3 }
  0xdc   :  { %8469 = vmatmul.mubr.msk.f32.gmra.mrb[104].mxu0 %vm162_vm0, %v90_v36  ;;  %v99_v36 = vld [vmem:[%s16327_s0 + $0x1e8] sm:$0xff] }
  0xdd   :  { %8535 = vmatmul.mubr.msk.f32.gmra.mrb[104].mxu1 %vm162_vm0, %v92_v55  ;;  %685 = vmatprep.mubr.f32.mxu0 %v16340_v3 }
  0xde   :  { %1087 = vmatprep.mubr.f32.mxu1 %v16340_v3 }
  0xdf   :  { %v421_v58 = vpop.f32.mrb[0].mxu0 }
  0xe0   :  { %v3660_v59 = vadd.f32 %v10765_v56, %v421_v58  ;;  %v10774_v60 = vpop.f32.mrb[1].mxu0  ;;  %8470 = vmatmul.mubr.msk.f32.gmra.mrb[106].mxu0 %vm162_vm0, %v91_v52  ;;  %v10777_v61 = vpop.f32.mrb[0].mxu1  ;;  %v100_v58 = vld [vmem:[%s16327_s0 + $0x1f0] sm:$0xff] }
  0xe1   :  { %8536 = vmatmul.mubr.msk.f32.gmra.mrb[106].mxu1 %vm162_vm0, %v93_v57  ;;  %v819_v62 = vpop.f32.mrb[1].mxu1  ;;  %689 = vmatprep.mubr.f32.mxu0 %v16340_v3 }
  0xe2   :  { %v10781_v63 = vadd.f32 %v3660_v59, %v819_v62  ;;  %1091 = vmatprep.mubr.f32.mxu1 %v16340_v3 }
  0xe3   :  { %v427_v1 = vpop.f32.mrb[2].mxu0 }
  0xe4   :  { %v428_v2 = vpop.f32.mrb[3].mxu0  ;;  %8471 = vmatmul.mubr.msk.f32.gmra.mrb[108].mxu0 %vm162_vm0, %v92_v55  ;;  %v823_v4 = vpop.f32.mrb[2].mxu1 }
  0xe5   :  { %8537 = vmatmul.mubr.msk.f32.gmra.mrb[108].mxu1 %vm162_vm0, %v94_v0  ;;  %695 = vmatprep.mubr.f32.mxu0 %v16340_v3  ;;  %v824_v5 = vpop.f32.mrb[3].mxu1 }
  0xe6   :  { %1097 = vmatprep.mubr.f32.mxu1 %v16340_v3  ;;  %v101_v5 = vld [vmem:[%s16327_s0 + $0x1f8] sm:$0xff] }
  0xe7   :  { %v431_v7 = vpop.f32.mrb[4].mxu0 }
  0xe8   :  { %v3949_v8 = vadd.f32 %v10765_v56, %v431_v7  ;;  %v10795_v9 = vpop.f32.mrb[5].mxu0  ;;  %8472 = vmatmul.mubr.msk.f32.gmra.mrb[110].mxu0 %vm162_vm0, %v93_v57  ;;  %v10798_v10 = vpop.f32.mrb[4].mxu1 }
  0xe9   :  { %8538 = vmatmul.mubr.msk.f32.gmra.mrb[110].mxu1 %vm162_vm0, %v95_v6  ;;  %v829_v11 = vpop.f32.mrb[5].mxu1  ;;  %699 = vmatprep.mubr.f32.mxu0 %v16340_v3 }
  0xea   :  { %v10802_v12 = vadd.f32 %v3949_v8, %v829_v11  ;;  %1102 = vmatprep.mubr.f32.mxu1 %v16340_v3 }
  0xeb   :  { %v437_v14 = vpop.f32.mrb[6].mxu0 }
  0xec   :  { %v438_v15 = vpop.f32.mrb[7].mxu0  ;;  %8473 = vmatmul.mubr.msk.f32.gmra.mrb[112].mxu0 %vm162_vm0, %v94_v0  ;;  %v833_v16 = vpop.f32.mrb[6].mxu1 }
  0xed   :  { %8539 = vmatmul.mubr.msk.f32.gmra.mrb[112].mxu1 %vm162_vm0, %v96_v13  ;;  %705 = vmatprep.mubr.f32.mxu0 %v16340_v3  ;;  %v834_v17 = vpop.f32.mrb[7].mxu1 }
  0xee   :  { %1108 = vmatprep.mubr.f32.mxu1 %v16340_v3 }
  0xef   :  { %v441_v19 = vpop.f32.mrb[8].mxu0 }
  0xf0   :  { %v4381_v20 = vadd.f32 %v10765_v56, %v441_v19  ;;  %v10816_v21 = vpop.f32.mrb[9].mxu0  ;;  %8474 = vmatmul.mubr.msk.f32.gmra.mrb[114].mxu0 %vm162_vm0, %v95_v6  ;;  %v10819_v22 = vpop.f32.mrb[8].mxu1 }
  0xf1   :  { %8540 = vmatmul.mubr.msk.f32.gmra.mrb[114].mxu1 %vm162_vm0, %v97_v18  ;;  %v839_v23 = vpop.f32.mrb[9].mxu1  ;;  %709 = vmatprep.mubr.f32.mxu0 %v16340_v3 }
  0xf2   :  { %v10823_v24 = vadd.f32 %v4381_v20, %v839_v23  ;;  %1112 = vmatprep.mubr.f32.mxu1 %v16340_v3  ;;  %v106_v20 = vld [vmem:[%s16326_s1 + $0x20] sm:$0xff]  ;;  %v121_v23 = vld [vmem:[%s16326_s1 + $0x98] sm:$0xff] }
  0xf3   :  { %v447_v31 = vpop.f32.mrb[10].mxu0 }
  0xf4   :  { %v448_v32 = vpop.f32.mrb[11].mxu0  ;;  %8475 = vmatmul.mubr.msk.f32.gmra.mrb[116].mxu0 %vm162_vm0, %v96_v13  ;;  %v843_v34 = vpop.f32.mrb[10].mxu1 }
  0xf5   :  { %8541 = vmatmul.mubr.msk.f32.gmra.mrb[116].mxu1 %vm162_vm0, %v98_v30  ;;  %715 = vmatprep.mubr.f32.mxu0 %v16340_v3  ;;  %v844_v35 = vpop.f32.mrb[11].mxu1 }
  0xf6   :  { %1118 = vmatprep.mubr.f32.mxu1 %v16340_v3  ;;  %v137_v35 = vld [vmem:[%s16326_s1 + $0x118] sm:$0xff] }
  0xf7   :  { %v10836_v52 = vpop.f32.mrb[12].mxu0 }
  0xf8   :  { %v10838_v54 = vpop.f32.mrb[13].mxu0  ;;  %8476 = vmatmul.mubr.msk.f32.gmra.mrb[118].mxu0 %vm162_vm0, %v97_v18  ;;  %v10841_v55 = vpop.f32.mrb[12].mxu1 }
  0xf9   :  { %8542 = vmatmul.mubr.msk.f32.gmra.mrb[118].mxu1 %vm162_vm0, %v99_v36  ;;  %719 = vmatprep.mubr.f32.mxu0 %v16340_v3  ;;  %v849_v57 = vpop.f32.mrb[13].mxu1 }
  0xfa   :  { %1122 = vmatprep.mubr.f32.mxu1 %v16340_v3  ;;  %v5038_v0 = vrot.slane %v849_v57, 1 }
  0xfb   :  { %v457_v59 = vpop.f32.mrb[14].mxu0 }
  0xfc   :  { %v458_v62 = vpop.f32.mrb[15].mxu0  ;;  %8477 = vmatmul.mubr.msk.f32.gmra.mrb[120].mxu0 %vm162_vm0, %v98_v30  ;;  %v853_v1 = vpop.f32.mrb[14].mxu1 }
  0xfd   :  { %8543 = vmatmul.mubr.msk.f32.gmra.mrb[120].mxu1 %vm162_vm0, %v100_v58  ;;  %725 = vmatprep.mubr.f32.mxu0 %v16340_v3  ;;  %v854_v2 = vpop.f32.mrb[15].mxu1  ;;  %v136_v62 = vld [vmem:[%s16326_s1 + $0x110] sm:$0xff] }
  0xfe   :  { %1128 = vmatprep.mubr.f32.mxu1 %v16340_v3  ;;  %v5039_v4 = vrot.slane %v854_v2, 1 }
  0xff   :  { %v461_v6 = vpop.f32.mrb[16].mxu0 }
 0x100   :  { %v3663_v7 = vadd.f32 %v10765_v56, %v461_v6  ;;  %v10857_v8 = vpop.f32.mrb[17].mxu0  ;;  %8478 = vmatmul.mubr.msk.f32.gmra.mrb[122].mxu0 %vm162_vm0, %v99_v36  ;;  %v10860_v11 = vpop.f32.mrb[16].mxu1  ;;  %v10863_v13 = vsel %vm3804_vm1, %v5038_v0, %v5039_v4  ;;  %v152_v36 = vld [vmem:[%s16326_s1 + $0x190] sm:$0xff]  ;;  %v151_v0 = vld [vmem:[%s16326_s1 + $0x188] sm:$0xff] }
 0x101   :  { %8544 = vmatmul.mubr.msk.f32.gmra.mrb[122].mxu1 %vm162_vm0, %v101_v5  ;;  %v860_v14 = vpop.f32.mrb[17].mxu1  ;;  %729 = vmatprep.mubr.f32.mxu0 %v16340_v3  ;;  %v9389_v2 = vpack.c.bf16 %v152_v36, %v137_v35  ;;  %v111_v6 = vld [vmem:[%s16326_s1 + $0x48] sm:$0xff] }
 0x102   :  { %v10867_v15 = vadd.f32 %v3663_v7, %v860_v14  ;;  %1598 = vmatprep.mubr.f32.mxu1 %v16340_v3  ;;  %v126_v7 = vld [vmem:[%s16326_s1 + $0xc0] sm:$0xff] }
 0x103   :  { %v467_v16 = vpop.f32.mrb[18].mxu0  ;;  %v9401_v36 = vpack.c.bf16 %v126_v7, %v111_v6 }
 0x104   :  { %v468_v17 = vpop.f32.mrb[19].mxu0  ;;  %8479 = vmatmul.mubr.msk.f32.gmra.mrb[124].mxu0 %vm162_vm0, %v100_v58  ;;  %v864_v18 = vpop.f32.mrb[18].mxu1  ;;  %v9387_v58 = vpack.c.bf16 %v121_v23, %v106_v20  ;;  %v9391_v16 = vpack.c.bf16 %v151_v0, %v136_v62  ;;  %v110_v20 = vld [vmem:[%s16326_s1 + $0x40] sm:$0xff]  ;;  %v125_v23 = vld [vmem:[%s16326_s1 + $0xb8] sm:$0xff] }
 0x105   :  { %8609 = vmatmul.mubr.msk.f32.vlgmr.msra.gmra.mrb[124].mxu1 %vm162_vm0, %v10277_v25  ;;  %735 = vmatprep.mubr.f32.mxu0 %v16340_v3  ;;  %v865_v19 = vpop.f32.mrb[19].mxu1  ;;  %v113_v17 = vld [vmem:[%s16326_s1 + $0x58] sm:$0xff]  ;;  %v128_v18 = vld [vmem:[%s16326_s1 + $0xd0] sm:$0xff] }
 0x106   :  { %1604 = vmatprep.mubr.f32.mxu1 %v16340_v3  ;;  %v112_v19 = vld [vmem:[%s16326_s1 + $0x50] sm:$0xff] }
 0x107   :  { %v471_v30 = vpop.f32.mrb[20].mxu0 }
 0x108   :  { %v3952_v31 = vadd.f32 %v10765_v56, %v471_v30  ;;  %v10882_v32 = vpop.f32.mrb[21].mxu0  ;;  %8480 = vmatmul.mubr.msk.f32.gmra.mrb[126].mxu0 %vm162_vm0, %v101_v5  ;;  %v10885_v34 = vpop.f32.mrb[20].mxu1  ;;  %v9409_v30 = vpack.c.bf16 %v128_v18, %v113_v17  ;;  %v156_v17 = vld [vmem:[%s16326_s1 + $0x1b0] sm:$0xff] }
 0x109   :  { %8610 = vmatmul.mubr.msk.f32.gmra.mrb[126].mxu1 %vm162_vm0, %v10291_v27  ;;  %v870_v57 = vpop.f32.mrb[21].mxu1  ;;  %804 = vmatprep.mubr.f32.mxu0 %v16340_v3  ;;  %v140_v18 = vld [vmem:[%s16326_s1 + $0x130] sm:$0xff] }
 0x10a   :  { %v10896_v59 = vadd.f32 %v3952_v31, %v870_v57  ;;  %1610 = vmatprep.mubr.f32.mxu1 %v16340_v3  ;;  %v127_v31 = vld [vmem:[%s16326_s1 + $0xc8] sm:$0xff]  ;;  %9410 = vmatprep.subr.bf16.mxu1 %v9409_v30 }
 0x10b   :  { %v477_v1 = vpop.f32.mrb[22].mxu0  ;;  %v9411_v57 = vpack.c.bf16 %v127_v31, %v112_v19  ;;  %v155_v19 = vld [vmem:[%s16326_s1 + $0x1a8] sm:$0xff] }
 0x10c   :  { %v478_v4 = vpop.f32.mrb[23].mxu0  ;;  %8481 = vmatmul.mubr.msk.f32.vlgmr.msra.gmra.mrb[128].mxu0 %vm162_vm0, %v10277_v25  ;;  %v874_v5 = vpop.f32.mrb[22].mxu1 }
 0x10d   :  { %8611 = vmatmul.mubr.msk.f32.gmra.mrb[128].mxu1 %vm162_vm0, %v10282_v26  ;;  %9388 = vmatpush1.bf16.msra.mxu0 %v9387_v58  ;;  %v875_v14 = vpop.f32.mrb[23].mxu1  ;;  %v9403_v4 = vpack.c.bf16 %v125_v23, %v110_v20  ;;  %v9407_v23 = vpack.c.bf16 %v155_v19, %v140_v18 }
 0x10e   :  { %810 = vmatprep.mubr.f32.mxu0 %v16340_v3  ;;  %1616 = vmatprep.mubr.f32.mxu1 %v16340_v3 }
 0x10f   :  { %v481_v35 = vpop.f32.mrb[24].mxu0  ;;  %9390 = vmatprep.subr.bf16.mxu0 %v9389_v2  ;;  %9412 = vmatpush1.bf16.msra.mxu1 %v9411_v57 }
 0x110   :  { %v4384_v58 = vadd.f32 %v10765_v56, %v481_v35  ;;  %v10936_v62 = vpop.f32.mrb[25].mxu0  ;;  %8482 = vmatmul.mubr.msk.f32.gmra.mrb[130].mxu0 %vm162_vm0, %v10291_v27  ;;  %v10940_v0 = vpop.f32.mrb[24].mxu1 }
 0x111   :  { %8612 = vmatmul.mubr.msk.f32.gmra.mrb[130].mxu1 %vm162_vm0, %v10298_v28  ;;  %9392 = vmatpush1.bf16.msra.mxu0 %v9391_v16  ;;  %v880_v1 = vpop.f32.mrb[25].mxu1  ;;  %v141_v16 = vld [vmem:[%s16326_s1 + $0x138] sm:$0xff] }
 0x112   :  { %v10944_v5 = vadd.f32 %v4384_v58, %v880_v1  ;;  %1197 = vmatprep.mubr.f32.mxu0 %v16340_v3  ;;  %1622 = vmatprep.mubr.f32.mxu1 %v16340_v3 }
 0x113   :  { %v487_v2 = vpop.f32.mrb[26].mxu0  ;;  %9402 = vmatprep.subr.bf16.mxu0 %v9401_v36 }
 0x114   :  { %v488_v6 = vpop.f32.mrb[27].mxu0  ;;  %8545 = vmatmul.mubr.msk.f32.vlgmr.msra.gmra.mrb[132].mxu0 %vm162_vm0, %v10277_v25  ;;  %v884_v7 = vpop.f32.mrb[26].mxu1  ;;  %v9405_v25 = vpack.c.bf16 %v156_v17, %v141_v16 }
 0x115   :  { %8613 = vmatmul.mubr.msk.f32.gmra.mrb[132].mxu1 %vm162_vm0, %v10309_v29  ;;  %9404 = vmatpush1.bf16.msra.mxu0 %v9403_v4  ;;  %v885_v14 = vpop.f32.mrb[27].mxu1 }
 0x116   :  { %1203 = vmatprep.mubr.f32.mxu0 %v16340_v3  ;;  %1628 = vmatprep.mubr.f32.mxu1 %v16340_v3 }
 0x117   :  { %v491_v20 = vpop.f32.mrb[28].mxu0  ;;  %9406 = vmatprep.subr.bf16.mxu0 %v9405_v25 }
 0x118   :  { %v4960_v30 = vadd.f32 %v10765_v56, %v491_v20  ;;  %v10967_v31 = vpop.f32.mrb[29].mxu0  ;;  %8546 = vmatmul.mubr.msk.f32.gmra.mrb[134].mxu0 %vm162_vm0, %v10291_v27  ;;  %v10971_v35 = vpop.f32.mrb[28].mxu1 }
 0x119   :  { %8614 = vmatmul.mubr.msk.f32.gmra.mrb[134].mxu1 %vm162_vm0, %v10329_v33  ;;  %1209 = vmatprep.mubr.f32.mxu0 %v16340_v3  ;;  %v890_v36 = vpop.f32.mrb[29].mxu1 }
 0x11a   :  { %v10977_v57 = vadd.f32 %v10863_v13, %v4960_v30  ;;  %1632 = vmatprep.mubr.f32.mxu1 %v16340_v3  ;;  %9408 = vmatpush1.bf16.msra.mxu0 %v9407_v23  ;;  %v5047_v27 = vrot.slane %v890_v36, 1 }
 0x11b   :  { %v497_v58 = vpop.f32.mrb[30].mxu0 }
 0x11c   :  { %v498_v1 = vpop.f32.mrb[31].mxu0  ;;  %8547 = vmatmul.mubr.msk.f32.gmra.mrb[136].mxu0 %vm162_vm0, %v10282_v26  ;;  %v894_v4 = vpop.f32.mrb[30].mxu1 }
 0x11d   :  { %8615 = vmatmul.mubr.msk.f32.gmra.mrb[136].mxu1 %vm162_vm0, %v10343_v37  ;;  %1215 = vmatprep.mubr.f32.mxu0 %v16340_v3  ;;  %v895_v2 = vpop.f32.mrb[31].mxu1 }
 0x11e   :  { %1638 = vmatprep.mubr.f32.mxu1 %v16340_v3  ;;  %v5048_v13 = vrot.slane %v895_v2, 1 }
 0x11f   :  { %v501_v6 = vpop.f32.mrb[32].mxu0 }
 0x120   :  { %v3666_v7 = vadd.f32 %v10765_v56, %v501_v6  ;;  %v10987_v14 = vpop.f32.mrb[33].mxu0  ;;  %8548 = vmatmul.mubr.msk.f32.gmra.mrb[138].mxu0 %vm162_vm0, %v10298_v28  ;;  %v10991_v26 = vpop.f32.mrb[32].mxu1  ;;  %v5049_v16 = vsel %vm3804_vm1, %v5047_v27, %v5048_v13 }
 0x121   :  { %8616 = vmatmul.mubr.msk.f32.gmra.mrb[138].mxu1 %vm162_vm0, %v10354_v38  ;;  %v901_v17 = vpop.f32.mrb[33].mxu1  ;;  %1219 = vmatprep.mubr.f32.mxu0 %v16340_v3 }
 0x122   :  { %v10997_v18 = vadd.f32 %v3666_v7, %v901_v17  ;;  %1642 = vmatprep.mubr.f32.mxu1 %v16340_v3 }
 0x123   :  { %v507_v25 = vpop.f32.mrb[34].mxu0 }
 0x124   :  { %v508_v19 = vpop.f32.mrb[35].mxu0  ;;  %8549 = vmatmul.mubr.msk.f32.gmra.mrb[140].mxu0 %vm162_vm0, %v10309_v29  ;;  %v905_v28 = vpop.f32.mrb[34].mxu1 }
 0x125   :  { %8617 = vmatmul.mubr.msk.f32.gmra.mrb[140].mxu1 %vm162_vm0, %v10365_v39  ;;  %1225 = vmatprep.mubr.f32.mxu0 %v16340_v3  ;;  %v906_v20 = vpop.f32.mrb[35].mxu1 }
 0x126   :  { %1648 = vmatprep.mubr.f32.mxu1 %v16340_v3 }
 0x127   :  { %v511_v23 = vpop.f32.mrb[36].mxu0 }
 0x128   :  { %v3955_v30 = vadd.f32 %v10765_v56, %v511_v23  ;;  %v11007_v36 = vpop.f32.mrb[37].mxu0  ;;  %8550 = vmatmul.mubr.msk.f32.gmra.mrb[142].mxu0 %vm162_vm0, %v10329_v33  ;;  %v11011_v58 = vpop.f32.mrb[36].mxu1 }
 0x129   :  { %8618 = vmatmul.mubr.msk.f32.gmra.mrb[142].mxu1 %vm162_vm0, %v10376_v40  ;;  %v911_v29 = vpop.f32.mrb[37].mxu1  ;;  %1229 = vmatprep.mubr.f32.mxu0 %v16340_v3 }
 0x12a   :  { %v11016_v1 = vadd.f32 %v3955_v30, %v911_v29  ;;  %1654 = vmatprep.mubr.f32.mxu1 %v16340_v3 }
 0x12b   :  { %v517_v27 = vpop.f32.mrb[38].mxu0 }
 0x12c   :  { %v518_v4 = vpop.f32.mrb[39].mxu0  ;;  %8551 = vmatmul.mubr.msk.f32.gmra.mrb[144].mxu0 %vm162_vm0, %v10343_v37  ;;  %v915_v2 = vpop.f32.mrb[38].mxu1 }
 0x12d   :  { %8619 = vmatmul.mubr.msk.f32.gmra.mrb[144].mxu1 %vm162_vm0, %v10387_v41  ;;  %1235 = vmatprep.mubr.f32.mxu0 %v16340_v3  ;;  %v916_v33 = vpop.f32.mrb[39].mxu1 }
 0x12e   :  { %1660 = vmatprep.mubr.f32.mxu1 %v16340_v3 }
 0x12f   :  { %v521_v13 = vpop.f32.mrb[40].mxu0 }
 0x130   :  { %v4387_v6 = vadd.f32 %v10765_v56, %v521_v13  ;;  %v11026_v7 = vpop.f32.mrb[41].mxu0  ;;  %8552 = vmatmul.mubr.msk.f32.gmra.mrb[146].mxu0 %vm162_vm0, %v10354_v38  ;;  %v11030_v17 = vpop.f32.mrb[40].mxu1 }
 0x131   :  { %8620 = vmatmul.mubr.msk.f32.gmra.mrb[146].mxu1 %vm162_vm0, %v10398_v42  ;;  %v921_v37 = vpop.f32.mrb[41].mxu1  ;;  %1239 = vmatprep.mubr.f32.mxu0 %v16340_v3 }
 0x132   :  { %v11035_v25 = vadd.f32 %v4387_v6, %v921_v37  ;;  %1666 = vmatprep.mubr.f32.mxu1 %v16340_v3 }
 0x133   :  { %v527_v19 = vpop.f32.mrb[42].mxu0 }
 0x134   :  { %v528_v28 = vpop.f32.mrb[43].mxu0  ;;  %8553 = vmatmul.mubr.msk.f32.gmra.mrb[148].mxu0 %vm162_vm0, %v10365_v39  ;;  %v925_v20 = vpop.f32.mrb[42].mxu1 }
 0x135   :  { %8621 = vmatmul.mubr.msk.f32.gmra.mrb[148].mxu1 %vm162_vm0, %v10409_v43  ;;  %1245 = vmatprep.mubr.f32.mxu0 %v16340_v3  ;;  %v926_v38 = vpop.f32.mrb[43].mxu1 }
 0x136   :  { %1672 = vmatprep.mubr.f32.mxu1 %v16340_v3 }
 0x137   :  { %v531_v23 = vpop.f32.mrb[44].mxu0 }
 0x138   :  { %v4963_v30 = vadd.f32 %v10765_v56, %v531_v23  ;;  %v11045_v29 = vpop.f32.mrb[45].mxu0  ;;  %8554 = vmatmul.mubr.msk.f32.gmra.mrb[150].mxu0 %vm162_vm0, %v10376_v40  ;;  %v11049_v27 = vpop.f32.mrb[44].mxu1 }
 0x139   :  { %16355 = vst [vmem:[#allocation4_spill] sm:$0xff] %v11049_v27  ;;  %8622 = vmatmul.mubr.msk.f32.gmra.mrb[150].mxu1 %vm162_vm0, %v10420_v44  ;;  %1251 = vmatprep.mubr.f32.mxu0 %v16340_v3  ;;  %v931_v39 = vpop.f32.mrb[45].mxu1 }
 0x13a   :  { %v11054_v43 = vadd.f32 %v5049_v16, %v4963_v30  ;;  %1676 = vmatprep.mubr.f32.mxu1 %v16340_v3  ;;  %v5056_v33 = vrot.slane %v931_v39, 1 }
 0x13b   :  { %v537_v4 = vpop.f32.mrb[46].mxu0 }
 0x13c   :  { %v538_v2 = vpop.f32.mrb[47].mxu0  ;;  %8555 = vmatmul.mubr.msk.f32.gmra.mrb[152].mxu0 %vm162_vm0, %v10387_v41  ;;  %v935_v13 = vpop.f32.mrb[46].mxu1 }
 0x13d   :  { %8623 = vmatmul.mubr.msk.f32.gmra.mrb[152].mxu1 %vm162_vm0, %v10431_v45  ;;  %1257 = vmatprep.mubr.f32.mxu0 %v16340_v3  ;;  %v936_v40 = vpop.f32.mrb[47].mxu1  ;;  %v9978_v2 = vld [vmem:[%s16327_s0 + $0x68] sm:$0xff] }
 0x13e   :  { %1682 = vmatprep.mubr.f32.mxu1 %v16340_v3  ;;  %v5057_v44 = vrot.slane %v936_v40, 1 }
 0x13f   :  { %v541_v16 = vpop.f32.mrb[48].mxu0 }
 0x140   :  { %v3669_v6 = vadd.f32 %v10765_v56, %v541_v16  ;;  %v11064_v37 = vpop.f32.mrb[49].mxu0  ;;  %8556 = vmatmul.mubr.msk.f32.gmra.mrb[154].mxu0 %vm162_vm0, %v10398_v42  ;;  %v11068_v41 = vpop.f32.mrb[48].mxu1  ;;  %v11071_v19 = vsel %vm3804_vm1, %v5056_v33, %v5057_v44  ;;  %v9977_v42 = vld [vmem:[%s16327_s0 + $0x60] sm:$0xff]  ;;  %v9979_v16 = vld [vmem:[%s16327_s0 + $0x70] sm:$0xff] }
 0x141   :  { %16356 = vst [vmem:[#allocation5_spill] sm:$0xff] %v11064_v37  ;;  %16357 = vst [vmem:[#allocation6_spill] sm:$0xff] %v11068_v41  ;;  %8624 = vmatmul.mubr.msk.f32.gmra.mrb[154].mxu1 %vm162_vm0, %v10442_v46  ;;  %v942_v45 = vpop.f32.mrb[49].mxu1  ;;  %1261 = vmatprep.mubr.f32.mxu0 %v16340_v3  ;;  %v16379_v41 = vmov 0.0  }
 0x142   :  { %v11076_v28 = vadd.f32 %v3669_v6, %v942_v45  ;;  %1686 = vmatprep.mubr.f32.mxu1 %v16340_v3 }
 0x143   :  { %v547_v20 = vpop.f32.mrb[50].mxu0 }
 0x144   :  { %v548_v38 = vpop.f32.mrb[51].mxu0  ;;  %8557 = vmatmul.mubr.msk.f32.gmra.mrb[156].mxu0 %vm162_vm0, %v9977_v42  ;;  %v946_v23 = vpop.f32.mrb[50].mxu1  ;;  %v9980_v42 = vld [vmem:[%s16327_s0 + $0x78] sm:$0xff] }
 0x145   :  { %8625 = vmatmul.mubr.msk.f32.gmra.mrb[156].mxu1 %vm162_vm0, %v10453_v47  ;;  %1267 = vmatprep.mubr.f32.mxu0 %v16340_v3  ;;  %v947_v46 = vpop.f32.mrb[51].mxu1 }
 0x146   :  { %1692 = vmatprep.mubr.f32.mxu1 %v16340_v3 }
 0x147   :  { %v551_v30 = vpop.f32.mrb[52].mxu0 }
 0x148   :  { %v3958_v39 = vadd.f32 %v10765_v56, %v551_v30  ;;  %v11088_v4 = vpop.f32.mrb[53].mxu0  ;;  %8558 = vmatmul.mubr.msk.f32.gmra.mrb[158].mxu0 %vm162_vm0, %v9978_v2  ;;  %v11094_v33 = vpop.f32.mrb[52].mxu1  ;;  %v9981_v2 = vld [vmem:[%s16327_s0 + $0x80] sm:$0xff] }
 0x149   :  { %16358 = vst [vmem:[#allocation7_spill] sm:$0xff] %v11088_v4  ;;  %16359 = vst [vmem:[#allocation8_spill] sm:$0xff] %v11094_v33  ;;  %8626 = vmatmul.mubr.msk.f32.gmra.mrb[158].mxu1 %vm162_vm0, %v10464_v48  ;;  %v952_v47 = vpop.f32.mrb[53].mxu1  ;;  %1271 = vmatprep.mubr.f32.mxu0 %v16340_v3 }
 0x14a   :  { %v11099_v13 = vadd.f32 %v3958_v39, %v952_v47  ;;  %1698 = vmatprep.mubr.f32.mxu1 %v16340_v3 }
 0x14b   :  { %v557_v40 = vpop.f32.mrb[54].mxu0 }
 0x14c   :  { %16360 = vst [vmem:[#allocation9_spill] sm:$0xff] %v11099_v13  ;;  %v558_v44 = vpop.f32.mrb[55].mxu0  ;;  %8559 = vmatmul.mubr.msk.f32.gmra.mrb[160].mxu0 %vm162_vm0, %v9979_v16  ;;  %v956_v6 = vpop.f32.mrb[54].mxu1  ;;  %v16342_v13 = vsub.s32 2, %v10742_v51 }
 0x14d   :  { %8627 = vmatmul.mubr.msk.f32.gmra.mrb[160].mxu1 %vm162_vm0, %v10475_v49  ;;  %1277 = vmatprep.mubr.f32.mxu0 %v16340_v3  ;;  %v957_v48 = vpop.f32.mrb[55].mxu1 }
 0x14e   :  { %1704 = vmatprep.mubr.f32.mxu1 %v16340_v3  ;;  %v9983_v48 = vld [vmem:[%s16327_s0 + $0x88] sm:$0xff] }
 0x14f   :  { %v561_v45 = vpop.f32.mrb[56].mxu0 }
 0x150   :  { %v4390_v20 = vadd.f32 %v10765_v56, %v561_v45  ;;  %v11111_v38 = vpop.f32.mrb[57].mxu0  ;;  %8560 = vmatmul.mubr.msk.f32.gmra.mrb[162].mxu0 %vm162_vm0, %v9980_v42  ;;  %v11117_v23 = vpop.f32.mrb[56].mxu1 }
 0x151   :  { %16361 = vst [vmem:[#allocation10_spill] sm:$0xff] %v11111_v38  ;;  %16362 = vst [vmem:[#allocation11_spill] sm:$0xff] %v11117_v23  ;;  %8628 = vmatmul.mubr.msk.f32.gmra.mrb[162].mxu1 %vm162_vm0, %v10486_v50  ;;  %v962_v49 = vpop.f32.mrb[57].mxu1  ;;  %1281 = vmatprep.mubr.f32.mxu0 %v16340_v3  ;;  %v9982_v50 = vld [vmem:[%s16327_s0 + $0xa0] sm:$0xff] }
 0x152   :  { %v11122_v46 = vadd.f32 %v4390_v20, %v962_v49  ;;  %1710 = vmatprep.mubr.f32.mxu1 %v16340_v3  ;;  %v9984_v20 = vld [vmem:[%s16327_s0 + $0xa8] sm:$0xff] }
 0x153   :  { %v567_v30 = vpop.f32.mrb[58].mxu0 }
 0x154   :  { %v568_v39 = vpop.f32.mrb[59].mxu0  ;;  %8561 = vmatmul.mubr.msk.f32.gmra.mrb[164].mxu0 %vm162_vm0, %v9981_v2  ;;  %v966_v47 = vpop.f32.mrb[58].mxu1  ;;  %v9985_v2 = vld [vmem:[%s16327_s0 + $0x90] sm:$0xff] }
 0x155   :  { %8629 = vmatmul.mubr.msk.f32.gmra.mrb[164].mxu1 %vm162_vm0, %v9982_v50  ;;  %1287 = vmatprep.mubr.f32.mxu0 %v16340_v3  ;;  %v967_v40 = vpop.f32.mrb[59].mxu1 }
 0x156   :  { %1716 = vmatprep.mubr.f32.mxu1 %v16340_v3 }
 0x157   :  { %v571_v44 = vpop.f32.mrb[60].mxu0 }
 0x158   :  { %v4966_v16 = vadd.f32 %v10765_v56, %v571_v44  ;;  %v11136_v6 = vpop.f32.mrb[61].mxu0  ;;  %8562 = vmatmul.mubr.msk.f32.gmra.mrb[166].mxu0 %vm162_vm0, %v9983_v48  ;;  %v11142_v45 = vpop.f32.mrb[60].mxu1  ;;  %v9986_v44 = vld [vmem:[%s16327_s0 + $0xb0] sm:$0xff] }
 0x159   :  { %16363 = vst [vmem:[#allocation12_spill] sm:$0xff] %v11136_v6  ;;  %16364 = vst [vmem:[#allocation13_spill] sm:$0xff] %v11142_v45  ;;  %8630 = vmatmul.mubr.msk.f32.gmra.mrb[166].mxu1 %vm162_vm0, %v9984_v20  ;;  %1293 = vmatprep.mubr.f32.mxu0 %v16340_v3  ;;  %v972_v42 = vpop.f32.mrb[61].mxu1 }
 0x15a   :  { %v11150_v49 = vadd.f32 %v11071_v19, %v4966_v16  ;;  %1720 = vmatprep.mubr.f32.mxu1 %v16340_v3  ;;  %v5065_v47 = vrot.slane %v972_v42, 1  ;;  %v9987_v42 = vld [vmem:[%s16327_s0 + $0x98] sm:$0xff] }
 0x15b   :  { %v577_v30 = vpop.f32.mrb[62].mxu0 }
 0x15c   :  { %v578_v39 = vpop.f32.mrb[63].mxu0  ;;  %8563 = vmatmul.mubr.msk.f32.gmra.mrb[168].mxu0 %vm162_vm0, %v9985_v2  ;;  %v976_v40 = vpop.f32.mrb[62].mxu1 }
 0x15d   :  { %8631 = vmatmul.mubr.msk.f32.gmra.mrb[168].mxu1 %vm162_vm0, %v9986_v44  ;;  %1299 = vmatprep.mubr.f32.mxu0 %v16340_v3  ;;  %v977_v19 = vpop.f32.mrb[63].mxu1 }
 0x15e   :  { %1726 = vmatprep.mubr.f32.mxu1 %v16340_v3  ;;  %v5066_v16 = vrot.slane %v977_v19, 1  ;;  %v9988_v19 = vld [vmem:[%s16327_s0 + $0xb8] sm:$0xff] }
 0x15f   :  { %v581_v48 = vpop.f32.mrb[64].mxu0 }
 0x160   :  { %v3672_v30 = vadd.f32 %v10765_v56, %v581_v48  ;;  %v11164_v39 = vpop.f32.mrb[65].mxu0  ;;  %8564 = vmatmul.mubr.msk.f32.gmra.mrb[170].mxu0 %vm162_vm0, %v9987_v42  ;;  %v11170_v2 = vpop.f32.mrb[64].mxu1  ;;  %v11173_v40 = vsel %vm3804_vm1, %v5065_v47, %v5066_v16  ;;  %v9989_v47 = vld [vmem:[%s16327_s0 + $0xc0] sm:$0xff] }
 0x161   :  { %16365 = vst [vmem:[#allocation14_spill] sm:$0xff] %v11164_v39  ;;  %16366 = vst [vmem:[#allocation15_spill] sm:$0xff] %v11170_v2  ;;  %8632 = vmatmul.mubr.msk.f32.gmra.mrb[170].mxu1 %vm162_vm0, %v9988_v19  ;;  %v983_v48 = vpop.f32.mrb[65].mxu1  ;;  %1303 = vmatprep.mubr.f32.mxu0 %v16340_v3 }
 0x162   :  { %v11180_v53 = vadd.f32 %v3672_v30, %v983_v48  ;;  %1730 = vmatprep.mubr.f32.mxu1 %v16340_v3 }
 0x163   :  { %v587_v45 = vpop.f32.mrb[66].mxu0 }
 0x164   :  { %16367 = vst [vmem:[#allocation16_spill] sm:$0xff] %v11180_v53  ;;  %v588_v42 = vpop.f32.mrb[67].mxu0  ;;  %8565 = vmatmul.mubr.msk.f32.gmra.mrb[172].mxu0 %vm162_vm0, %v9982_v50  ;;  %v987_v2 = vpop.f32.mrb[66].mxu1  ;;  %v9990_v45 = vld [vmem:[%s16327_s0 + $0xc8] sm:$0xff] }
 0x165   :  { %8633 = vmatmul.mubr.msk.f32.gmra.mrb[172].mxu1 %vm162_vm0, %v9989_v47  ;;  %1309 = vmatprep.mubr.f32.mxu0 %v16340_v3  ;;  %v988_v16 = vpop.f32.mrb[67].mxu1 }
 0x166   :  { %1736 = vmatprep.mubr.f32.mxu1 %v16340_v3 }
 0x167   :  { %v591_v30 = vpop.f32.mrb[68].mxu0 }
 0x168   :  { %v3961_v48 = vadd.f32 %v10765_v56, %v591_v30  ;;  %v11191_v39 = vpop.f32.mrb[69].mxu0  ;;  %8566 = vmatmul.mubr.msk.f32.gmra.mrb[174].mxu0 %vm162_vm0, %v9984_v20  ;;  %v11194_v50 = vpop.f32.mrb[68].mxu1 }
 0x169   :  { %16368 = vst [vmem:[#allocation17_spill] sm:$0xff] %v11191_v39  ;;  %16369 = vst [vmem:[#allocation18_spill] sm:$0xff] %v11194_v50  ;;  %8634 = vmatmul.mubr.msk.f32.gmra.mrb[174].mxu1 %vm162_vm0, %v9990_v45  ;;  %v993_v2 = vpop.f32.mrb[69].mxu1  ;;  %1313 = vmatprep.mubr.f32.mxu0 %v16340_v3  ;;  %v9991_v50 = vld [vmem:[%s16327_s0 + $0xd0] sm:$0xff] }
 0x16a   :  { %v11201_v42 = vadd.f32 %v3961_v48, %v993_v2  ;;  %1742 = vmatprep.mubr.f32.mxu1 %v16340_v3 }
 0x16b   :  { %v597_v16 = vpop.f32.mrb[70].mxu0 }
 0x16c   :  { %16370 = vst [vmem:[#allocation19_spill] sm:$0xff] %v11201_v42  ;;  %v598_v30 = vpop.f32.mrb[71].mxu0  ;;  %8567 = vmatmul.mubr.msk.f32.gmra.mrb[176].mxu0 %vm162_vm0, %v9986_v44  ;;  %v997_v20 = vpop.f32.mrb[70].mxu1  ;;  %v9992_v16 = vld [vmem:[%s16327_s0 + $0xd8] sm:$0xff] }
 0x16d   :  { %8635 = vmatmul.mubr.msk.f32.gmra.mrb[176].mxu1 %vm162_vm0, %v9991_v50  ;;  %1319 = vmatprep.mubr.f32.mxu0 %v16340_v3  ;;  %v998_v39 = vpop.f32.mrb[71].mxu1 }
 0x16e   :  { %1748 = vmatprep.mubr.f32.mxu1 %v16340_v3 }
 0x16f   :  { %v601_v48 = vpop.f32.mrb[72].mxu0 }
 0x170   :  { %v4393_v2 = vadd.f32 %v10765_v56, %v601_v48  ;;  %v11212_v42 = vpop.f32.mrb[73].mxu0  ;;  %8568 = vmatmul.mubr.msk.f32.gmra.mrb[178].mxu0 %vm162_vm0, %v9988_v19  ;;  %v11215_v44 = vpop.f32.mrb[72].mxu1 }
 0x171   :  { %16371 = vst [vmem:[#allocation20_spill] sm:$0xff] %v11212_v42  ;;  %16372 = vst [vmem:[#allocation21_spill] sm:$0xff] %v11215_v44  ;;  %8636 = vmatmul.mubr.msk.f32.gmra.mrb[178].mxu1 %vm162_vm0, %v9992_v16  ;;  %v1003_v30 = vpop.f32.mrb[73].mxu1  ;;  %1323 = vmatprep.mubr.f32.mxu0 %v16340_v3  ;;  %v9993_v42 = vld [vmem:[%s16327_s0 + $0xe0] sm:$0xff] }
 0x172   :  { %v11222_v39 = vadd.f32 %v4393_v2, %v1003_v30  ;;  %1754 = vmatprep.mubr.f32.mxu1 %v16340_v3 }
 0x173   :  { %v607_v20 = vpop.f32.mrb[74].mxu0 }
 0x174   :  { %16373 = vst [vmem:[#allocation22_spill] sm:$0xff] %v11222_v39  ;;  %v608_v48 = vpop.f32.mrb[75].mxu0  ;;  %8569 = vmatmul.mubr.msk.f32.gmra.mrb[180].mxu0 %vm162_vm0, %v9989_v47  ;;  %v1007_v19 = vpop.f32.mrb[74].mxu1  ;;  %v9994_v20 = vld [vmem:[%s16327_s0 + $0xe8] sm:$0xff] }
 0x175   :  { %8637 = vmatmul.mubr.msk.f32.gmra.mrb[180].mxu1 %vm162_vm0, %v9993_v42  ;;  %1329 = vmatprep.mubr.f32.mxu0 %v16340_v3  ;;  %v1008_v44 = vpop.f32.mrb[75].mxu1 }
 0x176   :  { %1760 = vmatprep.mubr.f32.mxu1 %v16340_v3 }
 0x177   :  { %v611_v2 = vpop.f32.mrb[76].mxu0 }
 0x178   :  { %v4969_v30 = vadd.f32 %v10765_v56, %v611_v2  ;;  %v11233_v53 = vpop.f32.mrb[77].mxu0  ;;  %8570 = vmatmul.mubr.msk.f32.gmra.mrb[182].mxu0 %vm162_vm0, %v9990_v45  ;;  %v11236_v47 = vpop.f32.mrb[76].mxu1 }
 0x179   :  { %16374 = vst [vmem:[#allocation23_spill] sm:$0xff] %v11233_v53  ;;  %16375 = vst [vmem:[#allocation24_spill] sm:$0xff] %v11236_v47  ;;  %8638 = vmatmul.mubr.msk.f32.gmra.mrb[182].mxu1 %vm162_vm0, %v9994_v20  ;;  %1335 = vmatprep.mubr.f32.mxu0 %v16340_v3  ;;  %v1013_v44 = vpop.f32.mrb[77].mxu1  ;;  %v9995_v53 = vld [vmem:[%s16327_s0 + $0xf0] sm:$0xff] }
 0x17a   :  { %v11244_v48 = vadd.f32 %v11173_v40, %v4969_v30  ;;  %1764 = vmatprep.mubr.f32.mxu1 %v16340_v3  ;;  %v5074_v45 = vrot.slane %v1013_v44, 1  ;;  %v143_v30 = vld [vmem:[%s16326_s1 + $0x148] sm:$0xff] }
 0x17b   :  { %v617_v19 = vpop.f32.mrb[78].mxu0 }
 0x17c   :  { %16376 = vst [vmem:[#allocation25_spill] sm:$0xff] %v11244_v48  ;;  %v618_v2 = vpop.f32.mrb[79].mxu0  ;;  %8571 = vmatmul.mubr.msk.f32.gmra.mrb[184].mxu0 %vm162_vm0, %v9991_v50  ;;  %v1017_v47 = vpop.f32.mrb[78].mxu1  ;;  %v158_v50 = vld [vmem:[%s16326_s1 + $0x1c0] sm:$0xff] }
 0x17d   :  { %8639 = vmatmul.mubr.msk.f32.gmra.mrb[184].mxu1 %vm162_vm0, %v9995_v53  ;;  %1341 = vmatprep.mubr.f32.mxu0 %v16340_v3  ;;  %v1018_v39 = vpop.f32.mrb[79].mxu1  ;;  %v9413_v44 = vpack.c.bf16 %v158_v50, %v143_v30  ;;  %v142_v19 = vld [vmem:[%s16326_s1 + $0x140] sm:$0xff]  ;;  %v157_v2 = vld [vmem:[%s16326_s1 + $0x1b8] sm:$0xff] }
 0x17e   :  { %1770 = vmatprep.mubr.f32.mxu1 %v16340_v3  ;;  %v5075_v40 = vrot.slane %v1018_v39, 1  ;;  %v9415_v30 = vpack.c.bf16 %v157_v2, %v142_v19  ;;  %v9996_v50 = vld [vmem:[%s16327_s0 + $0xf8] sm:$0xff] }
 0x17f   :  { %v621_v47 = vpop.f32.mrb[80].mxu0  ;;  %9414 = vmatprep.subr.bf16.mxu1 %v9413_v44 }
 0x180   :  { %v3675_v39 = vadd.f32 %v10765_v56, %v621_v47  ;;  %v11267_v3 = vpop.f32.mrb[81].mxu0  ;;  %8572 = vmatmul.mubr.msk.f32.gmra.mrb[186].mxu0 %vm162_vm0, %v9992_v16  ;;  %v11270_v48 = vpop.f32.mrb[80].mxu1  ;;  %v11273_v33 = vsel %vm3804_vm1, %v5074_v45, %v5075_v40  ;;  %9416 = vmatpush1.bf16.msra.mxu1 %v9415_v30  ;;  %v9997_v40 = vld [vmem:[%s16327_s0 + $0x100] sm:$0xff] }
 0x181   :  { %16377 = vst [vmem:[#allocation26_spill] sm:$0xff] %v11267_v3  ;;  %16378 = vst [vmem:[#allocation27_spill] sm:$0xff] %v11270_v48  ;;  %8640 = vmatmul.mubr.msk.f32.gmra.mrb[186].mxu1 %vm162_vm0, %v9996_v50  ;;  %v1024_v38 = vpop.f32.mrb[81].mxu1  ;;  %1345 = vmatprep.mubr.f32.mxu0 %v16379_v41 }
 0x182   :  { %v11280_v47 = vadd.f32 %v3675_v39, %v1024_v38  ;;  %1774 = vmatprep.mubr.f32.mxu1 %v16379_v41 }
 0x183   :  { %v627_v16 = vpop.f32.mrb[82].mxu0 }
 0x184   :  { %16380 = vst [vmem:[#allocation28_spill] sm:$0xff] %v11280_v47  ;;  %v628_v48 = vpop.f32.mrb[83].mxu0  ;;  %8573 = vmatmul.mubr.msk.f32.gmra.mrb[188].mxu0 %vm162_vm0, %v9993_v42  ;;  %v1028_v45 = vpop.f32.mrb[82].mxu1 }
 0x185   :  { %8641 = vmatmul.mubr.msk.f32.gmra.mrb[188].mxu1 %vm162_vm0, %v9997_v40  ;;  %1351 = vmatprep.mubr.f32.mxu0 %v16379_v41  ;;  %v1029_v19 = vpop.f32.mrb[83].mxu1  ;;  %v9998_v48 = vld [vmem:[%s16327_s0 + $0x108] sm:$0xff] }
 0x186   :  { %1780 = vmatprep.mubr.f32.mxu1 %v16379_v41  ;;  %v9999_v19 = vld [vmem:[%s16327_s0 + $0x110] sm:$0xff] }
 0x187   :  { %v631_v38 = vpop.f32.mrb[84].mxu0 }
 0x188   :  { %v3964_v44 = vadd.f32 %v10765_v56, %v631_v38  ;;  %v11291_v2 = vpop.f32.mrb[85].mxu0  ;;  %8574 = vmatmul.mubr.msk.f32.gmra.mrb[190].mxu0 %vm162_vm0, %v9994_v20  ;;  %v11294_v42 = vpop.f32.mrb[84].mxu1 }
 0x189   :  { %16381 = vst [vmem:[#allocation29_spill] sm:$0xff] %v11291_v2  ;;  %16382 = vst [vmem:[#allocation30_spill] sm:$0xff] %v11294_v42  ;;  %8642 = vmatmul.mubr.msk.f32.gmra.mrb[190].mxu1 %vm162_vm0, %v9998_v48  ;;  %v1034_v39 = vpop.f32.mrb[85].mxu1  ;;  %1355 = vmatprep.mubr.f32.mxu0 %v16379_v41 }
 0x18a   :  { %v11301_v30 = vadd.f32 %v3964_v44, %v1034_v39  ;;  %1786 = vmatprep.mubr.f32.mxu1 %v16379_v41 }
 0x18b   :  { %v637_v16 = vpop.f32.mrb[86].mxu0 }
 0x18c   :  { %16383 = vst [vmem:[#allocation31_spill] sm:$0xff] %v11301_v30  ;;  %v638_v45 = vpop.f32.mrb[87].mxu0  ;;  %8575 = vmatmul.mubr.msk.f32.gmra.mrb[192].mxu0 %vm162_vm0, %v9995_v53  ;;  %v1038_v20 = vpop.f32.mrb[86].mxu1  ;;  %v10000_v16 = vld [vmem:[%s16327_s0 + $0x118] sm:$0xff] }
 0x18d   :  { %8643 = vmatmul.mubr.msk.f32.gmra.mrb[192].mxu1 %vm162_vm0, %v9999_v19  ;;  %1361 = vmatprep.mubr.f32.mxu0 %v16379_v41  ;;  %v1039_v38 = vpop.f32.mrb[87].mxu1 }
 0x18e   :  { %1792 = vmatprep.mubr.f32.mxu1 %v16379_v41 }
 0x18f   :  { %v641_v44 = vpop.f32.mrb[88].mxu0 }
 0x190   :  { %v4396_v39 = vadd.f32 %v10765_v56, %v641_v44  ;;  %v11312_v42 = vpop.f32.mrb[89].mxu0  ;;  %8576 = vmatmul.mubr.msk.f32.gmra.mrb[194].mxu0 %vm162_vm0, %v9996_v50  ;;  %v11315_v53 = vpop.f32.mrb[88].mxu1 }
 0x191   :  { %16384 = vst [vmem:[#allocation32_spill] sm:$0xff] %v11312_v42  ;;  %16385 = vst [vmem:[#allocation33_spill] sm:$0xff] %v11315_v53  ;;  %8644 = vmatmul.mubr.msk.f32.gmra.mrb[194].mxu1 %vm162_vm0, %v10000_v16  ;;  %v1044_v45 = vpop.f32.mrb[89].mxu1  ;;  %1365 = vmatprep.mubr.f32.mxu0 %v16379_v41  ;;  %v10001_v42 = vld [vmem:[%s16327_s0 + $0x120] sm:$0xff] }
 0x192   :  { %v11322_v20 = vadd.f32 %v4396_v39, %v1044_v45  ;;  %1798 = vmatprep.mubr.f32.mxu1 %v16379_v41  ;;  %v115_v39 = vld [vmem:[%s16326_s1 + $0x68] sm:$0xff]  ;;  %v130_v45 = vld [vmem:[%s16326_s1 + $0xe0] sm:$0xff] }
 0x193   :  { %v647_v38 = vpop.f32.mrb[90].mxu0 }
 0x194   :  { %16386 = vst [vmem:[#allocation34_spill] sm:$0xff] %v11322_v20  ;;  %v648_v44 = vpop.f32.mrb[91].mxu0  ;;  %8577 = vmatmul.mubr.msk.f32.gmra.mrb[196].mxu0 %vm162_vm0, %v9997_v40  ;;  %v1048_v50 = vpop.f32.mrb[90].mxu1  ;;  %v9417_v40 = vpack.c.bf16 %v130_v45, %v115_v39 }
 0x195   :  { %8645 = vmatmul.mubr.msk.f32.gmra.mrb[196].mxu1 %vm162_vm0, %v10001_v42  ;;  %1371 = vmatprep.mubr.f32.mxu0 %v16379_v41  ;;  %v1049_v2 = vpop.f32.mrb[91].mxu1 }
 0x196   :  { %1804 = vmatprep.mubr.f32.mxu1 %v16379_v41  ;;  %9418 = vmatprep.subr.bf16.mxu0 %v9417_v40  ;;  %v10002_v2 = vld [vmem:[%s16327_s0 + $0x128] sm:$0xff] }
 0x197   :  { %v651_v38 = vpop.f32.mrb[92].mxu0 }
 0x198   :  { %v4972_v44 = vadd.f32 %v10765_v56, %v651_v38  ;;  %v11339_v50 = vpop.f32.mrb[93].mxu0  ;;  %8578 = vmatmul.mubr.msk.f32.gmra.mrb[198].mxu0 %vm162_vm0, %v9998_v48  ;;  %v11342_v30 = vpop.f32.mrb[92].mxu1 }
 0x199   :  { %16387 = vst [vmem:[#allocation35_spill] sm:$0xff] %v11339_v50  ;;  %16388 = vst [vmem:[#allocation36_spill] sm:$0xff] %v11342_v30  ;;  %8646 = vmatmul.mubr.msk.f32.gmra.mrb[198].mxu1 %vm162_vm0, %v10002_v2  ;;  %1377 = vmatprep.mubr.f32.mxu0 %v16379_v41  ;;  %v1054_v53 = vpop.f32.mrb[93].mxu1  ;;  %v10003_v30 = vld [vmem:[%s16327_s0 + $0x130] sm:$0xff] }
 0x19a   :  { %v11350_v39 = vadd.f32 %v11273_v33, %v4972_v44  ;;  %1808 = vmatprep.mubr.f32.mxu1 %v16379_v41  ;;  %v5083_v48 = vrot.slane %v1054_v53, 1 }
 0x19b   :  { %v657_v45 = vpop.f32.mrb[94].mxu0 }
 0x19c   :  { %16389 = vst [vmem:[#allocation37_spill] sm:$0xff] %v11350_v39  ;;  %v658_v38 = vpop.f32.mrb[95].mxu0  ;;  %8579 = vmatmul.mubr.msk.f32.gmra.mrb[200].mxu0 %vm162_vm0, %v9999_v19  ;;  %v1058_v40 = vpop.f32.mrb[94].mxu1  ;;  %v10019_v39 = vld [vmem:[%s16327_s0 + $0x1b0] sm:$0xff] }
 0x19d   :  { %8647 = vmatmul.mubr.msk.f32.gmra.mrb[200].mxu1 %vm162_vm0, %v10003_v30  ;;  %1383 = vmatprep.mubr.f32.mxu0 %v16379_v41  ;;  %v1059_v3 = vpop.f32.mrb[95].mxu1  ;;  %v10004_v40 = vld [vmem:[%s16327_s0 + $0x138] sm:$0xff] }
 0x19e   :  { %1814 = vmatprep.mubr.f32.mxu1 %v16379_v41  ;;  %v5084_v33 = vrot.slane %v1059_v3, 1 }
 0x19f   :  { %v661_v44 = vpop.f32.mrb[96].mxu0 }
 0x1a0   :  { %v3678_v45 = vadd.f32 %v10765_v56, %v661_v44  ;;  %v11361_v38 = vpop.f32.mrb[97].mxu0  ;;  %8580 = vmatmul.mubr.msk.f32.gmra.mrb[202].mxu0 %vm162_vm0, %v10000_v16  ;;  %v11364_v19 = vpop.f32.mrb[96].mxu1  ;;  %v11367_v53 = vsel %vm3804_vm1, %v5083_v48, %v5084_v33  ;;  %v10005_v48 = vld [vmem:[%s16327_s0 + $0x140] sm:$0xff] }
 0x1a1   :  { %16390 = vst [vmem:[#allocation38_spill] sm:$0xff] %v11361_v38  ;;  %16391 = vst [vmem:[#allocation39_spill] sm:$0xff] %v11364_v19  ;;  %8648 = vmatmul.mubr.msk.f32.gmra.mrb[202].mxu1 %vm162_vm0, %v10004_v40  ;;  %v1065_v50 = vpop.f32.mrb[97].mxu1  ;;  %1387 = vmatprep.mubr.f32.mxu0 %v16379_v41 }
 0x1a2   :  { %v11374_v3 = vadd.f32 %v3678_v45, %v1065_v50  ;;  %1818 = vmatprep.mubr.f32.mxu1 %v16379_v41 }
 0x1a3   :  { %v667_v44 = vpop.f32.mrb[98].mxu0 }
 0x1a4   :  { %16392 = vst [vmem:[#allocation40_spill] sm:$0xff] %v11374_v3  ;;  %v668_v16 = vpop.f32.mrb[99].mxu0  ;;  %8581 = vmatmul.mubr.msk.f32.gmra.mrb[204].mxu0 %vm162_vm0, %v10001_v42  ;;  %v1069_v19 = vpop.f32.mrb[98].mxu1 }
 0x1a5   :  { %8649 = vmatmul.mubr.msk.f32.gmra.mrb[204].mxu1 %vm162_vm0, %v10005_v48  ;;  %1393 = vmatprep.mubr.f32.mxu0 %v16379_v41  ;;  %v1070_v33 = vpop.f32.mrb[99].mxu1  ;;  %v10006_v19 = vld [vmem:[%s16327_s0 + $0x148] sm:$0xff] }
 0x1a6   :  { %1824 = vmatprep.mubr.f32.mxu1 %v16379_v41 }
 0x1a7   :  { %v671_v50 = vpop.f32.mrb[100].mxu0 }
 0x1a8   :  { %v3967_v45 = vadd.f32 %v10765_v56, %v671_v50  ;;  %v11385_v38 = vpop.f32.mrb[101].mxu0  ;;  %8582 = vmatmul.mubr.msk.f32.gmra.mrb[206].mxu0 %vm162_vm0, %v10002_v2  ;;  %v11388_v42 = vpop.f32.mrb[100].mxu1 }
 0x1a9   :  { %16393 = vst [vmem:[#allocation41_spill] sm:$0xff] %v11385_v38  ;;  %16394 = vst [vmem:[#allocation42_spill] sm:$0xff] %v11388_v42  ;;  %8650 = vmatmul.mubr.msk.f32.gmra.mrb[206].mxu1 %vm162_vm0, %v10006_v19  ;;  %v1075_v44 = vpop.f32.mrb[101].mxu1  ;;  %1397 = vmatprep.mubr.f32.mxu0 %v16379_v41  ;;  %v10007_v42 = vld [vmem:[%s16327_s0 + $0x150] sm:$0xff] }
 0x1aa   :  { %v11395_v16 = vadd.f32 %v3967_v45, %v1075_v44  ;;  %1830 = vmatprep.mubr.f32.mxu1 %v16379_v41 }
 0x1ab   :  { %v677_v33 = vpop.f32.mrb[102].mxu0 }
 0x1ac   :  { %16395 = vst [vmem:[#allocation43_spill] sm:$0xff] %v11395_v16  ;;  %v678_v50 = vpop.f32.mrb[103].mxu0  ;;  %8583 = vmatmul.mubr.msk.f32.gmra.mrb[208].mxu0 %vm162_vm0, %v10003_v30  ;;  %v1079_v2 = vpop.f32.mrb[102].mxu1  ;;  %v10008_v33 = vld [vmem:[%s16327_s0 + $0x158] sm:$0xff] }
 0x1ad   :  { %8651 = vmatmul.mubr.msk.f32.gmra.mrb[208].mxu1 %vm162_vm0, %v10007_v42  ;;  %1403 = vmatprep.mubr.f32.mxu0 %v16379_v41  ;;  %v1080_v38 = vpop.f32.mrb[103].mxu1 }
 0x1ae   :  { %1836 = vmatprep.mubr.f32.mxu1 %v16379_v41 }
 0x1af   :  { %v681_v45 = vpop.f32.mrb[104].mxu0 }
 0x1b0   :  { %v4399_v44 = vadd.f32 %v10765_v56, %v681_v45  ;;  %v11406_v16 = vpop.f32.mrb[105].mxu0  ;;  %8584 = vmatmul.mubr.msk.f32.gmra.mrb[210].mxu0 %vm162_vm0, %v10004_v40  ;;  %v11409_v30 = vpop.f32.mrb[104].mxu1 }
 0x1b1   :  { %16396 = vst [vmem:[#allocation44_spill] sm:$0xff] %v11406_v16  ;;  %16397 = vst [vmem:[#allocation45_spill] sm:$0xff] %v11409_v30  ;;  %8652 = vmatmul.mubr.msk.f32.gmra.mrb[210].mxu1 %vm162_vm0, %v10008_v33  ;;  %v1085_v50 = vpop.f32.mrb[105].mxu1  ;;  %1407 = vmatprep.mubr.f32.mxu0 %v16379_v41  ;;  %v10009_v16 = vld [vmem:[%s16327_s0 + $0x160] sm:$0xff] }
 0x1b2   :  { %v11416_v38 = vadd.f32 %v4399_v44, %v1085_v50  ;;  %1842 = vmatprep.mubr.f32.mxu1 %v16379_v41 }
 0x1b3   :  { %v687_v2 = vpop.f32.mrb[106].mxu0 }
 0x1b4   :  { %16398 = vst [vmem:[#allocation46_spill] sm:$0xff] %v11416_v38  ;;  %v688_v45 = vpop.f32.mrb[107].mxu0  ;;  %8585 = vmatmul.mubr.msk.f32.gmra.mrb[212].mxu0 %vm162_vm0, %v10005_v48  ;;  %v1089_v40 = vpop.f32.mrb[106].mxu1  ;;  %v10010_v2 = vld [vmem:[%s16327_s0 + $0x168] sm:$0xff] }
 0x1b5   :  { %8653 = vmatmul.mubr.msk.f32.gmra.mrb[212].mxu1 %vm162_vm0, %v10009_v16  ;;  %1413 = vmatprep.mubr.f32.mxu0 %v16379_v41  ;;  %v1090_v30 = vpop.f32.mrb[107].mxu1 }
 0x1b6   :  { %1848 = vmatprep.mubr.f32.mxu1 %v16379_v41 }
 0x1b7   :  { %v691_v44 = vpop.f32.mrb[108].mxu0 }
 0x1b8   :  { %v4975_v50 = vadd.f32 %v10765_v56, %v691_v44  ;;  %v11427_v3 = vpop.f32.mrb[109].mxu0  ;;  %8586 = vmatmul.mubr.msk.f32.gmra.mrb[214].mxu0 %vm162_vm0, %v10006_v19  ;;  %v11430_v48 = vpop.f32.mrb[108].mxu1 }
 0x1b9   :  { %16399 = vst [vmem:[#allocation47_spill] sm:$0xff] %v11427_v3  ;;  %16400 = vst [vmem:[#allocation48_spill] sm:$0xff] %v11430_v48  ;;  %8654 = vmatmul.mubr.msk.f32.gmra.mrb[214].mxu1 %vm162_vm0, %v10010_v2  ;;  %1419 = vmatprep.mubr.f32.mxu0 %v16379_v41  ;;  %v1095_v30 = vpop.f32.mrb[109].mxu1  ;;  %v10011_v3 = vld [vmem:[%s16327_s0 + $0x170] sm:$0xff] }
 0x1ba   :  { %v11438_v45 = vadd.f32 %v11367_v53, %v4975_v50  ;;  %1852 = vmatprep.mubr.f32.mxu1 %v16379_v41  ;;  %v5092_v19 = vrot.slane %v1095_v30, 1  ;;  %v10012_v30 = vld [vmem:[%s16327_s0 + $0x178] sm:$0xff] }
 0x1bb   :  { %v697_v40 = vpop.f32.mrb[110].mxu0 }
 0x1bc   :  { %16401 = vst [vmem:[#allocation49_spill] sm:$0xff] %v11438_v45  ;;  %v698_v44 = vpop.f32.mrb[111].mxu0  ;;  %8587 = vmatmul.mubr.msk.f32.gmra.mrb[216].mxu0 %vm162_vm0, %v10007_v42  ;;  %v1099_v48 = vpop.f32.mrb[110].mxu1 }
 0x1bd   :  { %8655 = vmatmul.mubr.msk.f32.gmra.mrb[216].mxu1 %vm162_vm0, %v10011_v3  ;;  %1425 = vmatprep.mubr.f32.mxu0 %v16379_v41  ;;  %v1100_v38 = vpop.f32.mrb[111].mxu1 }
 0x1be   :  { %1858 = vmatprep.mubr.f32.mxu1 %v16379_v41  ;;  %v5093_v53 = vrot.slane %v1100_v38, 1 }
 0x1bf   :  { %v701_v50 = vpop.f32.mrb[112].mxu0 }
 0x1c0   :  { %v3681_v40 = vadd.f32 %v10765_v56, %v701_v50  ;;  %v11449_v44 = vpop.f32.mrb[113].mxu0  ;;  %8588 = vmatmul.mubr.msk.f32.gmra.mrb[218].mxu0 %vm162_vm0, %v10008_v33  ;;  %v11452_v42 = vpop.f32.mrb[112].mxu1  ;;  %v11455_v48 = vsel %vm3804_vm1, %v5092_v19, %v5093_v53  ;;  %v10013_v19 = vld [vmem:[%s16327_s0 + $0x180] sm:$0xff] }
 0x1c1   :  { %16402 = vst [vmem:[#allocation50_spill] sm:$0xff] %v11449_v44  ;;  %16403 = vst [vmem:[#allocation51_spill] sm:$0xff] %v11452_v42  ;;  %8656 = vmatmul.mubr.msk.f32.gmra.mrb[218].mxu1 %vm162_vm0, %v10012_v30  ;;  %v1106_v45 = vpop.f32.mrb[113].mxu1  ;;  %1429 = vmatprep.mubr.f32.mxu0 %v16379_v41 }
 0x1c2   :  { %v11462_v38 = vadd.f32 %v3681_v40, %v1106_v45  ;;  %1862 = vmatprep.mubr.f32.mxu1 %v16379_v41 }
 0x1c3   :  { %v707_v50 = vpop.f32.mrb[114].mxu0 }
 0x1c4   :  { %16404 = vst [vmem:[#allocation52_spill] sm:$0xff] %v11462_v38  ;;  %v708_v33 = vpop.f32.mrb[115].mxu0  ;;  %8589 = vmatmul.mubr.msk.f32.gmra.mrb[220].mxu0 %vm162_vm0, %v10009_v16  ;;  %v1110_v42 = vpop.f32.mrb[114].mxu1 }
 0x1c5   :  { %8657 = vmatmul.mubr.msk.f32.gmra.mrb[220].mxu1 %vm162_vm0, %v10013_v19  ;;  %1435 = vmatprep.mubr.f32.mxu0 %v16379_v41  ;;  %v1111_v53 = vpop.f32.mrb[115].mxu1  ;;  %v10014_v42 = vld [vmem:[%s16327_s0 + $0x188] sm:$0xff] }
 0x1c6   :  { %1868 = vmatprep.mubr.f32.mxu1 %v16379_v41 }
 0x1c7   :  { %v711_v45 = vpop.f32.mrb[116].mxu0 }
 0x1c8   :  { %v3970_v40 = vadd.f32 %v10765_v56, %v711_v45  ;;  %v11473_v44 = vpop.f32.mrb[117].mxu0  ;;  %8590 = vmatmul.mubr.msk.f32.gmra.mrb[222].mxu0 %vm162_vm0, %v10010_v2  ;;  %v11476_v16 = vpop.f32.mrb[116].mxu1 }
 0x1c9   :  { %16405 = vst [vmem:[#allocation53_spill] sm:$0xff] %v11473_v44  ;;  %16406 = vst [vmem:[#allocation54_spill] sm:$0xff] %v11476_v16  ;;  %8658 = vmatmul.mubr.msk.f32.gmra.mrb[222].mxu1 %vm162_vm0, %v10014_v42  ;;  %v1116_v50 = vpop.f32.mrb[117].mxu1  ;;  %1439 = vmatprep.mubr.f32.mxu0 %v16379_v41  ;;  %v10015_v16 = vld [vmem:[%s16327_s0 + $0x190] sm:$0xff] }
 0x1ca   :  { %v11483_v33 = vadd.f32 %v3970_v40, %v1116_v50  ;;  %1874 = vmatprep.mubr.f32.mxu1 %v16379_v41 }
 0x1cb   :  { %v717_v53 = vpop.f32.mrb[118].mxu0 }
 0x1cc   :  { %16407 = vst [vmem:[#allocation55_spill] sm:$0xff] %v11483_v33  ;;  %v718_v45 = vpop.f32.mrb[119].mxu0  ;;  %8591 = vmatmul.mubr.msk.f32.gmra.mrb[224].mxu0 %vm162_vm0, %v10011_v3  ;;  %v1120_v2 = vpop.f32.mrb[118].mxu1  ;;  %v10016_v53 = vld [vmem:[%s16327_s0 + $0x198] sm:$0xff] }
 0x1cd   :  { %8659 = vmatmul.mubr.msk.f32.gmra.mrb[224].mxu1 %vm162_vm0, %v10015_v16  ;;  %1445 = vmatprep.mubr.f32.mxu0 %v16379_v41  ;;  %v1121_v44 = vpop.f32.mrb[119].mxu1 }
 0x1ce   :  { %1880 = vmatprep.mubr.f32.mxu1 %v16379_v41 }
 0x1cf   :  { %v721_v40 = vpop.f32.mrb[120].mxu0 }
 0x1d0   :  { %v4402_v50 = vadd.f32 %v10765_v56, %v721_v40  ;;  %v11494_v33 = vpop.f32.mrb[121].mxu0  ;;  %8592 = vmatmul.mubr.msk.f32.gmra.mrb[226].mxu0 %vm162_vm0, %v10012_v30  ;;  %v11497_v3 = vpop.f32.mrb[120].mxu1 }
 0x1d1   :  { %16408 = vst [vmem:[#allocation56_spill] sm:$0xff] %v11494_v33  ;;  %16409 = vst [vmem:[#allocation57_spill] sm:$0xff] %v11497_v3  ;;  %8660 = vmatmul.mubr.msk.f32.gmra.mrb[226].mxu1 %vm162_vm0, %v10016_v53  ;;  %v1126_v45 = vpop.f32.mrb[121].mxu1  ;;  %1449 = vmatprep.mubr.f32.mxu0 %v16379_v41  ;;  %v10017_v33 = vld [vmem:[%s16327_s0 + $0x1a0] sm:$0xff] }
 0x1d2   :  { %v11504_v44 = vadd.f32 %v4402_v50, %v1126_v45  ;;  %1886 = vmatprep.mubr.f32.mxu1 %v16379_v41 }
 0x1d3   :  { %v727_v2 = vpop.f32.mrb[122].mxu0 }
 0x1d4   :  { %16410 = vst [vmem:[#allocation58_spill] sm:$0xff] %v11504_v44  ;;  %v728_v40 = vpop.f32.mrb[123].mxu0  ;;  %8593 = vmatmul.mubr.msk.f32.gmra.mrb[228].mxu0 %vm162_vm0, %v10013_v19  ;;  %v1130_v30 = vpop.f32.mrb[122].mxu1  ;;  %v10018_v2 = vld [vmem:[%s16327_s0 + $0x1a8] sm:$0xff] }
 0x1d5   :  { %8661 = vmatmul.mubr.msk.f32.gmra.mrb[228].mxu1 %vm162_vm0, %v10017_v33  ;;  %1455 = vmatprep.mubr.f32.mxu0 %v16379_v41  ;;  %v1131_v3 = vpop.f32.mrb[123].mxu1 }
 0x1d6   :  { %1892 = vmatprep.mubr.f32.mxu1 %v16379_v41 }
 0x1d7   :  { %v731_v50 = vpop.f32.mrb[124].mxu0 }
 0x1d8   :  { %v4978_v45 = vadd.f32 %v10765_v56, %v731_v50  ;;  %v11515_v38 = vpop.f32.mrb[125].mxu0  ;;  %8594 = vmatmul.mubr.msk.f32.gmra.mrb[230].mxu0 %vm162_vm0, %v10014_v42  ;;  %v1600_v19 = vpop.f32.mrb[124].mxu1 }
 0x1d9   :  { %16411 = vst [vmem:[#allocation59_spill] sm:$0xff] %v11515_v38  ;;  %8662 = vmatmul.mubr.msk.f32.gmra.mrb[230].mxu1 %vm162_vm0, %v10018_v2  ;;  %v1602_v40 = vpop.f32.mrb[125].mxu1  ;;  %1461 = vmatprep.mubr.f32.mxu0 %v16379_v41  ;;  %v4477_v30 = vrot.slane %v1600_v19, 1 }
 0x1da   :  { %v11524_v3 = vadd.f32 %v11455_v48, %v4978_v45  ;;  %1896 = vmatprep.mubr.f32.mxu1 %v16379_v41  ;;  %v4480_v38 = vrot.slane %v1602_v40, 1 }
 0x1db   :  { %v737_v50 = vpop.f32.mrb[126].mxu0 }
 0x1dc   :  { %16412 = vst [vmem:[#allocation60_spill] sm:$0xff] %v11524_v3  ;;  %v1606_v44 = vpop.f32.mrb[126].mxu1  ;;  %v738_v42 = vpop.f32.mrb[127].mxu0  ;;  %8595 = vmatmul.mubr.msk.f32.gmra.mrb[232].mxu0 %vm162_vm0, %v10015_v16  ;;  %v11547_v3 = vld [vmem:[%s16327_s0 + $0x1b8] sm:$0xff] }
 0x1dd   :  { %v4478_v47 = vrot.slane %v1606_v44, 1  ;;  %8663 = vmatmul.mubr.msk.f32.gmra.mrb[232].mxu1 %vm162_vm0, %v10019_v39  ;;  %1467 = vmatprep.mubr.f32.mxu0 %v16379_v41  ;;  %v1608_v48 = vpop.f32.mrb[127].mxu1 }
 0x1de   :  { %1902 = vmatprep.mubr.f32.mxu1 %v16379_v41  ;;  %v4481_v45 = vrot.slane %v1608_v48, 1 }
 0x1df   :  { %v4479_v19 = vsel %vm3804_vm1, %v4477_v30, %v4478_v47  ;;  %v11535_v40 = vpop.f32.mrb[128].mxu0 }
 0x1e0   :  { %v11538_v50 = vadd.f32 %v4479_v19, %v10823_v24  ;;  %v808_v16 = vpop.f32.mrb[129].mxu0  ;;  %8596 = vmatmul.mubr.msk.f32.gmra.mrb[234].mxu0 %vm162_vm0, %v10016_v53  ;;  %v1612_v44 = vpop.f32.mrb[128].mxu1  ;;  %v11542_v42 = vsel %vm3804_vm1, %v4480_v38, %v4481_v45 }
 0x1e1   :  { %8664 = vmatmul.mubr.msk.f32.gmra.mrb[234].mxu1 %vm162_vm0, %v11547_v3  ;;  %1471 = vmatprep.mubr.f32.mxu0 %v16379_v41  ;;  %v1614_v47 = vpop.f32.mrb[129].mxu1  ;;  %v5197_v30 = vrot.slane %v1612_v44, 1  ;;  %v5029_v45 = vrot.slane %v808_v16, 1  ;;  %v11563_v44 = vsub.s32 1, %v10742_v51 }
 0x1e2   :  { %16413 = vst [vmem:[#allocation61_spill] sm:$0xff] %v11538_v50  ;;  %1906 = vmatprep.mubr.f32.mxu1 %v16379_v41  ;;  %v5200_v38 = vrot.slane %v1614_v47, 1  ;;  %v11557_v50 = vld [vmem:[%s16327_s0 + $0x1c0] sm:$0xff] }
 0x1e3   :  { %v812_v24 = vpop.f32.mrb[130].mxu0  ;;  %16414 = vst [vmem:[#allocation62_spill] sm:$0xff] %v11563_v44 }
 0x1e4   :  { %v813_v53 = vpop.f32.mrb[131].mxu0  ;;  %8597 = vmatmul.mubr.msk.f32.gmra.mrb[236].mxu0 %vm162_vm0, %v10017_v33  ;;  %v1618_v48 = vpop.f32.mrb[130].mxu1  ;;  %v4957_v33 = vadd.f32 %v10765_v56, %v10836_v52  ;;  %v10022_v56 = vld [vmem:[%s16327_s0 + $0x1c8] sm:$0xff] }
 0x1e5   :  { %v5030_v19 = vrot.slane %v813_v53, 1  ;;  %8665 = vmatmul.mubr.msk.f32.gmra.mrb[236].mxu1 %vm162_vm0, %v11557_v50  ;;  %v5198_v20 = vrot.slane %v1618_v48, 1  ;;  %v1620_v4 = vpop.f32.mrb[131].mxu1  ;;  %1477 = vmatprep.mubr.f32.mxu0 %v16379_v41 }
 0x1e6   :  { %v5201_v16 = vrot.slane %v1620_v4, 1  ;;  %1912 = vmatprep.mubr.f32.mxu1 %v16379_v41  ;;  %v10023_v4 = vld [vmem:[%s16328_s2] sm:$0x7] }
 0x1e7   :  { %v5031_v47 = vsel %vm3804_vm1, %v5029_v45, %v5030_v19  ;;  %v5199_v24 = vsel %vm3804_vm1, %v5197_v30, %v5198_v20  ;;  %v1199_v53 = vpop.f32.mrb[132].mxu0  ;;  %v11585_v20 = vrot.slane %v10023_v4, %v11563_v44 }
 0x1e8   :  { %v5125_v48 = vadd.f32 %v5031_v47, %v4957_v33  ;;  %v5202_v27 = vsel %vm3804_vm1, %v5200_v38, %v5201_v16  ;;  %v1624_v23 = vpop.f32.mrb[132].mxu1  ;;  %v1201_v37 = vpop.f32.mrb[133].mxu0  ;;  %8598 = vmatmul.mubr.msk.f32.gmra.mrb[238].mxu0 %vm162_vm0, %v10018_v2  ;;  %v5032_v30 = vrot.slane %v1199_v53, 1 }
 0x1e9   :  { %v11574_v6 = vadd.f32 %v10781_v63, %v1624_v23  ;;  %8666 = vmatmul.mubr.msk.f32.gmra.mrb[238].mxu1 %vm162_vm0, %v10022_v56  ;;  %1481 = vmatprep.mubr.f32.mxu0 %v16379_v41  ;;  %v1626_v52 = vpop.f32.mrb[133].mxu1  ;;  %v11592_v23 = vrot.slane %v10023_v4, %v16342_v13  ;;  %v4958_v33 = vadd.f32 %v11585_v20, %v10838_v54  ;;  %v5035_v16 = vrot.slane %v1201_v37, 1 }
 0x1ea   :  { %v11587_v2 = vadd.f32 %v5199_v24, %v5125_v48  ;;  %1918 = vmatprep.mubr.f32.mxu1 %v16379_v41  ;;  %v10024_v24 = vld [vmem:[%s16327_s0 + $0x1d0] sm:$0xff]  ;;  %v3661_v53 = vadd.f32 %v11585_v20, %v10774_v60 }
 0x1eb   :  { %v1205_v63 = vpop.f32.mrb[134].mxu0  ;;  %v3662_v54 = vadd.f32 %v11592_v23, %v11535_v40  ;;  %v10025_v40 = vld [vmem:[%s16327_s0 + $0x1d8] sm:$0xff] }
 0x1ec   :  { %v5033_v38 = vrot.slane %v1205_v63, 1  ;;  %v1207_v45 = vpop.f32.mrb[135].mxu0  ;;  %8599 = vmatmul.mubr.msk.f32.gmra.mrb[240].mxu0 %vm162_vm0, %v10019_v39  ;;  %v1630_v19 = vpop.f32.mrb[134].mxu1  ;;  %v4959_v39 = vadd.f32 %v11592_v23, %v10819_v22 }
 0x1ed   :  { %v5036_v47 = vrot.slane %v1207_v45, 1  ;;  %8667 = vmatmul.mubr.msk.f32.gmra.mrb[240].mxu1 %vm162_vm0, %v10024_v24  ;;  %v1631_v48 = vpop.f32.mrb[135].mxu1  ;;  %1487 = vmatprep.mubr.f32.mxu0 %v16379_v41 }
 0x1ee   :  { %v5034_v4 = vsel %vm3804_vm1, %v5032_v30, %v5033_v38  ;;  %1924 = vmatprep.mubr.f32.mxu1 %v16379_v41 }
 0x1ef   :  { %v5126_v37 = vadd.f32 %v5034_v4, %v4958_v33  ;;  %v5037_v63 = vsel %vm3804_vm1, %v5035_v16, %v5036_v47  ;;  %v1211_v45 = vpop.f32.mrb[136].mxu0  ;;  %v3950_v16 = vadd.f32 %v11585_v20, %v10795_v9 }
 0x1f0   :  { %v11611_v19 = vadd.f32 %v5037_v63, %v4959_v39  ;;  %v3685_v48 = vadd.f32 %v3661_v53, %v1211_v45  ;;  %v1634_v13 = vpop.f32.mrb[136].mxu1  ;;  %v1213_v51 = vpop.f32.mrb[137].mxu0  ;;  %8600 = vmatmul.mubr.msk.f32.gmra.mrb[242].mxu0 %vm162_vm0, %v11547_v3 }
 0x1f1   :  { %v11616_v60 = vadd.f32 %v10802_v12, %v1634_v13  ;;  %v11618_v22 = vadd.f32 %v3662_v54, %v1213_v51  ;;  %8668 = vmatmul.mubr.msk.f32.gmra.mrb[242].mxu1 %vm162_vm0, %v10025_v40  ;;  %1491 = vmatprep.mubr.f32.mxu0 %v16379_v41  ;;  %v1636_v30 = vpop.f32.mrb[137].mxu1  ;;  %v11625_v38 = vadd.f32 %v5202_v27, %v5126_v37  ;;  %v10026_v13 = vld [vmem:[%s16327_s0 + $0x1e0] sm:$0xff]  ;;  %v10027_v54 = vld [vmem:[%s16327_s0 + $0x1e8] sm:$0xff] }
 0x1f2   :  { %1930 = vmatprep.mubr.f32.mxu1 %v16379_v41  ;;  %v11628_v33 = vadd.f32 %v3685_v48, %v1626_v52  ;;  %v3951_v52 = vadd.f32 %v11592_v23, %v10777_v61 }
 0x1f3   :  { %v1217_v3 = vpop.f32.mrb[138].mxu0 }
 0x1f4   :  { %v1218_v12 = vpop.f32.mrb[139].mxu0  ;;  %8601 = vmatmul.mubr.msk.f32.gmra.mrb[244].mxu0 %vm162_vm0, %v11557_v50  ;;  %v1640_v51 = vpop.f32.mrb[138].mxu1 }
 0x1f5   :  { %8669 = vmatmul.mubr.msk.f32.gmra.mrb[244].mxu1 %vm162_vm0, %v10026_v13  ;;  %1497 = vmatprep.mubr.f32.mxu0 %v16379_v41  ;;  %v1641_v27 = vpop.f32.mrb[139].mxu1  ;;  %v10028_v12 = vld [vmem:[%s16327_s0 + $0x1f0] sm:$0xff]  ;;  %v4382_v51 = vadd.f32 %v11585_v20, %v10816_v21 }
 0x1f6   :  { %1936 = vmatprep.mubr.f32.mxu1 %v16379_v41 }
 0x1f7   :  { %v1221_v47 = vpop.f32.mrb[140].mxu0 }
 0x1f8   :  { %v3974_v50 = vadd.f32 %v3950_v16, %v1221_v47  ;;  %v1223_v53 = vpop.f32.mrb[141].mxu0  ;;  %8602 = vmatmul.mubr.msk.f32.gmra.mrb[246].mxu0 %vm162_vm0, %v10022_v56  ;;  %v1644_v39 = vpop.f32.mrb[140].mxu1  ;;  %v4383_v16 = vadd.f32 %v11592_v23, %v10798_v10  ;;  %v10029_v10 = vld [vmem:[%s16327_s0 + $0x1f8] sm:$0xff] }
 0x1f9   :  { %v11643_v4 = vadd.f32 %v3951_v52, %v1223_v53  ;;  %8670 = vmatmul.mubr.msk.f32.gmra.mrb[246].mxu1 %vm162_vm0, %v10027_v54  ;;  %v1646_v9 = vpop.f32.mrb[141].mxu1  ;;  %1503 = vmatprep.mubr.f32.mxu0 %v16379_v41  ;;  %v4486_v61 = vrot.slane %v1644_v39, 1 }
 0x1fa   :  { %v11650_v37 = vadd.f32 %v3974_v50, %v1636_v30  ;;  %1940 = vmatprep.mubr.f32.mxu1 %v16379_v41  ;;  %v4489_v45 = vrot.slane %v1646_v9, 1 }
 0x1fb   :  { %v1227_v63 = vpop.f32.mrb[142].mxu0 }
 0x1fc   :  { %v1650_v56 = vpop.f32.mrb[142].mxu1  ;;  %v1228_v48 = vpop.f32.mrb[143].mxu0  ;;  %8603 = vmatmul.mubr.msk.f32.gmra.mrb[248].mxu0 %vm162_vm0, %v10024_v24 }
 0x1fd   :  { %v4487_v3 = vrot.slane %v1650_v56, 1  ;;  %8671 = vmatmul.mubr.msk.f32.gmra.mrb[248].mxu1 %vm162_vm0, %v10028_v12  ;;  %1509 = vmatprep.mubr.f32.mxu0 %v16379_v41  ;;  %v1652_v30 = vpop.f32.mrb[143].mxu1 }
 0x1fe   :  { %1946 = vmatprep.mubr.f32.mxu1 %v16379_v41  ;;  %v4490_v27 = vrot.slane %v1652_v30, 1  ;;  %v11687_v30 = vld [vmem:[%s16327_s0] sm:$0xff] }
 0x1ff   :  { %v4488_v24 = vsel %vm3804_vm1, %v4486_v61, %v4487_v3  ;;  %v1231_v52 = vpop.f32.mrb[144].mxu0 }
 0x200   :  { %v11666_v47 = vadd.f32 %v4488_v24, %v10944_v5  ;;  %v4406_v50 = vadd.f32 %v4382_v51, %v1231_v52  ;;  %v1233_v53 = vpop.f32.mrb[145].mxu0  ;;  %8604 = vmatmul.mubr.msk.f32.gmra.mrb[250].mxu0 %vm162_vm0, %v10025_v40  ;;  %v1656_v39 = vpop.f32.mrb[144].mxu1  ;;  %v11670_v9 = vsel %vm3804_vm1, %v4489_v45, %v4490_v27 }
 0x201   :  { %v11672_v21 = vadd.f32 %v4383_v16, %v1233_v53  ;;  %8672 = vmatmul.mubr.msk.f32.gmra.mrb[250].mxu1 %vm162_vm0, %v10029_v10  ;;  %v1658_v61 = vpop.f32.mrb[145].mxu1  ;;  %1513 = vmatprep.mubr.f32.mxu0 %v16379_v41  ;;  %v5206_v40 = vrot.slane %v1656_v39, 1  ;;  %v11705_v39 = vld [vmem:[%s16327_s0 + $0x8] sm:$0xff] }
 0x202   :  { %v11680_v5 = vadd.f32 %v11542_v42, %v4406_v50  ;;  %2440 = vmatprep.mubr.f32.mxu1 %v16379_v41  ;;  %v5209_v45 = vrot.slane %v1658_v61, 1 }
 0x203   :  { %v1237_v63 = vpop.f32.mrb[146].mxu0 }
 0x204   :  { %v1662_v56 = vpop.f32.mrb[146].mxu1  ;;  %v1238_v48 = vpop.f32.mrb[147].mxu0  ;;  %8605 = vmatmul.mubr.msk.f32.gmra.mrb[252].mxu0 %vm162_vm0, %v10026_v13 }
 0x205   :  { %v5207_v3 = vrot.slane %v1662_v56, 1  ;;  %8737 = vmatmul.mubr.msk.f32.vlgmr.msra.gmra.mrb[252].mxu1 %vm162_vm0, %v11687_v30  ;;  %v1664_v42 = vpop.f32.mrb[147].mxu1  ;;  %1519 = vmatprep.mubr.f32.mxu0 %v16379_v41 }
 0x206   :  { %v5210_v51 = vrot.slane %v1664_v42, 1  ;;  %2446 = vmatprep.mubr.f32.mxu1 %v16379_v41 }
 0x207   :  { %v5208_v27 = vsel %vm3804_vm1, %v5206_v40, %v5207_v3  ;;  %v1241_v16 = vpop.f32.mrb[148].mxu0  ;;  %v11717_v3 = vld [vmem:[%s16327_s0 + $0x10] sm:$0xff] }
 0x208   :  { %v11695_v13 = vadd.f32 %v5208_v27, %v10977_v57  ;;  %v5211_v24 = vsel %vm3804_vm1, %v5209_v45, %v5210_v51  ;;  %v1668_v52 = vpop.f32.mrb[148].mxu1  ;;  %v1243_v50 = vpop.f32.mrb[149].mxu0  ;;  %8606 = vmatmul.mubr.msk.f32.gmra.mrb[254].mxu0 %vm162_vm0, %v10027_v54  ;;  %v5041_v40 = vrot.slane %v1241_v16, 1  ;;  %v4961_v45 = vadd.f32 %v11585_v20, %v10967_v31  ;;  %v129_v31 = vld [vmem:[%s16326_s1 + $0xd8] sm:$0xff] }
 0x209   :  { %v11700_v53 = vadd.f32 %v10867_v15, %v1668_v52  ;;  %8738 = vmatmul.mubr.msk.f32.gmra.mrb[254].mxu1 %vm162_vm0, %v11705_v39  ;;  %1523 = vmatprep.mubr.f32.mxu0 %v16379_v41  ;;  %v1670_v57 = vpop.f32.mrb[149].mxu1  ;;  %v5044_v56 = vrot.slane %v1243_v50, 1  ;;  %v3664_v51 = vadd.f32 %v11585_v20, %v10857_v8  ;;  %v4962_v27 = vadd.f32 %v11592_v23, %v10940_v0  ;;  %v131_v8 = vld [vmem:[%s16326_s1 + $0xe8] sm:$0xff] }
 0x20a   :  { %2452 = vmatprep.mubr.f32.mxu1 %v16379_v41  ;;  %v3665_v52 = vadd.f32 %v11592_v23, %v10841_v55 }
 0x20b   :  { %v1247_v61 = vpop.f32.mrb[150].mxu0 }
 0x20c   :  { %v5042_v63 = vrot.slane %v1247_v61, 1  ;;  %v1249_v54 = vpop.f32.mrb[151].mxu0  ;;  %8607 = vmatmul.mubr.msk.f32.gmra.mrb[0].mxu0 %vm162_vm0, %v10028_v12  ;;  %v1674_v15 = vpop.f32.mrb[150].mxu1  ;;  %v114_v12 = vld [vmem:[%s16326_s1 + $0x60] sm:$0xff] }
 0x20d   :  { %v5045_v48 = vrot.slane %v1249_v54, 1  ;;  %8739 = vmatmul.mubr.msk.f32.gmra.mrb[0].mxu1 %vm162_vm0, %v11717_v3  ;;  %v1675_v42 = vpop.f32.mrb[151].mxu1  ;;  %1529 = vmatprep.mubr.f32.mxu0 %v16379_v41  ;;  %v116_v15 = vld [vmem:[%s16326_s1 + $0x70] sm:$0xff]  ;;  %v9419_v55 = vpack.c.bf16 %v129_v31, %v114_v12 }
 0x20e   :  { %v5043_v16 = vsel %vm3804_vm1, %v5041_v40, %v5042_v63  ;;  %2458 = vmatprep.mubr.f32.mxu1 %v16379_v41 }
 0x20f   :  { %v5129_v50 = vadd.f32 %v5043_v16, %v4961_v45  ;;  %v5046_v61 = vsel %vm3804_vm1, %v5044_v56, %v5045_v48  ;;  %v1253_v54 = vpop.f32.mrb[152].mxu0  ;;  %v9425_v45 = vpack.c.bf16 %v131_v8, %v116_v15  ;;  %v10033_v16 = vld [vmem:[%s16327_s0 + $0x18] sm:$0xff]  ;;  %v159_v15 = vld [vmem:[%s16326_s1 + $0x1c8] sm:$0xff]  ;;  %v3954_v8 = vadd.f32 %v11592_v23, %v10860_v11 }
 0x210   :  { %v11743_v0 = vadd.f32 %v5046_v61, %v4962_v27  ;;  %v3688_v40 = vadd.f32 %v3664_v51, %v1253_v54  ;;  %v1678_v63 = vpop.f32.mrb[152].mxu1  ;;  %v1255_v42 = vpop.f32.mrb[153].mxu0  ;;  %8608 = vmatmul.mubr.msk.f32.gmra.mrb[2].mxu0 %vm162_vm0, %v10029_v10  ;;  %v3953_v61 = vadd.f32 %v11585_v20, %v10882_v32 }
 0x211   :  { %v11747_v56 = vadd.f32 %v10896_v59, %v1678_v63  ;;  %v11749_v48 = vadd.f32 %v3665_v52, %v1255_v42  ;;  %8740 = vmatmul.mubr.msk.f32.gmra.mrb[2].mxu1 %vm162_vm0, %v10033_v16  ;;  %2015 = vmatprep.mubr.f32.mxu0 %v16379_v41  ;;  %v1680_v51 = vpop.f32.mrb[153].mxu1  ;;  %v11756_v27 = vadd.f32 %v5211_v24, %v5129_v50  ;;  %v11766_v52 = vld [vmem:[%s16327_s0 + $0x20] sm:$0xff]  ;;  %v160_v50 = vld [vmem:[%s16326_s1 + $0x1d0] sm:$0xff] }
 0x212   :  { %2464 = vmatprep.mubr.f32.mxu1 %v16379_v41  ;;  %9426 = vmatprep.subr.bf16.mxu1 %v9425_v45  ;;  %v11759_v10 = vadd.f32 %v3688_v40, %v1670_v57  ;;  %v145_v57 = vld [vmem:[%s16326_s1 + $0x158] sm:$0xff] }
 0x213   :  { %v1259_v59 = vpop.f32.mrb[154].mxu0  ;;  %9428 = vmatpush3.bf16.msra.mxu1 %v9425_v45  ;;  %v9421_v54 = vpack.c.bf16 %v160_v50, %v145_v57 }
 0x214   :  { %v1260_v12 = vpop.f32.mrb[155].mxu0  ;;  %8673 = vmatmul.mubr.msk.f32.vlgmr.msra.gmra.mrb[4].mxu0 %vm162_vm0, %v11687_v30  ;;  %v1684_v31 = vpop.f32.mrb[154].mxu1  ;;  %v144_v30 = vld [vmem:[%s16326_s1 + $0x150] sm:$0xff]  ;;  %v10035_v59 = vld [vmem:[%s16327_s0 + $0x28] sm:$0xff] }
 0x215   :  { %8741 = vmatmul.mubr.msk.f32.gmra.mrb[4].mxu1 %vm162_vm0, %v11766_v52  ;;  %9420 = vmatpush1.bf16.msra.mxu0 %v9419_v55  ;;  %v1685_v24 = vpop.f32.mrb[155].mxu1  ;;  %v9423_v63 = vpack.c.bf16 %v159_v15, %v144_v30 }
 0x216   :  { %2021 = vmatprep.mubr.f32.mxu0 %v16379_v41  ;;  %2470 = vmatprep.mubr.f32.mxu1 %v16379_v41 }
 0x217   :  { %v1263_v40 = vpop.f32.mrb[156].mxu0  ;;  %9422 = vmatprep.subr.bf16.mxu0 %v9421_v54  ;;  %v4385_v54 = vadd.f32 %v11585_v20, %v10936_v62 }
 0x218   :  { %v3977_v42 = vadd.f32 %v3953_v61, %v1263_v40  ;;  %v1265_v55 = vpop.f32.mrb[157].mxu0  ;;  %8674 = vmatmul.mubr.msk.f32.gmra.mrb[6].mxu0 %vm162_vm0, %v11705_v39  ;;  %v1688_v32 = vpop.f32.mrb[156].mxu1  ;;  %v10036_v61 = vld [vmem:[%s16327_s0 + $0x30] sm:$0xff] }
 0x219   :  { %v11790_v45 = vadd.f32 %v3954_v8, %v1265_v55  ;;  %8742 = vmatmul.mubr.msk.f32.gmra.mrb[6].mxu1 %vm162_vm0, %v10035_v59  ;;  %v1690_v12 = vpop.f32.mrb[157].mxu1  ;;  %2027 = vmatprep.mubr.f32.mxu0 %v16379_v41  ;;  %v4495_v31 = vrot.slane %v1688_v32, 1  ;;  %v4386_v8 = vadd.f32 %v11592_v23, %v10885_v34  ;;  %v10037_v34 = vld [vmem:[%s16327_s0 + $0x38] sm:$0xff] }
 0x21a   :  { %v11797_v11 = vadd.f32 %v3977_v42, %v1680_v51  ;;  %2476 = vmatprep.mubr.f32.mxu1 %v16379_v41  ;;  %9424 = vmatpush1.bf16.msra.mxu0 %v9423_v63  ;;  %v4498_v24 = vrot.slane %v1690_v12, 1 }
 0x21b   :  { %v1269_v39 = vpop.f32.mrb[158].mxu0 }
 0x21c   :  { %v1694_v57 = vpop.f32.mrb[158].mxu1  ;;  %v1270_v50 = vpop.f32.mrb[159].mxu0  ;;  %8675 = vmatmul.mubr.msk.f32.gmra.mrb[8].mxu0 %vm162_vm0, %v11717_v3 }
 0x21d   :  { %v4496_v30 = vrot.slane %v1694_v57, 1  ;;  %8743 = vmatmul.mubr.msk.f32.gmra.mrb[8].mxu1 %vm162_vm0, %v10036_v61  ;;  %2033 = vmatprep.mubr.f32.mxu0 %v16379_v41  ;;  %v1696_v51 = vpop.f32.mrb[159].mxu1 }
 0x21e   :  { %2482 = vmatprep.mubr.f32.mxu1 %v16379_v41  ;;  %v4499_v15 = vrot.slane %v1696_v51, 1  ;;  %v10038_v51 = vld [vmem:[%s16327_s0 + $0x40] sm:$0xff] }
 0x21f   :  { %v4497_v3 = vsel %vm3804_vm1, %v4495_v31, %v4496_v30  ;;  %v1273_v40 = vpop.f32.mrb[160].mxu0 }
 0x220   :  { %v11814_v63 = vadd.f32 %v4497_v3, %v11035_v25  ;;  %v4409_v42 = vadd.f32 %v4385_v54, %v1273_v40  ;;  %v1275_v55 = vpop.f32.mrb[161].mxu0  ;;  %8676 = vmatmul.mubr.msk.f32.gmra.mrb[10].mxu0 %vm162_vm0, %v10033_v16  ;;  %v1700_v32 = vpop.f32.mrb[160].mxu1  ;;  %v11818_v12 = vsel %vm3804_vm1, %v4498_v24, %v4499_v15 }
 0x221   :  { %v11820_v62 = vadd.f32 %v4386_v8, %v1275_v55  ;;  %8744 = vmatmul.mubr.msk.f32.gmra.mrb[10].mxu1 %vm162_vm0, %v10037_v34  ;;  %v1702_v31 = vpop.f32.mrb[161].mxu1  ;;  %2039 = vmatprep.mubr.f32.mxu0 %v16379_v41  ;;  %v5215_v16 = vrot.slane %v1700_v32, 1  ;;  %v10039_v32 = vld [vmem:[%s16327_s0 + $0x48] sm:$0xff] }
 0x222   :  { %v11828_v25 = vadd.f32 %v11670_v9, %v4409_v42  ;;  %2486 = vmatprep.mubr.f32.mxu1 %v16379_v41  ;;  %v5218_v24 = vrot.slane %v1702_v31, 1 }
 0x223   :  { %v1279_v39 = vpop.f32.mrb[162].mxu0 }
 0x224   :  { %v1706_v57 = vpop.f32.mrb[162].mxu1  ;;  %v1280_v50 = vpop.f32.mrb[163].mxu0  ;;  %8677 = vmatmul.mubr.msk.f32.gmra.mrb[12].mxu0 %vm162_vm0, %v11766_v52 }
 0x225   :  { %v5216_v30 = vrot.slane %v1706_v57, 1  ;;  %8745 = vmatmul.mubr.msk.f32.gmra.mrb[12].mxu1 %vm162_vm0, %v10038_v51  ;;  %v1708_v54 = vpop.f32.mrb[163].mxu1  ;;  %2045 = vmatprep.mubr.f32.mxu0 %v16379_v41 }
 0x226   :  { %v5219_v9 = vrot.slane %v1708_v54, 1  ;;  %2492 = vmatprep.mubr.f32.mxu1 %v16379_v41 }
 0x227   :  { %v5217_v15 = vsel %vm3804_vm1, %v5215_v16, %v5216_v30  ;;  %v1283_v8 = vpop.f32.mrb[164].mxu0  ;;  %v10040_v30 = vld [vmem:[%s16327_s0 + $0x50] sm:$0xff] }
 0x228   :  { %v11841_v3 = vadd.f32 %v5217_v15, %v11054_v43  ;;  %v5220_v52 = vsel %vm3804_vm1, %v5218_v24, %v5219_v9  ;;  %v1712_v40 = vpop.f32.mrb[164].mxu1  ;;  %v1285_v42 = vpop.f32.mrb[165].mxu0  ;;  %8678 = vmatmul.mubr.msk.f32.gmra.mrb[14].mxu0 %vm162_vm0, %v10035_v59  ;;  %v5050_v16 = vrot.slane %v1283_v8, 1  ;;  %v3667_v9 = vadd.f32 %v11585_v20, %v10987_v14 }
 0x229   :  { %v11846_v55 = vadd.f32 %v10997_v18, %v1712_v40  ;;  %8746 = vmatmul.mubr.msk.f32.gmra.mrb[14].mxu1 %vm162_vm0, %v10039_v32  ;;  %2050 = vmatprep.mubr.f32.mxu0 %v16379_v41  ;;  %v1714_v31 = vpop.f32.mrb[165].mxu1  ;;  %v4964_v18 = vadd.f32 %v11585_v20, %v11045_v29  ;;  %v5053_v57 = vrot.slane %v1285_v42, 1  ;;  %v3668_v29 = vadd.f32 %v11592_v23, %v10971_v35  ;;  %v10041_v35 = vld [vmem:[%s16327_s0 + $0x58] sm:$0xff] }
 0x22a   :  { %2498 = vmatprep.mubr.f32.mxu1 %v16379_v41 }
 0x22b   :  { %16415 = vst [vmem:[#allocation63_spill] sm:$0xff] %v11846_v55  ;;  %v1289_v43 = vpop.f32.mrb[166].mxu0  ;;  %v16447_v55 = vld [vmem:[#allocation19_spill] sm:$0xff] }
 0x22c   :  { %v5051_v39 = vrot.slane %v1289_v43, 1  ;;  %v1291_v24 = vpop.f32.mrb[167].mxu0  ;;  %8679 = vmatmul.mubr.msk.f32.gmra.mrb[16].mxu0 %vm162_vm0, %v10036_v61  ;;  %v1718_v59 = vpop.f32.mrb[166].mxu1  ;;  %v4965_v61 = vadd.f32 %v11592_v23, %v11030_v17 }
 0x22d   :  { %v5054_v50 = vrot.slane %v1291_v24, 1  ;;  %8747 = vmatmul.mubr.msk.f32.gmra.mrb[16].mxu1 %vm162_vm0, %v10040_v30  ;;  %v1719_v54 = vpop.f32.mrb[167].mxu1  ;;  %2056 = vmatprep.mubr.f32.mxu0 %v16379_v41 }
 0x22e   :  { %v5052_v15 = vsel %vm3804_vm1, %v5050_v16, %v5051_v39  ;;  %2504 = vmatprep.mubr.f32.mxu1 %v16379_v41 }
 0x22f   :  { %v5132_v8 = vadd.f32 %v5052_v15, %v4964_v18  ;;  %v5055_v40 = vsel %vm3804_vm1, %v5053_v57, %v5054_v50  ;;  %v1295_v42 = vpop.f32.mrb[168].mxu0  ;;  %v10042_v50 = vld [vmem:[%s16327_s0 + $0x60] sm:$0xff] }
 0x230   :  { %v11871_v43 = vadd.f32 %v5055_v40, %v4965_v61  ;;  %v3691_v24 = vadd.f32 %v3667_v9, %v1295_v42  ;;  %v1722_v59 = vpop.f32.mrb[168].mxu1  ;;  %v1297_v54 = vpop.f32.mrb[169].mxu0  ;;  %8680 = vmatmul.mubr.msk.f32.gmra.mrb[18].mxu0 %vm162_vm0, %v10037_v34  ;;  %v10043_v40 = vld [vmem:[%s16327_s0 + $0x68] sm:$0xff] }
 0x231   :  { %v11875_v14 = vadd.f32 %v11016_v1, %v1722_v59  ;;  %v11877_v17 = vadd.f32 %v3668_v29, %v1297_v54  ;;  %8748 = vmatmul.mubr.msk.f32.gmra.mrb[18].mxu1 %vm162_vm0, %v10041_v35  ;;  %2060 = vmatprep.mubr.f32.mxu0 %v16379_v41  ;;  %v1724_v16 = vpop.f32.mrb[169].mxu1  ;;  %v11884_v39 = vadd.f32 %v5220_v52, %v5132_v8 }
 0x232   :  { %2510 = vmatprep.mubr.f32.mxu1 %v16379_v41  ;;  %v11887_v18 = vadd.f32 %v3691_v24, %v1714_v31  ;;  %v3956_v52 = vadd.f32 %v11585_v20, %v11007_v36  ;;  %v3957_v31 = vadd.f32 %v11592_v23, %v10991_v26 }
 0x233   :  { %v1301_v34 = vpop.f32.mrb[170].mxu0 }
 0x234   :  { %v1302_v1 = vpop.f32.mrb[171].mxu0  ;;  %8681 = vmatmul.mubr.msk.f32.gmra.mrb[20].mxu0 %vm162_vm0, %v10038_v51  ;;  %v1728_v57 = vpop.f32.mrb[170].mxu1 }
 0x235   :  { %8749 = vmatmul.mubr.msk.f32.gmra.mrb[20].mxu1 %vm162_vm0, %v10042_v50  ;;  %2066 = vmatprep.mubr.f32.mxu0 %v16379_v41  ;;  %v1729_v9 = vpop.f32.mrb[171].mxu1  ;;  %v10044_v1 = vld [vmem:[%s16327_s0 + $0x70] sm:$0xff]  ;;  %v4388_v57 = vadd.f32 %v11585_v20, %v11026_v7 }
 0x236   :  { %2516 = vmatprep.mubr.f32.mxu1 %v16379_v41 }
 0x237   :  { %v1305_v61 = vpop.f32.mrb[172].mxu0 }
 0x238   :  { %v3980_v51 = vadd.f32 %v3956_v52, %v1305_v61  ;;  %v1307_v15 = vpop.f32.mrb[173].mxu0  ;;  %8682 = vmatmul.mubr.msk.f32.gmra.mrb[22].mxu0 %vm162_vm0, %v10039_v32  ;;  %v1732_v29 = vpop.f32.mrb[172].mxu1  ;;  %v4389_v52 = vadd.f32 %v11592_v23, %v11011_v58  ;;  %v10045_v58 = vld [vmem:[%s16327_s0 + $0x78] sm:$0xff] }
 0x239   :  { %v11901_v8 = vadd.f32 %v3957_v31, %v1307_v15  ;;  %8750 = vmatmul.mubr.msk.f32.gmra.mrb[22].mxu1 %vm162_vm0, %v10043_v40  ;;  %v1734_v36 = vpop.f32.mrb[173].mxu1  ;;  %2072 = vmatprep.mubr.f32.mxu0 %v16379_v41  ;;  %v4504_v26 = vrot.slane %v1732_v29, 1 }
 0x23a   :  { %v11908_v42 = vadd.f32 %v3980_v51, %v1724_v16  ;;  %2522 = vmatprep.mubr.f32.mxu1 %v16379_v41  ;;  %v4507_v59 = vrot.slane %v1734_v36, 1 }
 0x23b   :  { %v1311_v24 = vpop.f32.mrb[174].mxu0 }
 0x23c   :  { %v1738_v32 = vpop.f32.mrb[174].mxu1  ;;  %v1312_v54 = vpop.f32.mrb[175].mxu0  ;;  %8683 = vmatmul.mubr.msk.f32.gmra.mrb[24].mxu0 %vm162_vm0, %v10040_v30 }
 0x23d   :  { %v4505_v34 = vrot.slane %v1738_v32, 1  ;;  %8751 = vmatmul.mubr.msk.f32.gmra.mrb[24].mxu1 %vm162_vm0, %v10044_v1  ;;  %2078 = vmatprep.mubr.f32.mxu0 %v16379_v41  ;;  %v1740_v16 = vpop.f32.mrb[175].mxu1 }
 0x23e   :  { %2528 = vmatprep.mubr.f32.mxu1 %v16379_v41  ;;  %v4508_v9 = vrot.slane %v1740_v16, 1  ;;  %v10046_v16 = vld [vmem:[%s16327_s0 + $0x80] sm:$0xff] }
 0x23f   :  { %v4506_v30 = vsel %vm3804_vm1, %v4504_v26, %v4505_v34  ;;  %v1315_v31 = vpop.f32.mrb[176].mxu0 }
 0x240   :  { %v11924_v61 = vadd.f32 %v4506_v30, %v11122_v46  ;;  %v4412_v51 = vadd.f32 %v4388_v57, %v1315_v31  ;;  %v1317_v15 = vpop.f32.mrb[177].mxu0  ;;  %8684 = vmatmul.mubr.msk.f32.gmra.mrb[26].mxu0 %vm162_vm0, %v10041_v35  ;;  %v1744_v29 = vpop.f32.mrb[176].mxu1  ;;  %v11928_v36 = vsel %vm3804_vm1, %v4507_v59, %v4508_v9 }
 0x241   :  { %v11930_v7 = vadd.f32 %v4389_v52, %v1317_v15  ;;  %8752 = vmatmul.mubr.msk.f32.gmra.mrb[26].mxu1 %vm162_vm0, %v10045_v58  ;;  %v1746_v26 = vpop.f32.mrb[177].mxu1  ;;  %2084 = vmatprep.mubr.f32.mxu0 %v16379_v41  ;;  %v5224_v35 = vrot.slane %v1744_v29, 1  ;;  %v10047_v29 = vld [vmem:[%s16327_s0 + $0x88] sm:$0xff] }
 0x242   :  { %16416 = vst [vmem:[#allocation64_spill] sm:$0xff] %v11924_v61  ;;  %v11938_v46 = vadd.f32 %v11818_v12, %v4412_v51  ;;  %2532 = vmatprep.mubr.f32.mxu1 %v16379_v41  ;;  %v5227_v59 = vrot.slane %v1746_v26, 1 }
 0x243   :  { %v1321_v24 = vpop.f32.mrb[178].mxu0 }
 0x244   :  { %v1750_v32 = vpop.f32.mrb[178].mxu1  ;;  %v1322_v54 = vpop.f32.mrb[179].mxu0  ;;  %8685 = vmatmul.mubr.msk.f32.gmra.mrb[28].mxu0 %vm162_vm0, %v10042_v50 }
 0x245   :  { %v5225_v34 = vrot.slane %v1750_v32, 1  ;;  %8753 = vmatmul.mubr.msk.f32.gmra.mrb[28].mxu1 %vm162_vm0, %v10046_v16  ;;  %v1752_v57 = vpop.f32.mrb[179].mxu1  ;;  %2090 = vmatprep.mubr.f32.mxu0 %v16379_v41 }
 0x246   :  { %v5228_v12 = vrot.slane %v1752_v57, 1  ;;  %2538 = vmatprep.mubr.f32.mxu1 %v16379_v41  ;;  %v10048_v57 = vld [vmem:[%s16327_s0 + $0x90] sm:$0xff] }
 0x247   :  { %v5226_v9 = vsel %vm3804_vm1, %v5224_v35, %v5225_v34  ;;  %v1325_v52 = vpop.f32.mrb[180].mxu0 }
 0x248   :  { %v11950_v30 = vadd.f32 %v5226_v9, %v11150_v49  ;;  %v5229_v50 = vsel %vm3804_vm1, %v5227_v59, %v5228_v12  ;;  %v1756_v31 = vpop.f32.mrb[180].mxu1  ;;  %v1327_v51 = vpop.f32.mrb[181].mxu0  ;;  %8686 = vmatmul.mubr.msk.f32.gmra.mrb[30].mxu0 %vm162_vm0, %v10043_v40  ;;  %v5059_v35 = vrot.slane %v1325_v52, 1  ;;  %v16420_v9 = vld [vmem:[#allocation5_spill] sm:$0xff] }
 0x249   :  { %v11955_v15 = vadd.f32 %v11076_v28, %v1756_v31  ;;  %8754 = vmatmul.mubr.msk.f32.gmra.mrb[30].mxu1 %vm162_vm0, %v10047_v29  ;;  %2095 = vmatprep.mubr.f32.mxu0 %v16379_v41  ;;  %v1758_v26 = vpop.f32.mrb[181].mxu1  ;;  %v16419_v28 = vld [vmem:[#allocation12_spill] sm:$0xff]  ;;  %v5062_v54 = vrot.slane %v1327_v51, 1  ;;  %v3670_v52 = vadd.f32 %v11585_v20, %v16420_v9  ;;  %v16421_v31 = vld [vmem:[#allocation11_spill] sm:$0xff]  ;;  %v16424_v9 = vld [vmem:[#allocation9_spill] sm:$0xff] }
 0x24a   :  { %16417 = vst [vmem:[#allocation65_spill] sm:$0xff] %v11950_v30  ;;  %2544 = vmatprep.mubr.f32.mxu1 %v16379_v41  ;;  %v4967_v32 = vadd.f32 %v11585_v20, %v16419_v28  ;;  %v16422_v51 = vld [vmem:[#allocation4_spill] sm:$0xff] }
 0x24b   :  { %16418 = vst [vmem:[#allocation66_spill] sm:$0xff] %v11955_v15  ;;  %v1331_v49 = vpop.f32.mrb[182].mxu0 }
 0x24c   :  { %v5060_v24 = vrot.slane %v1331_v49, 1  ;;  %v1333_v59 = vpop.f32.mrb[183].mxu0  ;;  %8687 = vmatmul.mubr.msk.f32.gmra.mrb[32].mxu0 %vm162_vm0, %v10044_v1  ;;  %v1762_v40 = vpop.f32.mrb[182].mxu1  ;;  %v4968_v1 = vadd.f32 %v11592_v23, %v16421_v31 }
 0x24d   :  { %v5063_v34 = vrot.slane %v1333_v59, 1  ;;  %8755 = vmatmul.mubr.msk.f32.gmra.mrb[32].mxu1 %vm162_vm0, %v10048_v57  ;;  %v1763_v12 = vpop.f32.mrb[183].mxu1  ;;  %2101 = vmatprep.mubr.f32.mxu0 %v16379_v41  ;;  %v3671_v59 = vadd.f32 %v11592_v23, %v16422_v51 }
 0x24e   :  { %v5061_v49 = vsel %vm3804_vm1, %v5059_v35, %v5060_v24  ;;  %2550 = vmatprep.mubr.f32.mxu1 %v16379_v41  ;;  %v10049_v24 = vld [vmem:[%s16327_s0 + $0x98] sm:$0xff] }
 0x24f   :  { %v5135_v40 = vadd.f32 %v5061_v49, %v4967_v32  ;;  %v5064_v28 = vsel %vm3804_vm1, %v5062_v54, %v5063_v34  ;;  %v1337_v44 = vpop.f32.mrb[184].mxu0  ;;  %v10050_v34 = vld [vmem:[%s16327_s0 + $0xa0] sm:$0xff] }
 0x250   :  { %v11980_v12 = vadd.f32 %v5064_v28, %v4968_v1  ;;  %v3694_v15 = vadd.f32 %v3670_v52, %v1337_v44  ;;  %v1766_v30 = vpop.f32.mrb[184].mxu1  ;;  %v1339_v61 = vpop.f32.mrb[185].mxu0  ;;  %8688 = vmatmul.mubr.msk.f32.gmra.mrb[34].mxu0 %vm162_vm0, %v10045_v58  ;;  %v10051_v28 = vld [vmem:[%s16327_s0 + $0xa8] sm:$0xff] }
 0x251   :  { %v11984_v31 = vadd.f32 %v16424_v9, %v1766_v30  ;;  %v11986_v35 = vadd.f32 %v3671_v59, %v1339_v61  ;;  %8756 = vmatmul.mubr.msk.f32.gmra.mrb[34].mxu1 %vm162_vm0, %v10049_v24  ;;  %2105 = vmatprep.mubr.f32.mxu0 %v16379_v41  ;;  %v1768_v32 = vpop.f32.mrb[185].mxu1  ;;  %v11993_v54 = vadd.f32 %v5229_v50, %v5135_v40  ;;  %v16429_v50 = vld [vmem:[#allocation7_spill] sm:$0xff] }
 0x252   :  { %16423 = vst [vmem:[#allocation12_spill] sm:$0xff] %v11980_v12  ;;  %2556 = vmatprep.mubr.f32.mxu1 %v16379_v41  ;;  %v11996_v44 = vadd.f32 %v3694_v15, %v1758_v26  ;;  %v3959_v1 = vadd.f32 %v11585_v20, %v16429_v50  ;;  %v16430_v15 = vld [vmem:[#allocation6_spill] sm:$0xff] }
 0x253   :  { %16425 = vst [vmem:[#allocation5_spill] sm:$0xff] %v11984_v31  ;;  %16426 = vst [vmem:[#allocation11_spill] sm:$0xff] %v11986_v35  ;;  %v1343_v58 = vpop.f32.mrb[186].mxu0  ;;  %v3960_v26 = vadd.f32 %v11592_v23, %v16430_v15  ;;  %v10052_v15 = vld [vmem:[%s16327_s0 + $0xb0] sm:$0xff]  ;;  %v16434_v35 = vld [vmem:[#allocation22_spill] sm:$0xff] }
 0x254   :  { %16427 = vst [vmem:[#allocation4_spill] sm:$0xff] %v11993_v54  ;;  %16428 = vst [vmem:[#allocation9_spill] sm:$0xff] %v11996_v44  ;;  %v1344_v30 = vpop.f32.mrb[187].mxu0  ;;  %8689 = vmatmul.mubr.msk.f32.gmra.mrb[36].mxu0 %vm162_vm0, %v10046_v16  ;;  %v1772_v61 = vpop.f32.mrb[186].mxu1  ;;  %v10056_v31 = vld [vmem:[%s16327_s0 + $0xd0] sm:$0xff] }
 0x255   :  { %8757 = vmatmul.mubr.msk.f32.gmra.mrb[36].mxu1 %vm162_vm0, %v10050_v34  ;;  %2111 = vmatprep.mubr.f32.mxu0 %v16379_v41  ;;  %v1773_v52 = vpop.f32.mrb[187].mxu1 }
 0x256   :  { %2562 = vmatprep.mubr.f32.mxu1 %v16379_v41 }
 0x257   :  { %v1347_v49 = vpop.f32.mrb[188].mxu0 }
 0x258   :  { %v3983_v16 = vadd.f32 %v3959_v1, %v1347_v49  ;;  %v1349_v51 = vpop.f32.mrb[189].mxu0  ;;  %8690 = vmatmul.mubr.msk.f32.gmra.mrb[38].mxu0 %vm162_vm0, %v10047_v29  ;;  %v1776_v59 = vpop.f32.mrb[188].mxu1 }
 0x259   :  { %v12010_v40 = vadd.f32 %v3960_v26, %v1349_v51  ;;  %8758 = vmatmul.mubr.msk.f32.gmra.mrb[38].mxu1 %vm162_vm0, %v10051_v28  ;;  %v1778_v9 = vpop.f32.mrb[189].mxu1  ;;  %2117 = vmatprep.mubr.f32.mxu0 %v16379_v41  ;;  %v4513_v30 = vrot.slane %v1776_v59, 1  ;;  %v16432_v26 = vld [vmem:[#allocation10_spill] sm:$0xff]  ;;  %v16433_v51 = vld [vmem:[#allocation8_spill] sm:$0xff] }
 0x25a   :  { %v12017_v58 = vadd.f32 %v3983_v16, %v1768_v32  ;;  %2568 = vmatprep.mubr.f32.mxu1 %v16379_v41  ;;  %v4516_v52 = vrot.slane %v1778_v9, 1  ;;  %v4391_v49 = vadd.f32 %v11585_v20, %v16432_v26  ;;  %v4392_v59 = vadd.f32 %v11592_v23, %v16433_v51 }
 0x25b   :  { %16431 = vst [vmem:[#allocation7_spill] sm:$0xff] %v12010_v40  ;;  %v1353_v61 = vpop.f32.mrb[190].mxu0 }
 0x25c   :  { %v1782_v29 = vpop.f32.mrb[190].mxu1  ;;  %v1354_v50 = vpop.f32.mrb[191].mxu0  ;;  %8691 = vmatmul.mubr.msk.f32.gmra.mrb[40].mxu0 %vm162_vm0, %v10048_v57 }
 0x25d   :  { %v4514_v1 = vrot.slane %v1782_v29, 1  ;;  %8759 = vmatmul.mubr.msk.f32.gmra.mrb[40].mxu1 %vm162_vm0, %v10052_v15  ;;  %2123 = vmatprep.mubr.f32.mxu0 %v16379_v41  ;;  %v1784_v32 = vpop.f32.mrb[191].mxu1 }
 0x25e   :  { %2574 = vmatprep.mubr.f32.mxu1 %v16379_v41  ;;  %v4517_v16 = vrot.slane %v1784_v32, 1  ;;  %v10053_v32 = vld [vmem:[%s16327_s0 + $0xb8] sm:$0xff] }
 0x25f   :  { %v1357_v57 = vpop.f32.mrb[192].mxu0  ;;  %v4515_v9 = vsel %vm3804_vm1, %v4513_v30, %v4514_v1 }
 0x260   :  { %v4415_v61 = vadd.f32 %v4391_v49, %v1357_v57  ;;  %v1359_v29 = vpop.f32.mrb[193].mxu0  ;;  %8692 = vmatmul.mubr.msk.f32.gmra.mrb[42].mxu0 %vm162_vm0, %v10049_v24  ;;  %v1788_v50 = vpop.f32.mrb[192].mxu1  ;;  %v12034_v40 = vsel %vm3804_vm1, %v4516_v52, %v4517_v16  ;;  %v12037_v12 = vadd.f32 %v4515_v9, %v16434_v35 }
 0x261   :  { %v12039_v26 = vadd.f32 %v4392_v59, %v1359_v29  ;;  %8760 = vmatmul.mubr.msk.f32.gmra.mrb[42].mxu1 %vm162_vm0, %v10053_v32  ;;  %v1790_v30 = vpop.f32.mrb[193].mxu1  ;;  %2129 = vmatprep.mubr.f32.mxu0 %v16379_v41  ;;  %v5233_v52 = vrot.slane %v1788_v50, 1  ;;  %v10054_v59 = vld [vmem:[%s16327_s0 + $0xc0] sm:$0xff] }
 0x262   :  { %16435 = vst [vmem:[#allocation6_spill] sm:$0xff] %v12037_v12  ;;  %v12047_v24 = vadd.f32 %v11928_v36, %v4415_v61  ;;  %2578 = vmatprep.mubr.f32.mxu1 %v16379_v41  ;;  %v5236_v35 = vrot.slane %v1790_v30, 1  ;;  %v16438_v30 = vld [vmem:[#allocation25_spill] sm:$0xff] }
 0x263   :  { %16436 = vst [vmem:[#allocation10_spill] sm:$0xff] %v12039_v26  ;;  %v1363_v1 = vpop.f32.mrb[194].mxu0 }
 0x264   :  { %16437 = vst [vmem:[#allocation8_spill] sm:$0xff] %v12047_v24  ;;  %v1794_v49 = vpop.f32.mrb[194].mxu1  ;;  %v1364_v16 = vpop.f32.mrb[195].mxu0  ;;  %8693 = vmatmul.mubr.msk.f32.gmra.mrb[44].mxu0 %vm162_vm0, %v10050_v34 }
 0x265   :  { %v5234_v51 = vrot.slane %v1794_v49, 1  ;;  %8761 = vmatmul.mubr.msk.f32.gmra.mrb[44].mxu1 %vm162_vm0, %v10054_v59  ;;  %v1796_v57 = vpop.f32.mrb[195].mxu1  ;;  %2135 = vmatprep.mubr.f32.mxu0 %v16379_v41  ;;  %v10055_v49 = vld [vmem:[%s16327_s0 + $0xc8] sm:$0xff] }
 0x266   :  { %v5237_v36 = vrot.slane %v1796_v57, 1  ;;  %2584 = vmatprep.mubr.f32.mxu1 %v16379_v41  ;;  %v16440_v57 = vld [vmem:[#allocation16_spill] sm:$0xff] }
 0x267   :  { %v1367_v9 = vpop.f32.mrb[196].mxu0  ;;  %v5235_v61 = vsel %vm3804_vm1, %v5233_v52, %v5234_v51 }
 0x268   :  { %v1800_v29 = vpop.f32.mrb[196].mxu1  ;;  %v1369_v50 = vpop.f32.mrb[197].mxu0  ;;  %8694 = vmatmul.mubr.msk.f32.gmra.mrb[46].mxu0 %vm162_vm0, %v10051_v28  ;;  %v5238_v34 = vsel %vm3804_vm1, %v5236_v35, %v5237_v36  ;;  %v12061_v1 = vadd.f32 %v5235_v61, %v16438_v30  ;;  %v5068_v51 = vrot.slane %v1367_v9, 1  ;;  %v16442_v30 = vld [vmem:[#allocation23_spill] sm:$0xff]  ;;  %v16443_v9 = vld [vmem:[#allocation14_spill] sm:$0xff] }
 0x269   :  { %8762 = vmatmul.mubr.msk.f32.gmra.mrb[46].mxu1 %vm162_vm0, %v10055_v49  ;;  %2140 = vmatprep.mubr.f32.mxu0 %v16379_v41  ;;  %v1802_v16 = vpop.f32.mrb[197].mxu1  ;;  %v12069_v52 = vadd.f32 %v16440_v57, %v1800_v29  ;;  %v5071_v12 = vrot.slane %v1369_v50, 1  ;;  %v3673_v57 = vadd.f32 %v11585_v20, %v16443_v9  ;;  %v16445_v50 = vld [vmem:[#allocation13_spill] sm:$0xff] }
 0x26a   :  { %16439 = vst [vmem:[#allocation22_spill] sm:$0xff] %v12061_v1  ;;  %2590 = vmatprep.mubr.f32.mxu1 %v16379_v41  ;;  %v4970_v1 = vadd.f32 %v11585_v20, %v16442_v30 }
 0x26b   :  { %16441 = vst [vmem:[#allocation25_spill] sm:$0xff] %v12069_v52  ;;  %v1373_v28 = vpop.f32.mrb[198].mxu0 }
 0x26c   :  { %v5069_v35 = vrot.slane %v1373_v28, 1  ;;  %v1375_v36 = vpop.f32.mrb[199].mxu0  ;;  %8695 = vmatmul.mubr.msk.f32.gmra.mrb[48].mxu0 %vm162_vm0, %v10052_v15  ;;  %v1806_v61 = vpop.f32.mrb[198].mxu1  ;;  %v16444_v28 = vld [vmem:[#allocation21_spill] sm:$0xff] }
 0x26d   :  { %v5072_v44 = vrot.slane %v1375_v36, 1  ;;  %8763 = vmatmul.mubr.msk.f32.gmra.mrb[48].mxu1 %vm162_vm0, %v10056_v31  ;;  %v1807_v29 = vpop.f32.mrb[199].mxu1  ;;  %2146 = vmatprep.mubr.f32.mxu0 %v16379_v41  ;;  %v4971_v15 = vadd.f32 %v11592_v23, %v16444_v28  ;;  %v3674_v36 = vadd.f32 %v11592_v23, %v16445_v50 }
 0x26e   :  { %v5070_v61 = vsel %vm3804_vm1, %v5068_v51, %v5069_v35  ;;  %2596 = vmatprep.mubr.f32.mxu1 %v16379_v41  ;;  %v10057_v51 = vld [vmem:[%s16327_s0 + $0xd8] sm:$0xff] }
 0x26f   :  { %v5138_v30 = vadd.f32 %v5070_v61, %v4970_v1  ;;  %v5073_v52 = vsel %vm3804_vm1, %v5071_v12, %v5072_v44  ;;  %v1379_v54 = vpop.f32.mrb[200].mxu0 }
 0x270   :  { %v3697_v29 = vadd.f32 %v3673_v57, %v1379_v54  ;;  %v1810_v26 = vpop.f32.mrb[200].mxu1  ;;  %v1381_v24 = vpop.f32.mrb[201].mxu0  ;;  %8696 = vmatmul.mubr.msk.f32.gmra.mrb[50].mxu0 %vm162_vm0, %v10053_v32  ;;  %v12090_v9 = vadd.f32 %v5073_v52, %v4971_v15  ;;  %v10058_v52 = vld [vmem:[%s16327_s0 + $0xe0] sm:$0xff] }
 0x271   :  { %v12093_v28 = vadd.f32 %v16447_v55, %v1810_v26  ;;  %8764 = vmatmul.mubr.msk.f32.gmra.mrb[50].mxu1 %vm162_vm0, %v10057_v51  ;;  %2150 = vmatprep.mubr.f32.mxu0 %v16379_v41  ;;  %v1812_v12 = vpop.f32.mrb[201].mxu1  ;;  %v12100_v44 = vadd.f32 %v5238_v34, %v5138_v30  ;;  %v12102_v54 = vadd.f32 %v3674_v36, %v1381_v24  ;;  %v16452_v24 = vld [vmem:[#allocation17_spill] sm:$0xff]  ;;  %v10059_v36 = vld [vmem:[%s16327_s0 + $0xe8] sm:$0xff] }
 0x272   :  { %16446 = vst [vmem:[#allocation16_spill] sm:$0xff] %v12090_v9  ;;  %2602 = vmatprep.mubr.f32.mxu1 %v16379_v41  ;;  %v12105_v32 = vadd.f32 %v3697_v29, %v1802_v16  ;;  %v3962_v35 = vadd.f32 %v11585_v20, %v16452_v24  ;;  %v16453_v16 = vld [vmem:[#allocation15_spill] sm:$0xff]  ;;  %v16458_v9 = vld [vmem:[#allocation34_spill] sm:$0xff] }
 0x273   :  { %16448 = vst [vmem:[#allocation23_spill] sm:$0xff] %v12093_v28  ;;  %16449 = vst [vmem:[#allocation14_spill] sm:$0xff] %v12100_v44  ;;  %v1385_v1 = vpop.f32.mrb[202].mxu0  ;;  %v3963_v57 = vadd.f32 %v11592_v23, %v16453_v16  ;;  %v10060_v16 = vld [vmem:[%s16327_s0 + $0xf0] sm:$0xff] }
 0x274   :  { %16450 = vst [vmem:[#allocation21_spill] sm:$0xff] %v12102_v54  ;;  %16451 = vst [vmem:[#allocation13_spill] sm:$0xff] %v12105_v32  ;;  %v1386_v55 = vpop.f32.mrb[203].mxu0  ;;  %8697 = vmatmul.mubr.msk.f32.gmra.mrb[52].mxu0 %vm162_vm0, %v10054_v59  ;;  %v1816_v26 = vpop.f32.mrb[202].mxu1 }
 0x275   :  { %8765 = vmatmul.mubr.msk.f32.gmra.mrb[52].mxu1 %vm162_vm0, %v10058_v52  ;;  %2156 = vmatprep.mubr.f32.mxu0 %v16379_v41  ;;  %v1817_v34 = vpop.f32.mrb[203].mxu1 }
 0x276   :  { %2608 = vmatprep.mubr.f32.mxu1 %v16379_v41 }
 0x277   :  { %v1389_v15 = vpop.f32.mrb[204].mxu0 }
 0x278   :  { %v3986_v59 = vadd.f32 %v3962_v35, %v1389_v15  ;;  %v1391_v61 = vpop.f32.mrb[205].mxu0  ;;  %8698 = vmatmul.mubr.msk.f32.gmra.mrb[54].mxu0 %vm162_vm0, %v10055_v49  ;;  %v1820_v50 = vpop.f32.mrb[204].mxu1 }
 0x279   :  { %8766 = vmatmul.mubr.msk.f32.gmra.mrb[54].mxu1 %vm162_vm0, %v10059_v36  ;;  %v1822_v30 = vpop.f32.mrb[205].mxu1  ;;  %2162 = vmatprep.mubr.f32.mxu0 %v16379_v41  ;;  %v12124_v29 = vadd.f32 %v3963_v57, %v1391_v61  ;;  %v4522_v55 = vrot.slane %v1820_v50, 1  ;;  %v16456_v57 = vld [vmem:[#allocation20_spill] sm:$0xff]  ;;  %v161_v61 = vld [vmem:[%s16326_s1 + $0x1d8] sm:$0xff]  ;;  %v16457_v50 = vld [vmem:[#allocation18_spill] sm:$0xff] }
 0x27a   :  { %v12126_v1 = vadd.f32 %v3986_v59, %v1812_v12  ;;  %2614 = vmatprep.mubr.f32.mxu1 %v16379_v41  ;;  %v4525_v34 = vrot.slane %v1822_v30, 1  ;;  %v4394_v15 = vadd.f32 %v11585_v20, %v16456_v57  ;;  %v4395_v30 = vadd.f32 %v11592_v23, %v16457_v50  ;;  %v10061_v50 = vld [vmem:[%s16327_s0 + $0xf8] sm:$0xff] }
 0x27b   :  { %16454 = vst [vmem:[#allocation19_spill] sm:$0xff] %v12124_v29  ;;  %v1395_v26 = vpop.f32.mrb[206].mxu0 }
 0x27c   :  { %16455 = vst [vmem:[#allocation17_spill] sm:$0xff] %v12126_v1  ;;  %v1826_v49 = vpop.f32.mrb[206].mxu1  ;;  %v1396_v24 = vpop.f32.mrb[207].mxu0  ;;  %8699 = vmatmul.mubr.msk.f32.gmra.mrb[56].mxu0 %vm162_vm0, %v10056_v31  ;;  %v146_v31 = vld [vmem:[%s16326_s1 + $0x160] sm:$0xff]  ;;  %v16471_v1 = vld [vmem:[#allocation31_spill] sm:$0xff] }
 0x27d   :  { %v4523_v35 = vrot.slane %v1826_v49, 1  ;;  %8767 = vmatmul.mubr.msk.f32.gmra.mrb[56].mxu1 %vm162_vm0, %v10060_v16  ;;  %2168 = vmatprep.mubr.f32.mxu0 %v16379_v41  ;;  %v1828_v12 = vpop.f32.mrb[207].mxu1  ;;  %v9429_v24 = vpack.c.bf16 %v161_v61, %v146_v31  ;;  %v10062_v61 = vld [vmem:[%s16327_s0 + $0x100] sm:$0xff] }
 0x27e   :  { %2620 = vmatprep.mubr.f32.mxu1 %v16379_v41  ;;  %v4526_v59 = vrot.slane %v1828_v12, 1 }
 0x27f   :  { %v4524_v26 = vsel %vm3804_vm1, %v4522_v55, %v4523_v35  ;;  %v1399_v49 = vpop.f32.mrb[208].mxu0  ;;  %9430 = vmatprep.subr.bf16.mxu1 %v9429_v24 }
 0x280   :  { %v4418_v29 = vadd.f32 %v4394_v15, %v1399_v49  ;;  %v1401_v57 = vpop.f32.mrb[209].mxu0  ;;  %8700 = vmatmul.mubr.msk.f32.gmra.mrb[58].mxu0 %vm162_vm0, %v10057_v51  ;;  %v1832_v12 = vpop.f32.mrb[208].mxu1  ;;  %v12149_v54 = vsel %vm3804_vm1, %v4525_v34, %v4526_v59  ;;  %v12152_v32 = vadd.f32 %v4524_v26, %v16458_v9  ;;  %9432 = vmatpush3.bf16.msra.mxu1 %v9429_v24 }
 0x281   :  { %v12154_v28 = vadd.f32 %v4395_v30, %v1401_v57  ;;  %8768 = vmatmul.mubr.msk.f32.gmra.mrb[58].mxu1 %vm162_vm0, %v10061_v50  ;;  %v1834_v55 = vpop.f32.mrb[209].mxu1  ;;  %2174 = vmatprep.mubr.f32.mxu0 %v16379_v41  ;;  %v5242_v34 = vrot.slane %v1832_v12, 1  ;;  %v16462_v57 = vld [vmem:[#allocation37_spill] sm:$0xff] }
 0x282   :  { %16459 = vst [vmem:[#allocation15_spill] sm:$0xff] %v12152_v32  ;;  %v12162_v51 = vadd.f32 %v12034_v40, %v4418_v29  ;;  %2624 = vmatprep.mubr.f32.mxu1 %v16379_v41  ;;  %v5245_v35 = vrot.slane %v1834_v55, 1  ;;  %v10063_v55 = vld [vmem:[%s16327_s0 + $0x108] sm:$0xff]  ;;  %v10064_v32 = vld [vmem:[%s16327_s0 + $0x110] sm:$0xff] }
 0x283   :  { %16460 = vst [vmem:[#allocation20_spill] sm:$0xff] %v12154_v28  ;;  %v1405_v9 = vpop.f32.mrb[210].mxu0 }
 0x284   :  { %16461 = vst [vmem:[#allocation18_spill] sm:$0xff] %v12162_v51  ;;  %v1838_v15 = vpop.f32.mrb[210].mxu1  ;;  %v1406_v59 = vpop.f32.mrb[211].mxu0  ;;  %8701 = vmatmul.mubr.msk.f32.gmra.mrb[60].mxu0 %vm162_vm0, %v10058_v52 }
 0x285   :  { %v5243_v31 = vrot.slane %v1838_v15, 1  ;;  %8769 = vmatmul.mubr.msk.f32.gmra.mrb[60].mxu1 %vm162_vm0, %v10062_v61  ;;  %v1840_v40 = vpop.f32.mrb[211].mxu1  ;;  %2180 = vmatprep.mubr.f32.mxu0 %v16379_v41 }
 0x286   :  { %v5246_v29 = vrot.slane %v1840_v40, 1  ;;  %2630 = vmatprep.mubr.f32.mxu1 %v16379_v41 }
 0x287   :  { %v5244_v30 = vsel %vm3804_vm1, %v5242_v34, %v5243_v31  ;;  %v1409_v26 = vpop.f32.mrb[212].mxu0  ;;  %v16464_v34 = vld [vmem:[#allocation28_spill] sm:$0xff] }
 0x288   :  { %v5247_v49 = vsel %vm3804_vm1, %v5245_v35, %v5246_v29  ;;  %v1844_v24 = vpop.f32.mrb[212].mxu1  ;;  %v1411_v52 = vpop.f32.mrb[213].mxu0  ;;  %8702 = vmatmul.mubr.msk.f32.gmra.mrb[62].mxu0 %vm162_vm0, %v10059_v36  ;;  %v12176_v12 = vadd.f32 %v5244_v30, %v16462_v57  ;;  %v5077_v59 = vrot.slane %v1409_v26, 1  ;;  %v16466_v29 = vld [vmem:[#allocation35_spill] sm:$0xff]  ;;  %v16467_v26 = vld [vmem:[#allocation26_spill] sm:$0xff] }
 0x289   :  { %8770 = vmatmul.mubr.msk.f32.gmra.mrb[62].mxu1 %vm162_vm0, %v10063_v55  ;;  %2185 = vmatprep.mubr.f32.mxu0 %v16379_v41  ;;  %v1846_v9 = vpop.f32.mrb[213].mxu1  ;;  %v12184_v15 = vadd.f32 %v16464_v34, %v1844_v24  ;;  %v4973_v30 = vadd.f32 %v11585_v20, %v16466_v29  ;;  %v5080_v57 = vrot.slane %v1411_v52, 1  ;;  %v3676_v34 = vadd.f32 %v11585_v20, %v16467_v26  ;;  %v16469_v52 = vld [vmem:[#allocation24_spill] sm:$0xff] }
 0x28a   :  { %16463 = vst [vmem:[#allocation34_spill] sm:$0xff] %v12176_v12  ;;  %2636 = vmatprep.mubr.f32.mxu1 %v16379_v41 }
 0x28b   :  { %16465 = vst [vmem:[#allocation37_spill] sm:$0xff] %v12184_v15  ;;  %v1415_v35 = vpop.f32.mrb[214].mxu0 }
 0x28c   :  { %v5078_v36 = vrot.slane %v1415_v35, 1  ;;  %v1417_v31 = vpop.f32.mrb[215].mxu0  ;;  %8703 = vmatmul.mubr.msk.f32.gmra.mrb[64].mxu0 %vm162_vm0, %v10060_v16  ;;  %v1850_v40 = vpop.f32.mrb[214].mxu1  ;;  %v16468_v35 = vld [vmem:[#allocation33_spill] sm:$0xff] }
 0x28d   :  { %v5081_v12 = vrot.slane %v1417_v31, 1  ;;  %8771 = vmatmul.mubr.msk.f32.gmra.mrb[64].mxu1 %vm162_vm0, %v10064_v32  ;;  %v1851_v24 = vpop.f32.mrb[215].mxu1  ;;  %2191 = vmatprep.mubr.f32.mxu0 %v16379_v41  ;;  %v4974_v16 = vadd.f32 %v11592_v23, %v16468_v35  ;;  %v3677_v31 = vadd.f32 %v11592_v23, %v16469_v52 }
 0x28e   :  { %v5079_v40 = vsel %vm3804_vm1, %v5077_v59, %v5078_v36  ;;  %2642 = vmatprep.mubr.f32.mxu1 %v16379_v41  ;;  %v10065_v59 = vld [vmem:[%s16327_s0 + $0x118] sm:$0xff] }
 0x28f   :  { %v5141_v29 = vadd.f32 %v5079_v40, %v4973_v30  ;;  %v5082_v15 = vsel %vm3804_vm1, %v5080_v57, %v5081_v12  ;;  %v1421_v44 = vpop.f32.mrb[216].mxu0  ;;  %v10066_v30 = vld [vmem:[%s16327_s0 + $0x120] sm:$0xff] }
 0x290   :  { %v3700_v24 = vadd.f32 %v3676_v34, %v1421_v44  ;;  %v1854_v28 = vpop.f32.mrb[216].mxu1  ;;  %v1423_v51 = vpop.f32.mrb[217].mxu0  ;;  %8704 = vmatmul.mubr.msk.f32.gmra.mrb[66].mxu0 %vm162_vm0, %v10061_v50  ;;  %v12205_v26 = vadd.f32 %v5082_v15, %v4974_v16 }
 0x291   :  { %v12208_v35 = vadd.f32 %v16471_v1, %v1854_v28  ;;  %8772 = vmatmul.mubr.msk.f32.gmra.mrb[66].mxu1 %vm162_vm0, %v10065_v59  ;;  %2195 = vmatprep.mubr.f32.mxu0 %v16379_v41  ;;  %v1856_v12 = vpop.f32.mrb[217].mxu1  ;;  %v12215_v36 = vadd.f32 %v5247_v49, %v5141_v29  ;;  %v12217_v44 = vadd.f32 %v3677_v31, %v1423_v51  ;;  %v16476_v51 = vld [vmem:[#allocation29_spill] sm:$0xff]  ;;  %v10067_v31 = vld [vmem:[%s16327_s0 + $0x128] sm:$0xff] }
 0x292   :  { %16470 = vst [vmem:[#allocation28_spill] sm:$0xff] %v12205_v26  ;;  %2648 = vmatprep.mubr.f32.mxu1 %v16379_v41  ;;  %v12220_v50 = vadd.f32 %v3700_v24, %v1846_v9  ;;  %v3965_v57 = vadd.f32 %v11585_v20, %v16476_v51  ;;  %v16477_v9 = vld [vmem:[#allocation27_spill] sm:$0xff] }
 0x293   :  { %16472 = vst [vmem:[#allocation35_spill] sm:$0xff] %v12208_v35  ;;  %16473 = vst [vmem:[#allocation26_spill] sm:$0xff] %v12215_v36  ;;  %v1427_v15 = vpop.f32.mrb[218].mxu0  ;;  %v3966_v34 = vadd.f32 %v11592_v23, %v16477_v9  ;;  %v10068_v9 = vld [vmem:[%s16327_s0 + $0x130] sm:$0xff] }
 0x294   :  { %16474 = vst [vmem:[#allocation33_spill] sm:$0xff] %v12217_v44  ;;  %16475 = vst [vmem:[#allocation24_spill] sm:$0xff] %v12220_v50  ;;  %v1428_v28 = vpop.f32.mrb[219].mxu0  ;;  %8705 = vmatmul.mubr.msk.f32.gmra.mrb[68].mxu0 %vm162_vm0, %v10062_v61  ;;  %v1860_v1 = vpop.f32.mrb[218].mxu1  ;;  %v16482_v44 = vld [vmem:[#allocation46_spill] sm:$0xff]  ;;  %v10072_v35 = vld [vmem:[%s16327_s0 + $0x150] sm:$0xff] }
 0x295   :  { %8773 = vmatmul.mubr.msk.f32.gmra.mrb[68].mxu1 %vm162_vm0, %v10066_v30  ;;  %2201 = vmatprep.mubr.f32.mxu0 %v16379_v41  ;;  %v1861_v49 = vpop.f32.mrb[219].mxu1 }
 0x296   :  { %2654 = vmatprep.mubr.f32.mxu1 %v16379_v41 }
 0x297   :  { %v1431_v16 = vpop.f32.mrb[220].mxu0 }
 0x298   :  { %v3989_v61 = vadd.f32 %v3965_v57, %v1431_v16  ;;  %v1433_v40 = vpop.f32.mrb[221].mxu0  ;;  %8706 = vmatmul.mubr.msk.f32.gmra.mrb[70].mxu0 %vm162_vm0, %v10063_v55  ;;  %v1864_v52 = vpop.f32.mrb[220].mxu1 }
 0x299   :  { %8774 = vmatmul.mubr.msk.f32.gmra.mrb[70].mxu1 %vm162_vm0, %v10067_v31  ;;  %v1866_v29 = vpop.f32.mrb[221].mxu1  ;;  %2207 = vmatprep.mubr.f32.mxu0 %v16379_v41  ;;  %v12239_v24 = vadd.f32 %v3966_v34, %v1433_v40  ;;  %v4531_v28 = vrot.slane %v1864_v52, 1  ;;  %v16480_v34 = vld [vmem:[#allocation32_spill] sm:$0xff]  ;;  %v16481_v40 = vld [vmem:[#allocation30_spill] sm:$0xff] }
 0x29a   :  { %v12241_v15 = vadd.f32 %v3989_v61, %v1856_v12  ;;  %2660 = vmatprep.mubr.f32.mxu1 %v16379_v41  ;;  %v4534_v49 = vrot.slane %v1866_v29, 1  ;;  %v4397_v16 = vadd.f32 %v11585_v20, %v16480_v34  ;;  %v4398_v52 = vadd.f32 %v11592_v23, %v16481_v40 }
 0x29b   :  { %16478 = vst [vmem:[#allocation31_spill] sm:$0xff] %v12239_v24  ;;  %v1437_v1 = vpop.f32.mrb[222].mxu0 }
 0x29c   :  { %16479 = vst [vmem:[#allocation29_spill] sm:$0xff] %v12241_v15  ;;  %v1870_v55 = vpop.f32.mrb[222].mxu1  ;;  %v1438_v51 = vpop.f32.mrb[223].mxu0  ;;  %8707 = vmatmul.mubr.msk.f32.gmra.mrb[72].mxu0 %vm162_vm0, %v10064_v32  ;;  %v16495_v15 = vld [vmem:[#allocation43_spill] sm:$0xff] }
 0x29d   :  { %v4532_v57 = vrot.slane %v1870_v55, 1  ;;  %8775 = vmatmul.mubr.msk.f32.gmra.mrb[72].mxu1 %vm162_vm0, %v10068_v9  ;;  %2213 = vmatprep.mubr.f32.mxu0 %v16379_v41  ;;  %v1872_v12 = vpop.f32.mrb[223].mxu1 }
 0x29e   :  { %2666 = vmatprep.mubr.f32.mxu1 %v16379_v41  ;;  %v4535_v61 = vrot.slane %v1872_v12, 1  ;;  %v10069_v12 = vld [vmem:[%s16327_s0 + $0x138] sm:$0xff] }
 0x29f   :  { %v4533_v32 = vsel %vm3804_vm1, %v4531_v28, %v4532_v57  ;;  %v1441_v29 = vpop.f32.mrb[224].mxu0 }
 0x2a0   :  { %v4421_v1 = vadd.f32 %v4397_v16, %v1441_v29  ;;  %v1443_v55 = vpop.f32.mrb[225].mxu0  ;;  %8708 = vmatmul.mubr.msk.f32.gmra.mrb[74].mxu0 %vm162_vm0, %v10065_v59  ;;  %v1876_v51 = vpop.f32.mrb[224].mxu1  ;;  %v12258_v24 = vsel %vm3804_vm1, %v4534_v49, %v4535_v61  ;;  %v12261_v26 = vadd.f32 %v4533_v32, %v16482_v44 }
 0x2a1   :  { %v12263_v34 = vadd.f32 %v4398_v52, %v1443_v55  ;;  %8776 = vmatmul.mubr.msk.f32.gmra.mrb[74].mxu1 %vm162_vm0, %v10069_v12  ;;  %v1878_v28 = vpop.f32.mrb[225].mxu1  ;;  %2219 = vmatprep.mubr.f32.mxu0 %v16379_v41  ;;  %v5251_v49 = vrot.slane %v1876_v51, 1  ;;  %v10070_v52 = vld [vmem:[%s16327_s0 + $0x140] sm:$0xff] }
 0x2a2   :  { %16483 = vst [vmem:[#allocation27_spill] sm:$0xff] %v12261_v26  ;;  %v12271_v59 = vadd.f32 %v12149_v54, %v4421_v1  ;;  %2670 = vmatprep.mubr.f32.mxu1 %v16379_v41  ;;  %v5254_v44 = vrot.slane %v1878_v28, 1  ;;  %v16486_v28 = vld [vmem:[#allocation49_spill] sm:$0xff] }
 0x2a3   :  { %16484 = vst [vmem:[#allocation32_spill] sm:$0xff] %v12263_v34  ;;  %v1447_v57 = vpop.f32.mrb[226].mxu0 }
 0x2a4   :  { %16485 = vst [vmem:[#allocation30_spill] sm:$0xff] %v12271_v59  ;;  %v1882_v16 = vpop.f32.mrb[226].mxu1  ;;  %v1448_v61 = vpop.f32.mrb[227].mxu0  ;;  %8709 = vmatmul.mubr.msk.f32.gmra.mrb[76].mxu0 %vm162_vm0, %v10066_v30 }
 0x2a5   :  { %v5252_v40 = vrot.slane %v1882_v16, 1  ;;  %8777 = vmatmul.mubr.msk.f32.gmra.mrb[76].mxu1 %vm162_vm0, %v10070_v52  ;;  %v1884_v32 = vpop.f32.mrb[227].mxu1  ;;  %2225 = vmatprep.mubr.f32.mxu0 %v16379_v41  ;;  %v10071_v16 = vld [vmem:[%s16327_s0 + $0x148] sm:$0xff] }
 0x2a6   :  { %v5255_v54 = vrot.slane %v1884_v32, 1  ;;  %2676 = vmatprep.mubr.f32.mxu1 %v16379_v41 }
 0x2a7   :  { %v5253_v29 = vsel %vm3804_vm1, %v5251_v49, %v5252_v40  ;;  %v1451_v1 = vpop.f32.mrb[228].mxu0  ;;  %v16488_v49 = vld [vmem:[#allocation40_spill] sm:$0xff] }
 0x2a8   :  { %v5256_v55 = vsel %vm3804_vm1, %v5254_v44, %v5255_v54  ;;  %v1888_v51 = vpop.f32.mrb[228].mxu1  ;;  %v1453_v30 = vpop.f32.mrb[229].mxu0  ;;  %8710 = vmatmul.mubr.msk.f32.gmra.mrb[78].mxu0 %vm162_vm0, %v10067_v31  ;;  %v12285_v57 = vadd.f32 %v5253_v29, %v16486_v28  ;;  %v5086_v32 = vrot.slane %v1451_v1, 1  ;;  %v16490_v28 = vld [vmem:[#allocation47_spill] sm:$0xff]  ;;  %v16491_v1 = vld [vmem:[#allocation38_spill] sm:$0xff] }
 0x2a9   :  { %8778 = vmatmul.mubr.msk.f32.gmra.mrb[78].mxu1 %vm162_vm0, %v10071_v16  ;;  %2230 = vmatprep.mubr.f32.mxu0 %v16379_v41  ;;  %v1890_v61 = vpop.f32.mrb[229].mxu1  ;;  %v12293_v40 = vadd.f32 %v16488_v49, %v1888_v51  ;;  %v5089_v26 = vrot.slane %v1453_v30, 1  ;;  %v3679_v49 = vadd.f32 %v11585_v20, %v16491_v1  ;;  %v16493_v30 = vld [vmem:[#allocation36_spill] sm:$0xff] }
 0x2aa   :  { %16487 = vst [vmem:[#allocation46_spill] sm:$0xff] %v12285_v57  ;;  %2682 = vmatprep.mubr.f32.mxu1 %v16379_v41  ;;  %v4976_v57 = vadd.f32 %v11585_v20, %v16490_v28 }
 0x2ab   :  { %16489 = vst [vmem:[#allocation49_spill] sm:$0xff] %v12293_v40  ;;  %v1457_v44 = vpop.f32.mrb[230].mxu0 }
 0x2ac   :  { %v5087_v31 = vrot.slane %v1457_v44, 1  ;;  %v1459_v54 = vpop.f32.mrb[231].mxu0  ;;  %8711 = vmatmul.mubr.msk.f32.gmra.mrb[80].mxu0 %vm162_vm0, %v10068_v9  ;;  %v1894_v29 = vpop.f32.mrb[230].mxu1  ;;  %v16492_v44 = vld [vmem:[#allocation45_spill] sm:$0xff] }
 0x2ad   :  { %v5090_v50 = vrot.slane %v1459_v54, 1  ;;  %8779 = vmatmul.mubr.msk.f32.gmra.mrb[80].mxu1 %vm162_vm0, %v10072_v35  ;;  %v1895_v51 = vpop.f32.mrb[231].mxu1  ;;  %2236 = vmatprep.mubr.f32.mxu0 %v16379_v41  ;;  %v4977_v9 = vadd.f32 %v11592_v23, %v16492_v44  ;;  %v3680_v54 = vadd.f32 %v11592_v23, %v16493_v30 }
 0x2ae   :  { %v5088_v29 = vsel %vm3804_vm1, %v5086_v32, %v5087_v31  ;;  %2688 = vmatprep.mubr.f32.mxu1 %v16379_v41  ;;  %v10073_v32 = vld [vmem:[%s16327_s0 + $0x158] sm:$0xff] }
 0x2af   :  { %v5144_v28 = vadd.f32 %v5088_v29, %v4976_v57  ;;  %v5091_v40 = vsel %vm3804_vm1, %v5089_v26, %v5090_v50  ;;  %v1463_v36 = vpop.f32.mrb[232].mxu0 }
 0x2b0   :  { %v3703_v51 = vadd.f32 %v3679_v49, %v1463_v36  ;;  %v1898_v34 = vpop.f32.mrb[232].mxu1  ;;  %v1465_v59 = vpop.f32.mrb[233].mxu0  ;;  %8712 = vmatmul.mubr.msk.f32.gmra.mrb[82].mxu0 %vm162_vm0, %v10069_v12  ;;  %v12314_v1 = vadd.f32 %v5091_v40, %v4977_v9  ;;  %v10074_v40 = vld [vmem:[%s16327_s0 + $0x160] sm:$0xff] }
 0x2b1   :  { %v12317_v44 = vadd.f32 %v16495_v15, %v1898_v34  ;;  %8780 = vmatmul.mubr.msk.f32.gmra.mrb[82].mxu1 %vm162_vm0, %v10073_v32  ;;  %2240 = vmatprep.mubr.f32.mxu0 %v16379_v41  ;;  %v1900_v26 = vpop.f32.mrb[233].mxu1  ;;  %v12324_v50 = vadd.f32 %v5256_v55, %v5144_v28  ;;  %v12326_v36 = vadd.f32 %v3680_v54, %v1465_v59  ;;  %v16500_v59 = vld [vmem:[#allocation41_spill] sm:$0xff]  ;;  %v10075_v54 = vld [vmem:[%s16327_s0 + $0x168] sm:$0xff] }
 0x2b2   :  { %16494 = vst [vmem:[#allocation40_spill] sm:$0xff] %v12314_v1  ;;  %2694 = vmatprep.mubr.f32.mxu1 %v16379_v41  ;;  %v12329_v12 = vadd.f32 %v3703_v51, %v1890_v61  ;;  %v3968_v31 = vadd.f32 %v11585_v20, %v16500_v59  ;;  %v16501_v61 = vld [vmem:[#allocation39_spill] sm:$0xff] }
 0x2b3   :  { %16496 = vst [vmem:[#allocation47_spill] sm:$0xff] %v12317_v44  ;;  %16497 = vst [vmem:[#allocation38_spill] sm:$0xff] %v12324_v50  ;;  %v1469_v57 = vpop.f32.mrb[234].mxu0  ;;  %v3969_v49 = vadd.f32 %v11592_v23, %v16501_v61  ;;  %v10076_v61 = vld [vmem:[%s16327_s0 + $0x170] sm:$0xff] }
 0x2b4   :  { %16498 = vst [vmem:[#allocation45_spill] sm:$0xff] %v12326_v36  ;;  %16499 = vst [vmem:[#allocation36_spill] sm:$0xff] %v12329_v12  ;;  %v1470_v15 = vpop.f32.mrb[235].mxu0  ;;  %8713 = vmatmul.mubr.msk.f32.gmra.mrb[84].mxu0 %vm162_vm0, %v10070_v52  ;;  %v1904_v34 = vpop.f32.mrb[234].mxu1  ;;  %v16506_v36 = vld [vmem:[#allocation58_spill] sm:$0xff]  ;;  %v10080_v44 = vld [vmem:[%s16327_s0 + $0x190] sm:$0xff] }
 0x2b5   :  { %8781 = vmatmul.mubr.msk.f32.gmra.mrb[84].mxu1 %vm162_vm0, %v10074_v40  ;;  %2246 = vmatprep.mubr.f32.mxu0 %v16379_v41  ;;  %v1905_v55 = vpop.f32.mrb[235].mxu1 }
 0x2b6   :  { %2700 = vmatprep.mubr.f32.mxu1 %v16379_v41 }
 0x2b7   :  { %v1473_v9 = vpop.f32.mrb[236].mxu0 }
 0x2b8   :  { %v3992_v52 = vadd.f32 %v3968_v31, %v1473_v9  ;;  %v1475_v29 = vpop.f32.mrb[237].mxu0  ;;  %8714 = vmatmul.mubr.msk.f32.gmra.mrb[86].mxu0 %vm162_vm0, %v10071_v16  ;;  %v1908_v30 = vpop.f32.mrb[236].mxu1 }
 0x2b9   :  { %8782 = vmatmul.mubr.msk.f32.gmra.mrb[86].mxu1 %vm162_vm0, %v10075_v54  ;;  %v1910_v28 = vpop.f32.mrb[237].mxu1  ;;  %2252 = vmatprep.mubr.f32.mxu0 %v16379_v41  ;;  %v12348_v51 = vadd.f32 %v3969_v49, %v1475_v29  ;;  %v4540_v15 = vrot.slane %v1908_v30, 1  ;;  %v16504_v49 = vld [vmem:[#allocation44_spill] sm:$0xff]  ;;  %v16505_v29 = vld [vmem:[#allocation42_spill] sm:$0xff] }
 0x2ba   :  { %v12350_v57 = vadd.f32 %v3992_v52, %v1900_v26  ;;  %2706 = vmatprep.mubr.f32.mxu1 %v16379_v41  ;;  %v4543_v55 = vrot.slane %v1910_v28, 1  ;;  %v4400_v9 = vadd.f32 %v11585_v20, %v16504_v49  ;;  %v4401_v30 = vadd.f32 %v11592_v23, %v16505_v29 }
 0x2bb   :  { %16502 = vst [vmem:[#allocation43_spill] sm:$0xff] %v12348_v51  ;;  %v1479_v34 = vpop.f32.mrb[238].mxu0 }
 0x2bc   :  { %16503 = vst [vmem:[#allocation41_spill] sm:$0xff] %v12350_v57  ;;  %v1914_v16 = vpop.f32.mrb[238].mxu1  ;;  %v1480_v59 = vpop.f32.mrb[239].mxu0  ;;  %8715 = vmatmul.mubr.msk.f32.gmra.mrb[88].mxu0 %vm162_vm0, %v10072_v35  ;;  %v16519_v57 = vld [vmem:[#allocation55_spill] sm:$0xff] }
 0x2bd   :  { %v4541_v31 = vrot.slane %v1914_v16, 1  ;;  %8783 = vmatmul.mubr.msk.f32.gmra.mrb[88].mxu1 %vm162_vm0, %v10076_v61  ;;  %2258 = vmatprep.mubr.f32.mxu0 %v16379_v41  ;;  %v1916_v26 = vpop.f32.mrb[239].mxu1 }
 0x2be   :  { %2712 = vmatprep.mubr.f32.mxu1 %v16379_v41  ;;  %v4544_v52 = vrot.slane %v1916_v26, 1  ;;  %v10077_v26 = vld [vmem:[%s16327_s0 + $0x178] sm:$0xff] }
 0x2bf   :  { %v4542_v35 = vsel %vm3804_vm1, %v4540_v15, %v4541_v31  ;;  %v1483_v28 = vpop.f32.mrb[240].mxu0 }
 0x2c0   :  { %v4424_v34 = vadd.f32 %v4400_v9, %v1483_v28  ;;  %v1485_v16 = vpop.f32.mrb[241].mxu0  ;;  %8716 = vmatmul.mubr.msk.f32.gmra.mrb[90].mxu0 %vm162_vm0, %v10073_v32  ;;  %v1920_v59 = vpop.f32.mrb[240].mxu1  ;;  %v12367_v51 = vsel %vm3804_vm1, %v4543_v55, %v4544_v52  ;;  %v12370_v1 = vadd.f32 %v4542_v35, %v16506_v36 }
 0x2c1   :  { %v12372_v49 = vadd.f32 %v4401_v30, %v1485_v16  ;;  %8784 = vmatmul.mubr.msk.f32.gmra.mrb[90].mxu1 %vm162_vm0, %v10077_v26  ;;  %v1922_v15 = vpop.f32.mrb[241].mxu1  ;;  %2264 = vmatprep.mubr.f32.mxu0 %v16379_v41  ;;  %v5260_v55 = vrot.slane %v1920_v59, 1  ;;  %v10078_v30 = vld [vmem:[%s16327_s0 + $0x180] sm:$0xff] }
 0x2c2   :  { %16507 = vst [vmem:[#allocation39_spill] sm:$0xff] %v12370_v1  ;;  %v12380_v32 = vadd.f32 %v12258_v24, %v4424_v34  ;;  %2716 = vmatprep.mubr.f32.mxu1 %v16379_v41  ;;  %v5263_v36 = vrot.slane %v1922_v15, 1  ;;  %v16510_v15 = vld [vmem:[#allocation60_spill] sm:$0xff] }
 0x2c3   :  { %16508 = vst [vmem:[#allocation44_spill] sm:$0xff] %v12372_v49  ;;  %v1489_v31 = vpop.f32.mrb[242].mxu0 }
 0x2c4   :  { %16509 = vst [vmem:[#allocation42_spill] sm:$0xff] %v12380_v32  ;;  %v1926_v9 = vpop.f32.mrb[242].mxu1  ;;  %v1490_v52 = vpop.f32.mrb[243].mxu0  ;;  %8717 = vmatmul.mubr.msk.f32.gmra.mrb[92].mxu0 %vm162_vm0, %v10074_v40 }
 0x2c5   :  { %v5261_v29 = vrot.slane %v1926_v9, 1  ;;  %8785 = vmatmul.mubr.msk.f32.gmra.mrb[92].mxu1 %vm162_vm0, %v10078_v30  ;;  %v1928_v35 = vpop.f32.mrb[243].mxu1  ;;  %2270 = vmatprep.mubr.f32.mxu0 %v16379_v41  ;;  %v10079_v9 = vld [vmem:[%s16327_s0 + $0x188] sm:$0xff] }
 0x2c6   :  { %v5264_v24 = vrot.slane %v1928_v35, 1  ;;  %2722 = vmatprep.mubr.f32.mxu1 %v16379_v41 }
 0x2c7   :  { %v5262_v28 = vsel %vm3804_vm1, %v5260_v55, %v5261_v29  ;;  %v1493_v34 = vpop.f32.mrb[244].mxu0  ;;  %v16512_v55 = vld [vmem:[#allocation52_spill] sm:$0xff] }
 0x2c8   :  { %v5265_v16 = vsel %vm3804_vm1, %v5263_v36, %v5264_v24  ;;  %v1932_v59 = vpop.f32.mrb[244].mxu1  ;;  %v1495_v40 = vpop.f32.mrb[245].mxu0  ;;  %8718 = vmatmul.mubr.msk.f32.gmra.mrb[94].mxu0 %vm162_vm0, %v10075_v54  ;;  %v12394_v31 = vadd.f32 %v5262_v28, %v16510_v15  ;;  %v5095_v35 = vrot.slane %v1493_v34, 1  ;;  %v16514_v15 = vld [vmem:[#allocation59_spill] sm:$0xff]  ;;  %v16515_v34 = vld [vmem:[#allocation50_spill] sm:$0xff] }
 0x2c9   :  { %8786 = vmatmul.mubr.msk.f32.gmra.mrb[94].mxu1 %vm162_vm0, %v10079_v9  ;;  %2275 = vmatprep.mubr.f32.mxu0 %v16379_v41  ;;  %v1934_v52 = vpop.f32.mrb[245].mxu1  ;;  %v12402_v29 = vadd.f32 %v16512_v55, %v1932_v59  ;;  %v5098_v1 = vrot.slane %v1495_v40, 1  ;;  %v3682_v55 = vadd.f32 %v11585_v20, %v16515_v34  ;;  %v16517_v40 = vld [vmem:[#allocation48_spill] sm:$0xff] }
 0x2ca   :  { %16511 = vst [vmem:[#allocation58_spill] sm:$0xff] %v12394_v31  ;;  %2728 = vmatprep.mubr.f32.mxu1 %v16379_v41  ;;  %v4979_v31 = vadd.f32 %v11585_v20, %v16514_v15 }
 0x2cb   :  { %16513 = vst [vmem:[#allocation60_spill] sm:$0xff] %v12402_v29  ;;  %v1499_v36 = vpop.f32.mrb[246].mxu0 }
 0x2cc   :  { %v5096_v54 = vrot.slane %v1499_v36, 1  ;;  %v1501_v24 = vpop.f32.mrb[247].mxu0  ;;  %8719 = vmatmul.mubr.msk.f32.gmra.mrb[96].mxu0 %vm162_vm0, %v10076_v61  ;;  %v1938_v28 = vpop.f32.mrb[246].mxu1  ;;  %v16516_v36 = vld [vmem:[#allocation57_spill] sm:$0xff] }
 0x2cd   :  { %v5099_v12 = vrot.slane %v1501_v24, 1  ;;  %8787 = vmatmul.mubr.msk.f32.gmra.mrb[96].mxu1 %vm162_vm0, %v10080_v44  ;;  %v1939_v59 = vpop.f32.mrb[247].mxu1  ;;  %2281 = vmatprep.mubr.f32.mxu0 %v16379_v41  ;;  %v4980_v61 = vadd.f32 %v11592_v23, %v16516_v36  ;;  %v3683_v24 = vadd.f32 %v11592_v23, %v16517_v40 }
 0x2ce   :  { %v5097_v28 = vsel %vm3804_vm1, %v5095_v35, %v5096_v54  ;;  %2734 = vmatprep.mubr.f32.mxu1 %v16379_v41  ;;  %v10081_v35 = vld [vmem:[%s16327_s0 + $0x198] sm:$0xff] }
 0x2cf   :  { %v5147_v15 = vadd.f32 %v5097_v28, %v4979_v31  ;;  %v5100_v29 = vsel %vm3804_vm1, %v5098_v1, %v5099_v12  ;;  %v1505_v50 = vpop.f32.mrb[248].mxu0 }
 0x2d0   :  { %v3706_v59 = vadd.f32 %v3682_v55, %v1505_v50  ;;  %v1942_v49 = vpop.f32.mrb[248].mxu1  ;;  %v1507_v32 = vpop.f32.mrb[249].mxu0  ;;  %8720 = vmatmul.mubr.msk.f32.gmra.mrb[98].mxu0 %vm162_vm0, %v10077_v26  ;;  %v12423_v34 = vadd.f32 %v5100_v29, %v4980_v61  ;;  %v10082_v29 = vld [vmem:[%s16327_s0 + $0x1a0] sm:$0xff] }
 0x2d1   :  { %v12426_v36 = vadd.f32 %v16519_v57, %v1942_v49  ;;  %8788 = vmatmul.mubr.msk.f32.gmra.mrb[98].mxu1 %vm162_vm0, %v10081_v35  ;;  %2285 = vmatprep.mubr.f32.mxu0 %v16379_v41  ;;  %v1944_v1 = vpop.f32.mrb[249].mxu1  ;;  %v12433_v12 = vadd.f32 %v5265_v16, %v5147_v15  ;;  %v12435_v50 = vadd.f32 %v3683_v24, %v1507_v32  ;;  %v16521_v32 = vld [vmem:[#allocation53_spill] sm:$0xff]  ;;  %v10083_v24 = vld [vmem:[%s16327_s0 + $0x1a8] sm:$0xff] }
 0x2d2   :  { %16518 = vst [vmem:[#allocation52_spill] sm:$0xff] %v12423_v34  ;;  %2740 = vmatprep.mubr.f32.mxu1 %v16379_v41  ;;  %v12438_v26 = vadd.f32 %v3706_v59, %v1934_v52  ;;  %v3971_v54 = vadd.f32 %v11585_v20, %v16521_v32  ;;  %v16522_v52 = vld [vmem:[#allocation51_spill] sm:$0xff] }
 0x2d3   :  { %16520 = vst [vmem:[#allocation59_spill] sm:$0xff] %v12435_v50  ;;  %v1511_v31 = vpop.f32.mrb[250].mxu0  ;;  %v3972_v55 = vadd.f32 %v11592_v23, %v16522_v52  ;;  %v10084_v52 = vld [vmem:[%s16327_s0 + $0x1b0] sm:$0xff] }
 0x2d4   :  { %v1512_v57 = vpop.f32.mrb[251].mxu0  ;;  %8721 = vmatmul.mubr.msk.f32.gmra.mrb[100].mxu0 %vm162_vm0, %v10078_v30  ;;  %v1948_v49 = vpop.f32.mrb[250].mxu1 }
 0x2d5   :  { %8789 = vmatmul.mubr.msk.f32.gmra.mrb[100].mxu1 %vm162_vm0, %v10082_v29  ;;  %2291 = vmatprep.mubr.f32.mxu0 %v16379_v41  ;;  %v1949_v16 = vpop.f32.mrb[251].mxu1 }
 0x2d6   :  { %2746 = vmatprep.mubr.f32.mxu1 %v16379_v41 }
 0x2d7   :  { %v1515_v61 = vpop.f32.mrb[252].mxu0 }
 0x2d8   :  { %v3995_v30 = vadd.f32 %v3971_v54, %v1515_v61  ;;  %v1517_v28 = vpop.f32.mrb[253].mxu0  ;;  %8722 = vmatmul.mubr.msk.f32.gmra.mrb[102].mxu0 %vm162_vm0, %v10079_v9  ;;  %v2442_v40 = vpop.f32.mrb[252].mxu1 }
 0x2d9   :  { %8790 = vmatmul.mubr.msk.f32.gmra.mrb[102].mxu1 %vm162_vm0, %v10083_v24  ;;  %v2444_v15 = vpop.f32.mrb[253].mxu1  ;;  %2297 = vmatprep.mubr.f32.mxu0 %v16379_v41  ;;  %v12457_v59 = vadd.f32 %v3972_v55, %v1517_v28  ;;  %v4072_v57 = vrot.slane %v2442_v40, 1  ;;  %v16524_v55 = vld [vmem:[#allocation56_spill] sm:$0xff]  ;;  %v16525_v28 = vld [vmem:[#allocation54_spill] sm:$0xff] }
 0x2da   :  { %v12459_v31 = vadd.f32 %v3995_v30, %v1944_v1  ;;  %2752 = vmatprep.mubr.f32.mxu1 %v16379_v41  ;;  %v4075_v16 = vrot.slane %v2444_v15, 1  ;;  %v4403_v61 = vadd.f32 %v11585_v20, %v16524_v55  ;;  %v4404_v40 = vadd.f32 %v11592_v23, %v16525_v28  ;;  %v12486_v23 = vld [vmem:[%s16327_s0 + $0x1b8] sm:$0xff] }
 0x2db   :  { %16523 = vst [vmem:[#allocation50_spill] sm:$0xff] %v12457_v59  ;;  %v1521_v49 = vpop.f32.mrb[254].mxu0 }
 0x2dc   :  { %v2448_v9 = vpop.f32.mrb[254].mxu1  ;;  %v1522_v32 = vpop.f32.mrb[255].mxu0  ;;  %8723 = vmatmul.mubr.msk.f32.gmra.mrb[104].mxu0 %vm162_vm0, %v10080_v44 }
 0x2dd   :  { %v4073_v54 = vrot.slane %v2448_v9, 1  ;;  %8791 = vmatmul.mubr.msk.f32.gmra.mrb[104].mxu1 %vm162_vm0, %v10084_v52  ;;  %2303 = vmatprep.mubr.f32.mxu0 %v16379_v41  ;;  %v2450_v1 = vpop.f32.mrb[255].mxu1 }
 0x2de   :  { %2758 = vmatprep.mubr.f32.mxu1 %v16379_v41  ;;  %v4076_v30 = vrot.slane %v2450_v1, 1 }
 0x2df   :  { %v1525_v44 = vpop.f32.mrb[0].mxu0  ;;  %v4074_v15 = vsel %vm3804_vm1, %v4072_v57, %v4073_v54 }
 0x2e0   :  { %v4427_v49 = vadd.f32 %v4403_v61, %v1525_v44  ;;  %v1527_v9 = vpop.f32.mrb[1].mxu0  ;;  %8724 = vmatmul.mubr.msk.f32.gmra.mrb[106].mxu0 %vm162_vm0, %v10081_v35  ;;  %v2454_v32 = vpop.f32.mrb[0].mxu1  ;;  %v12476_v59 = vsel %vm3804_vm1, %v4075_v16, %v4076_v30  ;;  %v12479_v50 = vadd.f32 %v4074_v15, %v11650_v37  ;;  %v12499_v30 = vld [vmem:[%s16327_s0 + $0x1c0] sm:$0xff] }
 0x2e1   :  { %v12481_v20 = vadd.f32 %v4404_v40, %v1527_v9  ;;  %8792 = vmatmul.mubr.msk.f32.gmra.mrb[106].mxu1 %vm162_vm0, %v12486_v23  ;;  %v2456_v57 = vpop.f32.mrb[1].mxu1  ;;  %2309 = vmatprep.mubr.f32.mxu0 %v16379_v41  ;;  %v4648_v37 = vrot.slane %v2454_v32, 1  ;;  %v12514_v32 = vld [vmem:[%s16327_s0 + $0x1c8] sm:$0xff] }
 0x2e2   :  { %16526 = vst [vmem:[#allocation57_spill] sm:$0xff] %v12479_v50  ;;  %v12492_v35 = vadd.f32 %v12367_v51, %v4427_v49  ;;  %2762 = vmatprep.mubr.f32.mxu1 %v16379_v41  ;;  %v4651_v54 = vrot.slane %v2456_v57, 1 }
 0x2e3   :  { %v1531_v16 = vpop.f32.mrb[2].mxu0 }
 0x2e4   :  { %v2460_v1 = vpop.f32.mrb[2].mxu1  ;;  %v1532_v55 = vpop.f32.mrb[3].mxu0  ;;  %8725 = vmatmul.mubr.msk.f32.gmra.mrb[108].mxu0 %vm162_vm0, %v10082_v29 }
 0x2e5   :  { %v4649_v61 = vrot.slane %v2460_v1, 1  ;;  %8793 = vmatmul.mubr.msk.f32.gmra.mrb[108].mxu1 %vm162_vm0, %v12499_v30  ;;  %2315 = vmatprep.mubr.f32.mxu0 %v16379_v41  ;;  %v2462_v51 = vpop.f32.mrb[3].mxu1 }
 0x2e6   :  { %2768 = vmatprep.mubr.f32.mxu1 %v16379_v41  ;;  %v4652_v28 = vrot.slane %v2462_v51, 1 }
 0x2e7   :  { %v4650_v40 = vsel %vm3804_vm1, %v4648_v37, %v4649_v61  ;;  %v2017_v44 = vpop.f32.mrb[4].mxu0 }
 0x2e8   :  { %v2019_v15 = vpop.f32.mrb[5].mxu0  ;;  %8726 = vmatmul.mubr.msk.f32.gmra.mrb[110].mxu0 %vm162_vm0, %v10083_v24  ;;  %v4653_v29 = vsel %vm3804_vm1, %v4651_v54, %v4652_v28  ;;  %v2466_v49 = vpop.f32.mrb[4].mxu1  ;;  %v12509_v9 = vadd.f32 %v4650_v40, %v11680_v5  ;;  %v4483_v16 = vrot.slane %v2017_v44, 1  ;;  %v12524_v40 = vld [vmem:[%s16327_s0 + $0x1d0] sm:$0xff] }
 0x2e9   :  { %8794 = vmatmul.mubr.msk.f32.gmra.mrb[110].mxu1 %vm162_vm0, %v12514_v32  ;;  %v2468_v57 = vpop.f32.mrb[5].mxu1  ;;  %2320 = vmatprep.mubr.f32.mxu0 %v16379_v41  ;;  %v5368_v24 = vrot.slane %v2466_v49, 1  ;;  %v4069_v61 = vrot.slane %v2019_v15, 1 }
 0x2ea   :  { %16527 = vst [vmem:[#allocation48_spill] sm:$0xff] %v12509_v9  ;;  %2774 = vmatprep.mubr.f32.mxu1 %v16379_v41  ;;  %v5371_v54 = vrot.slane %v2468_v57, 1 }
 0x2eb   :  { %v2023_v37 = vpop.f32.mrb[6].mxu0 }
 0x2ec   :  { %v4484_v1 = vrot.slane %v2023_v37, 1  ;;  %v2472_v5 = vpop.f32.mrb[6].mxu1  ;;  %v2025_v55 = vpop.f32.mrb[7].mxu0  ;;  %8727 = vmatmul.mubr.msk.f32.gmra.mrb[112].mxu0 %vm162_vm0, %v10084_v52 }
 0x2ed   :  { %v5369_v51 = vrot.slane %v2472_v5, 1  ;;  %v4070_v28 = vrot.slane %v2025_v55, 1  ;;  %8795 = vmatmul.mubr.msk.f32.gmra.mrb[112].mxu1 %vm162_vm0, %v12524_v40  ;;  %v2474_v49 = vpop.f32.mrb[7].mxu1  ;;  %2326 = vmatprep.mubr.f32.mxu0 %v16379_v41 }
 0x2ee   :  { %v4485_v44 = vsel %vm3804_vm1, %v4483_v16, %v4484_v1  ;;  %v5372_v57 = vrot.slane %v2474_v49, 1  ;;  %2780 = vmatprep.mubr.f32.mxu1 %v16379_v41  ;;  %v12562_v49 = vld [vmem:[%s16327_s0 + $0x1e0] sm:$0xff] }
 0x2ef   :  { %v4575_v52 = vadd.f32 %v4485_v44, %v11672_v21  ;;  %v5370_v15 = vsel %vm3804_vm1, %v5368_v24, %v5369_v51  ;;  %v4071_v37 = vsel %vm3804_vm1, %v4069_v61, %v4070_v28  ;;  %v2029_v5 = vpop.f32.mrb[8].mxu0  ;;  %v12549_v24 = vld [vmem:[%s16327_s0 + $0x1d8] sm:$0xff] }
 0x2f0   :  { %v5373_v55 = vsel %vm3804_vm1, %v5371_v54, %v5372_v57  ;;  %v2478_v9 = vpop.f32.mrb[8].mxu1  ;;  %v2031_v50 = vpop.f32.mrb[9].mxu0  ;;  %8728 = vmatmul.mubr.msk.f32.gmra.mrb[114].mxu0 %vm162_vm0, %v12486_v23  ;;  %v12538_v34 = vadd.f32 %v4071_v37, %v11616_v60  ;;  %v12541_v16 = vadd.f32 %v5370_v15, %v11625_v38  ;;  %v5203_v38 = vrot.slane %v2029_v5, 1 }
 0x2f1   :  { %v12544_v21 = vadd.f32 %v11628_v33, %v2478_v9  ;;  %8796 = vmatmul.mubr.msk.f32.gmra.mrb[114].mxu1 %vm162_vm0, %v12549_v24  ;;  %2330 = vmatprep.mubr.f32.mxu0 %v16379_v41  ;;  %v2480_v54 = vpop.f32.mrb[9].mxu1  ;;  %v12554_v1 = vadd.f32 %v4653_v29, %v4575_v52  ;;  %v4645_v51 = vrot.slane %v2031_v50, 1 }
 0x2f2   :  { %16528 = vst [vmem:[#allocation55_spill] sm:$0xff] %v12538_v34  ;;  %16529 = vst [vmem:[#allocation53_spill] sm:$0xff] %v12541_v16  ;;  %2786 = vmatprep.mubr.f32.mxu1 %v16379_v41 }
 0x2f3   :  { %16530 = vst [vmem:[#allocation51_spill] sm:$0xff] %v12544_v21  ;;  %16531 = vst [vmem:[#allocation56_spill] sm:$0xff] %v12554_v1  ;;  %v2035_v60 = vpop.f32.mrb[10].mxu0 }
 0x2f4   :  { %v5204_v61 = vrot.slane %v2035_v60, 1  ;;  %v2037_v33 = vpop.f32.mrb[11].mxu0  ;;  %8729 = vmatmul.mubr.msk.f32.gmra.mrb[116].mxu0 %vm162_vm0, %v12499_v30  ;;  %v2484_v9 = vpop.f32.mrb[10].mxu1  ;;  %v16532_v60 = vld [vmem:[#allocation61_spill] sm:$0xff] }
 0x2f5   :  { %v4646_v28 = vrot.slane %v2037_v33, 1  ;;  %8797 = vmatmul.mubr.msk.f32.gmra.mrb[116].mxu1 %vm162_vm0, %v12562_v49  ;;  %2336 = vmatprep.mubr.f32.mxu0 %v16379_v41  ;;  %v2485_v29 = vpop.f32.mrb[11].mxu1 }
 0x2f6   :  { %v5205_v44 = vsel %vm3804_vm1, %v5203_v38, %v5204_v61  ;;  %2792 = vmatprep.mubr.f32.mxu1 %v16379_v41  ;;  %v12580_v38 = vld [vmem:[%s16327_s0 + $0x1e8] sm:$0xff] }
 0x2f7   :  { %v5295_v57 = vadd.f32 %v5205_v44, %v11611_v19  ;;  %v4647_v50 = vsel %vm3804_vm1, %v4645_v51, %v4646_v28  ;;  %v2041_v52 = vpop.f32.mrb[12].mxu0 }
 0x2f8   :  { %v3710_v15 = vadd.f32 %v11618_v22, %v2041_v52  ;;  %v2043_v37 = vpop.f32.mrb[13].mxu0  ;;  %8730 = vmatmul.mubr.msk.f32.gmra.mrb[118].mxu0 %vm162_vm0, %v12514_v32  ;;  %v2488_v5 = vpop.f32.mrb[12].mxu1  ;;  %v12575_v33 = vadd.f32 %v4647_v50, %v16532_v60 }
 0x2f9   :  { %8798 = vmatmul.mubr.msk.f32.gmra.mrb[118].mxu1 %vm162_vm0, %v12580_v38  ;;  %v2490_v19 = vpop.f32.mrb[13].mxu1  ;;  %2342 = vmatprep.mubr.f32.mxu0 %v16379_v41  ;;  %v12585_v22 = vadd.f32 %v5373_v55, %v5295_v57  ;;  %v4081_v9 = vrot.slane %v2488_v5, 1  ;;  %v5365_v50 = vrot.slane %v2043_v37, 1  ;;  %v12595_v55 = vld [vmem:[%s16327_s0 + $0x1f0] sm:$0xff] }
 0x2fa   :  { %16533 = vst [vmem:[#allocation54_spill] sm:$0xff] %v12575_v33  ;;  %v12587_v61 = vadd.f32 %v3710_v15, %v2480_v54  ;;  %2798 = vmatprep.mubr.f32.mxu1 %v16379_v41  ;;  %v4084_v28 = vrot.slane %v2490_v19, 1 }
 0x2fb   :  { %16534 = vst [vmem:[#allocation61_spill] sm:$0xff] %v12585_v22  ;;  %v2047_v51 = vpop.f32.mrb[14].mxu0 }
 0x2fc   :  { %16535 = vst [vmem:[#allocation67_spill] sm:$0xff] %v12587_v61  ;;  %v2494_v29 = vpop.f32.mrb[14].mxu1  ;;  %v2048_v44 = vpop.f32.mrb[15].mxu0  ;;  %8731 = vmatmul.mubr.msk.f32.gmra.mrb[120].mxu0 %vm162_vm0, %v12524_v40 }
 0x2fd   :  { %v4082_v52 = vrot.slane %v2494_v29, 1  ;;  %v5366_v60 = vrot.slane %v2048_v44, 1  ;;  %8799 = vmatmul.mubr.msk.f32.gmra.mrb[120].mxu1 %vm162_vm0, %v12595_v55  ;;  %2348 = vmatprep.mubr.f32.mxu0 %v16379_v41  ;;  %v2496_v54 = vpop.f32.mrb[15].mxu1 }
 0x2fe   :  { %2804 = vmatprep.mubr.f32.mxu1 %v16379_v41  ;;  %v4085_v57 = vrot.slane %v2496_v54, 1 }
 0x2ff   :  { %v4083_v15 = vsel %vm3804_vm1, %v4081_v9, %v4082_v52  ;;  %v5367_v37 = vsel %vm3804_vm1, %v5365_v50, %v5366_v60  ;;  %v2052_v5 = vpop.f32.mrb[16].mxu0 }
 0x300   :  { %v3999_v19 = vadd.f32 %v11643_v4, %v2052_v5  ;;  %v2054_v51 = vpop.f32.mrb[17].mxu0  ;;  %8732 = vmatmul.mubr.msk.f32.gmra.mrb[122].mxu0 %vm162_vm0, %v12549_v24  ;;  %v2500_v29 = vpop.f32.mrb[16].mxu1  ;;  %v12607_v44 = vsel %vm3804_vm1, %v4084_v28, %v4085_v57  ;;  %v12610_v16 = vadd.f32 %v5367_v37, %v11587_v2  ;;  %v12613_v54 = vadd.f32 %v4083_v15, %v11797_v11  ;;  %v12621_v4 = vld [vmem:[%s16327_s0 + $0x1f8] sm:$0xff]  ;;  %v12632_v11 = vld [vmem:[%s16327_s0] sm:$0xff]  ;;  %v12649_v5 = vld [vmem:[%s16327_s0 + $0x10] sm:$0xff] }
 0x301   :  { %v12616_v9 = vadd.f32 %v11574_v6, %v2054_v51  ;;  %8800 = vmatmul.mubr.msk.f32.gmra.mrb[122].mxu1 %vm162_vm0, %v12621_v4  ;;  %v2502_v50 = vpop.f32.mrb[17].mxu1  ;;  %2354 = vmatprep.mubr.f32.mxu0 %v16379_v41  ;;  %v4657_v6 = vrot.slane %v2500_v29, 1 }
 0x302   :  { %16536 = vst [vmem:[#allocation68_spill] sm:$0xff] %v12610_v16  ;;  %16537 = vst [vmem:[#allocation69_spill] sm:$0xff] %v12613_v54  ;;  %v12627_v2 = vadd.f32 %v12476_v59, %v3999_v19  ;;  %9219 = vmatprep.mubr.msk.f32.mxu1 %vm162_vm0, %v12632_v11  ;;  %v4660_v52 = vrot.slane %v2502_v50, 1  ;;  %v12641_v59 = vld [vmem:[%s16327_s0 + $0x8] sm:$0xff]  ;;  %v12663_v54 = vld [vmem:[%s16327_s0 + $0x18] sm:$0xff] }
 0x303   :  { %16538 = vst [vmem:[#allocation70_spill] sm:$0xff] %v12616_v9  ;;  %v2058_v28 = vpop.f32.mrb[18].mxu0  ;;  %v12680_v9 = vld [vmem:[%s16327_s0 + $0x28] sm:$0xff] }
 0x304   :  { %16539 = vst [vmem:[#allocation71_spill] sm:$0xff] %v12627_v2  ;;  %v2506_v60 = vpop.f32.mrb[18].mxu1  ;;  %v2059_v57 = vpop.f32.mrb[19].mxu0  ;;  %8733 = vmatmul.mubr.msk.f32.gmra.mrb[124].mxu0 %vm162_vm0, %v12562_v49 }
 0x305   :  { %v4658_v15 = vrot.slane %v2506_v60, 1  ;;  %9220 = vmatmul.mubr.msk.f32.vlgmr.msra.gmra.mrb[124].mxu1 %vm162_vm0, %v12641_v59  ;;  %2360 = vmatprep.mubr.f32.mxu0 %v16379_v41  ;;  %v2508_v37 = vpop.f32.mrb[19].mxu1 }
 0x306   :  { %9222 = vmatprep.mubr.msk.f32.mxu1 %vm162_vm0, %v12649_v5  ;;  %v4661_v19 = vrot.slane %v2508_v37, 1 }
 0x307   :  { %v4659_v51 = vsel %vm3804_vm1, %v4657_v6, %v4658_v15  ;;  %v2062_v29 = vpop.f32.mrb[20].mxu0 }
 0x308   :  { %v12655_v50 = vadd.f32 %v4659_v51, %v11828_v25  ;;  %v2064_v28 = vpop.f32.mrb[21].mxu0  ;;  %8734 = vmatmul.mubr.msk.f32.gmra.mrb[126].mxu0 %vm162_vm0, %v12580_v38  ;;  %v4662_v60 = vsel %vm3804_vm1, %v4660_v52, %v4661_v19  ;;  %v2512_v57 = vpop.f32.mrb[20].mxu1  ;;  %v12671_v25 = vld [vmem:[%s16327_s0 + $0x20] sm:$0xff]  ;;  %v4492_v37 = vrot.slane %v2062_v29, 1 }
 0x309   :  { %9223 = vmatmul.mubr.msk.f32.gmra.mrb[126].mxu1 %vm162_vm0, %v12663_v54  ;;  %v2514_v6 = vpop.f32.mrb[21].mxu1  ;;  %2365 = vmatprep.mubr.f32.mxu0 %v16379_v41  ;;  %v5377_v52 = vrot.slane %v2512_v57, 1  ;;  %v4078_v33 = vrot.slane %v2064_v28, 1  ;;  %v12689_v28 = vld [vmem:[%s16327_s0 + $0x30] sm:$0xff] }
 0x30a   :  { %16540 = vst [vmem:[#allocation72_spill] sm:$0xff] %v12655_v50  ;;  %9225 = vmatprep.mubr.msk.f32.mxu1 %vm162_vm0, %v12671_v25  ;;  %v5380_v19 = vrot.slane %v2514_v6, 1 }
 0x30b   :  { %v2068_v15 = vpop.f32.mrb[22].mxu0 }
 0x30c   :  { %v4493_v51 = vrot.slane %v2068_v15, 1  ;;  %v2518_v50 = vpop.f32.mrb[22].mxu1  ;;  %v2070_v16 = vpop.f32.mrb[23].mxu0  ;;  %8735 = vmatmul.mubr.msk.f32.gmra.mrb[128].mxu0 %vm162_vm0, %v12595_v55 }
 0x30d   :  { %v5378_v34 = vrot.slane %v2518_v50, 1  ;;  %v4079_v21 = vrot.slane %v2070_v16, 1  ;;  %9226 = vmatmul.mubr.msk.f32.gmra.mrb[128].mxu1 %vm162_vm0, %v12680_v9  ;;  %v2520_v57 = vpop.f32.mrb[23].mxu1  ;;  %2371 = vmatprep.mubr.f32.mxu0 %v16379_v41 }
 0x30e   :  { %v4494_v29 = vsel %vm3804_vm1, %v4492_v37, %v4493_v51  ;;  %v5381_v6 = vrot.slane %v2520_v57, 1  ;;  %9228 = vmatprep.mubr.msk.f32.mxu1 %vm162_vm0, %v12689_v28 }
 0x30f   :  { %v4578_v16 = vadd.f32 %v4494_v29, %v11820_v62  ;;  %v5379_v50 = vsel %vm3804_vm1, %v5377_v52, %v5378_v34  ;;  %v4080_v15 = vsel %vm3804_vm1, %v4078_v33, %v4079_v21  ;;  %v2074_v22 = vpop.f32.mrb[24].mxu0  ;;  %v12711_v34 = vld [vmem:[%s16327_s0 + $0x38] sm:$0xff] }
 0x310   :  { %v12697_v1 = vadd.f32 %v5379_v50, %v11756_v27  ;;  %v5382_v37 = vsel %vm3804_vm1, %v5380_v19, %v5381_v6  ;;  %v2524_v51 = vpop.f32.mrb[24].mxu1  ;;  %v2076_v57 = vpop.f32.mrb[25].mxu0  ;;  %8736 = vmatmul.mubr.msk.f32.gmra.mrb[130].mxu0 %vm162_vm0, %v12621_v4  ;;  %v12703_v2 = vadd.f32 %v4080_v15, %v11747_v56  ;;  %v12721_v56 = vld [vmem:[%s16327_s0 + $0x40] sm:$0xff]  ;;  %v5212_v33 = vrot.slane %v2074_v22, 1 }
 0x311   :  { %v12706_v62 = vadd.f32 %v11759_v10, %v2524_v51  ;;  %9229 = vmatmul.mubr.msk.f32.gmra.mrb[130].mxu1 %vm162_vm0, %v12711_v34  ;;  %2873 = vmatprep.mubr.f32.mxu0 %v16379_v41  ;;  %v2526_v27 = vpop.f32.mrb[25].mxu1  ;;  %v12716_v21 = vadd.f32 %v4662_v60, %v4578_v16  ;;  %v4654_v6 = vrot.slane %v2076_v57, 1  ;;  %v12730_v60 = vld [vmem:[%s16327_s0 + $0x48] sm:$0xff] }
 0x312   :  { %16541 = vst [vmem:[#allocation73_spill] sm:$0xff] %v12697_v1  ;;  %16542 = vst [vmem:[#allocation74_spill] sm:$0xff] %v12703_v2  ;;  %9231 = vmatprep.mubr.msk.f32.mxu1 %vm162_vm0, %v12721_v56 }
 0x313   :  { %16543 = vst [vmem:[#allocation75_spill] sm:$0xff] %v12706_v62  ;;  %16544 = vst [vmem:[#allocation76_spill] sm:$0xff] %v12716_v21  ;;  %v2080_v10 = vpop.f32.mrb[26].mxu0  ;;  %v12866_v62 = vld [vmem:[%s16327_s0 + $0xa8] sm:$0xff] }
 0x314   :  { %v5213_v52 = vrot.slane %v2080_v10, 1  ;;  %v2082_v19 = vpop.f32.mrb[27].mxu0  ;;  %8801 = vmatmul.mubr.msk.f32.vlgmr.msra.gmra.mrb[132].mxu0 %vm162_vm0, %v12632_v11  ;;  %v2530_v29 = vpop.f32.mrb[26].mxu1  ;;  %v12739_v11 = vld [vmem:[%s16327_s0 + $0x50] sm:$0xff] }
 0x315   :  { %v4655_v50 = vrot.slane %v2082_v19, 1  ;;  %9232 = vmatmul.mubr.msk.f32.gmra.mrb[132].mxu1 %vm162_vm0, %v12730_v60  ;;  %2879 = vmatprep.mubr.f32.mxu0 %v16379_v41  ;;  %v2531_v16 = vpop.f32.mrb[27].mxu1  ;;  %v12754_v29 = vld [vmem:[%s16327_s0 + $0x58] sm:$0xff] }
 0x316   :  { %v5214_v22 = vsel %vm3804_vm1, %v5212_v33, %v5213_v52  ;;  %9234 = vmatprep.mubr.msk.f32.mxu1 %vm162_vm0, %v12739_v11 }
 0x317   :  { %v5298_v15 = vadd.f32 %v5214_v22, %v11743_v0  ;;  %v4656_v51 = vsel %vm3804_vm1, %v4654_v6, %v4655_v50  ;;  %v2086_v57 = vpop.f32.mrb[28].mxu0 }
 0x318   :  { %v3713_v10 = vadd.f32 %v11749_v48, %v2086_v57  ;;  %v2088_v19 = vpop.f32.mrb[29].mxu0  ;;  %8802 = vmatmul.mubr.msk.f32.gmra.mrb[134].mxu0 %vm162_vm0, %v12641_v59  ;;  %v2534_v33 = vpop.f32.mrb[28].mxu1  ;;  %v12749_v52 = vadd.f32 %v4656_v51, %v11666_v47  ;;  %v12766_v47 = vld [vmem:[%s16327_s0 + $0x60] sm:$0xff]  ;;  %v12775_v57 = vld [vmem:[%s16327_s0 + $0x68] sm:$0xff] }
 0x319   :  { %9235 = vmatmul.mubr.msk.f32.gmra.mrb[134].mxu1 %vm162_vm0, %v12754_v29  ;;  %v2536_v0 = vpop.f32.mrb[29].mxu1  ;;  %2885 = vmatprep.mubr.f32.mxu0 %v16379_v41  ;;  %v12759_v48 = vadd.f32 %v5382_v37, %v5298_v15  ;;  %v4090_v59 = vrot.slane %v2534_v33, 1  ;;  %v5374_v37 = vrot.slane %v2088_v19, 1  ;;  %v12783_v33 = vld [vmem:[%s16327_s0 + $0x70] sm:$0xff] }
 0x31a   :  { %16545 = vst [vmem:[#allocation77_spill] sm:$0xff] %v12749_v52  ;;  %v12761_v6 = vadd.f32 %v3713_v10, %v2526_v27  ;;  %9237 = vmatprep.mubr.msk.f32.mxu1 %vm162_vm0, %v12766_v47  ;;  %v4093_v16 = vrot.slane %v2536_v0, 1 }
 0x31b   :  { %16546 = vst [vmem:[#allocation78_spill] sm:$0xff] %v12759_v48  ;;  %v2092_v50 = vpop.f32.mrb[30].mxu0 }
 0x31c   :  { %16547 = vst [vmem:[#allocation79_spill] sm:$0xff] %v12761_v6  ;;  %v2540_v22 = vpop.f32.mrb[30].mxu1  ;;  %v2093_v51 = vpop.f32.mrb[31].mxu0  ;;  %8803 = vmatmul.mubr.msk.f32.gmra.mrb[136].mxu0 %vm162_vm0, %v12649_v5  ;;  %v16584_v6 = vld [vmem:[#allocation65_spill] sm:$0xff] }
 0x31d   :  { %v4091_v15 = vrot.slane %v2540_v22, 1  ;;  %v5375_v27 = vrot.slane %v2093_v51, 1  ;;  %9238 = vmatmul.mubr.msk.f32.gmra.mrb[136].mxu1 %vm162_vm0, %v12775_v57  ;;  %2891 = vmatprep.mubr.f32.mxu0 %v16379_v41  ;;  %v2542_v10 = vpop.f32.mrb[31].mxu1 }
 0x31e   :  { %9240 = vmatprep.mubr.msk.f32.mxu1 %vm162_vm0, %v12783_v33  ;;  %v4094_v5 = vrot.slane %v2542_v10, 1 }
 0x31f   :  { %v4092_v19 = vsel %vm3804_vm1, %v4090_v59, %v4091_v15  ;;  %v5376_v0 = vsel %vm3804_vm1, %v5374_v37, %v5375_v27  ;;  %v2097_v50 = vpop.f32.mrb[32].mxu0 }
 0x320   :  { %v12790_v22 = vadd.f32 %v4092_v19, %v11908_v42  ;;  %v4002_v51 = vadd.f32 %v11790_v45, %v2097_v50  ;;  %v2099_v1 = vpop.f32.mrb[33].mxu0  ;;  %v12794_v52 = vsel %vm3804_vm1, %v4093_v16, %v4094_v5  ;;  %8804 = vmatmul.mubr.msk.f32.gmra.mrb[138].mxu0 %vm162_vm0, %v12663_v54  ;;  %v2546_v2 = vpop.f32.mrb[32].mxu1  ;;  %v12799_v10 = vadd.f32 %v5376_v0, %v11695_v13  ;;  %v12807_v42 = vld [vmem:[%s16327_s0 + $0x78] sm:$0xff]  ;;  %v12818_v13 = vld [vmem:[%s16327_s0 + $0x80] sm:$0xff] }
 0x321   :  { %v12802_v59 = vadd.f32 %v11700_v53, %v2099_v1  ;;  %9241 = vmatmul.mubr.msk.f32.gmra.mrb[138].mxu1 %vm162_vm0, %v12807_v42  ;;  %v2548_v45 = vpop.f32.mrb[33].mxu1  ;;  %2897 = vmatprep.mubr.f32.mxu0 %v16379_v41  ;;  %v4666_v53 = vrot.slane %v2546_v2, 1  ;;  %v12835_v2 = vld [vmem:[%s16327_s0 + $0x90] sm:$0xff] }
 0x322   :  { %16548 = vst [vmem:[#allocation80_spill] sm:$0xff] %v12790_v22  ;;  %16549 = vst [vmem:[#allocation81_spill] sm:$0xff] %v12799_v10  ;;  %v12813_v54 = vadd.f32 %v12607_v44, %v4002_v51  ;;  %9243 = vmatprep.mubr.msk.f32.mxu1 %vm162_vm0, %v12818_v13  ;;  %v4669_v16 = vrot.slane %v2548_v45, 1  ;;  %v12827_v44 = vld [vmem:[%s16327_s0 + $0x88] sm:$0xff] }
 0x323   :  { %16550 = vst [vmem:[#allocation82_spill] sm:$0xff] %v12802_v59  ;;  %v2103_v1 = vpop.f32.mrb[34].mxu0 }
 0x324   :  { %16551 = vst [vmem:[#allocation83_spill] sm:$0xff] %v12813_v54  ;;  %v2552_v37 = vpop.f32.mrb[34].mxu1  ;;  %v2104_v15 = vpop.f32.mrb[35].mxu0  ;;  %8805 = vmatmul.mubr.msk.f32.gmra.mrb[140].mxu0 %vm162_vm0, %v12671_v25  ;;  %v16572_v54 = vld [vmem:[#allocation9_spill] sm:$0xff] }
 0x325   :  { %v4667_v27 = vrot.slane %v2552_v37, 1  ;;  %9244 = vmatmul.mubr.msk.f32.gmra.mrb[140].mxu1 %vm162_vm0, %v12827_v44  ;;  %2903 = vmatprep.mubr.f32.mxu0 %v16379_v41  ;;  %v2554_v5 = vpop.f32.mrb[35].mxu1  ;;  %v12849_v37 = vld [vmem:[%s16327_s0 + $0x98] sm:$0xff] }
 0x326   :  { %9246 = vmatprep.mubr.msk.f32.mxu1 %vm162_vm0, %v12835_v2  ;;  %v4670_v25 = vrot.slane %v2554_v5, 1 }
 0x327   :  { %v4668_v19 = vsel %vm3804_vm1, %v4666_v53, %v4667_v27  ;;  %v2107_v0 = vpop.f32.mrb[36].mxu0 }
 0x328   :  { %v12841_v50 = vadd.f32 %v4668_v19, %v11938_v46  ;;  %v2109_v51 = vpop.f32.mrb[37].mxu0  ;;  %v4671_v45 = vsel %vm3804_vm1, %v4669_v16, %v4670_v25  ;;  %8806 = vmatmul.mubr.msk.f32.gmra.mrb[142].mxu0 %vm162_vm0, %v12680_v9  ;;  %v2558_v1 = vpop.f32.mrb[36].mxu1  ;;  %v12857_v46 = vld [vmem:[%s16327_s0 + $0xa0] sm:$0xff]  ;;  %v4501_v15 = vrot.slane %v2107_v0, 1 }
 0x329   :  { %9247 = vmatmul.mubr.msk.f32.gmra.mrb[142].mxu1 %vm162_vm0, %v12849_v37  ;;  %v2560_v53 = vpop.f32.mrb[37].mxu1  ;;  %2909 = vmatprep.mubr.f32.mxu0 %v16379_v41  ;;  %v5386_v9 = vrot.slane %v2558_v1, 1 }
 0x32a   :  { %16552 = vst [vmem:[#allocation84_spill] sm:$0xff] %v12841_v50  ;;  %9249 = vmatprep.mubr.msk.f32.mxu1 %vm162_vm0, %v12857_v46  ;;  %v5389_v27 = vrot.slane %v2560_v53, 1  ;;  %v4087_v50 = vrot.slane %v2109_v51, 1 }
 0x32b   :  { %v2113_v16 = vpop.f32.mrb[38].mxu0 }
 0x32c   :  { %v4502_v5 = vrot.slane %v2113_v16, 1  ;;  %v2564_v25 = vpop.f32.mrb[38].mxu1  ;;  %v2115_v19 = vpop.f32.mrb[39].mxu0  ;;  %8807 = vmatmul.mubr.msk.f32.gmra.mrb[144].mxu0 %vm162_vm0, %v12689_v28  ;;  %v12875_v28 = vld [vmem:[%s16327_s0 + $0xb0] sm:$0xff] }
 0x32d   :  { %v5387_v22 = vrot.slane %v2564_v25, 1  ;;  %v4088_v10 = vrot.slane %v2115_v19, 1  ;;  %9250 = vmatmul.mubr.msk.f32.gmra.mrb[144].mxu1 %vm162_vm0, %v12866_v62  ;;  %v2566_v1 = vpop.f32.mrb[39].mxu1  ;;  %2915 = vmatprep.mubr.f32.mxu0 %v16379_v41 }
 0x32e   :  { %v4503_v0 = vsel %vm3804_vm1, %v4501_v15, %v4502_v5  ;;  %v5390_v53 = vrot.slane %v2566_v1, 1  ;;  %9252 = vmatprep.mubr.msk.f32.mxu1 %vm162_vm0, %v12875_v28 }
 0x32f   :  { %v4581_v51 = vadd.f32 %v4503_v0, %v11930_v7  ;;  %v5388_v16 = vsel %vm3804_vm1, %v5386_v9, %v5387_v22  ;;  %v4089_v25 = vsel %vm3804_vm1, %v4087_v50, %v4088_v10  ;;  %v2119_v19 = vpop.f32.mrb[40].mxu0  ;;  %v12897_v22 = vld [vmem:[%s16327_s0 + $0xb8] sm:$0xff] }
 0x330   :  { %v12883_v59 = vadd.f32 %v5388_v16, %v11884_v39  ;;  %v5391_v15 = vsel %vm3804_vm1, %v5389_v27, %v5390_v53  ;;  %v2570_v5 = vpop.f32.mrb[40].mxu1  ;;  %v2121_v1 = vpop.f32.mrb[41].mxu0  ;;  %8808 = vmatmul.mubr.msk.f32.gmra.mrb[146].mxu0 %vm162_vm0, %v12711_v34  ;;  %v12889_v48 = vadd.f32 %v4089_v25, %v11875_v14  ;;  %v12907_v14 = vld [vmem:[%s16327_s0 + $0xc0] sm:$0xff]  ;;  %v5221_v34 = vrot.slane %v2119_v19, 1 }
 0x331   :  { %v12892_v7 = vadd.f32 %v11887_v18, %v2570_v5  ;;  %9253 = vmatmul.mubr.msk.f32.gmra.mrb[146].mxu1 %vm162_vm0, %v12897_v22  ;;  %2921 = vmatprep.mubr.f32.mxu0 %v16379_v41  ;;  %v2572_v39 = vpop.f32.mrb[41].mxu1  ;;  %v12902_v10 = vadd.f32 %v4671_v45, %v4581_v51  ;;  %v4663_v0 = vrot.slane %v2121_v1, 1  ;;  %v12916_v45 = vld [vmem:[%s16327_s0 + $0xc8] sm:$0xff] }
 0x332   :  { %16553 = vst [vmem:[#allocation85_spill] sm:$0xff] %v12883_v59  ;;  %16554 = vst [vmem:[#allocation86_spill] sm:$0xff] %v12889_v48  ;;  %9255 = vmatprep.mubr.msk.f32.mxu1 %vm162_vm0, %v12907_v14 }
 0x333   :  { %16555 = vst [vmem:[#allocation87_spill] sm:$0xff] %v12892_v7  ;;  %16556 = vst [vmem:[#allocation88_spill] sm:$0xff] %v12902_v10  ;;  %v2125_v18 = vpop.f32.mrb[42].mxu0  ;;  %v16568_v10 = vld [vmem:[#allocation4_spill] sm:$0xff] }
 0x334   :  { %v5222_v50 = vrot.slane %v2125_v18, 1  ;;  %v2127_v9 = vpop.f32.mrb[43].mxu0  ;;  %8809 = vmatmul.mubr.msk.f32.gmra.mrb[148].mxu0 %vm162_vm0, %v12721_v56  ;;  %v2576_v27 = vpop.f32.mrb[42].mxu1  ;;  %v12925_v56 = vld [vmem:[%s16327_s0 + $0xd0] sm:$0xff] }
 0x335   :  { %v4664_v53 = vrot.slane %v2127_v9, 1  ;;  %9256 = vmatmul.mubr.msk.f32.gmra.mrb[148].mxu1 %vm162_vm0, %v12916_v45  ;;  %2927 = vmatprep.mubr.f32.mxu0 %v16379_v41  ;;  %v2577_v51 = vpop.f32.mrb[43].mxu1  ;;  %v12940_v9 = vld [vmem:[%s16327_s0 + $0xd8] sm:$0xff] }
 0x336   :  { %v5223_v16 = vsel %vm3804_vm1, %v5221_v34, %v5222_v50  ;;  %9258 = vmatprep.mubr.msk.f32.mxu1 %vm162_vm0, %v12925_v56 }
 0x337   :  { %v5301_v25 = vadd.f32 %v5223_v16, %v11871_v43  ;;  %v4665_v19 = vsel %vm3804_vm1, %v4663_v0, %v4664_v53  ;;  %v2131_v5 = vpop.f32.mrb[44].mxu0 }
 0x338   :  { %v3716_v1 = vadd.f32 %v11877_v17, %v2131_v5  ;;  %v2133_v18 = vpop.f32.mrb[45].mxu0  ;;  %8810 = vmatmul.mubr.msk.f32.gmra.mrb[150].mxu0 %vm162_vm0, %v12730_v60  ;;  %v2580_v34 = vpop.f32.mrb[44].mxu1  ;;  %v12935_v50 = vadd.f32 %v4665_v19, %v11814_v63  ;;  %v12952_v63 = vld [vmem:[%s16327_s0 + $0xe0] sm:$0xff]  ;;  %v12961_v19 = vld [vmem:[%s16327_s0 + $0xe8] sm:$0xff] }
 0x339   :  { %9259 = vmatmul.mubr.msk.f32.gmra.mrb[150].mxu1 %vm162_vm0, %v12940_v9  ;;  %v2582_v43 = vpop.f32.mrb[45].mxu1  ;;  %2933 = vmatprep.mubr.f32.mxu0 %v16379_v41  ;;  %v12945_v17 = vadd.f32 %v5391_v15, %v5301_v25  ;;  %v4099_v60 = vrot.slane %v2580_v34, 1  ;;  %v5383_v15 = vrot.slane %v2133_v18, 1 }
 0x33a   :  { %16557 = vst [vmem:[#allocation89_spill] sm:$0xff] %v12935_v50  ;;  %v12947_v27 = vadd.f32 %v3716_v1, %v2572_v39  ;;  %9261 = vmatprep.mubr.msk.f32.mxu1 %vm162_vm0, %v12952_v63  ;;  %v4102_v53 = vrot.slane %v2582_v43, 1  ;;  %v12969_v1 = vld [vmem:[%s16327_s0 + $0xf0] sm:$0xff] }
 0x33b   :  { %16558 = vst [vmem:[#allocation90_spill] sm:$0xff] %v12945_v17  ;;  %v2137_v0 = vpop.f32.mrb[46].mxu0 }
 0x33c   :  { %16559 = vst [vmem:[#allocation91_spill] sm:$0xff] %v12947_v27  ;;  %v2586_v51 = vpop.f32.mrb[46].mxu1  ;;  %v2138_v16 = vpop.f32.mrb[47].mxu0  ;;  %8811 = vmatmul.mubr.msk.f32.gmra.mrb[152].mxu0 %vm162_vm0, %v12739_v11  ;;  %v16570_v27 = vld [vmem:[#allocation5_spill] sm:$0xff] }
 0x33d   :  { %v4100_v25 = vrot.slane %v2586_v51, 1  ;;  %v5384_v39 = vrot.slane %v2138_v16, 1  ;;  %9262 = vmatmul.mubr.msk.f32.gmra.mrb[152].mxu1 %vm162_vm0, %v12961_v19  ;;  %2939 = vmatprep.mubr.f32.mxu0 %v16379_v41  ;;  %v2588_v5 = vpop.f32.mrb[47].mxu1 }
 0x33e   :  { %9264 = vmatprep.mubr.msk.f32.mxu1 %vm162_vm0, %v12969_v1  ;;  %v4103_v11 = vrot.slane %v2588_v5, 1 }
 0x33f   :  { %v4101_v18 = vsel %vm3804_vm1, %v4099_v60, %v4100_v25  ;;  %v5385_v34 = vsel %vm3804_vm1, %v5383_v15, %v5384_v39  ;;  %v2142_v43 = vpop.f32.mrb[48].mxu0  ;;  %v16562_v60 = vld [vmem:[#allocation63_spill] sm:$0xff] }
 0x340   :  { %v12976_v0 = vadd.f32 %v4101_v18, %v12017_v58  ;;  %v4005_v51 = vadd.f32 %v11901_v8, %v2142_v43  ;;  %v2144_v16 = vpop.f32.mrb[49].mxu0  ;;  %v12980_v59 = vsel %vm3804_vm1, %v4102_v53, %v4103_v11  ;;  %8812 = vmatmul.mubr.msk.f32.gmra.mrb[154].mxu0 %vm162_vm0, %v12754_v29  ;;  %v2592_v50 = vpop.f32.mrb[48].mxu1  ;;  %v12985_v5 = vadd.f32 %v5385_v34, %v11841_v3  ;;  %v12993_v58 = vld [vmem:[%s16327_s0 + $0xf8] sm:$0xff]  ;;  %v13004_v3 = vld [vmem:[%s16327_s0 + $0x100] sm:$0xff] }
 0x341   :  { %v12988_v25 = vadd.f32 %v16562_v60, %v2144_v16  ;;  %9265 = vmatmul.mubr.msk.f32.gmra.mrb[154].mxu1 %vm162_vm0, %v12993_v58  ;;  %v2594_v8 = vpop.f32.mrb[49].mxu1  ;;  %2945 = vmatprep.mubr.f32.mxu0 %v16379_v41  ;;  %v4675_v53 = vrot.slane %v2592_v50, 1  ;;  %v13021_v50 = vld [vmem:[%s16327_s0 + $0x110] sm:$0xff] }
 0x342   :  { %16560 = vst [vmem:[#allocation92_spill] sm:$0xff] %v12976_v0  ;;  %16561 = vst [vmem:[#allocation93_spill] sm:$0xff] %v12985_v5  ;;  %v12999_v29 = vadd.f32 %v12794_v52, %v4005_v51  ;;  %9267 = vmatprep.mubr.msk.f32.mxu1 %vm162_vm0, %v13004_v3  ;;  %v4678_v39 = vrot.slane %v2594_v8, 1  ;;  %v13013_v52 = vld [vmem:[%s16327_s0 + $0x108] sm:$0xff]  ;;  %v16565_v60 = vld [vmem:[#allocation8_spill] sm:$0xff] }
 0x343   :  { %16563 = vst [vmem:[#allocation63_spill] sm:$0xff] %v12988_v25  ;;  %v2148_v15 = vpop.f32.mrb[50].mxu0  ;;  %v13035_v0 = vld [vmem:[%s16327_s0 + $0x118] sm:$0xff]  ;;  %v13052_v25 = vld [vmem:[%s16327_s0 + $0x128] sm:$0xff] }
 0x344   :  { %16564 = vst [vmem:[#allocation94_spill] sm:$0xff] %v12999_v29  ;;  %v2598_v11 = vpop.f32.mrb[50].mxu1  ;;  %v2149_v18 = vpop.f32.mrb[51].mxu0  ;;  %8813 = vmatmul.mubr.msk.f32.gmra.mrb[156].mxu0 %vm162_vm0, %v12766_v47 }
 0x345   :  { %v4676_v34 = vrot.slane %v2598_v11, 1  ;;  %9268 = vmatmul.mubr.msk.f32.gmra.mrb[156].mxu1 %vm162_vm0, %v13013_v52  ;;  %2951 = vmatprep.mubr.f32.mxu0 %v16379_v41  ;;  %v2600_v43 = vpop.f32.mrb[51].mxu1 }
 0x346   :  { %9270 = vmatprep.mubr.msk.f32.mxu1 %vm162_vm0, %v13021_v50  ;;  %v4679_v47 = vrot.slane %v2600_v43, 1 }
 0x347   :  { %v4677_v51 = vsel %vm3804_vm1, %v4675_v53, %v4676_v34  ;;  %v2152_v16 = vpop.f32.mrb[52].mxu0  ;;  %v13043_v34 = vld [vmem:[%s16327_s0 + $0x120] sm:$0xff] }
 0x348   :  { %v13027_v8 = vadd.f32 %v4677_v51, %v16565_v60  ;;  %v2154_v15 = vpop.f32.mrb[53].mxu0  ;;  %v4680_v11 = vsel %vm3804_vm1, %v4678_v39, %v4679_v47  ;;  %8814 = vmatmul.mubr.msk.f32.gmra.mrb[158].mxu0 %vm162_vm0, %v12775_v57  ;;  %v2604_v18 = vpop.f32.mrb[52].mxu1  ;;  %v4510_v43 = vrot.slane %v2152_v16, 1 }
 0x349   :  { %9271 = vmatmul.mubr.msk.f32.gmra.mrb[158].mxu1 %vm162_vm0, %v13035_v0  ;;  %v2606_v53 = vpop.f32.mrb[53].mxu1  ;;  %2957 = vmatprep.mubr.f32.mxu0 %v16379_v41  ;;  %v5395_v57 = vrot.slane %v2604_v18, 1  ;;  %v4096_v5 = vrot.slane %v2154_v15, 1 }
 0x34a   :  { %16566 = vst [vmem:[#allocation8_spill] sm:$0xff] %v13027_v8  ;;  %9273 = vmatprep.mubr.msk.f32.mxu1 %vm162_vm0, %v13043_v34  ;;  %v5398_v47 = vrot.slane %v2606_v53, 1 }
 0x34b   :  { %v2158_v39 = vpop.f32.mrb[54].mxu0 }
 0x34c   :  { %v4511_v51 = vrot.slane %v2158_v39, 1  ;;  %v2610_v60 = vpop.f32.mrb[54].mxu1  ;;  %v2160_v8 = vpop.f32.mrb[55].mxu0  ;;  %8815 = vmatmul.mubr.msk.f32.gmra.mrb[160].mxu0 %vm162_vm0, %v12783_v33  ;;  %v13061_v33 = vld [vmem:[%s16327_s0 + $0x130] sm:$0xff] }
 0x34d   :  { %v5396_v48 = vrot.slane %v2610_v60, 1  ;;  %v4097_v7 = vrot.slane %v2160_v8, 1  ;;  %9274 = vmatmul.mubr.msk.f32.gmra.mrb[160].mxu1 %vm162_vm0, %v13052_v25  ;;  %v2612_v18 = vpop.f32.mrb[55].mxu1  ;;  %2963 = vmatprep.mubr.f32.mxu0 %v16379_v41  ;;  %v16567_v8 = vld [vmem:[#allocation10_spill] sm:$0xff] }
 0x34e   :  { %v4512_v16 = vsel %vm3804_vm1, %v4510_v43, %v4511_v51  ;;  %v5399_v53 = vrot.slane %v2612_v18, 1  ;;  %9276 = vmatprep.mubr.msk.f32.mxu1 %vm162_vm0, %v13061_v33 }
 0x34f   :  { %v4584_v15 = vadd.f32 %v4512_v16, %v16567_v8  ;;  %v5397_v39 = vsel %vm3804_vm1, %v5395_v57, %v5396_v48  ;;  %v4098_v60 = vsel %vm3804_vm1, %v4096_v5, %v4097_v7  ;;  %v2164_v17 = vpop.f32.mrb[56].mxu0  ;;  %v13083_v48 = vld [vmem:[%s16327_s0 + $0x138] sm:$0xff] }
 0x350   :  { %v13069_v29 = vadd.f32 %v5397_v39, %v16568_v10  ;;  %v5400_v43 = vsel %vm3804_vm1, %v5398_v47, %v5399_v53  ;;  %v2616_v51 = vpop.f32.mrb[56].mxu1  ;;  %v2166_v18 = vpop.f32.mrb[57].mxu0  ;;  %8816 = vmatmul.mubr.msk.f32.gmra.mrb[162].mxu0 %vm162_vm0, %v12807_v42  ;;  %v13075_v21 = vadd.f32 %v4098_v60, %v16570_v27  ;;  %v13093_v42 = vld [vmem:[%s16327_s0 + $0x140] sm:$0xff]  ;;  %v5230_v27 = vrot.slane %v2164_v17, 1  ;;  %v16575_v39 = vld [vmem:[#allocation12_spill] sm:$0xff] }
 0x351   :  { %v13078_v16 = vadd.f32 %v16572_v54, %v2616_v51  ;;  %9277 = vmatmul.mubr.msk.f32.gmra.mrb[162].mxu1 %vm162_vm0, %v13083_v48  ;;  %2969 = vmatprep.mubr.f32.mxu0 %v16379_v41  ;;  %v2618_v7 = vpop.f32.mrb[57].mxu1  ;;  %v13088_v10 = vadd.f32 %v4680_v11, %v4584_v15  ;;  %v4672_v53 = vrot.slane %v2166_v18, 1  ;;  %v13102_v11 = vld [vmem:[%s16327_s0 + $0x148] sm:$0xff] }
 0x352   :  { %16569 = vst [vmem:[#allocation10_spill] sm:$0xff] %v13069_v29  ;;  %16571 = vst [vmem:[#allocation4_spill] sm:$0xff] %v13075_v21  ;;  %9279 = vmatprep.mubr.msk.f32.mxu1 %vm162_vm0, %v13093_v42  ;;  %v13126_v29 = vld [vmem:[%s16327_s0 + $0x158] sm:$0xff]  ;;  %v16583_v21 = vld [vmem:[#allocation7_spill] sm:$0xff] }
 0x353   :  { %16573 = vst [vmem:[#allocation5_spill] sm:$0xff] %v13078_v16  ;;  %16574 = vst [vmem:[#allocation9_spill] sm:$0xff] %v13088_v10  ;;  %v2170_v54 = vpop.f32.mrb[58].mxu0 }
 0x354   :  { %v5231_v5 = vrot.slane %v2170_v54, 1  ;;  %v2172_v57 = vpop.f32.mrb[59].mxu0  ;;  %8817 = vmatmul.mubr.msk.f32.gmra.mrb[164].mxu0 %vm162_vm0, %v12818_v13  ;;  %v2622_v47 = vpop.f32.mrb[58].mxu1  ;;  %v13111_v13 = vld [vmem:[%s16327_s0 + $0x150] sm:$0xff]  ;;  %v16576_v54 = vld [vmem:[#allocation11_spill] sm:$0xff] }
 0x355   :  { %v4673_v8 = vrot.slane %v2172_v57, 1  ;;  %9280 = vmatmul.mubr.msk.f32.gmra.mrb[164].mxu1 %vm162_vm0, %v13102_v11  ;;  %2975 = vmatprep.mubr.f32.mxu0 %v16379_v41  ;;  %v2623_v15 = vpop.f32.mrb[59].mxu1 }
 0x356   :  { %v5232_v17 = vsel %vm3804_vm1, %v5230_v27, %v5231_v5  ;;  %9282 = vmatprep.mubr.msk.f32.mxu1 %vm162_vm0, %v13111_v13  ;;  %v16577_v5 = vld [vmem:[#allocation64_spill] sm:$0xff] }
 0x357   :  { %v5304_v60 = vadd.f32 %v5232_v17, %v16575_v39  ;;  %v4674_v51 = vsel %vm3804_vm1, %v4672_v53, %v4673_v8  ;;  %v2176_v18 = vpop.f32.mrb[60].mxu0 }
 0x358   :  { %v3719_v57 = vadd.f32 %v16576_v54, %v2176_v18  ;;  %v2178_v47 = vpop.f32.mrb[61].mxu0  ;;  %8818 = vmatmul.mubr.msk.f32.gmra.mrb[166].mxu0 %vm162_vm0, %v12827_v44  ;;  %v2626_v27 = vpop.f32.mrb[60].mxu1  ;;  %v13121_v15 = vadd.f32 %v4674_v51, %v16577_v5  ;;  %v13138_v44 = vld [vmem:[%s16327_s0 + $0x160] sm:$0xff] }
 0x359   :  { %9283 = vmatmul.mubr.msk.f32.gmra.mrb[166].mxu1 %vm162_vm0, %v13126_v29  ;;  %v2628_v53 = vpop.f32.mrb[61].mxu1  ;;  %2981 = vmatprep.mubr.f32.mxu0 %v16379_v41  ;;  %v13131_v8 = vadd.f32 %v5400_v43, %v5304_v60  ;;  %v4108_v39 = vrot.slane %v2626_v27, 1  ;;  %v5392_v43 = vrot.slane %v2178_v47, 1 }
 0x35a   :  { %16578 = vst [vmem:[#allocation12_spill] sm:$0xff] %v13121_v15  ;;  %v13133_v17 = vadd.f32 %v3719_v57, %v2618_v7  ;;  %9285 = vmatprep.mubr.msk.f32.mxu1 %vm162_vm0, %v13138_v44  ;;  %v4111_v18 = vrot.slane %v2628_v53, 1  ;;  %v13147_v57 = vld [vmem:[%s16327_s0 + $0x168] sm:$0xff]  ;;  %v13155_v53 = vld [vmem:[%s16327_s0 + $0x170] sm:$0xff] }
 0x35b   :  { %16579 = vst [vmem:[#allocation11_spill] sm:$0xff] %v13131_v8  ;;  %v2182_v51 = vpop.f32.mrb[62].mxu0 }
 0x35c   :  { %16580 = vst [vmem:[#allocation64_spill] sm:$0xff] %v13133_v17  ;;  %v2632_v54 = vpop.f32.mrb[62].mxu1  ;;  %v2183_v5 = vpop.f32.mrb[63].mxu0  ;;  %8819 = vmatmul.mubr.msk.f32.gmra.mrb[168].mxu0 %vm162_vm0, %v12835_v2 }
 0x35d   :  { %v4109_v60 = vrot.slane %v2632_v54, 1  ;;  %v5393_v7 = vrot.slane %v2183_v5, 1  ;;  %9286 = vmatmul.mubr.msk.f32.gmra.mrb[168].mxu1 %vm162_vm0, %v13147_v57  ;;  %2987 = vmatprep.mubr.f32.mxu0 %v16379_v41  ;;  %v2634_v27 = vpop.f32.mrb[63].mxu1  ;;  %v16581_v5 = vld [vmem:[#allocation17_spill] sm:$0xff] }
 0x35e   :  { %9288 = vmatprep.mubr.msk.f32.mxu1 %vm162_vm0, %v13155_v53  ;;  %v4112_v2 = vrot.slane %v2634_v27, 1 }
 0x35f   :  { %v4110_v47 = vsel %vm3804_vm1, %v4108_v39, %v4109_v60  ;;  %v5394_v51 = vsel %vm3804_vm1, %v5392_v43, %v5393_v7  ;;  %v2187_v54 = vpop.f32.mrb[64].mxu0  ;;  %v16586_v39 = vld [vmem:[#allocation66_spill] sm:$0xff]  ;;  %v13179_v43 = vld [vmem:[%s16327_s0 + $0x178] sm:$0xff] }
 0x360   :  { %v13162_v15 = vadd.f32 %v4110_v47, %v16581_v5  ;;  %v4008_v16 = vadd.f32 %v16583_v21, %v2187_v54  ;;  %v2189_v8 = vpop.f32.mrb[65].mxu0  ;;  %8820 = vmatmul.mubr.msk.f32.gmra.mrb[170].mxu0 %vm162_vm0, %v12849_v37  ;;  %v2638_v10 = vpop.f32.mrb[64].mxu1  ;;  %v13168_v17 = vsel %vm3804_vm1, %v4111_v18, %v4112_v2  ;;  %v13171_v27 = vadd.f32 %v5394_v51, %v16584_v6  ;;  %v13190_v6 = vld [vmem:[%s16327_s0 + $0x180] sm:$0xff] }
 0x361   :  { %v13174_v60 = vadd.f32 %v16586_v39, %v2189_v8  ;;  %9289 = vmatmul.mubr.msk.f32.gmra.mrb[170].mxu1 %vm162_vm0, %v13179_v43  ;;  %v2640_v21 = vpop.f32.mrb[65].mxu1  ;;  %2993 = vmatprep.mubr.f32.mxu0 %v16379_v41  ;;  %v4684_v8 = vrot.slane %v2638_v10, 1  ;;  %v13207_v10 = vld [vmem:[%s16327_s0 + $0x190] sm:$0xff]  ;;  %v16591_v39 = vld [vmem:[#allocation18_spill] sm:$0xff] }
 0x362   :  { %16582 = vst [vmem:[#allocation17_spill] sm:$0xff] %v13162_v15  ;;  %16585 = vst [vmem:[#allocation7_spill] sm:$0xff] %v13171_v27  ;;  %v13185_v37 = vadd.f32 %v12980_v59, %v4008_v16  ;;  %9291 = vmatprep.mubr.msk.f32.mxu1 %vm162_vm0, %v13190_v6  ;;  %v4687_v7 = vrot.slane %v2640_v21, 1  ;;  %v13199_v59 = vld [vmem:[%s16327_s0 + $0x188] sm:$0xff]  ;;  %v13221_v15 = vld [vmem:[%s16327_s0 + $0x198] sm:$0xff] }
 0x363   :  { %16587 = vst [vmem:[#allocation65_spill] sm:$0xff] %v13174_v60  ;;  %v2193_v18 = vpop.f32.mrb[66].mxu0  ;;  %16589 = vst [vmem:[#allocation95_spill] sm:$0xff] %v13199_v59 }
 0x364   :  { %16588 = vst [vmem:[#allocation66_spill] sm:$0xff] %v13185_v37  ;;  %v2644_v2 = vpop.f32.mrb[66].mxu1  ;;  %v2194_v47 = vpop.f32.mrb[67].mxu0  ;;  %8821 = vmatmul.mubr.msk.f32.gmra.mrb[172].mxu0 %vm162_vm0, %v12857_v46  ;;  %16590 = vst [vmem:[#allocation96_spill] sm:$0xff] %v13207_v10 }
 0x365   :  { %v4685_v51 = vrot.slane %v2644_v2, 1  ;;  %9292 = vmatmul.mubr.msk.f32.gmra.mrb[172].mxu1 %vm162_vm0, %v13199_v59  ;;  %2999 = vmatprep.mubr.f32.mxu0 %v16379_v41  ;;  %v2646_v16 = vpop.f32.mrb[67].mxu1  ;;  %16593 = vst [vmem:[#allocation97_spill] sm:$0xff] %v13221_v15 }
 0x366   :  { %9294 = vmatprep.mubr.msk.f32.mxu1 %vm162_vm0, %v13207_v10  ;;  %v4688_v46 = vrot.slane %v2646_v16, 1 }
 0x367   :  { %v4686_v54 = vsel %vm3804_vm1, %v4684_v8, %v4685_v51  ;;  %v2197_v5 = vpop.f32.mrb[68].mxu0  ;;  %v13229_v51 = vld [vmem:[%s16327_s0 + $0x1a0] sm:$0xff] }
 0x368   :  { %v13213_v21 = vadd.f32 %v4686_v54, %v16591_v39  ;;  %v2199_v18 = vpop.f32.mrb[69].mxu0  ;;  %v4689_v2 = vsel %vm3804_vm1, %v4687_v7, %v4688_v46  ;;  %8822 = vmatmul.mubr.msk.f32.gmra.mrb[174].mxu0 %vm162_vm0, %v12866_v62  ;;  %v2650_v47 = vpop.f32.mrb[68].mxu1  ;;  %16594 = vst [vmem:[#allocation98_spill] sm:$0xff] %v13229_v51  ;;  %v4519_v16 = vrot.slane %v2197_v5, 1 }
 0x369   :  { %9295 = vmatmul.mubr.msk.f32.gmra.mrb[174].mxu1 %vm162_vm0, %v13221_v15  ;;  %v2652_v8 = vpop.f32.mrb[69].mxu1  ;;  %3005 = vmatprep.mubr.f32.mxu0 %v16379_v41  ;;  %v5404_v62 = vrot.slane %v2650_v47, 1  ;;  %v4105_v27 = vrot.slane %v2199_v18, 1  ;;  %v10147_v15 = vld [vmem:[%s16327_s0 + $0x1a8] sm:$0xff] }
 0x36a   :  { %16592 = vst [vmem:[#allocation18_spill] sm:$0xff] %v13213_v21  ;;  %9297 = vmatprep.mubr.msk.f32.mxu1 %vm162_vm0, %v13229_v51  ;;  %v5407_v46 = vrot.slane %v2652_v8, 1  ;;  %v10148_v8 = vld [vmem:[%s16327_s0 + $0x1b0] sm:$0xff] }
 0x36b   :  { %v2203_v7 = vpop.f32.mrb[70].mxu0 }
 0x36c   :  { %v4520_v54 = vrot.slane %v2203_v7, 1  ;;  %v2656_v39 = vpop.f32.mrb[70].mxu1  ;;  %v2205_v21 = vpop.f32.mrb[71].mxu0  ;;  %8823 = vmatmul.mubr.msk.f32.gmra.mrb[176].mxu0 %vm162_vm0, %v12875_v28  ;;  %v16595_v28 = vld [vmem:[#allocation20_spill] sm:$0xff] }
 0x36d   :  { %v5405_v60 = vrot.slane %v2656_v39, 1  ;;  %v4106_v37 = vrot.slane %v2205_v21, 1  ;;  %9298 = vmatmul.mubr.msk.f32.gmra.mrb[176].mxu1 %vm162_vm0, %v10147_v15  ;;  %v2658_v51 = vpop.f32.mrb[71].mxu1  ;;  %3011 = vmatprep.mubr.f32.mxu0 %v16379_v41  ;;  %v16596_v15 = vld [vmem:[#allocation14_spill] sm:$0xff] }
 0x36e   :  { %v4521_v5 = vsel %vm3804_vm1, %v4519_v16, %v4520_v54  ;;  %v5408_v47 = vrot.slane %v2658_v51, 1  ;;  %9300 = vmatprep.mubr.msk.f32.mxu1 %vm162_vm0, %v10148_v8  ;;  %v16597_v54 = vld [vmem:[#allocation23_spill] sm:$0xff]  ;;  %v16598_v8 = vld [vmem:[#allocation13_spill] sm:$0xff] }
 0x36f   :  { %v4587_v21 = vadd.f32 %v4521_v5, %v16595_v28  ;;  %v5406_v18 = vsel %vm3804_vm1, %v5404_v62, %v5405_v60  ;;  %v4107_v7 = vsel %vm3804_vm1, %v4105_v27, %v4106_v37  ;;  %v2209_v39 = vpop.f32.mrb[72].mxu0 }
 0x370   :  { %v13249_v61 = vadd.f32 %v5406_v18, %v16596_v15  ;;  %v5409_v10 = vsel %vm3804_vm1, %v5407_v46, %v5408_v47  ;;  %v2662_v16 = vpop.f32.mrb[72].mxu1  ;;  %v2211_v51 = vpop.f32.mrb[73].mxu0  ;;  %8824 = vmatmul.mubr.msk.f32.gmra.mrb[178].mxu0 %vm162_vm0, %v12897_v22  ;;  %v13255_v59 = vadd.f32 %v4107_v7, %v16597_v54  ;;  %v5239_v62 = vrot.slane %v2209_v39, 1 }
 0x371   :  { %v13258_v5 = vadd.f32 %v16598_v8, %v2662_v16  ;;  %9301 = vmatmul.mubr.msk.f32.gmra.mrb[178].mxu1 %vm162_vm0, %v12486_v23  ;;  %3017 = vmatprep.mubr.f32.mxu0 %v16379_v41  ;;  %v2664_v27 = vpop.f32.mrb[73].mxu1  ;;  %v13263_v60 = vadd.f32 %v4689_v2, %v4587_v21  ;;  %v4681_v28 = vrot.slane %v2211_v51, 1  ;;  %v16601_v16 = vld [vmem:[#allocation21_spill] sm:$0xff] }
 0x372   :  { %9303 = vmatprep.mubr.msk.f32.mxu1 %vm162_vm0, %v12499_v30  ;;  %v16599_v30 = vld [vmem:[#allocation16_spill] sm:$0xff] }
 0x373   :  { %v2215_v37 = vpop.f32.mrb[74].mxu0 }
 0x374   :  { %v5240_v22 = vrot.slane %v2215_v37, 1  ;;  %v2217_v46 = vpop.f32.mrb[75].mxu0  ;;  %8825 = vmatmul.mubr.msk.f32.gmra.mrb[180].mxu0 %vm162_vm0, %v12907_v14  ;;  %v2668_v47 = vpop.f32.mrb[74].mxu1  ;;  %v16600_v14 = vld [vmem:[#allocation6_spill] sm:$0xff] }
 0x375   :  { %v4682_v18 = vrot.slane %v2217_v46, 1  ;;  %9304 = vmatmul.mubr.msk.f32.gmra.mrb[180].mxu1 %vm162_vm0, %v12514_v32  ;;  %3023 = vmatprep.mubr.f32.mxu0 %v16379_v41  ;;  %v2669_v23 = vpop.f32.mrb[75].mxu1 }
 0x376   :  { %v5241_v2 = vsel %vm3804_vm1, %v5239_v62, %v5240_v22  ;;  %9306 = vmatprep.mubr.msk.f32.mxu1 %vm162_vm0, %v12524_v40 }
 0x377   :  { %v5307_v21 = vadd.f32 %v5241_v2, %v16599_v30  ;;  %v4683_v7 = vsel %vm3804_vm1, %v4681_v28, %v4682_v18  ;;  %v2221_v39 = vpop.f32.mrb[76].mxu0  ;;  %v16602_v30 = vld [vmem:[#allocation29_spill] sm:$0xff] }
 0x378   :  { %v13278_v15 = vadd.f32 %v4683_v7, %v16600_v14  ;;  %v3722_v51 = vadd.f32 %v16601_v16, %v2221_v39  ;;  %v2223_v54 = vpop.f32.mrb[77].mxu0  ;;  %8826 = vmatmul.mubr.msk.f32.gmra.mrb[182].mxu0 %vm162_vm0, %v12916_v45  ;;  %v2672_v32 = vpop.f32.mrb[76].mxu1  ;;  %v16604_v39 = vld [vmem:[#allocation19_spill] sm:$0xff] }
 0x379   :  { %9307 = vmatmul.mubr.msk.f32.gmra.mrb[182].mxu1 %vm162_vm0, %v12549_v24  ;;  %v2674_v8 = vpop.f32.mrb[77].mxu1  ;;  %3029 = vmatprep.mubr.f32.mxu0 %v16379_v41  ;;  %v13286_v40 = vadd.f32 %v5409_v10, %v5307_v21  ;;  %v4117_v62 = vrot.slane %v2672_v32, 1  ;;  %v5401_v45 = vrot.slane %v2223_v54, 1  ;;  %v16603_v21 = vld [vmem:[#allocation22_spill] sm:$0xff] }
 0x37a   :  { %v13288_v37 = vadd.f32 %v3722_v51, %v2664_v27  ;;  %9309 = vmatprep.mubr.msk.f32.mxu1 %vm162_vm0, %v12562_v49  ;;  %v4120_v46 = vrot.slane %v2674_v8, 1  ;;  %v16605_v51 = vld [vmem:[#allocation25_spill] sm:$0xff] }
 0x37b   :  { %v2227_v22 = vpop.f32.mrb[78].mxu0 }
 0x37c   :  { %v2678_v47 = vpop.f32.mrb[78].mxu1  ;;  %v2228_v28 = vpop.f32.mrb[79].mxu0  ;;  %8827 = vmatmul.mubr.msk.f32.gmra.mrb[184].mxu0 %vm162_vm0, %v12925_v56 }
 0x37d   :  { %v4118_v24 = vrot.slane %v2678_v47, 1  ;;  %v5402_v18 = vrot.slane %v2228_v28, 1  ;;  %9310 = vmatmul.mubr.msk.f32.gmra.mrb[184].mxu1 %vm162_vm0, %v12580_v38  ;;  %3035 = vmatprep.mubr.f32.mxu0 %v16379_v41  ;;  %v2680_v10 = vpop.f32.mrb[79].mxu1 }
 0x37e   :  { %9312 = vmatprep.mubr.msk.f32.mxu1 %vm162_vm0, %v12595_v55  ;;  %v4121_v49 = vrot.slane %v2680_v10, 1  ;;  %v16606_v10 = vld [vmem:[#allocation30_spill] sm:$0xff] }
 0x37f   :  { %v4119_v27 = vsel %vm3804_vm1, %v4117_v62, %v4118_v24  ;;  %v5403_v23 = vsel %vm3804_vm1, %v5401_v45, %v5402_v18  ;;  %v2232_v2 = vpop.f32.mrb[80].mxu0 }
 0x380   :  { %v13302_v56 = vadd.f32 %v4119_v27, %v16602_v30  ;;  %v13305_v7 = vadd.f32 %v5403_v23, %v16603_v21  ;;  %v4011_v38 = vadd.f32 %v16604_v39, %v2232_v2  ;;  %v2234_v14 = vpop.f32.mrb[81].mxu0  ;;  %8828 = vmatmul.mubr.msk.f32.gmra.mrb[186].mxu0 %vm162_vm0, %v12940_v9  ;;  %v2684_v16 = vpop.f32.mrb[80].mxu1  ;;  %v13311_v55 = vsel %vm3804_vm1, %v4120_v46, %v4121_v49 }
 0x381   :  { %v13314_v54 = vadd.f32 %v16605_v51, %v2234_v14  ;;  %9313 = vmatmul.mubr.msk.f32.gmra.mrb[186].mxu1 %vm162_vm0, %v12621_v4  ;;  %v2686_v32 = vpop.f32.mrb[81].mxu1  ;;  %3041 = vmatprep.mubr.f32.mxu0 %v16379_v41  ;;  %v4693_v62 = vrot.slane %v2684_v16, 1 }
 0x382   :  { %v13320_v8 = vadd.f32 %v13168_v17, %v4011_v38  ;;  %v4696_v47 = vrot.slane %v2686_v32, 1 }
 0x383   :  { %v2238_v22 = vpop.f32.mrb[82].mxu0 }
 0x384   :  { %v2690_v9 = vpop.f32.mrb[82].mxu1  ;;  %v2239_v28 = vpop.f32.mrb[83].mxu0  ;;  %8829 = vmatmul.mubr.msk.f32.gmra.mrb[188].mxu0 %vm162_vm0, %v12952_v63 }
 0x385   :  { %v4694_v46 = vrot.slane %v2690_v9, 1  ;;  %3047 = vmatprep.mubr.f32.mxu0 %v16379_v41  ;;  %v2692_v45 = vpop.f32.mrb[83].mxu1  ;;  %v16607_v9 = vld [vmem:[#allocation32_spill] sm:$0xff] }
 0x386   :  { %v4697_v24 = vrot.slane %v2692_v45, 1 }
 0x387   :  { %v4695_v4 = vsel %vm3804_vm1, %v4693_v62, %v4694_v46  ;;  %v2242_v18 = vpop.f32.mrb[84].mxu0 }
 0x388   :  { %v13327_v49 = vadd.f32 %v4695_v4, %v16606_v10  ;;  %v2244_v17 = vpop.f32.mrb[85].mxu0  ;;  %v4698_v27 = vsel %vm3804_vm1, %v4696_v47, %v4697_v24  ;;  %8830 = vmatmul.mubr.msk.f32.gmra.mrb[190].mxu0 %vm162_vm0, %v12961_v19  ;;  %v2696_v23 = vpop.f32.mrb[84].mxu1  ;;  %v4528_v21 = vrot.slane %v2242_v18, 1  ;;  %v16608_v4 = vld [vmem:[#allocation26_spill] sm:$0xff] }
 0x389   :  { %v2698_v2 = vpop.f32.mrb[85].mxu1  ;;  %3053 = vmatprep.mubr.f32.mxu0 %v16379_v41  ;;  %v5413_v63 = vrot.slane %v2696_v23, 1  ;;  %v4114_v51 = vrot.slane %v2244_v17, 1 }
 0x38a   :  { %v5416_v39 = vrot.slane %v2698_v2, 1 }
 0x38b   :  { %v2248_v30 = vpop.f32.mrb[86].mxu0 }
 0x38c   :  { %v4529_v38 = vrot.slane %v2248_v30, 1  ;;  %v2702_v14 = vpop.f32.mrb[86].mxu1  ;;  %v2250_v16 = vpop.f32.mrb[87].mxu0  ;;  %8831 = vmatmul.mubr.msk.f32.gmra.mrb[192].mxu0 %vm162_vm0, %v12969_v1  ;;  %v16609_v1 = vld [vmem:[#allocation35_spill] sm:$0xff]  ;;  %v16610_v30 = vld [vmem:[#allocation24_spill] sm:$0xff] }
 0x38d   :  { %v5414_v32 = vrot.slane %v2702_v14, 1  ;;  %v4115_v62 = vrot.slane %v2250_v16, 1  ;;  %v2704_v22 = vpop.f32.mrb[87].mxu1  ;;  %3059 = vmatprep.mubr.f32.mxu0 %v16379_v41 }
 0x38e   :  { %v4530_v19 = vsel %vm3804_vm1, %v4528_v21, %v4529_v38  ;;  %v5417_v47 = vrot.slane %v2704_v22, 1 }
 0x38f   :  { %v4590_v28 = vadd.f32 %v4530_v19, %v16607_v9  ;;  %v5415_v46 = vsel %vm3804_vm1, %v5413_v63, %v5414_v32  ;;  %v4116_v45 = vsel %vm3804_vm1, %v4114_v51, %v4115_v62  ;;  %v2254_v24 = vpop.f32.mrb[88].mxu0 }
 0x390   :  { %v13341_v18 = vadd.f32 %v5415_v46, %v16608_v4  ;;  %v13344_v10 = vadd.f32 %v4116_v45, %v16609_v1  ;;  %v5418_v17 = vsel %vm3804_vm1, %v5416_v39, %v5417_v47  ;;  %v2708_v23 = vpop.f32.mrb[88].mxu1  ;;  %v2256_v2 = vpop.f32.mrb[89].mxu0  ;;  %8832 = vmatmul.mubr.msk.f32.gmra.mrb[194].mxu0 %vm162_vm0, %v12993_v58  ;;  %v5248_v16 = vrot.slane %v2254_v24, 1  ;;  %v16611_v47 = vld [vmem:[#allocation28_spill] sm:$0xff]  ;;  %v16612_v46 = vld [vmem:[#allocation15_spill] sm:$0xff]  ;;  %v16613_v24 = vld [vmem:[#allocation33_spill] sm:$0xff] }
 0x391   :  { %v13350_v21 = vadd.f32 %v16610_v30, %v2708_v23  ;;  %3065 = vmatprep.mubr.f32.mxu0 %v16379_v41  ;;  %v2710_v63 = vpop.f32.mrb[89].mxu1  ;;  %v13353_v38 = vadd.f32 %v4698_v27, %v4590_v28  ;;  %v4690_v62 = vrot.slane %v2256_v2, 1 }
 0x393   :  { %v2260_v14 = vpop.f32.mrb[90].mxu0 }
 0x394   :  { %v5249_v51 = vrot.slane %v2260_v14, 1  ;;  %v2262_v32 = vpop.f32.mrb[91].mxu0  ;;  %8833 = vmatmul.mubr.msk.f32.gmra.mrb[196].mxu0 %vm162_vm0, %v13004_v3  ;;  %v2714_v39 = vpop.f32.mrb[90].mxu1 }
 0x395   :  { %v4691_v22 = vrot.slane %v2262_v32, 1  ;;  %3071 = vmatprep.mubr.f32.mxu0 %v16379_v41  ;;  %v2715_v58 = vpop.f32.mrb[91].mxu1 }
 0x396   :  { %v5250_v19 = vsel %vm3804_vm1, %v5248_v16, %v5249_v51 }
 0x397   :  { %v5310_v9 = vadd.f32 %v5250_v19, %v16611_v47  ;;  %v4692_v27 = vsel %vm3804_vm1, %v4690_v62, %v4691_v22  ;;  %v2266_v28 = vpop.f32.mrb[92].mxu0 }
 0x398   :  { %v13362_v45 = vadd.f32 %v4692_v27, %v16612_v46  ;;  %v3725_v4 = vadd.f32 %v16613_v24, %v2266_v28  ;;  %v2268_v1 = vpop.f32.mrb[93].mxu0  ;;  %8834 = vmatmul.mubr.msk.f32.gmra.mrb[198].mxu0 %vm162_vm0, %v13013_v52  ;;  %v2718_v3 = vpop.f32.mrb[92].mxu1  ;;  %v16616_v28 = vld [vmem:[#allocation34_spill] sm:$0xff]  ;;  %v16617_v24 = vld [vmem:[#allocation31_spill] sm:$0xff] }
 0x399   :  { %v2720_v23 = vpop.f32.mrb[93].mxu1  ;;  %3077 = vmatprep.mubr.f32.mxu0 %v16379_v41  ;;  %v13368_v2 = vadd.f32 %v5418_v17, %v5310_v9  ;;  %v4126_v14 = vrot.slane %v2718_v3, 1  ;;  %v5410_v62 = vrot.slane %v2268_v1, 1  ;;  %v16614_v9 = vld [vmem:[#allocation41_spill] sm:$0xff] }
 0x39a   :  { %v13370_v30 = vadd.f32 %v3725_v4, %v2710_v63  ;;  %v4129_v51 = vrot.slane %v2720_v23, 1  ;;  %v16618_v23 = vld [vmem:[#allocation37_spill] sm:$0xff] }
 0x39b   :  { %v2272_v16 = vpop.f32.mrb[94].mxu0 }
 0x39c   :  { %v2724_v32 = vpop.f32.mrb[94].mxu1  ;;  %v2273_v39 = vpop.f32.mrb[95].mxu0  ;;  %8835 = vmatmul.mubr.msk.f32.gmra.mrb[200].mxu0 %vm162_vm0, %v13021_v50 }
 0x39d   :  { %v4127_v22 = vrot.slane %v2724_v32, 1  ;;  %v5411_v58 = vrot.slane %v2273_v39, 1  ;;  %3083 = vmatprep.mubr.f32.mxu0 %v16379_v41  ;;  %v2726_v52 = vpop.f32.mrb[95].mxu1 }
 0x39e   :  { %v4130_v19 = vrot.slane %v2726_v52, 1 }
 0x39f   :  { %v4128_v17 = vsel %vm3804_vm1, %v4126_v14, %v4127_v22  ;;  %v5412_v63 = vsel %vm3804_vm1, %v5410_v62, %v5411_v58  ;;  %v2277_v47 = vpop.f32.mrb[96].mxu0 }
 0x3a0   :  { %v13378_v27 = vadd.f32 %v4128_v17, %v16614_v9  ;;  %v13381_v46 = vadd.f32 %v5412_v63, %v16616_v28  ;;  %v4014_v50 = vadd.f32 %v16617_v24, %v2277_v47  ;;  %v2279_v4 = vpop.f32.mrb[97].mxu0  ;;  %8836 = vmatmul.mubr.msk.f32.gmra.mrb[202].mxu0 %vm162_vm0, %v13035_v0  ;;  %v2730_v1 = vpop.f32.mrb[96].mxu1  ;;  %v13387_v3 = vsel %vm3804_vm1, %v4129_v51, %v4130_v19  ;;  %v16619_v47 = vld [vmem:[#allocation42_spill] sm:$0xff] }
 0x3a1   :  { %v13390_v14 = vadd.f32 %v16618_v23, %v2279_v4  ;;  %v2732_v16 = vpop.f32.mrb[97].mxu1  ;;  %3089 = vmatprep.mubr.f32.mxu0 %v16379_v41  ;;  %v4702_v39 = vrot.slane %v2730_v1, 1 }
 0x3a2   :  { %16615 = vst [vmem:[#allocation20_spill] sm:$0xff] %v13378_v27  ;;  %v13394_v32 = vadd.f32 %v13311_v55, %v4014_v50  ;;  %v4705_v22 = vrot.slane %v2732_v16, 1 }
 0x3a3   :  { %v2283_v62 = vpop.f32.mrb[98].mxu0 }
 0x3a4   :  { %v2736_v58 = vpop.f32.mrb[98].mxu1  ;;  %v2284_v52 = vpop.f32.mrb[99].mxu0  ;;  %8837 = vmatmul.mubr.msk.f32.gmra.mrb[204].mxu0 %vm162_vm0, %v13043_v34 }
 0x3a5   :  { %v4703_v0 = vrot.slane %v2736_v58, 1  ;;  %3095 = vmatprep.mubr.f32.mxu0 %v16379_v41  ;;  %v2738_v51 = vpop.f32.mrb[99].mxu1 }
 0x3a6   :  { %v4706_v19 = vrot.slane %v2738_v51, 1 }
 0x3a7   :  { %v4704_v17 = vsel %vm3804_vm1, %v4702_v39, %v4703_v0  ;;  %v2287_v63 = vpop.f32.mrb[100].mxu0 }
 0x3a8   :  { %v13401_v9 = vadd.f32 %v4704_v17, %v16619_v47  ;;  %v2289_v55 = vpop.f32.mrb[101].mxu0  ;;  %v4707_v28 = vsel %vm3804_vm1, %v4705_v22, %v4706_v19  ;;  %8838 = vmatmul.mubr.msk.f32.gmra.mrb[206].mxu0 %vm162_vm0, %v13052_v25  ;;  %v2742_v24 = vpop.f32.mrb[100].mxu1  ;;  %v4537_v1 = vrot.slane %v2287_v63, 1  ;;  %v16621_v19 = vld [vmem:[#allocation44_spill] sm:$0xff] }
 0x3a9   :  { %v2744_v50 = vpop.f32.mrb[101].mxu1  ;;  %3101 = vmatprep.mubr.f32.mxu0 %v16379_v41  ;;  %v5422_v34 = vrot.slane %v2742_v24, 1  ;;  %v4123_v58 = vrot.slane %v2289_v55, 1 }
 0x3aa   :  { %16620 = vst [vmem:[#allocation14_spill] sm:$0xff] %v13401_v9  ;;  %v5425_v23 = vrot.slane %v2744_v50, 1  ;;  %v16622_v50 = vld [vmem:[#allocation38_spill] sm:$0xff] }
 0x3ab   :  { %v2293_v4 = vpop.f32.mrb[102].mxu0 }
 0x3ac   :  { %v4538_v16 = vrot.slane %v2293_v4, 1  ;;  %v2748_v39 = vpop.f32.mrb[102].mxu1  ;;  %v2295_v62 = vpop.f32.mrb[103].mxu0  ;;  %8839 = vmatmul.mubr.msk.f32.gmra.mrb[208].mxu0 %vm162_vm0, %v13061_v33  ;;  %v16624_v33 = vld [vmem:[#allocation47_spill] sm:$0xff] }
 0x3ad   :  { %v5423_v52 = vrot.slane %v2748_v39, 1  ;;  %v4124_v22 = vrot.slane %v2295_v62, 1  ;;  %v2750_v0 = vpop.f32.mrb[103].mxu1  ;;  %3107 = vmatprep.mubr.f32.mxu0 %v16379_v41 }
 0x3ae   :  { %v4539_v25 = vsel %vm3804_vm1, %v4537_v1, %v4538_v16  ;;  %v5426_v51 = vrot.slane %v2750_v0, 1  ;;  %v16626_v1 = vld [vmem:[#allocation36_spill] sm:$0xff] }
 0x3af   :  { %v4593_v17 = vadd.f32 %v4539_v25, %v16621_v19  ;;  %v5424_v63 = vsel %vm3804_vm1, %v5422_v34, %v5423_v52  ;;  %v4125_v47 = vsel %vm3804_vm1, %v4123_v58, %v4124_v22  ;;  %v2299_v24 = vpop.f32.mrb[104].mxu0 }
 0x3b0   :  { %v13415_v4 = vadd.f32 %v5424_v63, %v16622_v50  ;;  %v13418_v55 = vadd.f32 %v4125_v47, %v16624_v33  ;;  %v5427_v39 = vsel %vm3804_vm1, %v5425_v23, %v5426_v51  ;;  %v2754_v62 = vpop.f32.mrb[104].mxu1  ;;  %v2301_v9 = vpop.f32.mrb[105].mxu0  ;;  %8840 = vmatmul.mubr.msk.f32.gmra.mrb[210].mxu0 %vm162_vm0, %v13083_v48  ;;  %v5257_v22 = vrot.slane %v2299_v24, 1  ;;  %v16628_v47 = vld [vmem:[#allocation40_spill] sm:$0xff]  ;;  %v16629_v33 = vld [vmem:[#allocation27_spill] sm:$0xff] }
 0x3b1   :  { %v13424_v16 = vadd.f32 %v16626_v1, %v2754_v62  ;;  %3113 = vmatprep.mubr.f32.mxu0 %v16379_v41  ;;  %v2756_v34 = vpop.f32.mrb[105].mxu1  ;;  %v13427_v58 = vadd.f32 %v4707_v28, %v4593_v17  ;;  %v4699_v51 = vrot.slane %v2301_v9, 1  ;;  %v16631_v62 = vld [vmem:[#allocation45_spill] sm:$0xff] }
 0x3b2   :  { %16623 = vst [vmem:[#allocation23_spill] sm:$0xff] %v13415_v4  ;;  %16625 = vst [vmem:[#allocation13_spill] sm:$0xff] %v13418_v55  ;;  %v16659_v4 = vld [vmem:[#allocation79_spill] sm:$0xff] }
 0x3b3   :  { %16627 = vst [vmem:[#allocation16_spill] sm:$0xff] %v13424_v16  ;;  %v2305_v52 = vpop.f32.mrb[106].mxu0 }
 0x3b4   :  { %v5258_v0 = vrot.slane %v2305_v52, 1  ;;  %v2307_v25 = vpop.f32.mrb[107].mxu0  ;;  %8841 = vmatmul.mubr.msk.f32.gmra.mrb[212].mxu0 %vm162_vm0, %v13093_v42  ;;  %v2760_v23 = vpop.f32.mrb[106].mxu1 }
 0x3b5   :  { %v4700_v19 = vrot.slane %v2307_v25, 1  ;;  %3119 = vmatprep.mubr.f32.mxu0 %v16379_v41  ;;  %v2761_v48 = vpop.f32.mrb[107].mxu1 }
 0x3b6   :  { %v5259_v63 = vsel %vm3804_vm1, %v5257_v22, %v5258_v0 }
 0x3b7   :  { %v5313_v50 = vadd.f32 %v5259_v63, %v16628_v47  ;;  %v4701_v28 = vsel %vm3804_vm1, %v4699_v51, %v4700_v19  ;;  %v2311_v17 = vpop.f32.mrb[108].mxu0 }
 0x3b8   :  { %v13436_v24 = vadd.f32 %v4701_v28, %v16629_v33  ;;  %v3728_v1 = vadd.f32 %v16631_v62, %v2311_v17  ;;  %v2313_v52 = vpop.f32.mrb[109].mxu0  ;;  %8842 = vmatmul.mubr.msk.f32.gmra.mrb[214].mxu0 %vm162_vm0, %v13102_v11  ;;  %v2764_v42 = vpop.f32.mrb[108].mxu1  ;;  %v16633_v62 = vld [vmem:[#allocation46_spill] sm:$0xff] }
 0x3b9   :  { %v2766_v9 = vpop.f32.mrb[109].mxu1  ;;  %3125 = vmatprep.mubr.f32.mxu0 %v16379_v41  ;;  %v13442_v25 = vadd.f32 %v5427_v39, %v5313_v50  ;;  %v4135_v0 = vrot.slane %v2764_v42, 1  ;;  %v5419_v63 = vrot.slane %v2313_v52, 1  ;;  %v16635_v42 = vld [vmem:[#allocation43_spill] sm:$0xff] }
 0x3ba   :  { %16630 = vst [vmem:[#allocation6_spill] sm:$0xff] %v13436_v24  ;;  %v13444_v22 = vadd.f32 %v3728_v1, %v2756_v34  ;;  %v4138_v51 = vrot.slane %v2766_v9, 1 }
 0x3bb   :  { %v2317_v23 = vpop.f32.mrb[110].mxu0 }
 0x3bc   :  { %v2770_v19 = vpop.f32.mrb[110].mxu1  ;;  %v2318_v48 = vpop.f32.mrb[111].mxu0  ;;  %8843 = vmatmul.mubr.msk.f32.gmra.mrb[216].mxu0 %vm162_vm0, %v13111_v13 }
 0x3bd   :  { %v4136_v47 = vrot.slane %v2770_v19, 1  ;;  %v5420_v28 = vrot.slane %v2318_v48, 1  ;;  %3131 = vmatprep.mubr.f32.mxu0 %v16379_v41  ;;  %v2772_v11 = vpop.f32.mrb[111].mxu1 }
 0x3be   :  { %v4139_v17 = vrot.slane %v2772_v11, 1 }
 0x3bf   :  { %v4137_v39 = vsel %vm3804_vm1, %v4135_v0, %v4136_v47  ;;  %v5421_v34 = vsel %vm3804_vm1, %v5419_v63, %v5420_v28  ;;  %v2322_v50 = vpop.f32.mrb[112].mxu0  ;;  %v16636_v0 = vld [vmem:[#allocation49_spill] sm:$0xff] }
 0x3c0   :  { %v13452_v33 = vadd.f32 %v4137_v39, %v12459_v31  ;;  %v13455_v1 = vadd.f32 %v5421_v34, %v16633_v62  ;;  %v4017_v13 = vadd.f32 %v16635_v42, %v2322_v50  ;;  %v2324_v52 = vpop.f32.mrb[113].mxu0  ;;  %8844 = vmatmul.mubr.msk.f32.gmra.mrb[218].mxu0 %vm162_vm0, %v13126_v29  ;;  %v2776_v9 = vpop.f32.mrb[112].mxu1  ;;  %v13461_v23 = vsel %vm3804_vm1, %v4138_v51, %v4139_v17  ;;  %v5903_v34 = vld [vmem:[%s16329_s3 + $0x8] sm:$0xff] }
 0x3c1   :  { %v13464_v19 = vadd.f32 %v16636_v0, %v2324_v52  ;;  %v2778_v48 = vpop.f32.mrb[113].mxu1  ;;  %3137 = vmatprep.mubr.f32.mxu0 %v16379_v41  ;;  %v4711_v63 = vrot.slane %v2776_v9, 1  ;;  %v5907_v50 = vld [vmem:[%s16329_s3 + $0x28] sm:$0xff]  ;;  %v5902_v52 = vld [vmem:[%s16329_s3] sm:$0xff]  ;;  %v5912_v9 = vld [vmem:[%s16329_s3 + $0x50] sm:$0xff] }
 0x3c2   :  { %16632 = vst [vmem:[#allocation21_spill] sm:$0xff] %v13452_v33  ;;  %16634 = vst [vmem:[#allocation29_spill] sm:$0xff] %v13455_v1  ;;  %v13468_v31 = vadd.f32 %v13387_v3, %v4017_v13  ;;  %v4714_v28 = vrot.slane %v2778_v48, 1  ;;  %v5913_v3 = vld [vmem:[%s16329_s3 + $0x58] sm:$0xff] }
 0x3c3   :  { %16637 = vst [vmem:[#allocation22_spill] sm:$0xff] %v13464_v19  ;;  %v2328_v47 = vpop.f32.mrb[114].mxu0  ;;  %v9433_v42 = vpack.c.bf16 %v5913_v3, %v5903_v34  ;;  %v5917_v13 = vld [vmem:[%s16329_s3 + $0x78] sm:$0xff]  ;;  %v5927_v34 = vld [vmem:[%s16329_s3 + $0xc8] sm:$0xff] }
 0x3c4   :  { %v2782_v11 = vpop.f32.mrb[114].mxu1  ;;  %v2329_v39 = vpop.f32.mrb[115].mxu0  ;;  %8845 = vmatmul.mubr.msk.f32.gmra.mrb[220].mxu0 %vm162_vm0, %v13138_v44 }
 0x3c5   :  { %v4712_v29 = vrot.slane %v2782_v11, 1  ;;  %3143 = vmatprep.mubr.f32.mxu0 %v16379_v41  ;;  %v2784_v51 = vpop.f32.mrb[115].mxu1  ;;  %v9529_v11 = vpack.c.bf16 %v5917_v13, %v5907_v50  ;;  %v5906_v39 = vld [vmem:[%s16329_s3 + $0x20] sm:$0xff]  ;;  %9434 = vmatprep.subr.bf16.mxu1 %v9433_v42  ;;  %v5937_v13 = vld [vmem:[%s16329_s3 + $0x118] sm:$0xff] }
 0x3c6   :  { %v4715_v17 = vrot.slane %v2784_v51, 1 }
 0x3c7   :  { %v4713_v62 = vsel %vm3804_vm1, %v4711_v63, %v4712_v29  ;;  %v2332_v44 = vpop.f32.mrb[116].mxu0  ;;  %v5916_v29 = vld [vmem:[%s16329_s3 + $0x70] sm:$0xff]  ;;  %9530 = vmatprep.subr.bf16.mxu0 %v9529_v11 }
 0x3c8   :  { %v13493_v0 = vadd.f32 %v4713_v62, %v12492_v35  ;;  %v2334_v48 = vpop.f32.mrb[117].mxu0  ;;  %v13496_v63 = vsel %vm3804_vm1, %v4714_v28, %v4715_v17  ;;  %8846 = vmatmul.mubr.msk.f32.gmra.mrb[222].mxu0 %vm162_vm0, %v13147_v57  ;;  %v2788_v47 = vpop.f32.mrb[116].mxu1  ;;  %v9435_v35 = vpack.c.bf16 %v5912_v9, %v5902_v52  ;;  %v9531_v28 = vpack.c.bf16 %v5916_v29, %v5906_v39  ;;  %v5923_v57 = vld [vmem:[%s16329_s3 + $0xa8] sm:$0xff]  ;;  %v5933_v17 = vld [vmem:[%s16329_s3 + $0xf8] sm:$0xff]  ;;  %v5922_v52 = vld [vmem:[%s16329_s3 + $0xa0] sm:$0xff] }
 0x3c9   :  { %v2790_v51 = vpop.f32.mrb[117].mxu1  ;;  %3149 = vmatprep.mubr.f32.mxu0 %v16379_v41  ;;  %v4546_v3 = vrot.slane %v2332_v44, 1  ;;  %v5431_v50 = vrot.slane %v2788_v47, 1  ;;  %v9437_v42 = vpack.c.bf16 %v5933_v17, %v5923_v57  ;;  %v5932_v9 = vld [vmem:[%s16329_s3 + $0xf0] sm:$0xff]  ;;  %v9533_v29 = vpack.c.bf16 %v5937_v13, %v5927_v34  ;;  %v5943_v13 = vld [vmem:[%s16329_s3 + $0x148] sm:$0xff] }
 0x3ca   :  { %16638 = vst [vmem:[#allocation19_spill] sm:$0xff] %v13493_v0  ;;  %9436 = vmatpush1.bf16.msra.mxu1 %v9435_v35  ;;  %9532 = vmatpush1.bf16.msra.mxu0 %v9531_v28  ;;  %v5434_v11 = vrot.slane %v2790_v51, 1  ;;  %v9439_v35 = vpack.c.bf16 %v5932_v9, %v5922_v52  ;;  %v5926_v28 = vld [vmem:[%s16329_s3 + $0xc0] sm:$0xff]  ;;  %v5936_v57 = vld [vmem:[%s16329_s3 + $0x110] sm:$0xff]  ;;  %v4132_v17 = vrot.slane %v2334_v48, 1  ;;  %v5953_v52 = vld [vmem:[%s16329_s3 + $0x198] sm:$0xff] }
 0x3cb   :  { %v2338_v62 = vpop.f32.mrb[118].mxu0  ;;  %9438 = vmatprep.subr.bf16.mxu1 %v9437_v42  ;;  %9534 = vmatprep.subr.bf16.mxu0 %v9533_v29  ;;  %v5947_v48 = vld [vmem:[%s16329_s3 + $0x168] sm:$0xff]  ;;  %v5952_v29 = vld [vmem:[%s16329_s3 + $0x190] sm:$0xff] }
 0x3cc   :  { %v4547_v39 = vrot.slane %v2338_v62, 1  ;;  %v2794_v44 = vpop.f32.mrb[118].mxu1  ;;  %v2340_v47 = vpop.f32.mrb[119].mxu0  ;;  %8847 = vmatmul.mubr.msk.f32.gmra.mrb[224].mxu0 %vm162_vm0, %v13155_v53  ;;  %v9535_v62 = vpack.c.bf16 %v5936_v57, %v5926_v28  ;;  %v5946_v28 = vld [vmem:[%s16329_s3 + $0x160] sm:$0xff] }
 0x3cd   :  { %v5432_v0 = vrot.slane %v2794_v44, 1  ;;  %v4133_v33 = vrot.slane %v2340_v47, 1  ;;  %v2796_v51 = vpop.f32.mrb[119].mxu1  ;;  %3155 = vmatprep.mubr.f32.mxu0 %v16379_v41  ;;  %v5957_v44 = vld [vmem:[%s16329_s3 + $0x1b8] sm:$0xff]  ;;  %v5942_v47 = vld [vmem:[%s16329_s3 + $0x140] sm:$0xff] }
 0x3ce   :  { %v4548_v53 = vsel %vm3804_vm1, %v4546_v3, %v4547_v39  ;;  %v5435_v34 = vrot.slane %v2796_v51, 1  ;;  %9440 = vmatpush1.bf16.msra.mxu1 %v9439_v35  ;;  %9536 = vmatpush1.bf16.msra.mxu0 %v9535_v62  ;;  %v9537_v51 = vpack.c.bf16 %v5957_v44, %v5947_v48  ;;  %v5972_v48 = vld [vmem:[%s16329_s3 + $0x230] sm:$0xff] }
 0x3cf   :  { %v4596_v9 = vadd.f32 %v4548_v53, %v12481_v20  ;;  %v5433_v42 = vsel %vm3804_vm1, %v5431_v50, %v5432_v0  ;;  %v4134_v3 = vsel %vm3804_vm1, %v4132_v17, %v4133_v33  ;;  %v2344_v39 = vpop.f32.mrb[120].mxu0  ;;  %v9441_v17 = vpack.c.bf16 %v5953_v52, %v5943_v13  ;;  %v5963_v53 = vld [vmem:[%s16329_s3 + $0x1e8] sm:$0xff]  ;;  %v5977_v13 = vld [vmem:[%s16329_s3 + $0x258] sm:$0xff]  ;;  %v5962_v52 = vld [vmem:[%s16329_s3 + $0x1e0] sm:$0xff] }
 0x3d0   :  { %v13557_v20 = vadd.f32 %v5433_v42, %v12433_v12  ;;  %v13560_v33 = vadd.f32 %v4134_v3, %v12426_v36  ;;  %v13563_v0 = vsel %vm3804_vm1, %v5434_v11, %v5435_v34  ;;  %v2800_v50 = vpop.f32.mrb[120].mxu1  ;;  %v2346_v35 = vpop.f32.mrb[121].mxu0  ;;  %8848 = vmatmul.mubr.msk.f32.gmra.mrb[226].mxu0 %vm162_vm0, %v13179_v43  ;;  %v5956_v12 = vld [vmem:[%s16329_s3 + $0x1b0] sm:$0xff]  ;;  %v9443_v43 = vpack.c.bf16 %v5952_v29, %v5942_v47  ;;  %v5973_v34 = vld [vmem:[%s16329_s3 + $0x238] sm:$0xff] }
 0x3d1   :  { %v13574_v57 = vadd.f32 %v12438_v26, %v2800_v50  ;;  %3161 = vmatprep.mubr.f32.mxu0 %v16379_v41  ;;  %v2802_v36 = vpop.f32.mrb[121].mxu1  ;;  %v13578_v11 = vadd.f32 %v13496_v63, %v4596_v9  ;;  %v9539_v62 = vpack.c.bf16 %v5956_v12, %v5946_v28  ;;  %v5967_v26 = vld [vmem:[%s16329_s3 + $0x208] sm:$0xff]  ;;  %9442 = vmatprep.subr.bf16.mxu1 %v9441_v17  ;;  %v5266_v9 = vrot.slane %v2344_v39, 1  ;;  %v5966_v50 = vld [vmem:[%s16329_s3 + $0x200] sm:$0xff]  ;;  %v5976_v28 = vld [vmem:[%s16329_s3 + $0x250] sm:$0xff] }
 0x3d2   :  { %16639 = vst [vmem:[#allocation25_spill] sm:$0xff] %v13557_v20  ;;  %16640 = vst [vmem:[#allocation30_spill] sm:$0xff] %v13560_v33  ;;  %v9445_v63 = vpack.c.bf16 %v5973_v34, %v5963_v53  ;;  %9538 = vmatprep.subr.bf16.mxu0 %v9537_v51  ;;  %v9541_v29 = vpack.c.bf16 %v5977_v13, %v5967_v26  ;;  %v4708_v12 = vrot.slane %v2346_v35, 1  ;;  %9444 = vmatpush1.bf16.msra.mxu1 %v9443_v43  ;;  %v5983_v34 = vld [vmem:[%s16329_s3 + $0x288] sm:$0xff]  ;;  %v5993_v26 = vld [vmem:[%s16329_s3 + $0x2d8] sm:$0xff] }
 0x3d3   :  { %16641 = vst [vmem:[#allocation32_spill] sm:$0xff] %v13574_v57  ;;  %v2350_v42 = vpop.f32.mrb[122].mxu0  ;;  %v9447_v39 = vpack.c.bf16 %v5972_v48, %v5962_v52  ;;  %9540 = vmatpush1.bf16.msra.mxu0 %v9539_v62  ;;  %v9543_v51 = vpack.c.bf16 %v5976_v28, %v5966_v50  ;;  %v5987_v35 = vld [vmem:[%s16329_s3 + $0x2a8] sm:$0xff]  ;;  %v9449_v62 = vpack.c.bf16 %v5993_v26, %v5983_v34  ;;  %v5982_v48 = vld [vmem:[%s16329_s3 + $0x280] sm:$0xff]  ;;  %v6036_v20 = vld [vmem:[%s16329_s3 + $0x430] sm:$0xff] }
 0x3d4   :  { %v5267_v3 = vrot.slane %v2350_v42, 1  ;;  %v2352_v44 = vpop.f32.mrb[123].mxu0  ;;  %8849 = vmatmul.mubr.msk.f32.gmra.mrb[228].mxu0 %vm162_vm0, %v13190_v6  ;;  %v2806_v47 = vpop.f32.mrb[122].mxu1  ;;  %9446 = vmatprep.subr.bf16.mxu1 %v9445_v63  ;;  %v16642_v42 = vld [vmem:[#allocation52_spill] sm:$0xff]  ;;  %v5997_v63 = vld [vmem:[%s16329_s3 + $0x2f8] sm:$0xff] }
 0x3d5   :  { %v4709_v17 = vrot.slane %v2352_v44, 1  ;;  %v2807_v53 = vpop.f32.mrb[123].mxu1  ;;  %3167 = vmatprep.mubr.f32.mxu0 %v16379_v41  ;;  %9542 = vmatprep.subr.bf16.mxu0 %v9541_v29  ;;  %v16645_v47 = vld [vmem:[#allocation59_spill] sm:$0xff] }
 0x3d6   :  { %v5268_v6 = vsel %vm3804_vm1, %v5266_v9, %v5267_v3  ;;  %v5992_v9 = vld [vmem:[%s16329_s3 + $0x2d0] sm:$0xff]  ;;  %v16643_v3 = vld [vmem:[#allocation39_spill] sm:$0xff]  ;;  %v5986_v53 = vld [vmem:[%s16329_s3 + $0x2a0] sm:$0xff]  ;;  %9448 = vmatpush1.bf16.msra.mxu1 %v9447_v39 }
 0x3d7   :  { %v5316_v43 = vadd.f32 %v5268_v6, %v16642_v42  ;;  %v4710_v13 = vsel %vm3804_vm1, %v4708_v12, %v4709_v17  ;;  %v2356_v52 = vpop.f32.mrb[124].mxu0  ;;  %v16646_v12 = vld [vmem:[#allocation95_spill] sm:$0xff]  ;;  %v9545_v17 = vpack.c.bf16 %v5997_v63, %v5987_v35  ;;  %v5996_v6 = vld [vmem:[%s16329_s3 + $0x2f0] sm:$0xff]  ;;  %9544 = vmatpush1.bf16.msra.mxu0 %v9543_v51  ;;  %9450 = vmatprep.subr.bf16.mxu1 %v9449_v62  ;;  %v6017_v51 = vld [vmem:[%s16329_s3 + $0x398] sm:$0xff] }
 0x3d8   :  { %v13629_v44 = vadd.f32 %v4710_v13, %v16643_v3  ;;  %v3731_v50 = vadd.f32 %v16645_v47, %v2356_v52  ;;  %v9221_v28 = vpop.f32.mrb[124].mxu1  ;;  %v2358_v29 = vpop.f32.mrb[125].mxu0  ;;  %8850 = vmatmul.mubr.msk.f32.gmra.mrb[230].mxu0 %vm162_vm0, %v16646_v12  ;;  %v9451_v13 = vpack.c.bf16 %v5992_v9, %v5982_v48  ;;  %v9547_v63 = vpack.c.bf16 %v5996_v6, %v5986_v53  ;;  %v6003_v3 = vld [vmem:[%s16329_s3 + $0x328] sm:$0xff]  ;;  %v6013_v47 = vld [vmem:[%s16329_s3 + $0x378] sm:$0xff]  ;;  %v6012_v62 = vld [vmem:[%s16329_s3 + $0x370] sm:$0xff] }
 0x3d9   :  { %v3812_v34 = vrot.slane %v9221_v28, 1  ;;  %v3324_v26 = vpop.f32.mrb[125].mxu1  ;;  %3173 = vmatprep.mubr.f32.mxu0 %v16379_v41  ;;  %v13642_v42 = vadd.f32 %v13563_v0, %v5316_v43  ;;  %v6007_v0 = vld [vmem:[%s16329_s3 + $0x348] sm:$0xff]  ;;  %9546 = vmatprep.subr.bf16.mxu0 %v9545_v17  ;;  %v6002_v43 = vld [vmem:[%s16329_s3 + $0x320] sm:$0xff]  ;;  %v5428_v48 = vrot.slane %v2358_v29, 1  ;;  %v16647_v12 = vld [vmem:[#allocation96_spill] sm:$0xff] }
 0x3da   :  { %16644 = vst [vmem:[#allocation26_spill] sm:$0xff] %v13629_v44  ;;  %v13644_v52 = vadd.f32 %v3731_v50, %v2802_v36  ;;  %v3811_v35 = vrot.slane %v3324_v26, 1  ;;  %v9453_v36 = vpack.c.bf16 %v6013_v47, %v6003_v3  ;;  %v9549_v17 = vpack.c.bf16 %v6017_v51, %v6007_v0  ;;  %v6006_v53 = vld [vmem:[%s16329_s3 + $0x340] sm:$0xff]  ;;  %v6016_v6 = vld [vmem:[%s16329_s3 + $0x390] sm:$0xff]  ;;  %v16648_v26 = vld [vmem:[#allocation67_spill] sm:$0xff]  ;;  %9452 = vmatpush1.bf16.msra.mxu1 %v9451_v13 }
 0x3db   :  { %v2362_v39 = vpop.f32.mrb[126].mxu0  ;;  %9548 = vmatpush1.bf16.msra.mxu0 %v9547_v63  ;;  %v9551_v0 = vpack.c.bf16 %v6016_v6, %v6006_v53  ;;  %v6023_v51 = vld [vmem:[%s16329_s3 + $0x3c8] sm:$0xff]  ;;  %v6037_v63 = vld [vmem:[%s16329_s3 + $0x438] sm:$0xff]  ;;  %v16651_v6 = vld [vmem:[#allocation50_spill] sm:$0xff] }
 0x3dc   :  { %v3813_v9 = vsel %vm3804_vm1, %v3811_v35, %v3812_v34  ;;  %v9224_v50 = vpop.f32.mrb[126].mxu1  ;;  %v2363_v28 = vpop.f32.mrb[127].mxu0  ;;  %8851 = vmatmul.mubr.msk.f32.gmra.mrb[232].mxu0 %vm162_vm0, %v16647_v12  ;;  %v9455_v35 = vpack.c.bf16 %v6012_v62, %v6002_v43  ;;  %9454 = vmatprep.subr.bf16.mxu1 %v9453_v36  ;;  %v6022_v36 = vld [vmem:[%s16329_s3 + $0x3c0] sm:$0xff]  ;;  %v6032_v62 = vld [vmem:[%s16329_s3 + $0x410] sm:$0xff] }
 0x3dd   :  { %v13674_v3 = vadd.f32 %v3813_v9, %v16648_v26  ;;  %v4244_v29 = vrot.slane %v9224_v50, 1  ;;  %v5429_v47 = vrot.slane %v2363_v28, 1  ;;  %v3334_v34 = vpop.f32.mrb[127].mxu1  ;;  %3179 = vmatprep.mubr.f32.mxu0 %v16379_v41  ;;  %v6033_v9 = vld [vmem:[%s16329_s3 + $0x418] sm:$0xff]  ;;  %v6027_v50 = vld [vmem:[%s16329_s3 + $0x3e8] sm:$0xff]  ;;  %9550 = vmatprep.subr.bf16.mxu0 %v9549_v17  ;;  %v16649_v12 = vld [vmem:[#allocation58_spill] sm:$0xff] }
 0x3de   :  { %v4243_v39 = vrot.slane %v3334_v34, 1  ;;  %v9457_v43 = vpack.c.bf16 %v6033_v9, %v6023_v51  ;;  %v16652_v34 = vld [vmem:[#allocation97_spill] sm:$0xff]  ;;  %v9553_v51 = vpack.c.bf16 %v6037_v63, %v6027_v50  ;;  %v6026_v9 = vld [vmem:[%s16329_s3 + $0x3e0] sm:$0xff]  ;;  %9456 = vmatpush1.bf16.msra.mxu1 %v9455_v35  ;;  %v6047_v35 = vld [vmem:[%s16329_s3 + $0x488] sm:$0xff] }
 0x3df   :  { %v5430_v28 = vsel %vm3804_vm1, %v5428_v48, %v5429_v47  ;;  %v2367_v13 = vpop.f32.mrb[128].mxu0  ;;  %9552 = vmatpush1.bf16.msra.mxu0 %v9551_v0 }
 0x3e0   :  { %v13697_v53 = vadd.f32 %v5430_v28, %v16649_v12  ;;  %v4245_v48 = vsel %vm3804_vm1, %v4243_v39, %v4244_v29  ;;  %v4020_v17 = vadd.f32 %v16651_v6, %v2367_v13  ;;  %v9227_v26 = vpop.f32.mrb[128].mxu1  ;;  %v2369_v47 = vpop.f32.mrb[129].mxu0  ;;  %8852 = vmatmul.mubr.msk.f32.gmra.mrb[234].mxu0 %vm162_vm0, %v16652_v34  ;;  %v16653_v28 = vld [vmem:[#allocation71_spill] sm:$0xff]  ;;  %v16654_v29 = vld [vmem:[#allocation60_spill] sm:$0xff]  ;;  %v9459_v6 = vpack.c.bf16 %v6032_v62, %v6022_v36 }
 0x3e1   :  { %v4335_v12 = vadd.f32 %v4245_v48, %v16653_v28  ;;  %v13711_v39 = vadd.f32 %v16654_v29, %v2369_v47  ;;  %v3344_v13 = vpop.f32.mrb[129].mxu1  ;;  %3185 = vmatprep.mubr.f32.mxu0 %v16379_v41  ;;  %9458 = vmatprep.subr.bf16.mxu1 %v9457_v43  ;;  %v9555_v34 = vpack.c.bf16 %v6036_v20, %v6026_v9  ;;  %v6043_v48 = vld [vmem:[%s16329_s3 + $0x468] sm:$0xff]  ;;  %v6057_v20 = vld [vmem:[%s16329_s3 + $0x4d8] sm:$0xff]  ;;  %v6042_v43 = vld [vmem:[%s16329_s3 + $0x460] sm:$0xff] }
 0x3e2   :  { %16650 = vst [vmem:[#allocation35_spill] sm:$0xff] %v13697_v53  ;;  %v4820_v53 = vrot.slane %v9227_v26, 1  ;;  %v13715_v50 = vadd.f32 %v13461_v23, %v4020_v17  ;;  %v4819_v63 = vrot.slane %v3344_v13, 1  ;;  %v6053_v26 = vld [vmem:[%s16329_s3 + $0x4b8] sm:$0xff]  ;;  %v3927_v23 = vmax.f32 %v13674_v3, 0.0  ;;  %9554 = vmatprep.subr.bf16.mxu0 %v9553_v51  ;;  %v6052_v17 = vld [vmem:[%s16329_s3 + $0x4b0] sm:$0xff]  ;;  %9460 = vmatpush1.bf16.msra.mxu1 %v9459_v6 }
 0x3e3   :  { %16655 = vst [vmem:[#allocation24_spill] sm:$0xff] %v13711_v39  ;;  %v2373_v36 = vpop.f32.mrb[130].mxu0  ;;  %v4359_v62 = vmax.f32 %v4335_v12, 0.0  ;;  %v9461_v0 = vpack.c.bf16 %v6053_v26, %v6043_v48  ;;  %v16656_v3 = vld [vmem:[#allocation98_spill] sm:$0xff]  ;;  %v9557_v51 = vpack.c.bf16 %v6057_v20, %v6047_v35  ;;  %v6056_v29 = vld [vmem:[%s16329_s3 + $0x4d0] sm:$0xff]  ;;  %9556 = vmatpush1.bf16.msra.mxu0 %v9555_v34  ;;  %v6077_v34 = vld [vmem:[%s16329_s3 + $0x578] sm:$0xff] }
 0x3e4   :  { %v4821_v47 = vsel %vm3804_vm1, %v4819_v63, %v4820_v53  ;;  %v9230_v9 = vpop.f32.mrb[130].mxu1  ;;  %v2374_v28 = vpop.f32.mrb[131].mxu0  ;;  %8853 = vmatmul.mubr.msk.f32.gmra.mrb[236].mxu0 %vm162_vm0, %v16656_v3  ;;  %v6046_v12 = vld [vmem:[%s16329_s3 + $0x480] sm:$0xff]  ;;  %v16657_v13 = vld [vmem:[#allocation56_spill] sm:$0xff]  ;;  %v9463_v63 = vpack.c.bf16 %v6052_v17, %v6042_v43 }
 0x3e5   :  { %v13746_v48 = vadd.f32 %v4821_v47, %v16657_v13  ;;  %v5540_v26 = vrot.slane %v9230_v9, 1  ;;  %v3354_v36 = vpop.f32.mrb[131].mxu1  ;;  %3191 = vmatprep.mubr.f32.mxu0 %v16379_v41  ;;  %v13749_v53 = vmax.f32 %v3927_v23, %v4359_v62  ;;  %9462 = vmatprep.subr.bf16.mxu1 %v9461_v0  ;;  %v9559_v20 = vpack.c.bf16 %v6056_v29, %v6046_v12  ;;  %v6063_v28 = vld [vmem:[%s16329_s3 + $0x508] sm:$0xff]  ;;  %v6073_v47 = vld [vmem:[%s16329_s3 + $0x558] sm:$0xff]  ;;  %v6062_v62 = vld [vmem:[%s16329_s3 + $0x500] sm:$0xff] }
 0x3e6   :  { %v5539_v35 = vrot.slane %v3354_v36, 1  ;;  %v6067_v9 = vld [vmem:[%s16329_s3 + $0x528] sm:$0xff]  ;;  %9558 = vmatprep.subr.bf16.mxu0 %v9557_v51  ;;  %v9465_v6 = vpack.c.bf16 %v6073_v47, %v6063_v28  ;;  %v6072_v0 = vld [vmem:[%s16329_s3 + $0x550] sm:$0xff]  ;;  %v6066_v29 = vld [vmem:[%s16329_s3 + $0x520] sm:$0xff]  ;;  %9464 = vmatpush1.bf16.msra.mxu1 %v9463_v63 }
 0x3e7   :  { %v2875_v23 = vpop.f32.mrb[132].mxu0  ;;  %v10149_v51 = vld [vmem:[%s16327_s0 + $0x1a8] sm:$0xff]  ;;  %v9561_v12 = vpack.c.bf16 %v6077_v34, %v6067_v9  ;;  %v6076_v13 = vld [vmem:[%s16329_s3 + $0x570] sm:$0xff]  ;;  %v16658_v36 = vld [vmem:[#allocation61_spill] sm:$0xff]  ;;  %v9467_v47 = vpack.c.bf16 %v6072_v0, %v6062_v62  ;;  %v4935_v9 = vmax.f32 %v13746_v48, 0.0  ;;  %9560 = vmatpush1.bf16.msra.mxu0 %v9559_v20 }
 0x3e8   :  { %v5541_v43 = vsel %vm3804_vm1, %v5539_v35, %v5540_v26  ;;  %v9233_v17 = vpop.f32.mrb[132].mxu1  ;;  %v2877_v3 = vpop.f32.mrb[133].mxu0  ;;  %8854 = vmatmul.mubr.msk.f32.gmra.mrb[238].mxu0 %vm162_vm0, %v10149_v51  ;;  %v3805_v44 = vrot.slane %v2875_v23, 1  ;;  %9466 = vmatprep.subr.bf16.mxu1 %v9465_v6  ;;  %v9563_v34 = vpack.c.bf16 %v6076_v13, %v6066_v29  ;;  %v6083_v51 = vld [vmem:[%s16329_s3 + $0x5a8] sm:$0xff]  ;;  %v6097_v20 = vld [vmem:[%s16329_s3 + $0x618] sm:$0xff]  ;;  %v6082_v6 = vld [vmem:[%s16329_s3 + $0x5a0] sm:$0xff] }
 0x3e9   :  { %v5631_v28 = vadd.f32 %v5541_v43, %v16658_v36  ;;  %v3821_v26 = vrot.slane %v9233_v17, 1  ;;  %v3364_v35 = vpop.f32.mrb[133].mxu1  ;;  %3197 = vmatprep.mubr.f32.mxu0 %v16379_v41  ;;  %v6093_v43 = vld [vmem:[%s16329_s3 + $0x5f8] sm:$0xff]  ;;  %v6087_v63 = vld [vmem:[%s16329_s3 + $0x5c8] sm:$0xff]  ;;  %v3808_v62 = vrot.slane %v2877_v3, 1  ;;  %9562 = vmatprep.subr.bf16.mxu0 %v9561_v12  ;;  %v6092_v17 = vld [vmem:[%s16329_s3 + $0x5f0] sm:$0xff] }
 0x3ea   :  { %v3820_v33 = vrot.slane %v3364_v35, 1  ;;  %v9469_v48 = vpack.c.bf16 %v6093_v43, %v6083_v51  ;;  %v10150_v3 = vld [vmem:[%s16327_s0 + $0x1b0] sm:$0xff]  ;;  %v9471_v35 = vpack.c.bf16 %v6092_v17, %v6082_v6  ;;  %v6086_v51 = vld [vmem:[%s16329_s3 + $0x5c0] sm:$0xff]  ;;  %9468 = vmatpush1.bf16.msra.mxu1 %v9467_v47  ;;  %v6113_v6 = vld [vmem:[%s16329_s3 + $0x698] sm:$0xff] }
 0x3eb   :  { %v2881_v23 = vpop.f32.mrb[134].mxu0  ;;  %v5655_v0 = vmax.f32 %v5631_v28, 0.0  ;;  %v9565_v28 = vpack.c.bf16 %v6097_v20, %v6087_v63  ;;  %v6096_v43 = vld [vmem:[%s16329_s3 + $0x610] sm:$0xff]  ;;  %9564 = vmatpush1.bf16.msra.mxu0 %v9563_v34  ;;  %v6103_v20 = vld [vmem:[%s16329_s3 + $0x648] sm:$0xff] }
 0x3ec   :  { %v3806_v29 = vrot.slane %v2881_v23, 1  ;;  %v9236_v13 = vpop.f32.mrb[134].mxu1  ;;  %v2883_v36 = vpop.f32.mrb[135].mxu0  ;;  %8855 = vmatmul.mubr.msk.f32.gmra.mrb[240].mxu0 %vm162_vm0, %v10150_v3  ;;  %v3822_v12 = vsel %vm3804_vm1, %v3820_v33, %v3821_v26  ;;  %9470 = vmatprep.subr.bf16.mxu1 %v9469_v48  ;;  %v9567_v63 = vpack.c.bf16 %v6096_v43, %v6086_v51  ;;  %v9473_v34 = vpack.c.bf16 %v6113_v6, %v6103_v20  ;;  %v6102_v48 = vld [vmem:[%s16329_s3 + $0x640] sm:$0xff]  ;;  %v6112_v17 = vld [vmem:[%s16329_s3 + $0x690] sm:$0xff] }
 0x3ed   :  { %v4253_v23 = vrot.slane %v9236_v13, 1  ;;  %v3809_v57 = vrot.slane %v2883_v36, 1  ;;  %v3374_v39 = vpop.f32.mrb[135].mxu1  ;;  %3203 = vmatprep.mubr.f32.mxu0 %v16379_v41  ;;  %v13814_v1 = vadd.f32 %v3822_v12, %v16659_v4  ;;  %v13816_v3 = vmax.f32 %v4935_v9, %v5655_v0  ;;  %v6107_v4 = vld [vmem:[%s16329_s3 + $0x668] sm:$0xff]  ;;  %v16660_v9 = vld [vmem:[#allocation70_spill] sm:$0xff]  ;;  %9566 = vmatprep.subr.bf16.mxu0 %v9565_v28  ;;  %v6117_v0 = vld [vmem:[%s16329_s3 + $0x6b8] sm:$0xff] }
 0x3ee   :  { %v3807_v33 = vsel %vm3804_vm1, %v3805_v44, %v3806_v29  ;;  %v4252_v26 = vrot.slane %v3374_v39, 1  ;;  %v16661_v36 = vld [vmem:[#allocation51_spill] sm:$0xff]  ;;  %v9569_v28 = vpack.c.bf16 %v6117_v0, %v6107_v4  ;;  %v6106_v51 = vld [vmem:[%s16329_s3 + $0x660] sm:$0xff]  ;;  %v6116_v43 = vld [vmem:[%s16329_s3 + $0x6b0] sm:$0xff]  ;;  %9472 = vmatpush1.bf16.msra.mxu1 %v9471_v35  ;;  %v9475_v4 = vpack.c.bf16 %v6112_v17, %v6102_v48 }
 0x3ef   :  { %v13829_v47 = vadd.f32 %v3807_v33, %v16660_v9  ;;  %v2887_v44 = vpop.f32.mrb[136].mxu0  ;;  %v3810_v39 = vsel %vm3804_vm1, %v3808_v62, %v3809_v57  ;;  %v10151_v57 = vld [vmem:[%s16327_s0 + $0x1b8] sm:$0xff]  ;;  %v3930_v6 = vmax.f32 %v13814_v1, 0.0  ;;  %v16662_v9 = vld [vmem:[#allocation83_spill] sm:$0xff]  ;;  %9568 = vmatpush1.bf16.msra.mxu0 %v9567_v63  ;;  %9474 = vmatprep.subr.bf16.mxu1 %v9473_v34  ;;  %v9571_v0 = vpack.c.bf16 %v6116_v43, %v6106_v51  ;;  %v6122_v48 = vld [vmem:[%s16329_s3 + $0x6e0] sm:$0xff] }
 0x3f0   :  { %v9239_v29 = vpop.f32.mrb[136].mxu1  ;;  %v2889_v13 = vpop.f32.mrb[137].mxu0  ;;  %8856 = vmatmul.mubr.msk.f32.gmra.mrb[242].mxu0 %vm162_vm0, %v10151_v57  ;;  %v4254_v62 = vsel %vm3804_vm1, %v4252_v26, %v4253_v23  ;;  %v13847_v12 = vadd.f32 %v3810_v39, %v16661_v36  ;;  %v4237_v26 = vrot.slane %v2887_v44, 1  ;;  %v6123_v57 = vld [vmem:[%s16329_s3 + $0x6e8] sm:$0xff]  ;;  %9570 = vmatprep.subr.bf16.mxu0 %v9569_v28  ;;  %v6137_v34 = vld [vmem:[%s16329_s3 + $0x758] sm:$0xff]  ;;  %v6132_v17 = vld [vmem:[%s16329_s3 + $0x730] sm:$0xff] }
 0x3f1   :  { %v4829_v33 = vrot.slane %v9239_v29, 1  ;;  %v3384_v20 = vpop.f32.mrb[137].mxu1  ;;  %3209 = vmatprep.mubr.f32.mxu0 %v16379_v41  ;;  %v4338_v23 = vadd.f32 %v4254_v62, %v16662_v9  ;;  %v6133_v29 = vld [vmem:[%s16329_s3 + $0x738] sm:$0xff]  ;;  %v6127_v1 = vld [vmem:[%s16329_s3 + $0x708] sm:$0xff]  ;;  %v4240_v62 = vrot.slane %v2889_v13, 1  ;;  %v10152_v28 = vld [vmem:[%s16327_s0 + $0x1c0] sm:$0xff]  ;;  %v9479_v9 = vpack.c.bf16 %v6132_v17, %v6122_v48 }
 0x3f2   :  { %v4828_v39 = vrot.slane %v3384_v20, 1  ;;  %v9477_v63 = vpack.c.bf16 %v6133_v29, %v6123_v57  ;;  %v9573_v20 = vpack.c.bf16 %v6137_v34, %v6127_v1  ;;  %v6136_v57 = vld [vmem:[%s16329_s3 + $0x750] sm:$0xff]  ;;  %9476 = vmatpush1.bf16.msra.mxu1 %v9475_v4  ;;  %v16664_v17 = vld [vmem:[#allocation55_spill] sm:$0xff] }
 0x3f3   :  { %v2893_v35 = vpop.f32.mrb[138].mxu0  ;;  %v4362_v44 = vmax.f32 %v4338_v23, 0.0  ;;  %v6126_v23 = vld [vmem:[%s16329_s3 + $0x700] sm:$0xff]  ;;  %9572 = vmatpush1.bf16.msra.mxu0 %v9571_v0  ;;  %v3925_v0 = vmax.f32 %v13829_v47, 0.0 }
 0x3f4   :  { %v4830_v36 = vsel %vm3804_vm1, %v4828_v39, %v4829_v33  ;;  %v4238_v51 = vrot.slane %v2893_v35, 1  ;;  %v9242_v13 = vpop.f32.mrb[138].mxu1  ;;  %v2895_v43 = vpop.f32.mrb[139].mxu0  ;;  %8857 = vmatmul.mubr.msk.f32.gmra.mrb[244].mxu0 %vm162_vm0, %v10152_v28  ;;  %v16663_v33 = vld [vmem:[#allocation76_spill] sm:$0xff]  ;;  %9478 = vmatprep.subr.bf16.mxu1 %v9477_v63  ;;  %v9575_v48 = vpack.c.bf16 %v6136_v57, %v6126_v23  ;;  %v3926_v23 = vmax.f32 %v13847_v12, 0.0 }
 0x3f5   :  { %v4914_v39 = vadd.f32 %v4830_v36, %v16663_v33  ;;  %v5549_v29 = vrot.slane %v9242_v13, 1  ;;  %v4241_v35 = vrot.slane %v2895_v43, 1  ;;  %v3394_v24 = vpop.f32.mrb[139].mxu1  ;;  %v5682_v27 = vmax.f32 %v3930_v6, %v4362_v44  ;;  %3215 = vmatprep.mubr.f32.mxu0 %v16379_v41  ;;  %9574 = vmatprep.subr.bf16.mxu0 %v9573_v20 }
 0x3f6   :  { %v4239_v1 = vsel %vm3804_vm1, %v4237_v26, %v4238_v51  ;;  %v5548_v34 = vrot.slane %v3394_v24, 1  ;;  %v10153_v24 = vld [vmem:[%s16327_s0 + $0x1c8] sm:$0xff]  ;;  %v16665_v26 = vld [vmem:[#allocation57_spill] sm:$0xff]  ;;  %9480 = vmatpush1.bf16.msra.mxu1 %v9479_v9  ;;  %v10154_v9 = vld [vmem:[%s16327_s0 + $0x1d0] sm:$0xff] }
 0x3f7   :  { %v4333_v28 = vadd.f32 %v4239_v1, %v16664_v17  ;;  %5747 = vrot.lane.b32.xlu1 %v5682_v27, %s10161_s29  ;;  %v2899_v55 = vpop.f32.mrb[140].mxu0  ;;  %v4242_v36 = vsel %vm3804_vm1, %v4240_v62, %v4241_v35  ;;  %v16666_v27 = vld [vmem:[#allocation78_spill] sm:$0xff]  ;;  %9576 = vmatpush1.bf16.msra.mxu0 %v9575_v48  ;;  %v4938_v35 = vmax.f32 %v4914_v39, 0.0 }
 0x3f8   :  { %v5550_v6 = vsel %vm3804_vm1, %v5548_v34, %v5549_v29  ;;  %v9245_v44 = vpop.f32.mrb[140].mxu1  ;;  %v2901_v13 = vpop.f32.mrb[141].mxu0  ;;  %8858 = vmatmul.mubr.msk.f32.gmra.mrb[246].mxu0 %vm162_vm0, %v10153_v24  ;;  %v4334_v4 = vadd.f32 %v4242_v36, %v16665_v26  ;;  %v4813_v33 = vrot.slane %v2899_v55, 1  ;;  %v16667_v55 = vld [vmem:[#allocation91_spill] sm:$0xff] }
 0x3f9   :  { %v4357_v63 = vmax.f32 %v4333_v28, 0.0  ;;  %v5634_v51 = vadd.f32 %v5550_v6, %v16666_v27  ;;  %v3830_v43 = vrot.slane %v9245_v44, 1  ;;  %v3404_v62 = vpop.f32.mrb[141].mxu1  ;;  %3221 = vmatprep.mubr.f32.mxu0 %v16379_v41  ;;  %v4816_v47 = vrot.slane %v2901_v13, 1 }
 0x3fa   :  { %v3829_v20 = vrot.slane %v3404_v62, 1  ;;  %v4358_v57 = vmax.f32 %v4334_v4, 0.0 }
 0x3fb   :  { %v2905_v29 = vpop.f32.mrb[142].mxu0  ;;  %v5658_v1 = vmax.f32 %v5634_v51, 0.0  ;;  %v13903_v34 = vmax.f32 %v3925_v0, %v4357_v63  ;;  %v16668_v0 = vld [vmem:[#allocation54_spill] sm:$0xff] }
 0x3fc   :  { %v3831_v17 = vsel %vm3804_vm1, %v3829_v20, %v3830_v43  ;;  %v4814_v28 = vrot.slane %v2905_v29, 1  ;;  %v9248_v36 = vpop.f32.mrb[142].mxu1  ;;  %v2907_v6 = vpop.f32.mrb[143].mxu0  ;;  %8859 = vmatmul.mubr.msk.f32.gmra.mrb[248].mxu0 %vm162_vm0, %v10154_v9  ;;  %v13910_v12 = vmax.f32 %v3926_v23, %v4358_v57  ;;  %v16669_v43 = vld [vmem:[#allocation48_spill] sm:$0xff]  ;;  %v10155_v29 = vld [vmem:[%s16327_s0 + $0x1d8] sm:$0xff] }
 0x3fd   :  { %v3909_v48 = vadd.f32 %v3831_v17, %v16667_v55  ;;  %v4262_v39 = vrot.slane %v9248_v36, 1  ;;  %v4817_v44 = vrot.slane %v2907_v6, 1  ;;  %v3414_v24 = vpop.f32.mrb[143].mxu1  ;;  %3227 = vmatprep.mubr.f32.mxu0 %v16379_v41  ;;  %v13914_v13 = vmax.f32 %v4938_v35, %v5658_v1 }
 0x3fe   :  { %v4815_v26 = vsel %vm3804_vm1, %v4813_v33, %v4814_v28  ;;  %v4261_v4 = vrot.slane %v3414_v24, 1  ;;  %5741 = vrot.lane.b32.xlu0 %v13910_v12, %s10161_s29  ;;  %v16670_v33 = vld [vmem:[#allocation94_spill] sm:$0xff] }
 0x3ff   :  { %v4909_v63 = vadd.f32 %v4815_v26, %v16668_v0  ;;  %v4818_v27 = vsel %vm3804_vm1, %v4816_v47, %v4817_v44  ;;  %v2911_v51 = vpop.f32.mrb[144].mxu0  ;;  %v3933_v36 = vmax.f32 %v3909_v48, 0.0  ;;  %v16671_v0 = vld [vmem:[#allocation88_spill] sm:$0xff] }
 0x400   :  { %v4910_v62 = vadd.f32 %v4818_v27, %v16669_v43  ;;  %v4263_v20 = vsel %vm3804_vm1, %v4261_v4, %v4262_v39  ;;  %v9251_v23 = vpop.f32.mrb[144].mxu1  ;;  %v2913_v57 = vpop.f32.mrb[145].mxu0  ;;  %8860 = vmatmul.mubr.msk.f32.gmra.mrb[250].mxu0 %vm162_vm0, %v10155_v29  ;;  %v5533_v9 = vrot.slane %v2911_v51, 1  ;;  %v10156_v4 = vld [vmem:[%s16327_s0 + $0x1e0] sm:$0xff] }
 0x401   :  { %v4341_v35 = vadd.f32 %v4263_v20, %v16670_v33  ;;  %v4838_v1 = vrot.slane %v9251_v23, 1  ;;  %v3424_v17 = vpop.f32.mrb[145].mxu1  ;;  %3233 = vmatprep.mubr.f32.mxu0 %v16379_v41  ;;  %v5536_v55 = vrot.slane %v2913_v57, 1  ;;  %v16672_v57 = vld [vmem:[#allocation68_spill] sm:$0xff] }
 0x402   :  { %v4837_v47 = vrot.slane %v3424_v17, 1  ;;  %5743 = vrot.lane.b32.xlu0 %v13749_v53, %s10161_s29 }
 0x403   :  { %v2917_v28 = vpop.f32.mrb[146].mxu0  ;;  %v4365_v6 = vmax.f32 %v4341_v35, 0.0 }
 0x404   :  { %v4839_v39 = vsel %vm3804_vm1, %v4837_v47, %v4838_v1  ;;  %v5534_v44 = vrot.slane %v2917_v28, 1  ;;  %v9254_v24 = vpop.f32.mrb[146].mxu1  ;;  %v2919_v26 = vpop.f32.mrb[147].mxu0  ;;  %8861 = vmatmul.mubr.msk.f32.gmra.mrb[252].mxu0 %vm162_vm0, %v10156_v4  ;;  %v16673_v1 = vld [vmem:[#allocation53_spill] sm:$0xff] }
 0x405   :  { %v4917_v27 = vadd.f32 %v4839_v39, %v16671_v0  ;;  %v5558_v43 = vrot.slane %v9254_v24, 1  ;;  %v5537_v53 = vrot.slane %v2919_v26, 1  ;;  %v3434_v20 = vpop.f32.mrb[147].mxu1  ;;  %3239 = vmatprep.mubr.f32.mxu0 %v16379_v41  ;;  %v13938_v48 = vmax.f32 %v3933_v36, %v4365_v6  ;;  %v10157_v24 = vld [vmem:[%s16327_s0 + $0x1e8] sm:$0xff] }
 0x406   :  { %v5535_v51 = vsel %vm3804_vm1, %v5533_v9, %v5534_v44  ;;  %v5557_v23 = vrot.slane %v3434_v20, 1  ;;  %v4933_v36 = vmax.f32 %v4909_v63, 0.0  ;;  %v16674_v9 = vld [vmem:[#allocation90_spill] sm:$0xff]  ;;  %v4934_v0 = vmax.f32 %v4910_v62, 0.0 }
 0x407   :  { %v5629_v29 = vadd.f32 %v5535_v51, %v16672_v57  ;;  %v5538_v33 = vsel %vm3804_vm1, %v5536_v55, %v5537_v53  ;;  %v2923_v35 = vpop.f32.mrb[148].mxu0  ;;  %v4941_v51 = vmax.f32 %v4917_v27, 0.0 }
 0x408   :  { %v5630_v17 = vadd.f32 %v5538_v33, %v16673_v1  ;;  %v5559_v47 = vsel %vm3804_vm1, %v5557_v23, %v5558_v43  ;;  %v9257_v28 = vpop.f32.mrb[148].mxu1  ;;  %v2925_v39 = vpop.f32.mrb[149].mxu0  ;;  %8862 = vmatmul.mubr.msk.f32.gmra.mrb[254].mxu0 %vm162_vm0, %v10157_v24  ;;  %v3814_v43 = vrot.slane %v2923_v35, 1  ;;  %v16677_v35 = vld [vmem:[#allocation64_spill] sm:$0xff] }
 0x409   :  { %v5653_v6 = vmax.f32 %v5629_v29, 0.0  ;;  %v5637_v44 = vadd.f32 %v5559_v47, %v16674_v9  ;;  %v3839_v26 = vrot.slane %v9257_v28, 1  ;;  %v3444_v4 = vpop.f32.mrb[149].mxu1  ;;  %3245 = vmatprep.mubr.f32.mxu0 %v16379_v41  ;;  %v3817_v33 = vrot.slane %v2925_v39, 1  ;;  %v10158_v47 = vld [vmem:[%s16327_s0 + $0x1f0] sm:$0xff] }
 0x40a   :  { %v3838_v55 = vrot.slane %v3444_v4, 1  ;;  %v5654_v53 = vmax.f32 %v5630_v17, 0.0 }
 0x40b   :  { %v2929_v20 = vpop.f32.mrb[150].mxu0  ;;  %v5661_v23 = vmax.f32 %v5637_v44, 0.0  ;;  %v13951_v57 = vmax.f32 %v4933_v36, %v5653_v6  ;;  %v16678_v44 = vld [vmem:[#allocation82_spill] sm:$0xff] }
 0x40c   :  { %v3840_v1 = vsel %vm3804_vm1, %v3838_v55, %v3839_v26  ;;  %v3815_v63 = vrot.slane %v2929_v20, 1  ;;  %v9260_v29 = vpop.f32.mrb[150].mxu1  ;;  %v2931_v24 = vpop.f32.mrb[151].mxu0  ;;  %8863 = vmatmul.mubr.msk.f32.gmra.mrb[0].mxu0 %vm162_vm0, %v10158_v47  ;;  %v13958_v62 = vmax.f32 %v4934_v0, %v5654_v53  ;;  %v16679_v20 = vld [vmem:[#allocation75_spill] sm:$0xff] }
 0x40d   :  { %16675 = vst [vmem:[#allocation28_spill] sm:$0xff] %v13951_v57  ;;  %v3912_v17 = vadd.f32 %v3840_v1, %v16677_v35  ;;  %v4271_v27 = vrot.slane %v9260_v29, 1  ;;  %v3818_v28 = vrot.slane %v2931_v24, 1  ;;  %v3454_v36 = vpop.f32.mrb[151].mxu1  ;;  %3251 = vmatprep.mubr.f32.mxu0 %v16379_v41  ;;  %v13962_v39 = vmax.f32 %v4941_v51, %v5661_v23  ;;  %v10159_v24 = vld [vmem:[%s16327_s0 + $0x1f8] sm:$0xff]  ;;  %v16680_v51 = vld [vmem:[#allocation66_spill] sm:$0xff] }
 0x40e   :  { %16676 = vst [vmem:[#allocation15_spill] sm:$0xff] %v13958_v62  ;;  %v3816_v6 = vsel %vm3804_vm1, %v3814_v43, %v3815_v63  ;;  %v4270_v9 = vrot.slane %v3454_v36, 1 }
 0x40f   :  { %v3904_v26 = vadd.f32 %v3816_v6, %v16678_v44  ;;  %v3819_v4 = vsel %vm3804_vm1, %v3817_v33, %v3818_v28  ;;  %v2935_v55 = vpop.f32.mrb[152].mxu0  ;;  %v3936_v33 = vmax.f32 %v3912_v17, 0.0 }
 0x410   :  { %v3905_v0 = vadd.f32 %v3819_v4, %v16679_v20  ;;  %v4272_v53 = vsel %vm3804_vm1, %v4270_v9, %v4271_v27  ;;  %v9263_v1 = vpop.f32.mrb[152].mxu1  ;;  %v2937_v29 = vpop.f32.mrb[153].mxu0  ;;  %8864 = vmatmul.mubr.msk.f32.gmra.mrb[2].mxu0 %vm162_vm0, %v10159_v24  ;;  %v4246_v36 = vrot.slane %v2935_v55, 1  ;;  %v16681_v20 = vld [vmem:[#allocation9_spill] sm:$0xff] }
 0x411   :  { %v4344_v43 = vadd.f32 %v4272_v53, %v16680_v51  ;;  %v4847_v23 = vrot.slane %v9263_v1, 1  ;;  %v3464_v63 = vpop.f32.mrb[153].mxu1  ;;  %v4249_v6 = vrot.slane %v2937_v29, 1  ;;  %v16682_v51 = vld [vmem:[#allocation74_spill] sm:$0xff] }
 0x412   :  { %v4846_v47 = vrot.slane %v3464_v63, 1 }
 0x413   :  { %v2941_v35 = vpop.f32.mrb[154].mxu0  ;;  %v4368_v28 = vmax.f32 %v4344_v43, 0.0  ;;  %v16683_v43 = vld [vmem:[#allocation69_spill] sm:$0xff] }
 0x414   :  { %v4848_v27 = vsel %vm3804_vm1, %v4846_v47, %v4847_v23  ;;  %v4247_v9 = vrot.slane %v2941_v35, 1  ;;  %v9266_v44 = vpop.f32.mrb[154].mxu1  ;;  %v2943_v4 = vpop.f32.mrb[155].mxu0 }
 0x415   :  { %v4920_v41 = vadd.f32 %v4848_v27, %v16681_v20  ;;  %v5567_v57 = vrot.slane %v9266_v44, 1  ;;  %v4250_v62 = vrot.slane %v2943_v4, 1  ;;  %v3474_v24 = vpop.f32.mrb[155].mxu1  ;;  %v13976_v16 = vmax.f32 %v3936_v33, %v4368_v28  ;;  %v16684_v4 = vld [vmem:[#allocation11_spill] sm:$0xff] }
 0x416   :  { %v4248_v53 = vsel %vm3804_vm1, %v4246_v36, %v4247_v9  ;;  %v5566_v1 = vrot.slane %v3474_v24, 1  ;;  %v3928_v27 = vmax.f32 %v3904_v26, 0.0  ;;  %v3929_v36 = vmax.f32 %v3905_v0, 0.0 }
 0x417   :  { %v4336_v17 = vadd.f32 %v4248_v53, %v16682_v51  ;;  %v4251_v55 = vsel %vm3804_vm1, %v4249_v6, %v4250_v62  ;;  %v2947_v29 = vpop.f32.mrb[156].mxu0  ;;  %v4944_v51 = vmax.f32 %v4920_v41, 0.0 }
 0x418   :  { %v4337_v23 = vadd.f32 %v4251_v55, %v16683_v43  ;;  %v5568_v63 = vsel %vm3804_vm1, %v5566_v1, %v5567_v57  ;;  %v9269_v47 = vpop.f32.mrb[156].mxu1  ;;  %v2949_v35 = vpop.f32.mrb[157].mxu0  ;;  %v4822_v24 = vrot.slane %v2947_v29, 1 }
 0x419   :  { %v4360_v44 = vmax.f32 %v4336_v17, 0.0  ;;  %v5640_v20 = vadd.f32 %v5568_v63, %v16684_v4  ;;  %v3848_v33 = vrot.slane %v9269_v47, 1  ;;  %v3484_v28 = vpop.f32.mrb[157].mxu1  ;;  %v4825_v55 = vrot.slane %v2949_v35, 1  ;;  %v16685_v35 = vld [vmem:[#allocation77_spill] sm:$0xff] }
 0x41a   :  { %v3847_v19 = vrot.slane %v3484_v28, 1  ;;  %v4361_v9 = vmax.f32 %v4337_v23, 0.0 }
 0x41b   :  { %v2953_v53 = vpop.f32.mrb[158].mxu0  ;;  %v5664_v62 = vmax.f32 %v5640_v20, 0.0  ;;  %v13984_v6 = vmax.f32 %v3928_v27, %v4360_v44  ;;  %v16686_v20 = vld [vmem:[#allocation72_spill] sm:$0xff] }
 0x41c   :  { %v3849_v57 = vsel %vm3804_vm1, %v3847_v19, %v3848_v33  ;;  %v4823_v1 = vrot.slane %v2953_v53, 1  ;;  %v9272_v43 = vpop.f32.mrb[158].mxu1  ;;  %v2955_v26 = vpop.f32.mrb[159].mxu0  ;;  %v13987_v17 = vmax.f32 %v3929_v36, %v4361_v9 }
 0x41d   :  { %v3915_v63 = vadd.f32 %v3849_v57, %v13288_v37  ;;  %v4280_v47 = vrot.slane %v9272_v43, 1  ;;  %v4826_v4 = vrot.slane %v2955_v26, 1  ;;  %v3494_v0 = vpop.f32.mrb[159].mxu1  ;;  %v13990_v23 = vmax.f32 %v4944_v51, %v5664_v62 }
 0x41e   :  { %v4824_v41 = vsel %vm3804_vm1, %v4822_v24, %v4823_v1  ;;  %v4279_v29 = vrot.slane %v3494_v0, 1  ;;  %5745 = vrot.lane.b32.xlu1 %v13987_v17, %s10161_s29 }
 0x41f   :  { %v4912_v19 = vadd.f32 %v4824_v41, %v16685_v35  ;;  %v4827_v27 = vsel %vm3804_vm1, %v4825_v55, %v4826_v4  ;;  %v2959_v44 = vpop.f32.mrb[160].mxu0  ;;  %v3939_v57 = vmax.f32 %v3915_v63, 0.0 }
 0x420   :  { %v4913_v33 = vadd.f32 %v4827_v27, %v16686_v20  ;;  %v4281_v37 = vsel %vm3804_vm1, %v4279_v29, %v4280_v47  ;;  %v9275_v28 = vpop.f32.mrb[160].mxu1  ;;  %v2961_v36 = vpop.f32.mrb[161].mxu0  ;;  %v5542_v43 = vrot.slane %v2959_v44, 1 }
 0x421   :  { %v4347_v9 = vadd.f32 %v4281_v37, %v13320_v8  ;;  %v4856_v53 = vrot.slane %v9275_v28, 1  ;;  %v3504_v51 = vpop.f32.mrb[161].mxu1  ;;  %v5545_v55 = vrot.slane %v2961_v36, 1  ;;  %v16688_v36 = vld [vmem:[#allocation73_spill] sm:$0xff] }
 0x422   :  { %v4855_v24 = vrot.slane %v3504_v51, 1  ;;  %5751 = vrot.lane.b32.xlu1 %v13938_v48, %s10161_s29  ;;  %v16687_v48 = vld [vmem:[#allocation81_spill] sm:$0xff] }
 0x423   :  { %v2965_v62 = vpop.f32.mrb[162].mxu0  ;;  %v4371_v1 = vmax.f32 %v4347_v9, 0.0 }
 0x424   :  { %v4857_v26 = vsel %vm3804_vm1, %v4855_v24, %v4856_v53  ;;  %v5543_v4 = vrot.slane %v2965_v62, 1  ;;  %v9278_v0 = vpop.f32.mrb[162].mxu1  ;;  %v2967_v47 = vpop.f32.mrb[163].mxu0  ;;  %v4936_v24 = vmax.f32 %v4912_v19, 0.0 }
 0x425   :  { %v4923_v41 = vadd.f32 %v4857_v26, %v13263_v60  ;;  %v5576_v29 = vrot.slane %v9278_v0, 1  ;;  %v5546_v8 = vrot.slane %v2967_v47, 1  ;;  %v3514_v35 = vpop.f32.mrb[163].mxu1  ;;  %v5691_v27 = vmax.f32 %v3939_v57, %v4371_v1 }
 0x426   :  { %v5544_v20 = vsel %vm3804_vm1, %v5542_v43, %v5543_v4  ;;  %v5575_v37 = vrot.slane %v3514_v35, 1  ;;  %5755 = vrot.lane.b32.xlu1 %v13976_v16, %s10161_s29  ;;  %v4937_v16 = vmax.f32 %v4913_v33, 0.0 }
 0x427   :  { %v5632_v63 = vadd.f32 %v5544_v20, %v16687_v48  ;;  %v5547_v44 = vsel %vm3804_vm1, %v5545_v55, %v5546_v8  ;;  %v2971_v28 = vpop.f32.mrb[164].mxu0  ;;  %v4947_v47 = vmax.f32 %v4923_v41, 0.0 }
 0x428   :  { %v5633_v9 = vadd.f32 %v5547_v44, %v16688_v36  ;;  %v5577_v53 = vsel %vm3804_vm1, %v5575_v37, %v5576_v29  ;;  %v9281_v60 = vpop.f32.mrb[164].mxu1  ;;  %v2973_v51 = vpop.f32.mrb[165].mxu0  ;;  %v3823_v0 = vrot.slane %v2971_v28, 1 }
 0x429   :  { %v5656_v62 = vmax.f32 %v5632_v63, 0.0  ;;  %v5643_v57 = vadd.f32 %v5577_v53, %v13286_v40  ;;  %v3857_v1 = vrot.slane %v9281_v60, 1  ;;  %v3524_v43 = vpop.f32.mrb[165].mxu1  ;;  %v3826_v29 = vrot.slane %v2973_v51, 1 }
 0x42a   :  { %v3856_v26 = vrot.slane %v3524_v43, 1  ;;  %5759 = vrot.lane.b32.xlu1 %v5691_v27, %s10161_s29  ;;  %v5657_v4 = vmax.f32 %v5633_v9, 0.0  ;;  %v16689_v9 = vld [vmem:[#allocation63_spill] sm:$0xff] }
 0x42b   :  { %v2977_v55 = vpop.f32.mrb[166].mxu0  ;;  %v5667_v8 = vmax.f32 %v5643_v57, 0.0  ;;  %v14013_v35 = vmax.f32 %v4936_v24, %v5656_v62  ;;  %v16690_v24 = vld [vmem:[#allocation87_spill] sm:$0xff] }
 0x42c   :  { %v3858_v20 = vsel %vm3804_vm1, %v3856_v26, %v3857_v1  ;;  %v3824_v19 = vrot.slane %v2977_v55, 1  ;;  %v9284_v37 = vpop.f32.mrb[166].mxu1  ;;  %v2979_v48 = vpop.f32.mrb[167].mxu0  ;;  %v14016_v40 = vmax.f32 %v4937_v16, %v5657_v4 }
 0x42d   :  { %v3918_v63 = vadd.f32 %v3858_v20, %v13370_v30  ;;  %v4289_v44 = vrot.slane %v9284_v37, 1  ;;  %v3827_v27 = vrot.slane %v2979_v48, 1  ;;  %v3534_v33 = vpop.f32.mrb[167].mxu1  ;;  %v14019_v36 = vmax.f32 %v4947_v47, %v5667_v8 }
 0x42e   :  { %v3825_v41 = vsel %vm3804_vm1, %v3823_v0, %v3824_v19  ;;  %v4288_v28 = vrot.slane %v3534_v33, 1 }
 0x42f   :  { %v3907_v53 = vadd.f32 %v3825_v41, %v16689_v9  ;;  %v3828_v60 = vsel %vm3804_vm1, %v3826_v29, %v3827_v27  ;;  %v2983_v51 = vpop.f32.mrb[168].mxu0  ;;  %v3942_v47 = vmax.f32 %v3918_v63, 0.0 }
 0x430   :  { %v3908_v62 = vadd.f32 %v3828_v60, %v16690_v24  ;;  %v4290_v57 = vsel %vm3804_vm1, %v4288_v28, %v4289_v44  ;;  %v9287_v1 = vpop.f32.mrb[168].mxu1  ;;  %v2985_v43 = vpop.f32.mrb[169].mxu0  ;;  %v4255_v8 = vrot.slane %v2983_v51, 1  ;;  %v16691_v60 = vld [vmem:[#allocation86_spill] sm:$0xff] }
 0x431   :  { %v4350_v30 = vadd.f32 %v4290_v57, %v13394_v32  ;;  %v4865_v26 = vrot.slane %v9287_v1, 1  ;;  %v3544_v16 = vpop.f32.mrb[169].mxu1  ;;  %v4258_v20 = vrot.slane %v2985_v43, 1  ;;  %v16692_v57 = vld [vmem:[#allocation80_spill] sm:$0xff] }
 0x432   :  { %v4864_v4 = vrot.slane %v3544_v16, 1 }
 0x433   :  { %v2989_v55 = vpop.f32.mrb[170].mxu0  ;;  %v4374_v0 = vmax.f32 %v4350_v30, 0.0 }
 0x434   :  { %v4866_v19 = vsel %vm3804_vm1, %v4864_v4, %v4865_v26  ;;  %v4256_v29 = vrot.slane %v2989_v55, 1  ;;  %v9290_v37 = vpop.f32.mrb[170].mxu1  ;;  %v2991_v48 = vpop.f32.mrb[171].mxu0  ;;  %v3931_v26 = vmax.f32 %v3907_v53, 0.0 }
 0x435   :  { %v4926_v27 = vadd.f32 %v4866_v19, %v13353_v38  ;;  %v5585_v44 = vrot.slane %v9290_v37, 1  ;;  %v4259_v33 = vrot.slane %v2991_v48, 1  ;;  %v3554_v41 = vpop.f32.mrb[171].mxu1  ;;  %v5694_v28 = vmax.f32 %v3942_v47, %v4374_v0 }
 0x436   :  { %v4257_v32 = vsel %vm3804_vm1, %v4255_v8, %v4256_v29  ;;  %v5584_v9 = vrot.slane %v3554_v41, 1  ;;  %v3932_v8 = vmax.f32 %v3908_v62, 0.0 }
 0x437   :  { %v4339_v24 = vadd.f32 %v4257_v32, %v16691_v60  ;;  %v4260_v63 = vsel %vm3804_vm1, %v4258_v20, %v4259_v33  ;;  %5763 = vrot.lane.b32.xlu1 %v5694_v28, %s10161_s29  ;;  %v2995_v51 = vpop.f32.mrb[172].mxu0  ;;  %v4950_v37 = vmax.f32 %v4926_v27, 0.0 }
 0x438   :  { %v4340_v1 = vadd.f32 %v4260_v63, %v16692_v57  ;;  %v5586_v43 = vsel %vm3804_vm1, %v5584_v9, %v5585_v44  ;;  %v9293_v30 = vpop.f32.mrb[172].mxu1  ;;  %v2997_v38 = vpop.f32.mrb[173].mxu0  ;;  %v4831_v29 = vrot.slane %v2995_v51, 1  ;;  %v16693_v57 = vld [vmem:[#allocation89_spill] sm:$0xff] }
 0x439   :  { %v4363_v16 = vmax.f32 %v4339_v24, 0.0  ;;  %v5646_v4 = vadd.f32 %v5586_v43, %v13368_v2  ;;  %v3866_v55 = vrot.slane %v9293_v30, 1  ;;  %v3564_v47 = vpop.f32.mrb[173].mxu1  ;;  %v4834_v41 = vrot.slane %v2997_v38, 1  ;;  %v16694_v38 = vld [vmem:[#allocation84_spill] sm:$0xff] }
 0x43a   :  { %v3865_v0 = vrot.slane %v3564_v47, 1  ;;  %v4364_v19 = vmax.f32 %v4340_v1, 0.0 }
 0x43b   :  { %v3001_v20 = vpop.f32.mrb[174].mxu0  ;;  %v5670_v48 = vmax.f32 %v5646_v4, 0.0  ;;  %v14036_v33 = vmax.f32 %v3931_v26, %v4363_v16 }
 0x43c   :  { %v3867_v44 = vsel %vm3804_vm1, %v3865_v0, %v3866_v55  ;;  %v4832_v28 = vrot.slane %v3001_v20, 1  ;;  %v9296_v32 = vpop.f32.mrb[174].mxu1  ;;  %v3003_v53 = vpop.f32.mrb[175].mxu0  ;;  %v14039_v9 = vmax.f32 %v3932_v8, %v4364_v19 }
 0x43d   :  { %v3921_v2 = vadd.f32 %v3867_v44, %v13444_v22  ;;  %v4298_v60 = vrot.slane %v9296_v32, 1  ;;  %v4835_v24 = vrot.slane %v3003_v53, 1  ;;  %v3574_v62 = vpop.f32.mrb[175].mxu1  ;;  %v14042_v63 = vmax.f32 %v4950_v37, %v5670_v48 }
 0x43e   :  { %v4833_v27 = vsel %vm3804_vm1, %v4831_v29, %v4832_v28  ;;  %v4297_v51 = vrot.slane %v3574_v62, 1  ;;  %5749 = vrot.lane.b32.xlu0 %v14039_v9, %s10161_s29 }
 0x43f   :  { %v4915_v1 = vadd.f32 %v4833_v27, %v16693_v57  ;;  %v4836_v43 = vsel %vm3804_vm1, %v4834_v41, %v4835_v24  ;;  %v3007_v30 = vpop.f32.mrb[176].mxu0  ;;  %v3945_v29 = vmax.f32 %v3921_v2, 0.0  ;;  %v16695_v57 = vld [vmem:[#allocation93_spill] sm:$0xff] }
 0x440   :  { %v4916_v26 = vadd.f32 %v4836_v43, %v16694_v38  ;;  %v4299_v22 = vsel %vm3804_vm1, %v4297_v51, %v4298_v60  ;;  %v9299_v16 = vpop.f32.mrb[176].mxu1  ;;  %v3009_v4 = vpop.f32.mrb[177].mxu0  ;;  %v5551_v37 = vrot.slane %v3007_v30, 1  ;;  %v16696_v38 = vld [vmem:[#allocation85_spill] sm:$0xff] }
 0x441   :  { %v4353_v55 = vadd.f32 %v4299_v22, %v13468_v31  ;;  %v4874_v47 = vrot.slane %v9299_v16, 1  ;;  %v3584_v0 = vpop.f32.mrb[177].mxu1  ;;  %v5554_v48 = vrot.slane %v3009_v4, 1 }
 0x442   :  { %v4873_v8 = vrot.slane %v3584_v0, 1 }
 0x443   :  { %v3013_v19 = vpop.f32.mrb[178].mxu0  ;;  %v4377_v20 = vmax.f32 %v4353_v55, 0.0  ;;  %v4939_v55 = vmax.f32 %v4915_v1, 0.0 }
 0x444   :  { %v4875_v44 = vsel %vm3804_vm1, %v4873_v8, %v4874_v47  ;;  %v5552_v41 = vrot.slane %v3013_v19, 1  ;;  %v9302_v28 = vpop.f32.mrb[178].mxu1  ;;  %v3015_v32 = vpop.f32.mrb[179].mxu0 }
 0x445   :  { %v4929_v53 = vadd.f32 %v4875_v44, %v13427_v58  ;;  %v5594_v60 = vrot.slane %v9302_v28, 1  ;;  %v5555_v24 = vrot.slane %v3015_v32, 1  ;;  %v3594_v62 = vpop.f32.mrb[179].mxu1  ;;  %v5697_v27 = vmax.f32 %v3945_v29, %v4377_v20 }
 0x446   :  { %v5553_v31 = vsel %vm3804_vm1, %v5551_v37, %v5552_v41  ;;  %v5593_v51 = vrot.slane %v3594_v62, 1  ;;  %v4940_v20 = vmax.f32 %v4916_v26, 0.0 }
 0x447   :  { %v5635_v43 = vadd.f32 %v5553_v31, %v16695_v57  ;;  %v5556_v2 = vsel %vm3804_vm1, %v5554_v48, %v5555_v24  ;;  %5767 = vrot.lane.b32.xlu1 %v5697_v27, %s10161_s29  ;;  %v3019_v30 = vpop.f32.mrb[180].mxu0  ;;  %v4953_v41 = vmax.f32 %v4929_v53, 0.0 }
 0x448   :  { %v5636_v22 = vadd.f32 %v5556_v2, %v16696_v38  ;;  %v5595_v16 = vsel %vm3804_vm1, %v5593_v51, %v5594_v60  ;;  %v9305_v4 = vpop.f32.mrb[180].mxu1  ;;  %v3021_v58 = vpop.f32.mrb[181].mxu0  ;;  %v3832_v44 = vrot.slane %v3019_v30, 1  ;;  %v16697_v30 = vld [vmem:[#allocation65_spill] sm:$0xff] }
 0x449   :  { %v5659_v47 = vmax.f32 %v5635_v43, 0.0  ;;  %v5649_v0 = vadd.f32 %v5595_v16, %v13442_v25  ;;  %v3875_v8 = vrot.slane %v9305_v4, 1  ;;  %v3604_v19 = vpop.f32.mrb[181].mxu1  ;;  %v3835_v24 = vrot.slane %v3021_v58, 1  ;;  %v16698_v4 = vld [vmem:[#allocation5_spill] sm:$0xff] }
 0x44a   :  { %v3874_v29 = vrot.slane %v3604_v19, 1  ;;  %v5660_v37 = vmax.f32 %v5636_v22, 0.0 }
 0x44b   :  { %v3025_v48 = vpop.f32.mrb[182].mxu0  ;;  %v5673_v28 = vmax.f32 %v5649_v0, 0.0  ;;  %v14061_v32 = vmax.f32 %v4939_v55, %v5659_v47 }
 0x44c   :  { %v3876_v60 = vsel %vm3804_vm1, %v3874_v29, %v3875_v8  ;;  %v3833_v62 = vrot.slane %v3025_v48, 1  ;;  %v9308_v27 = vpop.f32.mrb[182].mxu1  ;;  %v3027_v1 = vpop.f32.mrb[183].mxu0  ;;  %v14064_v31 = vmax.f32 %v4940_v20, %v5660_v37 }
 0x44d   :  { %v3924_v25 = vadd.f32 %v3876_v60, %v13644_v52  ;;  %v4307_v51 = vrot.slane %v9308_v27, 1  ;;  %v3836_v57 = vrot.slane %v3027_v1, 1  ;;  %v3614_v26 = vpop.f32.mrb[183].mxu1  ;;  %v14067_v43 = vmax.f32 %v4953_v41, %v5673_v28 }
 0x44e   :  { %v3834_v53 = vsel %vm3804_vm1, %v3832_v44, %v3833_v62  ;;  %v4306_v2 = vrot.slane %v3614_v26, 1 }
 0x44f   :  { %v3910_v38 = vadd.f32 %v3834_v53, %v16697_v30  ;;  %v3837_v22 = vsel %vm3804_vm1, %v3835_v24, %v3836_v57  ;;  %v3031_v16 = vpop.f32.mrb[184].mxu0  ;;  %v3948_v37 = vmax.f32 %v3924_v25, 0.0 }
 0x450   :  { %v3911_v58 = vadd.f32 %v3837_v22, %v16698_v4  ;;  %v4308_v55 = vsel %vm3804_vm1, %v4306_v2, %v4307_v51  ;;  %v9311_v47 = vpop.f32.mrb[184].mxu1  ;;  %v3033_v0 = vpop.f32.mrb[185].mxu0  ;;  %v4264_v48 = vrot.slane %v3031_v16, 1  ;;  %v16699_v2 = vld [vmem:[#allocation4_spill] sm:$0xff] }
 0x451   :  { %v4356_v52 = vadd.f32 %v4308_v55, %v13715_v50  ;;  %v4883_v8 = vrot.slane %v9311_v47, 1  ;;  %v3624_v19 = vpop.f32.mrb[185].mxu1  ;;  %v4267_v41 = vrot.slane %v3033_v0, 1  ;;  %v16700_v16 = vld [vmem:[#allocation92_spill] sm:$0xff] }
 0x452   :  { %v4882_v29 = vrot.slane %v3624_v19, 1 }
 0x453   :  { %v3037_v20 = vpop.f32.mrb[186].mxu0  ;;  %v4380_v44 = vmax.f32 %v4356_v52, 0.0 }
 0x454   :  { %v4884_v28 = vsel %vm3804_vm1, %v4882_v29, %v4883_v8  ;;  %v4265_v24 = vrot.slane %v3037_v20, 1  ;;  %v9314_v60 = vpop.f32.mrb[186].mxu1  ;;  %v3039_v62 = vpop.f32.mrb[187].mxu0  ;;  %v3935_v8 = vmax.f32 %v3911_v58, 0.0  ;;  %v16701_v58 = vld [vmem:[#allocation12_spill] sm:$0xff] }
 0x455   :  { %v4932_v27 = vadd.f32 %v4884_v28, %v13578_v11  ;;  %v5603_v1 = vrot.slane %v9314_v60, 1  ;;  %v4268_v51 = vrot.slane %v3039_v62, 1  ;;  %v3634_v57 = vpop.f32.mrb[187].mxu1  ;;  %v5700_v26 = vmax.f32 %v3948_v37, %v4380_v44 }
 0x456   :  { %v4266_v50 = vsel %vm3804_vm1, %v4264_v48, %v4265_v24  ;;  %v5602_v53 = vrot.slane %v3634_v57, 1  ;;  %v3934_v11 = vmax.f32 %v3910_v38, 0.0 }
 0x457   :  { %v4342_v30 = vadd.f32 %v4266_v50, %v16699_v2  ;;  %v4269_v25 = vsel %vm3804_vm1, %v4267_v41, %v4268_v51  ;;  %5771 = vrot.lane.b32.xlu1 %v5700_v26, %s10161_s29  ;;  %v3043_v22 = vpop.f32.mrb[188].mxu0  ;;  %v4956_v20 = vmax.f32 %v4932_v27, 0.0  ;;  %v16702_v51 = vld [vmem:[#allocation8_spill] sm:$0xff] }
 0x458   :  { %v4343_v4 = vadd.f32 %v4269_v25, %v16700_v16  ;;  %v5604_v55 = vsel %vm3804_vm1, %v5602_v53, %v5603_v1  ;;  %v3045_v47 = vpop.f32.mrb[189].mxu0  ;;  %v4840_v48 = vrot.slane %v3043_v22, 1 }
 0x459   :  { %v4366_v0 = vmax.f32 %v4342_v30, 0.0  ;;  %v5652_v52 = vadd.f32 %v5604_v55, %v13642_v42  ;;  %v4843_v60 = vrot.slane %v3045_v47, 1 }
 0x45a   :  { %v4367_v19 = vmax.f32 %v4343_v4, 0.0  ;;  %v16703_v4 = vld [vmem:[#allocation7_spill] sm:$0xff] }
 0x45b   :  { %5832 = vrot.lane.b32.xlu1 %v13816_v3, %s10161_s29  ;;  %v3049_v29 = vpop.f32.mrb[190].mxu0  ;;  %v5676_v37 = vmax.f32 %v5652_v52, 0.0  ;;  %v14086_v44 = vmax.f32 %v3934_v11, %v4366_v0  ;;  %v16704_v11 = vld [vmem:[#allocation10_spill] sm:$0xff] }
 0x45c   :  { %v4841_v41 = vrot.slane %v3049_v29, 1  ;;  %v3051_v28 = vpop.f32.mrb[191].mxu0  ;;  %v14088_v24 = vmax.f32 %v3935_v8, %v4367_v19 }
 0x45d   :  { %v4844_v38 = vrot.slane %v3051_v28, 1  ;;  %v5724_v62 = vmax.f32 %v4956_v20, %v5676_v37 }
 0x45e   :  { %v4842_v42 = vsel %vm3804_vm1, %v4840_v48, %v4841_v41  ;;  %5753 = vrot.lane.b32.xlu0 %v14088_v24, %s10161_s29 }
 0x45f   :  { %v4918_v3 = vadd.f32 %v4842_v42, %v16701_v58  ;;  %v4845_v27 = vsel %vm3804_vm1, %v4843_v60, %v4844_v38  ;;  %5836 = vrot.lane.b32.xlu1 %v13914_v13, %s10161_s29  ;;  %v3055_v1 = vpop.f32.mrb[192].mxu0 }
 0x460   :  { %v4919_v57 = vadd.f32 %v4845_v27, %v16702_v51  ;;  %v3057_v26 = vpop.f32.mrb[193].mxu0  ;;  %v5560_v53 = vrot.slane %v3055_v1, 1 }
 0x461   :  { %v5563_v25 = vrot.slane %v3057_v26, 1 }
 0x462   :  { %v4943_v19 = vmax.f32 %v4919_v57, 0.0 }
 0x463   :  { %5840 = vrot.lane.b32.xlu1 %v13962_v39, %s10161_s29  ;;  %v3061_v50 = vpop.f32.mrb[194].mxu0  ;;  %v4942_v39 = vmax.f32 %v4918_v3, 0.0 }
 0x464   :  { %v5561_v2 = vrot.slane %v3061_v50, 1  ;;  %v3063_v30 = vpop.f32.mrb[195].mxu0 }
 0x465   :  { %v5564_v22 = vrot.slane %v3063_v30, 1 }
 0x466   :  { %v5562_v16 = vsel %vm3804_vm1, %v5560_v53, %v5561_v2 }
 0x467   :  { %v5638_v55 = vadd.f32 %v5562_v16, %v16703_v4  ;;  %v5565_v47 = vsel %vm3804_vm1, %v5563_v25, %v5564_v22  ;;  %5844 = vrot.lane.b32.xlu1 %v13990_v23, %s10161_s29  ;;  %v3067_v13 = vpop.f32.mrb[196].mxu0 }
 0x468   :  { %v5639_v0 = vadd.f32 %v5565_v47, %v16704_v11  ;;  %v3069_v52 = vpop.f32.mrb[197].mxu0  ;;  %v3841_v48 = vrot.slane %v3067_v13, 1 }
 0x469   :  { %v5662_v8 = vmax.f32 %v5638_v55, 0.0  ;;  %v3844_v23 = vrot.slane %v3069_v52, 1  ;;  %v14118_v57 = vpop.permute.xlu1 %5747 }
 0x46a   :  { %v5663_v29 = vmax.f32 %v5639_v0, 0.0 }
 0x46b   :  { %5848 = vrot.lane.b32.xlu1 %v14019_v36, %s10161_s29  ;;  %v3073_v20 = vpop.f32.mrb[198].mxu0  ;;  %v14108_v37 = vmax.f32 %v4942_v39, %v5662_v8 }
 0x46c   :  { %v3842_v41 = vrot.slane %v3073_v20, 1  ;;  %v3075_v28 = vpop.f32.mrb[199].mxu0  ;;  %v14110_v60 = vmax.f32 %v4943_v19, %v5663_v29 }
 0x46d   :  { %v3845_v38 = vrot.slane %v3075_v28, 1 }
 0x46e   :  { %v3843_v42 = vsel %vm3804_vm1, %v3841_v48, %v3842_v41 }
 0x46f   :  { %v3913_v58 = vadd.f32 %v3843_v42, %v13314_v54  ;;  %v3846_v3 = vsel %vm3804_vm1, %v3844_v23, %v3845_v38  ;;  %5852 = vrot.lane.b32.xlu1 %v14042_v63, %s10161_s29  ;;  %v3079_v36 = vpop.f32.mrb[200].mxu0  ;;  %v16706_v42 = vld [vmem:[#allocation18_spill] sm:$0xff] }
 0x470   :  { %v3914_v27 = vadd.f32 %v3846_v3, %v13258_v5  ;;  %v5742_v1 = vpop.permute.xlu0 %5741  ;;  %v3081_v51 = vpop.f32.mrb[201].mxu0  ;;  %v4273_v50 = vrot.slane %v3079_v36, 1 }
 0x471   :  { %v4276_v30 = vrot.slane %v3081_v51, 1 }
 0x473   :  { %5856 = vrot.lane.b32.xlu1 %v14067_v43, %s10161_s29  ;;  %v3085_v26 = vpop.f32.mrb[202].mxu0  ;;  %v14132_v43 = vmax.f32 %v13987_v17, %v14118_v57  ;;  %v3937_v17 = vmax.f32 %v3913_v58, 0.0 }
 0x474   :  { %v4274_v53 = vrot.slane %v3085_v26, 1  ;;  %v5744_v54 = vpop.permute.xlu0 %5743  ;;  %v3087_v2 = vpop.f32.mrb[203].mxu0 }
 0x475   :  { %v5774_v25 = vsel %vm5773_vm2, %v5742_v1, %v5744_v54  ;;  %v14124_v63 = vmax.f32 %v13910_v12, %v5744_v54  ;;  %v4277_v5 = vrot.slane %v3087_v2, 1  ;;  %v16705_v12 = vld [vmem:[#allocation17_spill] sm:$0xff] }
 0x476   :  { %v4275_v22 = vsel %vm3804_vm1, %v4273_v50, %v4274_v53  ;;  %v14128_v16 = vmax.f32 %v13903_v34, %v5774_v25 }
 0x477   :  { %v4345_v4 = vadd.f32 %v4275_v22, %v13255_v59  ;;  %v4278_v55 = vsel %vm3804_vm1, %v4276_v30, %v4277_v5  ;;  %5860 = vrot.lane.b32.xlu1 %v5724_v62, %s10161_s29  ;;  %v3091_v47 = vpop.f32.mrb[204].mxu0  ;;  %8929 = vmatprep.mubr.msk.f32.mxu1 %vm5773_vm2, %v14124_v63  ;;  %v3938_v59 = vmax.f32 %v3914_v27, 0.0 }
 0x478   :  { %v4346_v13 = vadd.f32 %v4278_v55, %v16705_v12  ;;  %8961 = vmatprep.mubr.msk.f32.mxu0 %vm5773_vm2, %v14124_v63  ;;  %v3093_v34 = vpop.f32.mrb[205].mxu0  ;;  %6255 = vmatmul.mubr.f32.vlgmr.msra.gmra.mrb[188].mxu1 %v14128_v16  ;;  %v4849_v39 = vrot.slane %v3091_v47, 1 }
 0x479   :  { %v4369_v11 = vmax.f32 %v4345_v4, 0.0  ;;  %6577 = vmatmul.mubr.f32.vlgmr.msra.gmra.mrb[4].mxu0 %v14128_v16  ;;  %8930 = vmatprep.mubr.msk.f32.mxu1 %vm5773_vm2, %v14132_v43  ;;  %v4852_v20 = vrot.slane %v3093_v34, 1 }
 0x47a   :  { %8962 = vmatprep.mubr.msk.f32.mxu0 %vm5773_vm2, %v14132_v43  ;;  %v4370_v62 = vmax.f32 %v4346_v13, 0.0 }
 0x47b   :  { %v3097_v0 = vpop.f32.mrb[206].mxu0  ;;  %v14148_v52 = vmax.f32 %v3937_v17, %v4369_v11 }
 0x47c   :  { %v4850_v8 = vrot.slane %v3097_v0, 1  ;;  %v3099_v19 = vpop.f32.mrb[207].mxu0  ;;  %v14150_v29 = vmax.f32 %v3938_v59, %v4370_v62 }
 0x47d   :  { %v4853_v48 = vrot.slane %v3099_v19, 1 }
 0x47e   :  { %v4851_v41 = vsel %vm3804_vm1, %v4849_v39, %v4850_v8  ;;  %5757 = vrot.lane.b32.xlu0 %v14150_v29, %s10161_s29 }
 0x47f   :  { %v4921_v28 = vadd.f32 %v4851_v41, %v13278_v15  ;;  %v4854_v23 = vsel %vm3804_vm1, %v4852_v20, %v4853_v48  ;;  %v3103_v38 = vpop.f32.mrb[208].mxu0 }
 0x480   :  { %v4922_v58 = vadd.f32 %v4854_v23, %v16706_v42  ;;  %v3105_v3 = vpop.f32.mrb[209].mxu0  ;;  %v5569_v27 = vrot.slane %v3103_v38, 1 }
 0x481   :  { %v5572_v26 = vrot.slane %v3105_v3, 1  ;;  %v4945_v5 = vmax.f32 %v4921_v28, 0.0 }
 0x482   :  { %v4946_v4 = vmax.f32 %v4922_v58, 0.0 }
 0x483   :  { %v3109_v36 = vpop.f32.mrb[210].mxu0 }
 0x484   :  { %v5570_v1 = vrot.slane %v3109_v36, 1  ;;  %v3111_v51 = vpop.f32.mrb[211].mxu0 }
 0x485   :  { %v5573_v50 = vrot.slane %v3111_v51, 1 }
 0x486   :  { %v5571_v53 = vsel %vm3804_vm1, %v5569_v27, %v5570_v1 }
 0x487   :  { %v5641_v54 = vadd.f32 %v5571_v53, %v13305_v7  ;;  %v5574_v2 = vsel %vm3804_vm1, %v5572_v26, %v5573_v50  ;;  %v3115_v30 = vpop.f32.mrb[212].mxu0 }
 0x488   :  { %v5642_v15 = vadd.f32 %v5574_v2, %v13249_v61  ;;  %v3117_v25 = vpop.f32.mrb[213].mxu0  ;;  %v3850_v13 = vrot.slane %v3115_v30, 1 }
 0x489   :  { %v5665_v22 = vmax.f32 %v5641_v54, 0.0  ;;  %v3853_v59 = vrot.slane %v3117_v25, 1 }
 0x48a   :  { %v5666_v55 = vmax.f32 %v5642_v15, 0.0 }
 0x48b   :  { %v3121_v47 = vpop.f32.mrb[214].mxu0  ;;  %v14162_v12 = vmax.f32 %v4945_v5, %v5665_v22 }
 0x48c   :  { %v3851_v34 = vrot.slane %v3121_v47, 1  ;;  %v3123_v17 = vpop.f32.mrb[215].mxu0  ;;  %v14164_v11 = vmax.f32 %v4946_v4, %v5666_v55 }
 0x48d   :  { %v3854_v7 = vrot.slane %v3123_v17, 1 }
 0x48e   :  { %v3852_v62 = vsel %vm3804_vm1, %v3850_v13, %v3851_v34 }
 0x48f   :  { %v3916_v0 = vadd.f32 %v3852_v62, %v13390_v14  ;;  %v3855_v61 = vsel %vm3804_vm1, %v3853_v59, %v3854_v7  ;;  %v3127_v39 = vpop.f32.mrb[216].mxu0 }
 0x490   :  { %v3917_v8 = vadd.f32 %v3855_v61, %v13350_v21  ;;  %v5746_v19 = vpop.permute.xlu1 %5745  ;;  %v3129_v20 = vpop.f32.mrb[217].mxu0  ;;  %v4282_v23 = vrot.slane %v3127_v39, 1 }
 0x491   :  { %v5775_v48 = vsel %vm5773_vm2, %v5746_v19, %v14118_v57  ;;  %v4285_v14 = vrot.slane %v3129_v20, 1  ;;  %v3940_v26 = vmax.f32 %v3916_v0, 0.0 }
 0x492   :  { %v14173_v41 = vmax.f32 %v13984_v6, %v5775_v48  ;;  %v3941_v50 = vmax.f32 %v3917_v8, 0.0 }
 0x493   :  { %v3133_v28 = vpop.f32.mrb[218].mxu0 }
 0x494   :  { %v4283_v38 = vrot.slane %v3133_v28, 1  ;;  %v14175_v42 = vpop.permute.xlu1 %5751  ;;  %v3135_v58 = vpop.f32.mrb[219].mxu0  ;;  %6261 = vmatmul.mubr.f32.gmra.mrb[190].mxu1 %v14173_v41  ;;  %6583 = vmatmul.mubr.f32.gmra.mrb[6].mxu0 %v14173_v41 }
 0x495   :  { %v14181_v21 = vmax.f32 %v14039_v9, %v14175_v42  ;;  %v4286_v3 = vrot.slane %v3135_v58, 1 }
 0x496   :  { %v4284_v57 = vsel %vm3804_vm1, %v4282_v23, %v4283_v38 }
 0x497   :  { %v4348_v6 = vadd.f32 %v4284_v57, %v13344_v10  ;;  %v4287_v36 = vsel %vm3804_vm1, %v4285_v14, %v4286_v3  ;;  %v3139_v27 = vpop.f32.mrb[220].mxu0  ;;  %8931 = vmatprep.mubr.msk.f32.mxu1 %vm5773_vm2, %v14181_v21  ;;  %8963 = vmatprep.mubr.msk.f32.mxu0 %vm5773_vm2, %v14181_v21 }
 0x498   :  { %v4349_v1 = vadd.f32 %v4287_v36, %v13302_v56  ;;  %v3141_v51 = vpop.f32.mrb[221].mxu0  ;;  %v4858_v10 = vrot.slane %v3139_v27, 1 }
 0x499   :  { %v4372_v9 = vmax.f32 %v4348_v6, 0.0  ;;  %v4861_v5 = vrot.slane %v3141_v51, 1  ;;  %v14210_v51 = vpop.permute.xlu1 %5755 }
 0x49a   :  { %v4373_v53 = vmax.f32 %v4349_v1, 0.0 }
 0x49b   :  { %v3145_v54 = vpop.f32.mrb[222].mxu0  ;;  %v14191_v2 = vmax.f32 %v3940_v26, %v4372_v9 }
 0x49c   :  { %v4859_v30 = vrot.slane %v3145_v54, 1  ;;  %v3147_v15 = vpop.f32.mrb[223].mxu0  ;;  %v14193_v25 = vmax.f32 %v3941_v50, %v4373_v53  ;;  %v16708_v53 = vld [vmem:[#allocation16_spill] sm:$0xff] }
 0x49d   :  { %v4862_v22 = vrot.slane %v3147_v15, 1 }
 0x49e   :  { %v4860_v4 = vsel %vm3804_vm1, %v4858_v10, %v4859_v30  ;;  %5761 = vrot.lane.b32.xlu0 %v14193_v25, %s10161_s29 }
 0x49f   :  { %v4924_v56 = vadd.f32 %v4860_v4, %v13362_v45  ;;  %v4863_v55 = vsel %vm3804_vm1, %v4861_v5, %v4862_v22  ;;  %v3151_v47 = vpop.f32.mrb[224].mxu0  ;;  %v14222_v22 = vmax.f32 %v14088_v24, %v14210_v51  ;;  %v5915_v24 = vld [vmem:[%s16329_s3 + $0x68] sm:$0xff] }
 0x4a0   :  { %v4925_v13 = vadd.f32 %v4863_v55, %v13327_v49  ;;  %v3153_v34 = vpop.f32.mrb[225].mxu0  ;;  %v5578_v59 = vrot.slane %v3151_v47, 1 }
 0x4a1   :  { %v5581_v0 = vrot.slane %v3153_v34, 1  ;;  %v4948_v28 = vmax.f32 %v4924_v56, 0.0 }
 0x4a2   :  { %v4949_v49 = vmax.f32 %v4925_v13, 0.0 }
 0x4a3   :  { %v3157_v17 = vpop.f32.mrb[226].mxu0 }
 0x4a4   :  { %v5579_v7 = vrot.slane %v3157_v17, 1  ;;  %v3159_v62 = vpop.f32.mrb[227].mxu0 }
 0x4a5   :  { %v5582_v61 = vrot.slane %v3159_v62, 1  ;;  %v5925_v62 = vld [vmem:[%s16329_s3 + $0xb8] sm:$0xff] }
 0x4a6   :  { %v5580_v39 = vsel %vm3804_vm1, %v5578_v59, %v5579_v7  ;;  %v5914_v7 = vld [vmem:[%s16329_s3 + $0x60] sm:$0xff] }
 0x4a7   :  { %v5644_v8 = vadd.f32 %v5580_v39, %v13381_v46  ;;  %v5583_v19 = vsel %vm3804_vm1, %v5581_v0, %v5582_v61  ;;  %v3163_v20 = vpop.f32.mrb[228].mxu0  ;;  %v5935_v0 = vld [vmem:[%s16329_s3 + $0x108] sm:$0xff]  ;;  %v16709_v61 = vld [vmem:[#allocation13_spill] sm:$0xff] }
 0x4a8   :  { %v5645_v45 = vadd.f32 %v5583_v19, %v13341_v18  ;;  %v3165_v48 = vpop.f32.mrb[229].mxu0  ;;  %v3859_v3 = vrot.slane %v3163_v20, 1  ;;  %v16707_v18 = vld [vmem:[#allocation22_spill] sm:$0xff] }
 0x4a9   :  { %v5668_v23 = vmax.f32 %v5644_v8, 0.0  ;;  %v3862_v27 = vrot.slane %v3165_v48, 1  ;;  %v5924_v48 = vld [vmem:[%s16329_s3 + $0xb0] sm:$0xff] }
 0x4aa   :  { %v5669_v38 = vmax.f32 %v5645_v45, 0.0  ;;  %v9485_v45 = vpack.c.bf16 %v5935_v0, %v5925_v62  ;;  %v5964_v0 = vld [vmem:[%s16329_s3 + $0x1f0] sm:$0xff] }
 0x4ab   :  { %v3169_v58 = vpop.f32.mrb[230].mxu0  ;;  %v14205_v14 = vmax.f32 %v4948_v28, %v5668_v23  ;;  %v5934_v28 = vld [vmem:[%s16329_s3 + $0x100] sm:$0xff]  ;;  %v5945_v23 = vld [vmem:[%s16329_s3 + $0x158] sm:$0xff] }
 0x4ac   :  { %v3860_v57 = vrot.slane %v3169_v58, 1  ;;  %v3171_v6 = vpop.f32.mrb[231].mxu0  ;;  %v14207_v36 = vmax.f32 %v4949_v49, %v5669_v38  ;;  %v16710_v49 = vld [vmem:[#allocation20_spill] sm:$0xff] }
 0x4ad   :  { %v3863_v46 = vrot.slane %v3171_v6, 1 }
 0x4ae   :  { %v3861_v1 = vsel %vm3804_vm1, %v3859_v3, %v3860_v57  ;;  %v5955_v3 = vld [vmem:[%s16329_s3 + $0x1a8] sm:$0xff] }
 0x4af   :  { %v3919_v26 = vadd.f32 %v3861_v1, %v16707_v18  ;;  %v3864_v9 = vsel %vm3804_vm1, %v3862_v27, %v3863_v46  ;;  %v3175_v50 = vpop.f32.mrb[232].mxu0  ;;  %v9487_v27 = vpack.c.bf16 %v5934_v28, %v5924_v48  ;;  %v5944_v46 = vld [vmem:[%s16329_s3 + $0x150] sm:$0xff]  ;;  %v5911_v1 = vld [vmem:[%s16329_s3 + $0x48] sm:$0xff] }
 0x4b0   :  { %v3920_v54 = vadd.f32 %v3864_v9, %v16708_v53  ;;  %v5750_v10 = vpop.permute.xlu0 %5749  ;;  %v3177_v30 = vpop.f32.mrb[233].mxu0  ;;  %v4291_v56 = vrot.slane %v3175_v50, 1  ;;  %v9489_v50 = vpack.c.bf16 %v5955_v3, %v5945_v23  ;;  %v5954_v53 = vld [vmem:[%s16329_s3 + $0x1a0] sm:$0xff] }
 0x4b1   :  { %v5776_v15 = vsel %vm5773_vm2, %v5750_v10, %v14175_v42  ;;  %v4294_v13 = vrot.slane %v3177_v30, 1  ;;  %v5904_v42 = vld [vmem:[%s16329_s3 + $0x10] sm:$0xff]  ;;  %v3943_v57 = vmax.f32 %v3919_v26, 0.0  ;;  %v5965_v26 = vld [vmem:[%s16329_s3 + $0x1f8] sm:$0xff] }
 0x4b2   :  { %v14218_v5 = vmax.f32 %v14036_v33, %v5776_v15  ;;  %v5905_v33 = vld [vmem:[%s16329_s3 + $0x18] sm:$0xff]  ;;  %v9483_v20 = vpack.c.bf16 %v5914_v7, %v5904_v42  ;;  %v3944_v18 = vmax.f32 %v3920_v54, 0.0  ;;  %v5975_v54 = vld [vmem:[%s16329_s3 + $0x248] sm:$0xff] }
 0x4b3   :  { %v3181_v4 = vpop.f32.mrb[234].mxu0  ;;  %v9481_v59 = vpack.c.bf16 %v5915_v24, %v5905_v33  ;;  %v5921_v10 = vld [vmem:[%s16329_s3 + $0x98] sm:$0xff]  ;;  %v9493_v62 = vpack.c.bf16 %v5975_v54, %v5965_v26 }
 0x4b4   :  { %v4292_v55 = vrot.slane %v3181_v4, 1  ;;  %v3183_v47 = vpop.f32.mrb[235].mxu0  ;;  %6267 = vmatmul.mubr.f32.gmra.mrb[192].mxu1 %v14218_v5  ;;  %6589 = vmatmul.mubr.f32.gmra.mrb[8].mxu0 %v14218_v5  ;;  %v9625_v4 = vpack.c.bf16 %v5921_v10, %v5911_v1 }
 0x4b5   :  { %v4295_v34 = vrot.slane %v3183_v47, 1  ;;  %8932 = vmatprep.mubr.msk.f32.mxu1 %vm5773_vm2, %v14222_v22  ;;  %8964 = vmatprep.mubr.msk.f32.mxu0 %vm5773_vm2, %v14222_v22 }
 0x4b6   :  { %v4293_v17 = vsel %vm3804_vm1, %v4291_v56, %v4292_v55  ;;  %9482 = vmatprep.subr.bf16.mxu1 %v9481_v59  ;;  %v5910_v56 = vld [vmem:[%s16329_s3 + $0x40] sm:$0xff]  ;;  %v5920_v55 = vld [vmem:[%s16329_s3 + $0x90] sm:$0xff]  ;;  %v9491_v59 = vpack.c.bf16 %v5954_v53, %v5944_v46  ;;  %9626 = vmatprep.subr.bf16.mxu0 %v9625_v4  ;;  %v16713_v46 = vld [vmem:[#allocation29_spill] sm:$0xff] }
 0x4b7   :  { %v4351_v39 = vadd.f32 %v4293_v17, %v16709_v61  ;;  %v4296_v8 = vsel %vm3804_vm1, %v4294_v13, %v4295_v34  ;;  %v3187_v19 = vpop.f32.mrb[236].mxu0  ;;  %9484 = vmatpush1.bf16.msra.mxu1 %v9483_v20  ;;  %v9627_v24 = vpack.c.bf16 %v5920_v55, %v5910_v56  ;;  %v5974_v61 = vld [vmem:[%s16329_s3 + $0x240] sm:$0xff]  ;;  %v5931_v56 = vld [vmem:[%s16329_s3 + $0xe8] sm:$0xff]  ;;  %v5941_v55 = vld [vmem:[%s16329_s3 + $0x138] sm:$0xff] }
 0x4b8   :  { %v4352_v38 = vadd.f32 %v4296_v8, %v16710_v49  ;;  %v3189_v58 = vpop.f32.mrb[237].mxu0  ;;  %9486 = vmatprep.subr.bf16.mxu1 %v9485_v45  ;;  %v4867_v47 = vrot.slane %v3187_v19, 1  ;;  %v16712_v45 = vld [vmem:[#allocation14_spill] sm:$0xff]  ;;  %v9495_v23 = vpack.c.bf16 %v5974_v61, %v5964_v0 }
 0x4b9   :  { %v4375_v6 = vmax.f32 %v4351_v39, 0.0  ;;  %v4870_v42 = vrot.slane %v3189_v58, 1  ;;  %v16711_v39 = vld [vmem:[#allocation6_spill] sm:$0xff]  ;;  %9628 = vmatpush1.bf16.msra.mxu0 %v9627_v24  ;;  %v5940_v24 = vld [vmem:[%s16329_s3 + $0x130] sm:$0xff] }
 0x4ba   :  { %v4376_v9 = vmax.f32 %v4352_v38, 0.0 }
 0x4bb   :  { %v3193_v30 = vpop.f32.mrb[238].mxu0  ;;  %v14279_v15 = vmax.f32 %v3943_v57, %v4375_v6  ;;  %9488 = vmatpush1.bf16.msra.mxu1 %v9487_v27 }
 0x4bc   :  { %v14290_v13 = vmax.f32 %v3944_v18, %v4376_v9  ;;  %v4868_v34 = vrot.slane %v3193_v30, 1  ;;  %v3195_v33 = vpop.f32.mrb[239].mxu0  ;;  %9490 = vmatprep.subr.bf16.mxu1 %v9489_v50  ;;  %v16714_v50 = vld [vmem:[#allocation23_spill] sm:$0xff] }
 0x4bd   :  { %v4871_v17 = vrot.slane %v3195_v33, 1  ;;  %v5930_v33 = vld [vmem:[%s16329_s3 + $0xe0] sm:$0xff] }
 0x4be   :  { %v4869_v7 = vsel %vm3804_vm1, %v4867_v47, %v4868_v34  ;;  %5765 = vrot.lane.b32.xlu0 %v14290_v13, %s10161_s29  ;;  %v9629_v34 = vpack.c.bf16 %v5941_v55, %v5931_v56  ;;  %v9631_v0 = vpack.c.bf16 %v5940_v24, %v5930_v33  ;;  %v6015_v56 = vld [vmem:[%s16329_s3 + $0x388] sm:$0xff]  ;;  %v6004_v55 = vld [vmem:[%s16329_s3 + $0x330] sm:$0xff]  ;;  %v5981_v24 = vld [vmem:[%s16329_s3 + $0x278] sm:$0xff] }
 0x4bf   :  { %v4927_v8 = vadd.f32 %v4869_v7, %v16711_v39  ;;  %v4872_v19 = vsel %vm3804_vm1, %v4870_v42, %v4871_v17  ;;  %v3199_v20 = vpop.f32.mrb[240].mxu0  ;;  %9492 = vmatpush1.bf16.msra.mxu1 %v9491_v59  ;;  %v5971_v33 = vld [vmem:[%s16329_s3 + $0x228] sm:$0xff] }
 0x4c0   :  { %v4928_v48 = vadd.f32 %v4872_v19, %v16712_v45  ;;  %v3201_v28 = vpop.f32.mrb[241].mxu0  ;;  %9494 = vmatprep.subr.bf16.mxu1 %v9493_v62  ;;  %v5587_v38 = vrot.slane %v3199_v20, 1  ;;  %9630 = vmatprep.subr.bf16.mxu0 %v9629_v34  ;;  %v5985_v19 = vld [vmem:[%s16329_s3 + $0x298] sm:$0xff]  ;;  %v5995_v20 = vld [vmem:[%s16329_s3 + $0x2e8] sm:$0xff]  ;;  %v5984_v45 = vld [vmem:[%s16329_s3 + $0x290] sm:$0xff] }
 0x4c1   :  { %v5590_v57 = vrot.slane %v3201_v28, 1  ;;  %v4951_v10 = vmax.f32 %v4927_v8, 0.0  ;;  %9632 = vmatpush1.bf16.msra.mxu0 %v9631_v0  ;;  %v16715_v28 = vld [vmem:[#allocation24_spill] sm:$0xff]  ;;  %v6014_v34 = vld [vmem:[%s16329_s3 + $0x380] sm:$0xff]  ;;  %v9637_v0 = vpack.c.bf16 %v5981_v24, %v5971_v33  ;;  %v6011_v24 = vld [vmem:[%s16329_s3 + $0x368] sm:$0xff] }
 0x4c2   :  { %v4952_v54 = vmax.f32 %v4928_v48, 0.0  ;;  %v14334_v48 = vpop.permute.xlu1 %5759  ;;  %v6034_v33 = vld [vmem:[%s16329_s3 + $0x420] sm:$0xff] }
 0x4c3   :  { %v3205_v49 = vpop.f32.mrb[242].mxu0  ;;  %9496 = vmatpush1.bf16.msra.mxu1 %v9495_v23 }
 0x4c4   :  { %v5588_v58 = vrot.slane %v3205_v49, 1  ;;  %v3207_v3 = vpop.f32.mrb[243].mxu0 }
 0x4c5   :  { %v5591_v6 = vrot.slane %v3207_v3, 1  ;;  %v5994_v3 = vld [vmem:[%s16329_s3 + $0x2e0] sm:$0xff] }
 0x4c6   :  { %v5589_v27 = vsel %vm3804_vm1, %v5587_v38, %v5588_v58  ;;  %v9497_v58 = vpack.c.bf16 %v5995_v20, %v5985_v19 }
 0x4c7   :  { %v5647_v1 = vadd.f32 %v5589_v27, %v16713_v46  ;;  %v5592_v18 = vsel %vm3804_vm1, %v5590_v57, %v5591_v6  ;;  %v3211_v9 = vpop.f32.mrb[244].mxu0  ;;  %v5951_v57 = vld [vmem:[%s16329_s3 + $0x188] sm:$0xff]  ;;  %v5961_v6 = vld [vmem:[%s16329_s3 + $0x1d8] sm:$0xff]  ;;  %v16716_v27 = vld [vmem:[#allocation32_spill] sm:$0xff] }
 0x4c8   :  { %v5648_v53 = vadd.f32 %v5592_v18, %v16714_v50  ;;  %v3213_v26 = vpop.f32.mrb[245].mxu0  ;;  %v3868_v17 = vrot.slane %v3211_v9, 1  ;;  %v9499_v9 = vpack.c.bf16 %v5994_v3, %v5984_v45  ;;  %v9633_v50 = vpack.c.bf16 %v5961_v6, %v5951_v57  ;;  %9498 = vmatprep.subr.bf16.mxu1 %v9497_v58  ;;  %v16717_v58 = vld [vmem:[#allocation30_spill] sm:$0xff] }
 0x4c9   :  { %v5671_v30 = vmax.f32 %v5647_v1, 0.0  ;;  %v3871_v61 = vrot.slane %v3213_v26, 1  ;;  %v5960_v26 = vld [vmem:[%s16329_s3 + $0x1d0] sm:$0xff] }
 0x4ca   :  { %v5672_v4 = vmax.f32 %v5648_v53, 0.0  ;;  %v5950_v53 = vld [vmem:[%s16329_s3 + $0x180] sm:$0xff]  ;;  %9500 = vmatpush1.bf16.msra.mxu1 %v9499_v9  ;;  %9634 = vmatprep.subr.bf16.mxu0 %v9633_v50  ;;  %v6000_v9 = vld [vmem:[%s16329_s3 + $0x310] sm:$0xff]  ;;  %v16718_v50 = vld [vmem:[#allocation21_spill] sm:$0xff] }
 0x4cb   :  { %v3217_v47 = vpop.f32.mrb[246].mxu0  ;;  %v14320_v42 = vmax.f32 %v4951_v10, %v5671_v30  ;;  %v9635_v30 = vpack.c.bf16 %v5960_v26, %v5950_v53 }
 0x4cc   :  { %v3869_v59 = vrot.slane %v3217_v47, 1  ;;  %v3219_v7 = vpop.f32.mrb[247].mxu0  ;;  %v14322_v62 = vmax.f32 %v4952_v54, %v5672_v4  ;;  %v6005_v4 = vld [vmem:[%s16329_s3 + $0x338] sm:$0xff] }
 0x4cd   :  { %v3872_v39 = vrot.slane %v3219_v7, 1  ;;  %9636 = vmatpush1.bf16.msra.mxu0 %v9635_v30  ;;  %v9501_v47 = vpack.c.bf16 %v6015_v56, %v6005_v4 }
 0x4ce   :  { %v3870_v8 = vsel %vm3804_vm1, %v3868_v17, %v3869_v59  ;;  %9638 = vmatprep.subr.bf16.mxu0 %v9637_v0  ;;  %v6020_v0 = vld [vmem:[%s16329_s3 + $0x3b0] sm:$0xff] }
 0x4cf   :  { %v14337_v23 = vadd.f32 %v3870_v8, %v16715_v28  ;;  %v3873_v49 = vsel %vm3804_vm1, %v3871_v61, %v3872_v39  ;;  %v3223_v38 = vpop.f32.mrb[248].mxu0  ;;  %v5970_v61 = vld [vmem:[%s16329_s3 + $0x220] sm:$0xff]  ;;  %v5980_v39 = vld [vmem:[%s16329_s3 + $0x270] sm:$0xff]  ;;  %9502 = vmatprep.subr.bf16.mxu1 %v9501_v47  ;;  %v6025_v28 = vld [vmem:[%s16329_s3 + $0x3d8] sm:$0xff] }
 0x4d0   :  { %v14350_v46 = vadd.f32 %v3873_v49, %v16716_v27  ;;  %v5754_v1 = vpop.permute.xlu0 %5753  ;;  %v3225_v18 = vpop.f32.mrb[249].mxu0  ;;  %v4300_v17 = vrot.slane %v3223_v38, 1  ;;  %v9639_v20 = vpack.c.bf16 %v5980_v39, %v5970_v61  ;;  %v6035_v49 = vld [vmem:[%s16329_s3 + $0x428] sm:$0xff] }
 0x4d1   :  { %v5777_v10 = vsel %vm5773_vm2, %v5754_v1, %v14210_v51  ;;  %v14374_v51 = vmax.f32 %v14150_v29, %v14334_v48  ;;  %v9503_v29 = vpack.c.bf16 %v6014_v34, %v6004_v55  ;;  %v4303_v8 = vrot.slane %v3225_v18, 1  ;;  %v5991_v38 = vld [vmem:[%s16329_s3 + $0x2c8] sm:$0xff]  ;;  %v6001_v1 = vld [vmem:[%s16329_s3 + $0x318] sm:$0xff]  ;;  %v5990_v18 = vld [vmem:[%s16329_s3 + $0x2c0] sm:$0xff] }
 0x4d2   :  { %v14361_v54 = vmax.f32 %v14086_v44, %v5777_v10  ;;  %9640 = vmatpush1.bf16.msra.mxu0 %v9639_v20  ;;  %v9505_v27 = vpack.c.bf16 %v6035_v49, %v6025_v28  ;;  %v9641_v10 = vpack.c.bf16 %v6001_v1, %v5991_v38  ;;  %v9643_v30 = vpack.c.bf16 %v6000_v9, %v5990_v18  ;;  %v6024_v34 = vld [vmem:[%s16329_s3 + $0x3d0] sm:$0xff]  ;;  %v6045_v49 = vld [vmem:[%s16329_s3 + $0x478] sm:$0xff]  ;;  %v6055_v38 = vld [vmem:[%s16329_s3 + $0x4c8] sm:$0xff] }
 0x4d3   :  { %v3229_v44 = vpop.f32.mrb[250].mxu0  ;;  %9504 = vmatpush1.bf16.msra.mxu1 %v9503_v29  ;;  %v3946_v4 = vmax.f32 %v14337_v23, 0.0  ;;  %v6010_v29 = vld [vmem:[%s16329_s3 + $0x360] sm:$0xff]  ;;  %v9509_v1 = vpack.c.bf16 %v6055_v38, %v6045_v49  ;;  %v6031_v9 = vld [vmem:[%s16329_s3 + $0x408] sm:$0xff]  ;;  %v6060_v49 = vld [vmem:[%s16329_s3 + $0x4f0] sm:$0xff] }
 0x4d4   :  { %v4301_v59 = vrot.slane %v3229_v44, 1  ;;  %v3231_v7 = vpop.f32.mrb[251].mxu0  ;;  %6273 = vmatmul.mubr.f32.gmra.mrb[194].mxu1 %v14361_v54  ;;  %6595 = vmatmul.mubr.f32.gmra.mrb[10].mxu0 %v14361_v54  ;;  %v3947_v44 = vmax.f32 %v14350_v46, 0.0  ;;  %v6021_v46 = vld [vmem:[%s16329_s3 + $0x3b8] sm:$0xff]  ;;  %v9647_v20 = vpack.c.bf16 %v6020_v0, %v6010_v29  ;;  %v6054_v18 = vld [vmem:[%s16329_s3 + $0x4c0] sm:$0xff]  ;;  %v6051_v0 = vld [vmem:[%s16329_s3 + $0x4a8] sm:$0xff] }
 0x4d5   :  { %v4304_v19 = vrot.slane %v3231_v7, 1  ;;  %8933 = vmatprep.mubr.msk.f32.mxu1 %vm5773_vm2, %v14374_v51  ;;  %8965 = vmatprep.mubr.msk.f32.mxu0 %vm5773_vm2, %v14374_v51  ;;  %v9507_v7 = vpack.c.bf16 %v6034_v33, %v6024_v34  ;;  %v16721_v34 = vld [vmem:[#allocation15_spill] sm:$0xff]  ;;  %v6065_v33 = vld [vmem:[%s16329_s3 + $0x518] sm:$0xff]  ;;  %v6074_v29 = vld [vmem:[%s16329_s3 + $0x560] sm:$0xff] }
 0x4d6   :  { %v4302_v45 = vsel %vm3804_vm1, %v4300_v17, %v4301_v59  ;;  %9506 = vmatprep.subr.bf16.mxu1 %v9505_v27  ;;  %9642 = vmatprep.subr.bf16.mxu0 %v9641_v10 }
 0x4d7   :  { %v4354_v3 = vadd.f32 %v4302_v45, %v16717_v58  ;;  %v4305_v57 = vsel %vm3804_vm1, %v4303_v8, %v4304_v19  ;;  %v3235_v6 = vpop.f32.mrb[252].mxu0  ;;  %9644 = vmatpush1.bf16.msra.mxu0 %v9643_v30  ;;  %v9645_v19 = vpack.c.bf16 %v6021_v46, %v6011_v24  ;;  %9508 = vmatpush1.bf16.msra.mxu1 %v9507_v7  ;;  %v6044_v58 = vld [vmem:[%s16329_s3 + $0x470] sm:$0xff]  ;;  %v6075_v24 = vld [vmem:[%s16329_s3 + $0x568] sm:$0xff] }
 0x4d8   :  { %v4355_v53 = vadd.f32 %v4305_v57, %v16718_v50  ;;  %v3237_v26 = vpop.f32.mrb[253].mxu0  ;;  %v4876_v55 = vrot.slane %v3235_v6, 1  ;;  %v6041_v50 = vld [vmem:[%s16329_s3 + $0x458] sm:$0xff]  ;;  %v9511_v30 = vpack.c.bf16 %v6054_v18, %v6044_v58  ;;  %9510 = vmatprep.subr.bf16.mxu1 %v9509_v1  ;;  %v9513_v46 = vpack.c.bf16 %v6075_v24, %v6065_v33  ;;  %v16722_v1 = vld [vmem:[#allocation35_spill] sm:$0xff] }
 0x4d9   :  { %v4378_v56 = vmax.f32 %v4354_v3, 0.0  ;;  %v4879_v23 = vrot.slane %v3237_v26, 1  ;;  %9646 = vmatprep.subr.bf16.mxu0 %v9645_v19  ;;  %v16719_v3 = vld [vmem:[#allocation26_spill] sm:$0xff]  ;;  %v16720_v26 = vld [vmem:[#allocation19_spill] sm:$0xff] }
 0x4da   :  { %v4379_v47 = vmax.f32 %v4355_v53, 0.0 }
 0x4db   :  { %v3241_v17 = vpop.f32.mrb[254].mxu0  ;;  %v14430_v59 = vmax.f32 %v3946_v4, %v4378_v56  ;;  %9648 = vmatpush1.bf16.msra.mxu0 %v9647_v20  ;;  %v9649_v4 = vpack.c.bf16 %v6041_v50, %v6031_v9  ;;  %v6030_v56 = vld [vmem:[%s16329_s3 + $0x400] sm:$0xff]  ;;  %9512 = vmatpush1.bf16.msra.mxu1 %v9511_v30  ;;  %v16723_v30 = vld [vmem:[#allocation25_spill] sm:$0xff] }
 0x4dc   :  { %v4877_v61 = vrot.slane %v3241_v17, 1  ;;  %v3243_v39 = vpop.f32.mrb[255].mxu0  ;;  %v14441_v8 = vmax.f32 %v3947_v44, %v4379_v47  ;;  %9514 = vmatprep.subr.bf16.mxu1 %v9513_v46  ;;  %v6094_v46 = vld [vmem:[%s16329_s3 + $0x600] sm:$0xff] }
 0x4dd   :  { %v4880_v45 = vrot.slane %v3243_v39, 1  ;;  %9650 = vmatprep.subr.bf16.mxu0 %v9649_v4 }
 0x4de   :  { %v4878_v28 = vsel %vm3804_vm1, %v4876_v55, %v4877_v61  ;;  %5769 = vrot.lane.b32.xlu0 %v14441_v8, %s10161_s29  ;;  %v6040_v55 = vld [vmem:[%s16329_s3 + $0x450] sm:$0xff]  ;;  %v6061_v61 = vld [vmem:[%s16329_s3 + $0x4f8] sm:$0xff] }
 0x4df   :  { %v14456_v57 = vadd.f32 %v4878_v28, %v16719_v3  ;;  %v4881_v6 = vsel %vm3804_vm1, %v4879_v23, %v4880_v45  ;;  %v3247_v27 = vpop.f32.mrb[0].mxu0  ;;  %v9651_v44 = vpack.c.bf16 %v6040_v55, %v6030_v56  ;;  %v6064_v23 = vld [vmem:[%s16329_s3 + $0x510] sm:$0xff]  ;;  %v9653_v45 = vpack.c.bf16 %v6061_v61, %v6051_v0  ;;  %v6050_v28 = vld [vmem:[%s16329_s3 + $0x4a0] sm:$0xff]  ;;  %v6085_v56 = vld [vmem:[%s16329_s3 + $0x5b8] sm:$0xff] }
 0x4e0   :  { %v3249_v53 = vpop.f32.mrb[1].mxu0  ;;  %v14469_v10 = vadd.f32 %v4881_v6, %v16720_v26  ;;  %v5596_v47 = vrot.slane %v3247_v27, 1  ;;  %v9515_v20 = vpack.c.bf16 %v6074_v29, %v6064_v23  ;;  %v9655_v58 = vpack.c.bf16 %v6060_v49, %v6050_v28  ;;  %v6071_v6 = vld [vmem:[%s16329_s3 + $0x548] sm:$0xff]  ;;  %v6081_v27 = vld [vmem:[%s16329_s3 + $0x598] sm:$0xff]  ;;  %v6080_v26 = vld [vmem:[%s16329_s3 + $0x590] sm:$0xff] }
 0x4e1   :  { %v5599_v17 = vrot.slane %v3249_v53, 1  ;;  %9652 = vmatpush1.bf16.msra.mxu0 %v9651_v44  ;;  %v9657_v50 = vpack.c.bf16 %v6081_v27, %v6071_v6  ;;  %v6070_v53 = vld [vmem:[%s16329_s3 + $0x540] sm:$0xff]  ;;  %v6095_v55 = vld [vmem:[%s16329_s3 + $0x608] sm:$0xff]  ;;  %v6100_v61 = vld [vmem:[%s16329_s3 + $0x630] sm:$0xff] }
 0x4e2   :  { %5830 = vrot.lane.b32.xlu0 %v16721_v34, %s10161_s29  ;;  %9516 = vmatpush1.bf16.msra.mxu1 %v9515_v20  ;;  %v9659_v44 = vpack.c.bf16 %v6080_v26, %v6070_v53  ;;  %v9517_v24 = vpack.c.bf16 %v6095_v55, %v6085_v56  ;;  %v4955_v23 = vmax.f32 %v14469_v10, 0.0  ;;  %v6101_v10 = vld [vmem:[%s16329_s3 + $0x638] sm:$0xff]  ;;  %v6090_v0 = vld [vmem:[%s16329_s3 + $0x5e0] sm:$0xff]  ;;  %v6115_v49 = vld [vmem:[%s16329_s3 + $0x6a8] sm:$0xff] }
 0x4e3   :  { %v3253_v7 = vpop.f32.mrb[2].mxu0  ;;  %9654 = vmatprep.subr.bf16.mxu0 %v9653_v45  ;;  %v9663_v45 = vpack.c.bf16 %v6100_v61, %v6090_v0  ;;  %v6105_v28 = vld [vmem:[%s16329_s3 + $0x658] sm:$0xff]  ;;  %v6111_v6 = vld [vmem:[%s16329_s3 + $0x688] sm:$0xff]  ;;  %v6110_v53 = vld [vmem:[%s16329_s3 + $0x680] sm:$0xff] }
 0x4e4   :  { %v5597_v39 = vrot.slane %v3253_v7, 1  ;;  %v3255_v19 = vpop.f32.mrb[3].mxu0  ;;  %v6084_v7 = vld [vmem:[%s16329_s3 + $0x5b0] sm:$0xff]  ;;  %9518 = vmatprep.subr.bf16.mxu1 %v9517_v24  ;;  %v6121_v27 = vld [vmem:[%s16329_s3 + $0x6d8] sm:$0xff]  ;;  %v6134_v24 = vld [vmem:[%s16329_s3 + $0x740] sm:$0xff] }
 0x4e5   :  { %v5600_v38 = vrot.slane %v3255_v19, 1  ;;  %9656 = vmatpush1.bf16.msra.mxu0 %v9655_v58  ;;  %v9519_v29 = vpack.c.bf16 %v6094_v46, %v6084_v7  ;;  %v9521_v58 = vpack.c.bf16 %v6115_v49, %v6105_v28  ;;  %v6120_v26 = vld [vmem:[%s16329_s3 + $0x6d0] sm:$0xff]  ;;  %v6125_v55 = vld [vmem:[%s16329_s3 + $0x6f8] sm:$0xff]  ;;  %v6130_v7 = vld [vmem:[%s16329_s3 + $0x720] sm:$0xff] }
 0x4e6   :  { %v5598_v3 = vsel %vm3804_vm1, %v5596_v47, %v5597_v39  ;;  %5834 = vrot.lane.b32.xlu0 %v14016_v40, %s10161_s29  ;;  %v4954_v47 = vmax.f32 %v14456_v57, 0.0  ;;  %9658 = vmatprep.subr.bf16.mxu0 %v9657_v50  ;;  %v6091_v57 = vld [vmem:[%s16329_s3 + $0x5e8] sm:$0xff]  ;;  %v9665_v50 = vpack.c.bf16 %v6121_v27, %v6111_v6  ;;  %v9667_v56 = vpack.c.bf16 %v6120_v26, %v6110_v53  ;;  %v6140_v46 = vld [vmem:[%s16329_s3 + $0x770] sm:$0xff] }
 0x4e7   :  { %v5650_v18 = vadd.f32 %v5598_v3, %v16722_v1  ;;  %v5601_v9 = vsel %vm3804_vm1, %v5599_v17, %v5600_v38  ;;  %v9661_v20 = vpack.c.bf16 %v6101_v10, %v6091_v57  ;;  %9520 = vmatpush1.bf16.msra.mxu1 %v9519_v29  ;;  %v6104_v38 = vld [vmem:[%s16329_s3 + $0x650] sm:$0xff]  ;;  %v6114_v3 = vld [vmem:[%s16329_s3 + $0x6a0] sm:$0xff]  ;;  %v5764_v1 = vpop.permute.xlu1 %5763  ;;  %v9671_v57 = vpack.c.bf16 %v6140_v46, %v6130_v7  ;;  %v5909_v29 = vld [vmem:[%s16329_s3 + $0x38] sm:$0xff] }
 0x4e8   :  { %v5651_v4 = vadd.f32 %v5601_v9, %v16723_v30  ;;  %v9523_v9 = vpack.c.bf16 %v6114_v3, %v6104_v38  ;;  %9522 = vmatprep.subr.bf16.mxu1 %v9521_v58  ;;  %v5919_v10 = vld [vmem:[%s16329_s3 + $0x88] sm:$0xff] }
 0x4e9   :  { %v5674_v33 = vmax.f32 %v5650_v18, 0.0  ;;  %9660 = vmatpush1.bf16.msra.mxu0 %v9659_v44  ;;  %v6135_v44 = vld [vmem:[%s16329_s3 + $0x748] sm:$0xff]  ;;  %v9577_v0 = vpack.c.bf16 %v5919_v10, %v5909_v29 }
 0x4ea   :  { %v5675_v17 = vmax.f32 %v5651_v4, 0.0  ;;  %5838 = vrot.lane.b32.xlu0 %v14064_v31, %s10161_s29  ;;  %9662 = vmatprep.subr.bf16.mxu0 %v9661_v20 }
 0x4eb   :  { %v14549_v39 = vmax.f32 %v4954_v47, %v5674_v33  ;;  %9524 = vmatpush1.bf16.msra.mxu1 %v9523_v9  ;;  %v9525_v47 = vpack.c.bf16 %v6135_v44, %v6125_v55  ;;  %v6124_v33 = vld [vmem:[%s16329_s3 + $0x6f0] sm:$0xff] }
 0x4ec   :  { %v14551_v19 = vmax.f32 %v4955_v23, %v5675_v17  ;;  %v6141_v23 = vld [vmem:[%s16329_s3 + $0x778] sm:$0xff]  ;;  %v16724_v55 = vld [vmem:[#allocation28_spill] sm:$0xff] }
 0x4ed   :  { %9664 = vmatpush1.bf16.msra.mxu0 %v9663_v45  ;;  %9526 = vmatprep.subr.bf16.mxu1 %v9525_v47  ;;  %v5768_v45 = vpop.permute.xlu1 %5767 }
 0x4ee   :  { %5842 = vrot.lane.b32.xlu0 %v14110_v60, %s10161_s29  ;;  %9666 = vmatprep.subr.bf16.mxu0 %v9665_v50  ;;  %v14636_v49 = vmax.f32 %v14290_v13, %v5768_v45 }
 0x4f0   :  { %v5758_v18 = vpop.permute.xlu0 %5757 }
 0x4f1   :  { %v5778_v30 = vsel %vm5773_vm2, %v5758_v18, %v14334_v48  ;;  %v6131_v48 = vld [vmem:[%s16329_s3 + $0x728] sm:$0xff]  ;;  %9668 = vmatpush1.bf16.msra.mxu0 %v9667_v56  ;;  %v5772_v3 = vpop.permute.xlu1 %5771 }
 0x4f2   :  { %v14582_v4 = vmax.f32 %v14148_v52, %v5778_v30  ;;  %5846 = vrot.lane.b32.xlu0 %v14164_v11, %s10161_s29  ;;  %v14596_v52 = vmax.f32 %v14193_v25, %v5764_v1  ;;  %v9527_v25 = vpack.c.bf16 %v6134_v24, %v6124_v33  ;;  %v9669_v17 = vpack.c.bf16 %v6141_v23, %v6131_v48 }
 0x4f3   :  { %v14649_v13 = vmax.f32 %v14441_v8, %v5772_v3 }
 0x4f4   :  { %6279 = vmatmul.mubr.f32.gmra.mrb[196].mxu1 %v14582_v4  ;;  %6601 = vmatmul.mubr.f32.gmra.mrb[12].mxu0 %v14582_v4 }
 0x4f5   :  { %8934 = vmatprep.mubr.msk.f32.mxu1 %vm5773_vm2, %v14596_v52  ;;  %8966 = vmatprep.mubr.msk.f32.mxu0 %vm5773_vm2, %v14596_v52  ;;  %v5833_v6 = vpop.permute.xlu1 %5832 }
 0x4f6   :  { %5850 = vrot.lane.b32.xlu0 %v14207_v36, %s10161_s29  ;;  %9670 = vmatprep.subr.bf16.mxu0 %v9669_v17  ;;  %v14666_v53 = vmax.f32 %v16721_v34, %v5833_v6 }
 0x4f7   :  { %9528 = vmatpush1.bf16.msra.mxu1 %v9527_v25  ;;  %9672 = vmatpush1.bf16.msra.mxu0 %v9671_v57 }
 0x4f8   :  { %9578 = vmatprep.subr.bf16.mxu1 %v9577_v0 }
 0x4f9   :  { %v5837_v27 = vpop.permute.xlu1 %5836 }
 0x4fa   :  { %5854 = vrot.lane.b32.xlu0 %v14322_v62, %s10161_s29  ;;  %v14679_v34 = vmax.f32 %v14016_v40, %v5837_v27 }
 0x4fe   :  { %5858 = vrot.lane.b32.xlu0 %v14551_v19, %s10161_s29 }
 0x510   :  { %v5762_v61 = vpop.permute.xlu0 %5761 }
 0x511   :  { %v5779_v20 = vsel %vm5773_vm2, %v5762_v61, %v5764_v1 }
 0x512   :  { %v14633_v28 = vmax.f32 %v14191_v2, %v5779_v20 }
 0x514   :  { %6285 = vmatmul.mubr.f32.gmra.mrb[198].mxu1 %v14633_v28  ;;  %6607 = vmatmul.mubr.f32.gmra.mrb[14].mxu0 %v14633_v28 }
 0x515   :  { %8935 = vmatprep.mubr.msk.f32.mxu1 %vm5773_vm2, %v14636_v49  ;;  %8967 = vmatprep.mubr.msk.f32.mxu0 %vm5773_vm2, %v14636_v49 }
 0x530   :  { %v5766_v38 = vpop.permute.xlu0 %5765 }
 0x531   :  { %v5780_v58 = vsel %vm5773_vm2, %v5766_v38, %v5768_v45 }
 0x532   :  { %v14646_v2 = vmax.f32 %v14279_v15, %v5780_v58  ;;  %v5841_v15 = vpop.permute.xlu1 %5840 }
 0x533   :  { %v14692_v33 = vmax.f32 %v14064_v31, %v5841_v15 }
 0x534   :  { %6291 = vmatmul.mubr.f32.gmra.mrb[200].mxu1 %v14646_v2  ;;  %6613 = vmatmul.mubr.f32.gmra.mrb[16].mxu0 %v14646_v2 }
 0x535   :  { %8936 = vmatprep.mubr.msk.f32.mxu1 %vm5773_vm2, %v14649_v13  ;;  %8968 = vmatprep.mubr.msk.f32.mxu0 %vm5773_vm2, %v14649_v13 }
 0x536   :  { %v5845_v30 = vpop.permute.xlu1 %5844 }
 0x537   :  { %v14705_v31 = vmax.f32 %v14110_v60, %v5845_v30 }
 0x53a   :  { %v5849_v40 = vpop.permute.xlu1 %5848 }
 0x53b   :  { %v14718_v60 = vmax.f32 %v14164_v11, %v5849_v40 }
 0x53e   :  { %v5853_v17 = vpop.permute.xlu1 %5852 }
 0x542   :  { %v5857_v11 = vpop.permute.xlu1 %5856 }
 0x546   :  { %v5861_v58 = vpop.permute.xlu1 %5860 }
 0x54c   :  { %v14657_v1 = vpop.f32.mrb[4].mxu0 }
 0x54d   :  { %v14659_v18 = vpop.f32.mrb[5].mxu0 }
 0x550   :  { %v5770_v9 = vpop.permute.xlu0 %5769 }
 0x551   :  { %v5781_v8 = vsel %vm5773_vm2, %v5770_v9, %v5772_v3  ;;  %v5939_v9 = vld [vmem:[%s16329_s3 + $0x128] sm:$0xff] }
 0x552   :  { %v14663_v50 = vmax.f32 %v14430_v59, %v5781_v8 }
 0x554   :  { %v5831_v26 = vpop.permute.xlu0 %5830  ;;  %6297 = vmatmul.mubr.f32.gmra.mrb[202].mxu1 %v14663_v50  ;;  %6619 = vmatmul.mubr.f32.gmra.mrb[18].mxu0 %v14663_v50 }
 0x555   :  { %v5862_v56 = vsel %vm5773_vm2, %v5831_v26, %v5833_v6  ;;  %8937 = vmatprep.mubr.msk.f32.mxu1 %vm5773_vm2, %v14666_v53  ;;  %8969 = vmatprep.mubr.msk.f32.mxu0 %vm5773_vm2, %v14666_v53  ;;  %v5928_v26 = vld [vmem:[%s16329_s3 + $0xd0] sm:$0xff] }
 0x556   :  { %v14676_v59 = vmax.f32 %v16724_v55, %v5862_v56  ;;  %v5949_v56 = vld [vmem:[%s16329_s3 + $0x178] sm:$0xff]  ;;  %v5959_v55 = vld [vmem:[%s16329_s3 + $0x1c8] sm:$0xff] }
 0x558   :  { %v5835_v44 = vpop.permute.xlu0 %5834  ;;  %6303 = vmatmul.mubr.f32.gmra.mrb[204].mxu1 %v14676_v59  ;;  %6625 = vmatmul.mubr.f32.gmra.mrb[20].mxu0 %v14676_v59 }
 0x559   :  { %v5863_v48 = vsel %vm5773_vm2, %v5835_v44, %v5837_v27  ;;  %8938 = vmatprep.mubr.msk.f32.mxu1 %vm5773_vm2, %v14679_v34  ;;  %8970 = vmatprep.mubr.msk.f32.mxu0 %vm5773_vm2, %v14679_v34 }
 0x55a   :  { %v14689_v47 = vmax.f32 %v14013_v35, %v5863_v48  ;;  %v9585_v48 = vpack.c.bf16 %v5959_v55, %v5949_v56 }
 0x55c   :  { %v5839_v24 = vpop.permute.xlu0 %5838  ;;  %6309 = vmatmul.mubr.f32.gmra.mrb[206].mxu1 %v14689_v47  ;;  %6631 = vmatmul.mubr.f32.gmra.mrb[22].mxu0 %v14689_v47 }
 0x55d   :  { %v5864_v23 = vsel %vm5773_vm2, %v5839_v24, %v5841_v15  ;;  %8939 = vmatprep.mubr.msk.f32.mxu1 %vm5773_vm2, %v14692_v33  ;;  %8971 = vmatprep.mubr.msk.f32.mxu0 %vm5773_vm2, %v14692_v33  ;;  %v5929_v15 = vld [vmem:[%s16329_s3 + $0xd8] sm:$0xff]  ;;  %v5958_v24 = vld [vmem:[%s16329_s3 + $0x1c0] sm:$0xff] }
 0x55e   :  { %v14702_v35 = vmax.f32 %v14061_v32, %v5864_v23  ;;  %v9581_v8 = vpack.c.bf16 %v5939_v9, %v5929_v15  ;;  %v5969_v23 = vld [vmem:[%s16329_s3 + $0x218] sm:$0xff]  ;;  %v6008_v9 = vld [vmem:[%s16329_s3 + $0x350] sm:$0xff] }
 0x560   :  { %v5843_v25 = vpop.permute.xlu0 %5842  ;;  %6315 = vmatmul.mubr.f32.gmra.mrb[208].mxu1 %v14702_v35  ;;  %6637 = vmatmul.mubr.f32.gmra.mrb[24].mxu0 %v14702_v35 }
 0x561   :  { %v5865_v7 = vsel %vm5773_vm2, %v5843_v25, %v5845_v30  ;;  %8940 = vmatprep.mubr.msk.f32.mxu1 %vm5773_vm2, %v14705_v31  ;;  %8972 = vmatprep.mubr.msk.f32.mxu0 %vm5773_vm2, %v14705_v31  ;;  %v5938_v30 = vld [vmem:[%s16329_s3 + $0x120] sm:$0xff]  ;;  %v5979_v25 = vld [vmem:[%s16329_s3 + $0x268] sm:$0xff] }
 0x562   :  { %v14715_v32 = vmax.f32 %v14108_v37, %v5865_v7  ;;  %v14731_v37 = vmax.f32 %v14207_v36, %v5853_v17  ;;  %v14748_v36 = vmax.f32 %v14322_v62, %v5857_v11  ;;  %v14761_v62 = vmax.f32 %v14551_v19, %v5861_v58  ;;  %v5918_v19 = vld [vmem:[%s16329_s3 + $0x80] sm:$0xff] }
 0x563   :  { %v9583_v44 = vpack.c.bf16 %v5938_v30, %v5928_v26  ;;  %v9589_v7 = vpack.c.bf16 %v5979_v25, %v5969_v23  ;;  %v6029_v26 = vld [vmem:[%s16329_s3 + $0x3f8] sm:$0xff]  ;;  %v6039_v30 = vld [vmem:[%s16329_s3 + $0x448] sm:$0xff] }
 0x564   :  { %v5847_v46 = vpop.permute.xlu0 %5846  ;;  %6321 = vmatmul.mubr.f32.gmra.mrb[210].mxu1 %v14715_v32  ;;  %6643 = vmatmul.mubr.f32.gmra.mrb[26].mxu0 %v14715_v32  ;;  %v9601_v55 = vpack.c.bf16 %v6039_v30, %v6029_v26 }
 0x565   :  { %v5866_v57 = vsel %vm5773_vm2, %v5847_v46, %v5849_v40  ;;  %8941 = vmatprep.mubr.msk.f32.mxu1 %vm5773_vm2, %v14718_v60  ;;  %8973 = vmatprep.mubr.msk.f32.mxu0 %vm5773_vm2, %v14718_v60  ;;  %v5948_v40 = vld [vmem:[%s16329_s3 + $0x170] sm:$0xff] }
 0x566   :  { %v14728_v29 = vmax.f32 %v14162_v12, %v5866_v57  ;;  %v5968_v46 = vld [vmem:[%s16329_s3 + $0x210] sm:$0xff]  ;;  %v5978_v57 = vld [vmem:[%s16329_s3 + $0x260] sm:$0xff] }
 0x567   :  { %v14733_v10 = vpop.f32.mrb[6].mxu0 }
 0x568   :  { %v5851_v0 = vpop.permute.xlu0 %5850  ;;  %6327 = vmatmul.mubr.f32.gmra.mrb[212].mxu1 %v14728_v29  ;;  %v14736_v61 = vpop.f32.mrb[7].mxu0  ;;  %6649 = vmatmul.mubr.f32.gmra.mrb[28].mxu0 %v14728_v29 }
 0x569   :  { %v5867_v20 = vsel %vm5773_vm2, %v5851_v0, %v5853_v17  ;;  %8942 = vmatprep.mubr.msk.f32.mxu1 %vm5773_vm2, %v14731_v37  ;;  %8974 = vmatprep.mubr.msk.f32.mxu0 %vm5773_vm2, %v14731_v37  ;;  %v9587_v17 = vpack.c.bf16 %v5958_v24, %v5948_v40  ;;  %v5999_v0 = vld [vmem:[%s16329_s3 + $0x308] sm:$0xff]  ;;  %v6049_v40 = vld [vmem:[%s16329_s3 + $0x498] sm:$0xff] }
 0x56a   :  { %v14745_v12 = vmax.f32 %v14205_v14, %v5867_v20  ;;  %v9591_v20 = vpack.c.bf16 %v5978_v57, %v5968_v46  ;;  %v6059_v24 = vld [vmem:[%s16329_s3 + $0x4e8] sm:$0xff]  ;;  %v6069_v46 = vld [vmem:[%s16329_s3 + $0x538] sm:$0xff] }
 0x56b   :  { %v9605_v25 = vpack.c.bf16 %v6059_v24, %v6049_v40  ;;  %v6079_v57 = vld [vmem:[%s16329_s3 + $0x588] sm:$0xff] }
 0x56c   :  { %v5855_v45 = vpop.permute.xlu0 %5854  ;;  %6333 = vmatmul.mubr.f32.gmra.mrb[214].mxu1 %v14745_v12  ;;  %6655 = vmatmul.mubr.f32.gmra.mrb[30].mxu0 %v14745_v12 }
 0x56d   :  { %v5868_v38 = vsel %vm5773_vm2, %v5855_v45, %v5857_v11  ;;  %8943 = vmatprep.mubr.msk.f32.mxu1 %vm5773_vm2, %v14748_v36  ;;  %8975 = vmatprep.mubr.msk.f32.mxu0 %vm5773_vm2, %v14748_v36  ;;  %v5989_v11 = vld [vmem:[%s16329_s3 + $0x2b8] sm:$0xff] }
 0x56e   :  { %v14758_v14 = vmax.f32 %v14320_v42, %v5868_v38  ;;  %v5908_v42 = vld [vmem:[%s16329_s3 + $0x30] sm:$0xff]  ;;  %v9593_v45 = vpack.c.bf16 %v5999_v0, %v5989_v11  ;;  %v9609_v0 = vpack.c.bf16 %v6079_v57, %v6069_v46 }
 0x56f   :  { %v5988_v38 = vld [vmem:[%s16329_s3 + $0x2b0] sm:$0xff] }
 0x570   :  { %6339 = vmatmul.mubr.f32.gmra.mrb[216].mxu1 %v14758_v14  ;;  %6661 = vmatmul.mubr.f32.gmra.mrb[32].mxu0 %v14758_v14  ;;  %v5859_v3 = vpop.permute.xlu0 %5858 }
 0x571   :  { %v5869_v6 = vsel %vm5773_vm2, %v5859_v3, %v5861_v58  ;;  %8944 = vmatprep.mubr.msk.f32.mxu1 %vm5773_vm2, %v14761_v62  ;;  %8976 = vmatprep.mubr.msk.f32.mxu0 %vm5773_vm2, %v14761_v62  ;;  %v5998_v58 = vld [vmem:[%s16329_s3 + $0x300] sm:$0xff]  ;;  %v6009_v3 = vld [vmem:[%s16329_s3 + $0x358] sm:$0xff] }
 0x572   :  { %v14771_v27 = vmax.f32 %v14549_v39, %v5869_v6  ;;  %v9579_v39 = vpack.c.bf16 %v5918_v19, %v5908_v42  ;;  %v6019_v6 = vld [vmem:[%s16329_s3 + $0x3a8] sm:$0xff]  ;;  %v9595_v42 = vpack.c.bf16 %v5998_v58, %v5988_v38  ;;  %v6089_v38 = vld [vmem:[%s16329_s3 + $0x5d8] sm:$0xff] }
 0x573   :  { %v9597_v15 = vpack.c.bf16 %v6019_v6, %v6009_v3  ;;  %v6099_v58 = vld [vmem:[%s16329_s3 + $0x628] sm:$0xff] }
 0x574   :  { %6345 = vmatmul.mubr.f32.gmra.mrb[218].mxu1 %v14771_v27  ;;  %6667 = vmatmul.mubr.f32.gmra.mrb[34].mxu0 %v14771_v27  ;;  %v9613_v6 = vpack.c.bf16 %v6099_v58, %v6089_v38  ;;  %v7665_v58 = vld [vmem:[%s16330_s5 + $0xf8] sm:$0xff] }
 0x575   :  { %8945 = vmatprep.mubr.msk.f32.mxu1 %vm5773_vm2, %v14124_v63  ;;  %8993 = vmatprep.mubr.msk.f32.mxu0 %vm5773_vm2, %v14124_v63 }
 0x578   :  { %6416 = vmatmul.mubr.f32.vlgmr.msra.gmra.mrb[220].mxu1 %v14128_v16  ;;  %6899 = vmatmul.mubr.f32.vlgmr.msra.gmra.mrb[36].mxu0 %v14128_v16 }
 0x579   :  { %8946 = vmatprep.mubr.msk.f32.mxu1 %vm5773_vm2, %v14132_v43  ;;  %9580 = vmatpush1.bf16.msra.mxu1 %v9579_v39  ;;  %v6018_v39 = vld [vmem:[%s16329_s3 + $0x3a0] sm:$0xff] }
 0x57a   :  { %8994 = vmatprep.mubr.msk.f32.mxu0 %vm5773_vm2, %v14132_v43  ;;  %9582 = vmatprep.subr.bf16.mxu1 %v9581_v8  ;;  %v9599_v56 = vpack.c.bf16 %v6018_v39, %v6008_v9  ;;  %v6109_v9 = vld [vmem:[%s16329_s3 + $0x678] sm:$0xff]  ;;  %v6119_v39 = vld [vmem:[%s16329_s3 + $0x6c8] sm:$0xff] }
 0x57b   :  { %v9617_v30 = vpack.c.bf16 %v6119_v39, %v6109_v9  ;;  %v7664_v9 = vld [vmem:[%s16330_s5 + $0xf0] sm:$0xff]  ;;  %v7667_v39 = vld [vmem:[%s16330_s5 + $0x108] sm:$0xff] }
 0x57c   :  { %6422 = vmatmul.mubr.f32.gmra.mrb[222].mxu1 %v14173_v41  ;;  %6905 = vmatmul.mubr.f32.gmra.mrb[38].mxu0 %v14173_v41 }
 0x57d   :  { %8947 = vmatprep.mubr.msk.f32.mxu1 %vm5773_vm2, %v14181_v21  ;;  %8995 = vmatprep.mubr.msk.f32.mxu0 %vm5773_vm2, %v14181_v21 }
 0x57e   :  { %9584 = vmatpush1.bf16.msra.mxu1 %v9583_v44  ;;  %v6028_v44 = vld [vmem:[%s16329_s3 + $0x3f0] sm:$0xff] }
 0x57f   :  { %9586 = vmatprep.subr.bf16.mxu1 %v9585_v48  ;;  %v6038_v48 = vld [vmem:[%s16329_s3 + $0x440] sm:$0xff] }
 0x580   :  { %6428 = vmatmul.mubr.f32.gmra.mrb[224].mxu1 %v14218_v5  ;;  %6911 = vmatmul.mubr.f32.gmra.mrb[40].mxu0 %v14218_v5  ;;  %v9603_v23 = vpack.c.bf16 %v6038_v48, %v6028_v44  ;;  %v6129_v44 = vld [vmem:[%s16329_s3 + $0x718] sm:$0xff]  ;;  %v6139_v48 = vld [vmem:[%s16329_s3 + $0x768] sm:$0xff] }
 0x581   :  { %8948 = vmatprep.mubr.msk.f32.mxu1 %vm5773_vm2, %v14222_v22  ;;  %8996 = vmatprep.mubr.msk.f32.mxu0 %vm5773_vm2, %v14222_v22  ;;  %v9621_v24 = vpack.c.bf16 %v6139_v48, %v6129_v44  ;;  %v7674_v44 = vld [vmem:[%s16330_s5 + $0x140] sm:$0xff] }
 0x582   :  { %9588 = vmatpush1.bf16.msra.mxu1 %v9587_v17  ;;  %v6048_v17 = vld [vmem:[%s16329_s3 + $0x490] sm:$0xff] }
 0x583   :  { %9590 = vmatprep.subr.bf16.mxu1 %v9589_v7  ;;  %v6058_v7 = vld [vmem:[%s16329_s3 + $0x4e0] sm:$0xff] }
 0x584   :  { %6434 = vmatmul.mubr.f32.gmra.mrb[226].mxu1 %v14361_v54  ;;  %6917 = vmatmul.mubr.f32.gmra.mrb[42].mxu0 %v14361_v54  ;;  %v9607_v11 = vpack.c.bf16 %v6058_v7, %v6048_v17 }
 0x585   :  { %8949 = vmatprep.mubr.msk.f32.mxu1 %vm5773_vm2, %v14374_v51  ;;  %8997 = vmatprep.mubr.msk.f32.mxu0 %vm5773_vm2, %v14374_v51 }
 0x586   :  { %9592 = vmatpush1.bf16.msra.mxu1 %v9591_v20  ;;  %v6068_v20 = vld [vmem:[%s16329_s3 + $0x530] sm:$0xff] }
 0x587   :  { %v14863_v19 = vpop.f32.mrb[8].mxu0  ;;  %9594 = vmatprep.subr.bf16.mxu1 %v9593_v45  ;;  %v6078_v45 = vld [vmem:[%s16329_s3 + $0x580] sm:$0xff] }
 0x588   :  { %6440 = vmatmul.mubr.f32.gmra.mrb[228].mxu1 %v14582_v4  ;;  %v14872_v8 = vpop.f32.mrb[9].mxu0  ;;  %6923 = vmatmul.mubr.f32.gmra.mrb[44].mxu0 %v14582_v4  ;;  %v9611_v3 = vpack.c.bf16 %v6078_v45, %v6068_v20  ;;  %v7661_v20 = vld [vmem:[%s16330_s5 + $0xd8] sm:$0xff] }
 0x589   :  { %8950 = vmatprep.mubr.msk.f32.mxu1 %vm5773_vm2, %v14596_v52  ;;  %8998 = vmatprep.mubr.msk.f32.mxu0 %vm5773_vm2, %v14596_v52 }
 0x58a   :  { %9596 = vmatpush1.bf16.msra.mxu1 %v9595_v42  ;;  %v6088_v42 = vld [vmem:[%s16329_s3 + $0x5d0] sm:$0xff] }
 0x58b   :  { %9598 = vmatprep.subr.bf16.mxu1 %v9597_v15  ;;  %v6098_v15 = vld [vmem:[%s16329_s3 + $0x620] sm:$0xff] }
 0x58c   :  { %6446 = vmatmul.mubr.f32.gmra.mrb[230].mxu1 %v14633_v28  ;;  %6929 = vmatmul.mubr.f32.gmra.mrb[46].mxu0 %v14633_v28  ;;  %v9615_v26 = vpack.c.bf16 %v6098_v15, %v6088_v42 }
 0x58d   :  { %8951 = vmatprep.mubr.msk.f32.mxu1 %vm5773_vm2, %v14636_v49  ;;  %8999 = vmatprep.mubr.msk.f32.mxu0 %vm5773_vm2, %v14636_v49 }
 0x58e   :  { %9600 = vmatpush1.bf16.msra.mxu1 %v9599_v56  ;;  %v6108_v56 = vld [vmem:[%s16329_s3 + $0x670] sm:$0xff] }
 0x58f   :  { %9602 = vmatprep.subr.bf16.mxu1 %v9601_v55  ;;  %v6118_v55 = vld [vmem:[%s16329_s3 + $0x6c0] sm:$0xff] }
 0x590   :  { %6452 = vmatmul.mubr.f32.gmra.mrb[232].mxu1 %v14646_v2  ;;  %6935 = vmatmul.mubr.f32.gmra.mrb[48].mxu0 %v14646_v2  ;;  %v9619_v40 = vpack.c.bf16 %v6118_v55, %v6108_v56  ;;  %v9695_v56 = vpack.c.bf16 %v7667_v39, %v7664_v9  ;;  %v7671_v55 = vld [vmem:[%s16330_s5 + $0x128] sm:$0xff] }
 0x591   :  { %8952 = vmatprep.mubr.msk.f32.mxu1 %vm5773_vm2, %v14649_v13  ;;  %9000 = vmatprep.mubr.msk.f32.mxu0 %vm5773_vm2, %v14649_v13 }
 0x592   :  { %9604 = vmatpush1.bf16.msra.mxu1 %v9603_v23  ;;  %v6128_v23 = vld [vmem:[%s16329_s3 + $0x710] sm:$0xff] }
 0x593   :  { %9606 = vmatprep.subr.bf16.mxu1 %v9605_v25  ;;  %v6138_v25 = vld [vmem:[%s16329_s3 + $0x760] sm:$0xff] }
 0x594   :  { %6458 = vmatmul.mubr.f32.gmra.mrb[234].mxu1 %v14663_v50  ;;  %6941 = vmatmul.mubr.f32.gmra.mrb[50].mxu0 %v14663_v50  ;;  %v9623_v17 = vpack.c.bf16 %v6138_v25, %v6128_v23  ;;  %v7670_v23 = vld [vmem:[%s16330_s5 + $0x120] sm:$0xff]  ;;  %v7673_v25 = vld [vmem:[%s16330_s5 + $0x138] sm:$0xff] }
 0x595   :  { %8953 = vmatprep.mubr.msk.f32.mxu1 %vm5773_vm2, %v14666_v53  ;;  %9001 = vmatprep.mubr.msk.f32.mxu0 %vm5773_vm2, %v14666_v53 }
 0x596   :  { %9608 = vmatpush1.bf16.msra.mxu1 %v9607_v11 }
 0x597   :  { %9610 = vmatprep.subr.bf16.mxu1 %v9609_v0  ;;  %v7658_v0 = vld [vmem:[%s16330_s5 + $0xc0] sm:$0xff] }
 0x598   :  { %6464 = vmatmul.mubr.f32.gmra.mrb[188].mxu1 %v14676_v59  ;;  %6947 = vmatmul.mubr.f32.gmra.mrb[52].mxu0 %v14676_v59  ;;  %v9691_v38 = vpack.c.bf16 %v7661_v20, %v7658_v0 }
 0x599   :  { %8954 = vmatprep.mubr.msk.f32.mxu1 %vm5773_vm2, %v14679_v34  ;;  %9002 = vmatprep.mubr.msk.f32.mxu0 %vm5773_vm2, %v14679_v34 }
 0x59a   :  { %9612 = vmatpush1.bf16.msra.mxu1 %v9611_v3  ;;  %v7668_v3 = vld [vmem:[%s16330_s5 + $0x110] sm:$0xff] }
 0x59b   :  { %9614 = vmatprep.subr.bf16.mxu1 %v9613_v6  ;;  %v9693_v15 = vpack.c.bf16 %v7668_v3, %v7665_v58  ;;  %v7689_v58 = vld [vmem:[%s16330_s5 + $0x1b8] sm:$0xff]  ;;  %v7692_v3 = vld [vmem:[%s16330_s5 + $0x1d0] sm:$0xff] }
 0x59c   :  { %6470 = vmatmul.mubr.f32.gmra.mrb[190].mxu1 %v14689_v47  ;;  %6953 = vmatmul.mubr.f32.gmra.mrb[54].mxu0 %v14689_v47 }
 0x59d   :  { %8955 = vmatprep.mubr.msk.f32.mxu1 %vm5773_vm2, %v14692_v33  ;;  %9003 = vmatprep.mubr.msk.f32.mxu0 %vm5773_vm2, %v14692_v33 }
 0x59e   :  { %9616 = vmatpush1.bf16.msra.mxu1 %v9615_v26 }
 0x59f   :  { %9618 = vmatprep.subr.bf16.mxu1 %v9617_v30 }
 0x5a0   :  { %6476 = vmatmul.mubr.f32.gmra.mrb[192].mxu1 %v14702_v35  ;;  %6959 = vmatmul.mubr.f32.gmra.mrb[56].mxu0 %v14702_v35 }
 0x5a1   :  { %8956 = vmatprep.mubr.msk.f32.mxu1 %vm5773_vm2, %v14705_v31  ;;  %9004 = vmatprep.mubr.msk.f32.mxu0 %vm5773_vm2, %v14705_v31 }
 0x5a2   :  { %9620 = vmatpush1.bf16.msra.mxu1 %v9619_v40 }
 0x5a3   :  { %9622 = vmatprep.subr.bf16.mxu1 %v9621_v24  ;;  %v9697_v24 = vpack.c.bf16 %v7674_v44, %v7671_v55  ;;  %v7693_v55 = vld [vmem:[%s16330_s5 + $0x1d8] sm:$0xff]  ;;  %v7688_v44 = vld [vmem:[%s16330_s5 + $0x1b0] sm:$0xff] }
 0x5a4   :  { %6482 = vmatmul.mubr.f32.gmra.mrb[194].mxu1 %v14715_v32  ;;  %6965 = vmatmul.mubr.f32.gmra.mrb[58].mxu0 %v14715_v32 }
 0x5a5   :  { %8957 = vmatprep.mubr.msk.f32.mxu1 %vm5773_vm2, %v14718_v60  ;;  %9005 = vmatprep.mubr.msk.f32.mxu0 %vm5773_vm2, %v14718_v60 }
 0x5a6   :  { %9624 = vmatpush1.bf16.msra.mxu1 %v9623_v17 }
 0x5a7   :  { %v14993_v7 = vpop.f32.mrb[10].mxu0 }
 0x5a8   :  { %6488 = vmatmul.mubr.f32.gmra.mrb[196].mxu1 %v14728_v29  ;;  %v14996_v46 = vpop.f32.mrb[11].mxu0  ;;  %6971 = vmatmul.mubr.f32.gmra.mrb[60].mxu0 %v14728_v29 }
 0x5a9   :  { %8958 = vmatprep.mubr.msk.f32.mxu1 %vm5773_vm2, %v14731_v37  ;;  %9006 = vmatprep.mubr.msk.f32.mxu0 %vm5773_vm2, %v14731_v37 }
 0x5ac   :  { %6494 = vmatmul.mubr.f32.gmra.mrb[198].mxu1 %v14745_v12  ;;  %6977 = vmatmul.mubr.f32.gmra.mrb[62].mxu0 %v14745_v12 }
 0x5ad   :  { %8959 = vmatprep.mubr.msk.f32.mxu1 %vm5773_vm2, %v14748_v36  ;;  %9007 = vmatprep.mubr.msk.f32.mxu0 %vm5773_vm2, %v14748_v36 }
 0x5b0   :  { %6500 = vmatmul.mubr.f32.gmra.mrb[200].mxu1 %v14758_v14  ;;  %6983 = vmatmul.mubr.f32.gmra.mrb[64].mxu0 %v14758_v14 }
 0x5b1   :  { %8960 = vmatprep.mubr.msk.f32.mxu1 %vm5773_vm2, %v14761_v62  ;;  %9008 = vmatprep.mubr.msk.f32.mxu0 %vm5773_vm2, %v14761_v62 }
 0x5b4   :  { %6506 = vmatmul.mubr.f32.gmra.mrb[202].mxu1 %v14771_v27  ;;  %6989 = vmatmul.mubr.f32.gmra.mrb[66].mxu0 %v14771_v27 }
 0x5b5   :  { %8977 = vmatprep.mubr.msk.f32.mxu1 %vm5773_vm2, %v14124_v63 }
 0x5b8   :  { %6738 = vmatmul.mubr.f32.vlgmr.msra.gmra.mrb[236].mxu1 %v14128_v16 }
 0x5b9   :  { %8978 = vmatprep.mubr.msk.f32.mxu1 %vm5773_vm2, %v14132_v43 }
 0x5bc   :  { %6744 = vmatmul.mubr.f32.gmra.mrb[238].mxu1 %v14173_v41 }
 0x5bd   :  { %8979 = vmatprep.mubr.msk.f32.mxu1 %vm5773_vm2, %v14181_v21 }
 0x5c0   :  { %6750 = vmatmul.mubr.f32.gmra.mrb[240].mxu1 %v14218_v5 }
 0x5c1   :  { %8980 = vmatprep.mubr.msk.f32.mxu1 %vm5773_vm2, %v14222_v22  ;;  %v7635_v22 = vld [vmem:[%s16330_s5 + $0x8] sm:$0xff] }
 0x5c4   :  { %6756 = vmatmul.mubr.f32.gmra.mrb[242].mxu1 %v14361_v54  ;;  %v7638_v54 = vld [vmem:[%s16330_s5 + $0x20] sm:$0xff] }
 0x5c5   :  { %8981 = vmatprep.mubr.msk.f32.mxu1 %vm5773_vm2, %v14374_v51  ;;  %v9673_v51 = vpack.c.bf16 %v7638_v54, %v7635_v22  ;;  %v9699_v54 = vpack.c.bf16 %v7673_v25, %v7670_v23  ;;  %v7642_v25 = vld [vmem:[%s16330_s5 + $0x40] sm:$0xff] }
 0x5c7   :  { %v15031_v63 = vpop.f32.mrb[12].mxu0  ;;  %9674 = vmatprep.subr.bf16.mxu1 %v9673_v51  ;;  %v7677_v51 = vld [vmem:[%s16330_s5 + $0x158] sm:$0xff] }
 0x5c8   :  { %v15033_v16 = vpop.f32.mrb[13].mxu0  ;;  %6762 = vmatmul.mubr.f32.gmra.mrb[244].mxu1 %v14582_v4  ;;  %v7634_v4 = vld [vmem:[%s16330_s5] sm:$0xff] }
 0x5c9   :  { %8982 = vmatprep.mubr.msk.f32.mxu1 %vm5773_vm2, %v14596_v52  ;;  %v7637_v52 = vld [vmem:[%s16330_s5 + $0x18] sm:$0xff] }
 0x5cc   :  { %6768 = vmatmul.mubr.f32.gmra.mrb[246].mxu1 %v14633_v28  ;;  %v9675_v28 = vpack.c.bf16 %v7637_v52, %v7634_v4  ;;  %v7680_v4 = vld [vmem:[%s16330_s5 + $0x170] sm:$0xff] }
 0x5cd   :  { %8983 = vmatprep.mubr.msk.f32.mxu1 %vm5773_vm2, %v14636_v49  ;;  %v7641_v49 = vld [vmem:[%s16330_s5 + $0x38] sm:$0xff] }
 0x5ce   :  { %9676 = vmatpush1.bf16.msra.mxu1 %v9675_v28 }
 0x5d0   :  { %6774 = vmatmul.mubr.f32.gmra.mrb[248].mxu1 %v14646_v2  ;;  %v7644_v2 = vld [vmem:[%s16330_s5 + $0x50] sm:$0xff] }
 0x5d1   :  { %8984 = vmatprep.mubr.msk.f32.mxu1 %vm5773_vm2, %v14649_v13  ;;  %v9677_v13 = vpack.c.bf16 %v7644_v2, %v7641_v49  ;;  %v9701_v49 = vpack.c.bf16 %v7680_v4, %v7677_v51  ;;  %v7676_v2 = vld [vmem:[%s16330_s5 + $0x150] sm:$0xff] }
 0x5d3   :  { %9678 = vmatprep.subr.bf16.mxu1 %v9677_v13  ;;  %v7679_v13 = vld [vmem:[%s16330_s5 + $0x168] sm:$0xff] }
 0x5d4   :  { %6780 = vmatmul.mubr.f32.gmra.mrb[250].mxu1 %v14663_v50  ;;  %v7640_v50 = vld [vmem:[%s16330_s5 + $0x30] sm:$0xff] }
 0x5d5   :  { %8985 = vmatprep.mubr.msk.f32.mxu1 %vm5773_vm2, %v14666_v53  ;;  %v7643_v53 = vld [vmem:[%s16330_s5 + $0x48] sm:$0xff] }
 0x5d8   :  { %6786 = vmatmul.mubr.f32.gmra.mrb[252].mxu1 %v14676_v59  ;;  %v9679_v59 = vpack.c.bf16 %v7643_v53, %v7640_v50 }
 0x5d9   :  { %8986 = vmatprep.mubr.msk.f32.mxu1 %vm5773_vm2, %v14679_v34  ;;  %v7647_v34 = vld [vmem:[%s16330_s5 + $0x68] sm:$0xff] }
 0x5da   :  { %9680 = vmatpush1.bf16.msra.mxu1 %v9679_v59  ;;  %v9703_v59 = vpack.c.bf16 %v7679_v13, %v7676_v2  ;;  %v7695_v13 = vld [vmem:[%s16330_s5 + $0x1e8] sm:$0xff] }
 0x5dc   :  { %6792 = vmatmul.mubr.f32.gmra.mrb[254].mxu1 %v14689_v47  ;;  %v7650_v47 = vld [vmem:[%s16330_s5 + $0x80] sm:$0xff] }
 0x5dd   :  { %8987 = vmatprep.mubr.msk.f32.mxu1 %vm5773_vm2, %v14692_v33  ;;  %v9681_v33 = vpack.c.bf16 %v7650_v47, %v7647_v34 }
 0x5df   :  { %9682 = vmatprep.subr.bf16.mxu1 %v9681_v33  ;;  %v7683_v33 = vld [vmem:[%s16330_s5 + $0x188] sm:$0xff] }
 0x5e0   :  { %6798 = vmatmul.mubr.f32.gmra.mrb[0].mxu1 %v14702_v35  ;;  %v7646_v35 = vld [vmem:[%s16330_s5 + $0x60] sm:$0xff] }
 0x5e1   :  { %8988 = vmatprep.mubr.msk.f32.mxu1 %vm5773_vm2, %v14705_v31  ;;  %v7649_v31 = vld [vmem:[%s16330_s5 + $0x78] sm:$0xff] }
 0x5e4   :  { %6804 = vmatmul.mubr.f32.gmra.mrb[2].mxu1 %v14715_v32  ;;  %v9683_v32 = vpack.c.bf16 %v7649_v31, %v7646_v35  ;;  %v7686_v35 = vld [vmem:[%s16330_s5 + $0x1a0] sm:$0xff]  ;;  %v7684_v31 = vld [vmem:[%s16330_s5 + $0x190] sm:$0xff] }
 0x5e5   :  { %8989 = vmatprep.mubr.msk.f32.mxu1 %vm5773_vm2, %v14718_v60  ;;  %v7653_v60 = vld [vmem:[%s16330_s5 + $0x98] sm:$0xff] }
 0x5e6   :  { %9684 = vmatpush1.bf16.msra.mxu1 %v9683_v32 }
 0x5e7   :  { %v15059_v43 = vpop.f32.mrb[14].mxu0 }
 0x5e8   :  { %v15061_v41 = vpop.f32.mrb[15].mxu0  ;;  %6810 = vmatmul.mubr.f32.gmra.mrb[4].mxu1 %v14728_v29  ;;  %v7656_v29 = vld [vmem:[%s16330_s5 + $0xb0] sm:$0xff] }
 0x5e9   :  { %8990 = vmatprep.mubr.msk.f32.mxu1 %vm5773_vm2, %v14731_v37  ;;  %v9685_v37 = vpack.c.bf16 %v7656_v29, %v7653_v60  ;;  %v9705_v29 = vpack.c.bf16 %v7686_v35, %v7683_v33  ;;  %v7696_v33 = vld [vmem:[%s16330_s5 + $0x1f0] sm:$0xff] }
 0x5eb   :  { %9686 = vmatprep.subr.bf16.mxu1 %v9685_v37  ;;  %v7687_v37 = vld [vmem:[%s16330_s5 + $0x1a8] sm:$0xff] }
 0x5ec   :  { %6816 = vmatmul.mubr.f32.gmra.mrb[6].mxu1 %v14745_v12  ;;  %v7652_v12 = vld [vmem:[%s16330_s5 + $0x90] sm:$0xff] }
 0x5ed   :  { %8991 = vmatprep.mubr.msk.f32.mxu1 %vm5773_vm2, %v14748_v36  ;;  %v7655_v36 = vld [vmem:[%s16330_s5 + $0xa8] sm:$0xff] }
 0x5f0   :  { %6822 = vmatmul.mubr.f32.gmra.mrb[8].mxu1 %v14758_v14  ;;  %v9687_v14 = vpack.c.bf16 %v7655_v36, %v7652_v12  ;;  %v7682_v12 = vld [vmem:[%s16330_s5 + $0x180] sm:$0xff]  ;;  %v7685_v36 = vld [vmem:[%s16330_s5 + $0x198] sm:$0xff] }
 0x5f1   :  { %8992 = vmatprep.mubr.msk.f32.mxu1 %vm5773_vm2, %v14761_v62  ;;  %v7659_v62 = vld [vmem:[%s16330_s5 + $0xc8] sm:$0xff] }
 0x5f2   :  { %9688 = vmatpush1.bf16.msra.mxu1 %v9687_v14  ;;  %v9801_v14 = vpack.c.bf16 %v7687_v37, %v7684_v31  ;;  %v7699_v37 = vld [vmem:[%s16330_s5 + $0x208] sm:$0xff] }
 0x5f4   :  { %6828 = vmatmul.mubr.f32.gmra.mrb[10].mxu1 %v14771_v27  ;;  %v7662_v27 = vld [vmem:[%s16330_s5 + $0xe0] sm:$0xff]  ;;  %9802 = vmatprep.subr.bf16.mxu0 %v9801_v14  ;;  %v9809_v14 = vpack.c.bf16 %v7699_v37, %v7696_v33 }
 0x5f5   :  { %v9689_v11 = vpack.c.bf16 %v7662_v27, %v7659_v62  ;;  %v9707_v62 = vpack.c.bf16 %v7685_v36, %v7682_v12  ;;  %v7636_v27 = vld [vmem:[%s16330_s5 + $0x10] sm:$0xff]  ;;  %v7694_v12 = vld [vmem:[%s16330_s5 + $0x1e0] sm:$0xff]  ;;  %v7697_v36 = vld [vmem:[%s16330_s5 + $0x1f8] sm:$0xff] }
 0x5f6   :  { %v7654_v33 = vld [vmem:[%s16330_s5 + $0xa0] sm:$0xff] }
 0x5f7   :  { %9690 = vmatprep.subr.bf16.mxu1 %v9689_v11  ;;  %v7639_v11 = vld [vmem:[%s16330_s5 + $0x28] sm:$0xff] }
 0x5f8   :  { %9692 = vmatpush1.bf16.msra.mxu1 %v9691_v38  ;;  %v9803_v0 = vpack.c.bf16 %v7639_v11, %v7636_v27  ;;  %v7651_v27 = vld [vmem:[%s16330_s5 + $0x88] sm:$0xff]  ;;  %v9715_v11 = vpack.c.bf16 %v7697_v36, %v7694_v12 }
 0x5f9   :  { %9694 = vmatprep.subr.bf16.mxu1 %v9693_v15  ;;  %v7690_v15 = vld [vmem:[%s16330_s5 + $0x1c0] sm:$0xff] }
 0x5fa   :  { %9804 = vmatpush3.bf16.msra.mxu0 %v9803_v0  ;;  %v9805_v23 = vpack.c.bf16 %v7693_v55, %v7690_v15  ;;  %v7701_v15 = vld [vmem:[%s16330_s5 + $0x218] sm:$0xff]  ;;  %v7702_v55 = vld [vmem:[%s16330_s5 + $0x220] sm:$0xff] }
 0x5fc   :  { %9696 = vmatpush1.bf16.msra.mxu1 %v9695_v56  ;;  %v9709_v56 = vpack.c.bf16 %v7692_v3, %v7689_v58  ;;  %9806 = vmatprep.subr.bf16.mxu0 %v9805_v23 }
 0x5fd   :  { %9698 = vmatprep.subr.bf16.mxu1 %v9697_v24  ;;  %v7691_v24 = vld [vmem:[%s16330_s5 + $0x1c8] sm:$0xff] }
 0x5fe   :  { %v9711_v51 = vpack.c.bf16 %v7691_v24, %v7688_v44 }
 0x600   :  { %9700 = vmatpush1.bf16.msra.mxu1 %v9699_v54  ;;  %v7645_v54 = vld [vmem:[%s16330_s5 + $0x58] sm:$0xff] }
 0x601   :  { %9702 = vmatprep.subr.bf16.mxu1 %v9701_v49  ;;  %v9807_v4 = vpack.c.bf16 %v7645_v54, %v7642_v25  ;;  %v7705_v25 = vld [vmem:[%s16330_s5 + $0x238] sm:$0xff]  ;;  %v7700_v54 = vld [vmem:[%s16330_s5 + $0x210] sm:$0xff] }
 0x603   :  { %9808 = vmatpush3.bf16.msra.mxu0 %v9807_v4  ;;  %v6995_v4 = vld [vmem:[%s16331_s4] sm:$0x3] }
 0x604   :  { %9704 = vmatpush1.bf16.msra.mxu1 %v9703_v59  ;;  %v7698_v59 = vld [vmem:[%s16330_s5 + $0x200] sm:$0xff]  ;;  %9810 = vmatprep.subr.bf16.mxu0 %v9809_v14  ;;  %v7707_v14 = vld [vmem:[%s16330_s5 + $0x248] sm:$0xff] }
 0x605   :  { %9706 = vmatprep.subr.bf16.mxu1 %v9705_v29  ;;  %v9713_v29 = vpack.c.bf16 %v7698_v59, %v7695_v13  ;;  %v9813_v13 = vpack.c.bf16 %v7705_v25, %v7702_v55  ;;  %v7706_v25 = vld [vmem:[%s16330_s5 + $0x240] sm:$0xff] }
 0x607   :  { %v15073_v21 = vpop.f32.mrb[16].mxu0 }
 0x608   :  { %16725 = vst [vmem:[#allocation33_spill] sm:$0xff] %v15073_v21  ;;  %v15075_v5 = vpop.f32.mrb[17].mxu0  ;;  %9708 = vmatpush1.bf16.msra.mxu1 %v9707_v62  ;;  %v7648_v62 = vld [vmem:[%s16330_s5 + $0x70] sm:$0xff]  ;;  %v7722_v21 = vld [vmem:[%s16330_s5 + $0x2c0] sm:$0xff] }
 0x609   :  { %16726 = vst [vmem:[#allocation41_spill] sm:$0xff] %v15075_v5  ;;  %9710 = vmatprep.subr.bf16.mxu1 %v9709_v56  ;;  %v9811_v0 = vpack.c.bf16 %v7651_v27, %v7648_v62  ;;  %v7704_v56 = vld [vmem:[%s16330_s5 + $0x230] sm:$0xff]  ;;  %v7710_v62 = vld [vmem:[%s16330_s5 + $0x260] sm:$0xff]  ;;  %v7719_v5 = vld [vmem:[%s16330_s5 + $0x2a8] sm:$0xff] }
 0x60a   :  { %v9717_v23 = vpack.c.bf16 %v7704_v56, %v7701_v15  ;;  %v7708_v27 = vld [vmem:[%s16330_s5 + $0x250] sm:$0xff]  ;;  %v9721_v55 = vpack.c.bf16 %v7710_v62, %v7707_v14 }
 0x60b   :  { %9812 = vmatpush3.bf16.msra.mxu0 %v9811_v0 }
 0x60c   :  { %9712 = vmatpush1.bf16.msra.mxu1 %v9711_v51  ;;  %v7703_v51 = vld [vmem:[%s16330_s5 + $0x228] sm:$0xff]  ;;  %9814 = vmatprep.subr.bf16.mxu0 %v9813_v13 }
 0x60d   :  { %9714 = vmatprep.subr.bf16.mxu1 %v9713_v29  ;;  %v9719_v59 = vpack.c.bf16 %v7703_v51, %v7700_v54  ;;  %v7657_v29 = vld [vmem:[%s16330_s5 + $0xb8] sm:$0xff]  ;;  %v16730_v51 = vld [vmem:[#allocation62_spill] sm:$0xff] }
 0x60e   :  { %v9815_v37 = vpack.c.bf16 %v7657_v29, %v7654_v33  ;;  %v7709_v54 = vld [vmem:[%s16330_s5 + $0x258] sm:$0xff]  ;;  %v15362_v13 = vrot.slane %v6995_v4, %v16730_v51  ;;  %v7712_v51 = vld [vmem:[%s16330_s5 + $0x270] sm:$0xff] }
 0x60f   :  { %v9723_v29 = vpack.c.bf16 %v7709_v54, %v7706_v25 }
 0x610   :  { %9716 = vmatpush1.bf16.msra.mxu1 %v9715_v11  ;;  %v16729_v11 = vld [vmem:[#allocation3_spill] sm:$0xff]  ;;  %9816 = vmatpush3.bf16.msra.mxu0 %v9815_v37 }
 0x611   :  { %9718 = vmatprep.subr.bf16.mxu1 %v9717_v23  ;;  %v15346_v0 = vrot.slane %v6995_v4, %v16729_v11  ;;  %v7711_v23 = vld [vmem:[%s16330_s5 + $0x268] sm:$0xff]  ;;  %v7713_v4 = vld [vmem:[%s16330_s5 + $0x278] sm:$0xff] }
 0x612   :  { %v9817_v33 = vpack.c.bf16 %v7711_v23, %v7708_v27  ;;  %v7663_v37 = vld [vmem:[%s16330_s5 + $0xe8] sm:$0xff]  ;;  %v7716_v27 = vld [vmem:[%s16330_s5 + $0x290] sm:$0xff]  ;;  %v7714_v23 = vld [vmem:[%s16330_s5 + $0x280] sm:$0xff] }
 0x614   :  { %9720 = vmatpush1.bf16.msra.mxu1 %v9719_v59  ;;  %v7660_v59 = vld [vmem:[%s16330_s5 + $0xd0] sm:$0xff]  ;;  %9818 = vmatprep.subr.bf16.mxu0 %v9817_v33  ;;  %v9725_v33 = vpack.c.bf16 %v7716_v27, %v7713_v4 }
 0x615   :  { %9722 = vmatprep.subr.bf16.mxu1 %v9721_v55  ;;  %v9819_v14 = vpack.c.bf16 %v7663_v37, %v7660_v59  ;;  %v7717_v37 = vld [vmem:[%s16330_s5 + $0x298] sm:$0xff] }
 0x617   :  { %9820 = vmatpush3.bf16.msra.mxu0 %v9819_v14  ;;  %v7669_v14 = vld [vmem:[%s16330_s5 + $0x118] sm:$0xff] }
 0x618   :  { %9724 = vmatpush1.bf16.msra.mxu1 %v9723_v29  ;;  %v7666_v29 = vld [vmem:[%s16330_s5 + $0x100] sm:$0xff] }
 0x619   :  { %9726 = vmatprep.subr.bf16.mxu1 %v9725_v33  ;;  %v7723_v33 = vld [vmem:[%s16330_s5 + $0x2c8] sm:$0xff] }
 0x627   :  { %v15131_v57 = vpop.f32.mrb[18].mxu0 }
 0x628   :  { %16727 = vst [vmem:[#allocation34_spill] sm:$0xff] %v15131_v57  ;;  %v15139_v45 = vpop.f32.mrb[19].mxu0 }
 0x629   :  { %16728 = vst [vmem:[#allocation31_spill] sm:$0xff] %v15139_v45 }
 0x62b   :  { %v15147_v6 = vpop.f32.mrb[204].mxu1  ;;  %v15149_v42 = vpop.f32.mrb[20].mxu0 }
 0x62c   :  { %v15157_v26 = vpop.f32.mrb[205].mxu1  ;;  %v15159_v30 = vpop.f32.mrb[21].mxu0  ;;  %v7247_v55 = vadd.f32 %v15346_v0, %v15147_v6  ;;  %v9821_v6 = vpack.c.bf16 %v7717_v37, %v7714_v23  ;;  %v7343_v4 = vrot.slane %v15149_v42, 1  ;;  %v7720_v42 = vld [vmem:[%s16330_s5 + $0x2b0] sm:$0xff] }
 0x62d   :  { %v7344_v23 = vrot.slane %v15159_v30, 1 }
 0x62e   :  { %9822 = vmatprep.subr.bf16.mxu0 %v9821_v6  ;;  %v7718_v6 = vld [vmem:[%s16330_s5 + $0x2a0] sm:$0xff] }
 0x62f   :  { %v15167_v48 = vpop.f32.mrb[206].mxu1  ;;  %v15169_v40 = vpop.f32.mrb[22].mxu0 }
 0x630   :  { %v15177_v17 = vpop.f32.mrb[207].mxu1  ;;  %v15179_v22 = vpop.f32.mrb[23].mxu0  ;;  %v7249_v30 = vadd.f32 %v15346_v0, %v15167_v48 }
 0x631   :  { %v7250_v48 = vadd.f32 %v15362_v13, %v15177_v17 }
 0x633   :  { %v15187_v52 = vpop.f32.mrb[208].mxu1  ;;  %v15189_v28 = vpop.f32.mrb[24].mxu0 }
 0x634   :  { %v15197_v50 = vpop.f32.mrb[209].mxu1  ;;  %v15199_v53 = vpop.f32.mrb[25].mxu0 }
 0x637   :  { %v15201_v34 = vpop.f32.mrb[210].mxu1  ;;  %v15203_v47 = vpop.f32.mrb[26].mxu0 }
 0x638   :  { %v15214_v32 = vpop.f32.mrb[211].mxu1  ;;  %v15216_v60 = vpop.f32.mrb[27].mxu0 }
 0x63b   :  { %v15233_v20 = vpop.f32.mrb[212].mxu1  ;;  %v15235_v38 = vpop.f32.mrb[28].mxu0 }
 0x63c   :  { %v15246_v9 = vpop.f32.mrb[213].mxu1  ;;  %v15248_v39 = vpop.f32.mrb[29].mxu0 }
 0x63f   :  { %v15265_v49 = vpop.f32.mrb[214].mxu1  ;;  %v15267_v2 = vpop.f32.mrb[30].mxu0 }
 0x640   :  { %v15278_v35 = vpop.f32.mrb[215].mxu1  ;;  %v15280_v31 = vpop.f32.mrb[31].mxu0 }
 0x643   :  { %v15297_v58 = vpop.f32.mrb[216].mxu1  ;;  %v15299_v3 = vpop.f32.mrb[32].mxu0 }
 0x644   :  { %v15310_v44 = vpop.f32.mrb[217].mxu1  ;;  %v15312_v24 = vpop.f32.mrb[33].mxu0 }
 0x647   :  { %v15332_v12 = vpop.f32.mrb[218].mxu1  ;;  %v15334_v36 = vpop.f32.mrb[34].mxu0 }
 0x648   :  { %v15348_v15 = vpop.f32.mrb[219].mxu1  ;;  %v15350_v56 = vpop.f32.mrb[35].mxu0 }
 0x64b   :  { %v6417_v62 = vpop.f32.mrb[220].mxu1  ;;  %v15370_v11 = vpop.f32.mrb[36].mxu0 }
 0x64c   :  { %16731 = vst [vmem:[#allocation37_spill] sm:$0xff] %v15370_v11  ;;  %v7279_v25 = vrot.slane %v6417_v62, 1  ;;  %v6419_v54 = vpop.f32.mrb[221].mxu1  ;;  %v15383_v59 = vpop.f32.mrb[37].mxu0  ;;  %v7248_v11 = vadd.f32 %v15362_v13, %v15157_v26  ;;  %v7715_v62 = vld [vmem:[%s16330_s5 + $0x288] sm:$0xff]  ;;  %v9823_v26 = vpack.c.bf16 %v7669_v14, %v7666_v29  ;;  %v9825_v14 = vpack.c.bf16 %v7723_v33, %v7720_v42  ;;  %v7728_v33 = vld [vmem:[%s16330_s5 + $0x2f0] sm:$0xff] }
 0x64d   :  { %16732 = vst [vmem:[#allocation42_spill] sm:$0xff] %v15383_v59  ;;  %v7280_v45 = vrot.slane %v6419_v54, 1  ;;  %v9727_v59 = vpack.c.bf16 %v7715_v62, %v7712_v51 }
 0x64e   :  { %v7311_v27 = vadd.f32 %v7279_v25, %v7247_v55  ;;  %9824 = vmatpush3.bf16.msra.mxu0 %v9823_v26  ;;  %v9729_v25 = vpack.c.bf16 %v7722_v21, %v7719_v5  ;;  %v7672_v21 = vld [vmem:[%s16330_s5 + $0x130] sm:$0xff]  ;;  %v7675_v5 = vld [vmem:[%s16330_s5 + $0x148] sm:$0xff] }
 0x64f   :  { %v7312_v54 = vadd.f32 %v7280_v45, %v7248_v11  ;;  %v6423_v37 = vpop.f32.mrb[222].mxu1  ;;  %v15404_v57 = vpop.f32.mrb[38].mxu0  ;;  %9728 = vmatpush1.bf16.msra.mxu1 %v9727_v59  ;;  %v7721_v59 = vld [vmem:[%s16330_s5 + $0x2b8] sm:$0xff]  ;;  %v9827_v26 = vpack.c.bf16 %v7675_v5, %v7672_v21  ;;  %9826 = vmatprep.subr.bf16.mxu0 %v9825_v14  ;;  %v7724_v14 = vld [vmem:[%s16330_s5 + $0x2d0] sm:$0xff] }
 0x650   :  { %v7281_v45 = vrot.slane %v6423_v37, 1  ;;  %v6425_v11 = vpop.f32.mrb[223].mxu1  ;;  %v15417_v51 = vpop.f32.mrb[39].mxu0  ;;  %v15419_v55 = vadd.f32 %v7343_v4, %v7311_v27  ;;  %v7345_v4 = vrot.slane %v15169_v40, 1  ;;  %9730 = vmatprep.subr.bf16.mxu1 %v9729_v25  ;;  %v9731_v17 = vpack.c.bf16 %v7721_v59, %v7718_v6  ;;  %v7726_v40 = vld [vmem:[%s16330_s5 + $0x2e0] sm:$0xff] }
 0x651   :  { %16733 = vst [vmem:[#allocation44_spill] sm:$0xff] %v15417_v51  ;;  %v7282_v62 = vrot.slane %v6425_v11, 1  ;;  %v15429_v29 = vadd.f32 %v7344_v23, %v7312_v54  ;;  %v7346_v23 = vrot.slane %v15179_v22, 1  ;;  %v7725_v11 = vld [vmem:[%s16330_s5 + $0x2d8] sm:$0xff]  ;;  %v7251_v22 = vadd.f32 %v15346_v0, %v15187_v52 }
 0x652   :  { %v7313_v27 = vadd.f32 %v7281_v45, %v7249_v30  ;;  %9828 = vmatpush3.bf16.msra.mxu0 %v9827_v26  ;;  %v7252_v52 = vadd.f32 %v15362_v13, %v15197_v50  ;;  %v7347_v26 = vrot.slane %v15189_v28, 1  ;;  %v7731_v28 = vld [vmem:[%s16330_s5 + $0x308] sm:$0xff] }
 0x653   :  { %v7314_v54 = vadd.f32 %v7282_v62, %v7250_v48  ;;  %v6429_v37 = vpop.f32.mrb[224].mxu1  ;;  %v15442_v42 = vpop.f32.mrb[40].mxu0  ;;  %9732 = vmatpush1.bf16.msra.mxu1 %v9731_v17  ;;  %v9733_v48 = vpack.c.bf16 %v7728_v33, %v7725_v11  ;;  %v7729_v62 = vld [vmem:[%s16330_s5 + $0x2f8] sm:$0xff] }
 0x654   :  { %16734 = vst [vmem:[#allocation38_spill] sm:$0xff] %v15442_v42  ;;  %v7283_v30 = vrot.slane %v6429_v37, 1  ;;  %v6431_v45 = vpop.f32.mrb[225].mxu1  ;;  %v15455_v25 = vpop.f32.mrb[41].mxu0  ;;  %v15457_v6 = vadd.f32 %v7345_v4, %v7313_v27  ;;  %v9829_v5 = vpack.c.bf16 %v7729_v62, %v7726_v40  ;;  %v7727_v4 = vld [vmem:[%s16330_s5 + $0x2e8] sm:$0xff]  ;;  %v7678_v27 = vld [vmem:[%s16330_s5 + $0x160] sm:$0xff] }
 0x655   :  { %16735 = vst [vmem:[#allocation47_spill] sm:$0xff] %v15455_v25  ;;  %v7284_v59 = vrot.slane %v6431_v45, 1  ;;  %v15467_v21 = vadd.f32 %v7346_v23, %v7314_v54  ;;  %v7681_v17 = vld [vmem:[%s16330_s5 + $0x178] sm:$0xff]  ;;  %9734 = vmatprep.subr.bf16.mxu1 %v9733_v48  ;;  %v9735_v50 = vpack.c.bf16 %v7727_v4, %v7724_v14  ;;  %v7348_v54 = vrot.slane %v15199_v53, 1  ;;  %v7734_v53 = vld [vmem:[%s16330_s5 + $0x320] sm:$0xff]  ;;  %v7780_v14 = vld [vmem:[%s16330_s5 + $0x490] sm:$0xff] }
 0x656   :  { %v7315_v37 = vadd.f32 %v7283_v30, %v7251_v22  ;;  %v9831_v23 = vpack.c.bf16 %v7681_v17, %v7678_v27  ;;  %9830 = vmatprep.subr.bf16.mxu0 %v9829_v5  ;;  %v7253_v45 = vadd.f32 %v15346_v0, %v15201_v34  ;;  %v7254_v22 = vadd.f32 %v15362_v13, %v15214_v32 }
 0x657   :  { %v7316_v11 = vadd.f32 %v7284_v59, %v7252_v52  ;;  %v6435_v33 = vpop.f32.mrb[226].mxu1  ;;  %v15480_v40 = vpop.f32.mrb[42].mxu0  ;;  %9736 = vmatpush1.bf16.msra.mxu1 %v9735_v50  ;;  %v9737_v48 = vpack.c.bf16 %v7734_v53, %v7731_v28  ;;  %v7783_v52 = vld [vmem:[%s16330_s5 + $0x4a8] sm:$0xff]  ;;  %v7349_v59 = vrot.slane %v15203_v47, 1  ;;  %v7350_v27 = vrot.slane %v15216_v60, 1 }
 0x658   :  { %v7285_v62 = vrot.slane %v6435_v33, 1  ;;  %v6437_v25 = vpop.f32.mrb[227].mxu1  ;;  %v15484_v42 = vpop.f32.mrb[43].mxu0  ;;  %v15486_v51 = vadd.f32 %v7347_v26, %v7315_v37  ;;  %9832 = vmatpush3.bf16.msra.mxu0 %v9831_v23  ;;  %v9833_v4 = vpack.c.bf16 %v7783_v52, %v7780_v14  ;;  %v7255_v26 = vadd.f32 %v15346_v0, %v15233_v20 }
 0x659   :  { %v7286_v34 = vrot.slane %v6437_v25, 1  ;;  %v15496_v30 = vadd.f32 %v7348_v54, %v7316_v11  ;;  %9738 = vmatprep.subr.bf16.mxu1 %v9737_v48  ;;  %v7256_v47 = vadd.f32 %v15362_v13, %v15246_v9  ;;  %v7351_v33 = vrot.slane %v15235_v38, 1 }
 0x65a   :  { %v7317_v5 = vadd.f32 %v7285_v62, %v7253_v45  ;;  %9834 = vmatprep.subr.bf16.mxu0 %v9833_v4  ;;  %v7352_v62 = vrot.slane %v15248_v39, 1  ;;  %v7258_v52 = vadd.f32 %v15362_v13, %v15278_v35  ;;  %v7353_v39 = vrot.slane %v15267_v2, 1 }
 0x65b   :  { %v7318_v17 = vadd.f32 %v7286_v34, %v7254_v22  ;;  %v6441_v32 = vpop.f32.mrb[228].mxu1  ;;  %v15506_v25 = vpop.f32.mrb[44].mxu0  ;;  %v7257_v22 = vadd.f32 %v15346_v0, %v15265_v49  ;;  %v7354_v4 = vrot.slane %v15280_v31, 1  ;;  %v7355_v31 = vrot.slane %v15299_v3, 1 }
 0x65c   :  { %v7287_v37 = vrot.slane %v6441_v32, 1  ;;  %v6443_v50 = vpop.f32.mrb[229].mxu1  ;;  %v15510_v23 = vpop.f32.mrb[45].mxu0  ;;  %v15512_v54 = vadd.f32 %v7349_v59, %v7317_v5  ;;  %v7259_v32 = vadd.f32 %v15346_v0, %v15297_v58 }
 0x65d   :  { %v7288_v11 = vrot.slane %v6443_v50, 1  ;;  %v15516_v60 = vadd.f32 %v7350_v27, %v7318_v17 }
 0x65e   :  { %v7319_v45 = vadd.f32 %v7287_v37, %v7255_v26 }
 0x65f   :  { %v7320_v28 = vadd.f32 %v7288_v11, %v7256_v47  ;;  %v6447_v20 = vpop.f32.mrb[230].mxu1  ;;  %v15520_v53 = vpop.f32.mrb[46].mxu0  ;;  %v7260_v47 = vadd.f32 %v15362_v13, %v15310_v44 }
 0x660   :  { %v7289_v34 = vrot.slane %v6447_v20, 1  ;;  %v6449_v48 = vpop.f32.mrb[231].mxu1  ;;  %v15524_v14 = vpop.f32.mrb[47].mxu0  ;;  %v15526_v9 = vadd.f32 %v7351_v33, %v7319_v45  ;;  %v7356_v45 = vrot.slane %v15312_v24, 1  ;;  %v7261_v20 = vadd.f32 %v15346_v0, %v15332_v12 }
 0x661   :  { %v7290_v38 = vrot.slane %v6449_v48, 1  ;;  %v15530_v59 = vadd.f32 %v7352_v62, %v7320_v28  ;;  %v7357_v24 = vrot.slane %v15334_v36, 1 }
 0x662   :  { %v7321_v5 = vadd.f32 %v7289_v34, %v7257_v22 }
 0x663   :  { %v7322_v27 = vadd.f32 %v7290_v38, %v7258_v52  ;;  %v6453_v17 = vpop.f32.mrb[232].mxu1  ;;  %v15534_v49 = vpop.f32.mrb[48].mxu0  ;;  %v7262_v52 = vadd.f32 %v15362_v13, %v15348_v15 }
 0x664   :  { %v7291_v26 = vrot.slane %v6453_v17, 1  ;;  %v6455_v37 = vpop.f32.mrb[233].mxu1  ;;  %v15538_v50 = vpop.f32.mrb[49].mxu0  ;;  %v15540_v35 = vadd.f32 %v7353_v39, %v7321_v5  ;;  %v7358_v5 = vrot.slane %v15350_v56, 1  ;;  %v7055_v17 = vrot.slane %v14657_v1, 1 }
 0x665   :  { %v7292_v2 = vrot.slane %v6455_v37, 1  ;;  %v15544_v11 = vadd.f32 %v7354_v4, %v7322_v27  ;;  %v7057_v1 = vrot.slane %v14733_v10, 1 }
 0x666   :  { %v7323_v33 = vadd.f32 %v7291_v26, %v7259_v32 }
 0x667   :  { %v7324_v62 = vadd.f32 %v7292_v2, %v7260_v47  ;;  %v6459_v28 = vpop.f32.mrb[234].mxu1  ;;  %v15548_v58 = vpop.f32.mrb[50].mxu0  ;;  %v7056_v47 = vrot.slane %v14659_v18, 1  ;;  %v7058_v18 = vrot.slane %v14736_v61, 1 }
 0x668   :  { %v7293_v22 = vrot.slane %v6459_v28, 1  ;;  %v6461_v34 = vpop.f32.mrb[235].mxu1  ;;  %v15552_v48 = vpop.f32.mrb[51].mxu0  ;;  %v15554_v44 = vadd.f32 %v7355_v31, %v7323_v33 }
 0x669   :  { %v7294_v3 = vrot.slane %v6461_v34, 1  ;;  %v15558_v38 = vadd.f32 %v7356_v45, %v7324_v62 }
 0x66a   :  { %v7325_v39 = vadd.f32 %v7293_v22, %v7261_v20 }
 0x66b   :  { %v7326_v4 = vadd.f32 %v7294_v3, %v7262_v52  ;;  %v6465_v27 = vpop.f32.mrb[188].mxu1  ;;  %v15562_v12 = vpop.f32.mrb[52].mxu0 }
 0x66c   :  { %v9937_v32 = vadd.f32 %v15346_v0, %v6465_v27  ;;  %v6467_v26 = vpop.f32.mrb[189].mxu1  ;;  %v15566_v37 = vpop.f32.mrb[53].mxu0  ;;  %v15568_v15 = vadd.f32 %v7357_v24, %v7325_v39  ;;  %v7059_v39 = vrot.slane %v14863_v19, 1  ;;  %v7060_v27 = vrot.slane %v14872_v8, 1 }
 0x66d   :  { %v9938_v36 = vadd.f32 %v15362_v13, %v6467_v26  ;;  %v15572_v2 = vadd.f32 %v7358_v5, %v7326_v4 }
 0x66e   :  { %v15574_v56 = vadd.f32 %v9937_v32, %v7055_v17 }
 0x66f   :  { %v15576_v31 = vadd.f32 %v9938_v36, %v7056_v47  ;;  %v6471_v33 = vpop.f32.mrb[190].mxu1  ;;  %v15578_v45 = vpop.f32.mrb[54].mxu0  ;;  %v7061_v36 = vrot.slane %v14993_v7, 1 }
 0x670   :  { %v9939_v62 = vadd.f32 %v15346_v0, %v6471_v33  ;;  %v6473_v28 = vpop.f32.mrb[191].mxu1  ;;  %v15582_v20 = vpop.f32.mrb[55].mxu0 }
 0x671   :  { %v9940_v22 = vadd.f32 %v15362_v13, %v6473_v28 }
 0x672   :  { %v15586_v34 = vadd.f32 %v9939_v62, %v7057_v1  ;;  %v7062_v62 = vrot.slane %v14996_v46, 1 }
 0x673   :  { %v15588_v52 = vadd.f32 %v9940_v22, %v7058_v18  ;;  %v6477_v3 = vpop.f32.mrb[192].mxu1  ;;  %v15590_v24 = vpop.f32.mrb[56].mxu0 }
 0x674   :  { %v9941_v10 = vadd.f32 %v15346_v0, %v6477_v3  ;;  %v6479_v5 = vpop.f32.mrb[193].mxu1  ;;  %v15594_v4 = vpop.f32.mrb[57].mxu0 }
 0x675   :  { %16736 = vst [vmem:[#allocation36_spill] sm:$0xff] %v15588_v52  ;;  %v9942_v61 = vadd.f32 %v15362_v13, %v6479_v5 }
 0x676   :  { %v15598_v17 = vadd.f32 %v9941_v10, %v7059_v39  ;;  %v7063_v39 = vrot.slane %v15031_v63, 1 }
 0x677   :  { %v15600_v32 = vadd.f32 %v9942_v61, %v7060_v27  ;;  %v6483_v26 = vpop.f32.mrb[194].mxu1  ;;  %v15602_v47 = vpop.f32.mrb[58].mxu0  ;;  %v7064_v27 = vrot.slane %v15033_v16, 1 }
 0x678   :  { %16737 = vst [vmem:[#allocation40_spill] sm:$0xff] %v15598_v17  ;;  %v9943_v19 = vadd.f32 %v15346_v0, %v6483_v26  ;;  %v6485_v33 = vpop.f32.mrb[195].mxu1  ;;  %v15606_v1 = vpop.f32.mrb[59].mxu0 }
 0x679   :  { %16738 = vst [vmem:[#allocation27_spill] sm:$0xff] %v15600_v32  ;;  %v9944_v8 = vadd.f32 %v15362_v13, %v6485_v33  ;;  %v7065_v33 = vrot.slane %v15059_v43, 1 }
 0x67a   :  { %v15610_v28 = vadd.f32 %v9943_v19, %v7061_v36 }
 0x67b   :  { %v15612_v18 = vadd.f32 %v9944_v8, %v7062_v62  ;;  %v6489_v22 = vpop.f32.mrb[196].mxu1  ;;  %v15614_v3 = vpop.f32.mrb[60].mxu0 }
 0x67c   :  { %16739 = vst [vmem:[#allocation45_spill] sm:$0xff] %v15610_v28  ;;  %v9945_v7 = vadd.f32 %v15346_v0, %v6489_v22  ;;  %v6491_v10 = vpop.f32.mrb[197].mxu1  ;;  %v15618_v5 = vpop.f32.mrb[61].mxu0  ;;  %v7066_v22 = vrot.slane %v15061_v41, 1 }
 0x67d   :  { %16740 = vst [vmem:[#allocation46_spill] sm:$0xff] %v15612_v18  ;;  %v9946_v46 = vadd.f32 %v15362_v13, %v6491_v10 }
 0x67e   :  { %v15622_v61 = vadd.f32 %v9945_v7, %v7063_v39 }
 0x67f   :  { %v15624_v26 = vadd.f32 %v9946_v46, %v7064_v27  ;;  %v6495_v36 = vpop.f32.mrb[198].mxu1  ;;  %v15626_v19 = vpop.f32.mrb[62].mxu0  ;;  %v16745_v27 = vld [vmem:[#allocation33_spill] sm:$0xff] }
 0x680   :  { %16741 = vst [vmem:[#allocation43_spill] sm:$0xff] %v15622_v61  ;;  %v9947_v63 = vadd.f32 %v15346_v0, %v6495_v36  ;;  %v6497_v62 = vpop.f32.mrb[199].mxu1  ;;  %v15630_v8 = vpop.f32.mrb[63].mxu0  ;;  %v7067_v46 = vrot.slane %v16745_v27, 1  ;;  %v16746_v61 = vld [vmem:[#allocation41_spill] sm:$0xff] }
 0x681   :  { %16742 = vst [vmem:[#allocation49_spill] sm:$0xff] %v15624_v26  ;;  %v9948_v16 = vadd.f32 %v15362_v13, %v6497_v62  ;;  %v7068_v28 = vrot.slane %v16746_v61, 1 }
 0x682   :  { %v15634_v18 = vadd.f32 %v9947_v63, %v7065_v33 }
 0x683   :  { %v15636_v39 = vadd.f32 %v9948_v16, %v7066_v22  ;;  %v6501_v7 = vpop.f32.mrb[200].mxu1  ;;  %v15638_v10 = vpop.f32.mrb[64].mxu0  ;;  %v16749_v22 = vld [vmem:[#allocation34_spill] sm:$0xff] }
 0x684   :  { %16743 = vst [vmem:[#allocation52_spill] sm:$0xff] %v15634_v18  ;;  %v9949_v43 = vadd.f32 %v15346_v0, %v6501_v7  ;;  %v6503_v26 = vpop.f32.mrb[201].mxu1  ;;  %v15642_v36 = vpop.f32.mrb[65].mxu0  ;;  %v7069_v16 = vrot.slane %v16749_v22, 1  ;;  %v16750_v18 = vld [vmem:[#allocation31_spill] sm:$0xff] }
 0x685   :  { %16744 = vst [vmem:[#allocation39_spill] sm:$0xff] %v15636_v39  ;;  %v9950_v41 = vadd.f32 %v15362_v13, %v6503_v26  ;;  %v7070_v17 = vrot.slane %v16750_v18, 1 }
 0x686   :  { %v15646_v32 = vadd.f32 %v9949_v43, %v7067_v46 }
 0x687   :  { %v15648_v33 = vadd.f32 %v9950_v41, %v7068_v28  ;;  %v6507_v63 = vpop.f32.mrb[202].mxu1  ;;  %v15650_v62 = vpop.f32.mrb[66].mxu0 }
 0x688   :  { %16747 = vst [vmem:[#allocation59_spill] sm:$0xff] %v15646_v32  ;;  %v9951_v27 = vadd.f32 %v15346_v0, %v6507_v63  ;;  %v6509_v39 = vpop.f32.mrb[203].mxu1  ;;  %v15654_v7 = vpop.f32.mrb[67].mxu0  ;;  %v7472_v0 = vrot.slane %v15566_v37, 2 }
 0x689   :  { %16748 = vst [vmem:[#allocation95_spill] sm:$0xff] %v15648_v33  ;;  %v9952_v61 = vadd.f32 %v15362_v13, %v6509_v39  ;;  %v7471_v33 = vrot.slane %v15562_v12, 2  ;;  %v7474_v12 = vrot.slane %v15582_v20, 2 }
 0x68a   :  { %v15658_v52 = vadd.f32 %v9951_v27, %v7069_v16  ;;  %v7473_v27 = vrot.slane %v15578_v45, 2  ;;  %v7476_v45 = vrot.slane %v15594_v4, 2 }
 0x68b   :  { %v15660_v26 = vadd.f32 %v9952_v61, %v7070_v17  ;;  %v6739_v28 = vpop.f32.mrb[236].mxu1 }
 0x68c   :  { %v7407_v46 = vrot.slane %v6739_v28, 2  ;;  %v6741_v43 = vpop.f32.mrb[237].mxu1 }
 0x68d   :  { %v7408_v41 = vrot.slane %v6741_v43, 2  ;;  %v7475_v43 = vrot.slane %v15590_v24, 2  ;;  %v7478_v24 = vrot.slane %v15606_v1, 2 }
 0x68e   :  { %v7439_v22 = vadd.f32 %v7407_v46, %v15419_v55 }
 0x68f   :  { %v7440_v63 = vadd.f32 %v7408_v41, %v15429_v29  ;;  %v6745_v32 = vpop.f32.mrb[238].mxu1 }
 0x690   :  { %v15666_v18 = vadd.f32 %v7471_v33, %v7439_v22  ;;  %v7409_v13 = vrot.slane %v6745_v32, 2  ;;  %v6747_v39 = vpop.f32.mrb[239].mxu1 }
 0x691   :  { %v15668_v16 = vadd.f32 %v7472_v0, %v7440_v63  ;;  %v7410_v17 = vrot.slane %v6747_v39, 2  ;;  %v7477_v39 = vrot.slane %v15602_v47, 2  ;;  %v7480_v47 = vrot.slane %v15618_v5, 2 }
 0x692   :  { %v7441_v61 = vadd.f32 %v7409_v13, %v15457_v6 }
 0x693   :  { %v7442_v55 = vadd.f32 %v7410_v17, %v15467_v21  ;;  %v6751_v28 = vpop.f32.mrb[240].mxu1 }
 0x694   :  { %v15674_v37 = vadd.f32 %v7473_v27, %v7441_v61  ;;  %v7411_v29 = vrot.slane %v6751_v28, 2  ;;  %v6753_v46 = vpop.f32.mrb[241].mxu1  ;;  %v7479_v28 = vrot.slane %v15614_v3, 2  ;;  %v7482_v3 = vrot.slane %v15630_v8, 2 }
 0x695   :  { %v15676_v33 = vadd.f32 %v7474_v12, %v7442_v55  ;;  %v7412_v32 = vrot.slane %v6753_v46, 2 }
 0x696   :  { %v7443_v41 = vadd.f32 %v7411_v29, %v15486_v51 }
 0x697   :  { %v7444_v6 = vadd.f32 %v7412_v32, %v15496_v30  ;;  %v6757_v22 = vpop.f32.mrb[242].mxu1 }
 0x698   :  { %v15682_v20 = vadd.f32 %v7475_v43, %v7443_v41  ;;  %v7413_v21 = vrot.slane %v6757_v22, 2  ;;  %v6759_v0 = vpop.f32.mrb[243].mxu1 }
 0x699   :  { %v15684_v63 = vadd.f32 %v7476_v45, %v7444_v6  ;;  %v7414_v13 = vrot.slane %v6759_v0, 2  ;;  %v7481_v45 = vrot.slane %v15626_v19, 2  ;;  %v7484_v19 = vrot.slane %v15642_v36, 2 }
 0x69a   :  { %v7445_v17 = vadd.f32 %v7413_v21, %v15512_v54 }
 0x69b   :  { %v7446_v51 = vadd.f32 %v7414_v13, %v15516_v60  ;;  %v6763_v27 = vpop.f32.mrb[244].mxu1 }
 0x69c   :  { %v15690_v4 = vadd.f32 %v7477_v39, %v7445_v17  ;;  %v7415_v30 = vrot.slane %v6763_v27, 2  ;;  %v6765_v61 = vpop.f32.mrb[245].mxu1  ;;  %v7483_v39 = vrot.slane %v15638_v10, 2  ;;  %v16751_v27 = vld [vmem:[#allocation37_spill] sm:$0xff]  ;;  %v7185_v10 = vrot.slane %v15404_v57, 2 }
 0x69d   :  { %v15692_v12 = vadd.f32 %v7478_v24, %v7446_v51  ;;  %v7416_v55 = vrot.slane %v6765_v61, 2 }
 0x69e   :  { %v7447_v29 = vadd.f32 %v7415_v30, %v15526_v9  ;;  %v7183_v30 = vrot.slane %v16751_v27, 2  ;;  %v7519_v27 = vmax.f32 %v15666_v18, 0.0  ;;  %v7525_v18 = vmax.f32 %v15690_v4, 0.0 }
 0x69f   :  { %v7448_v54 = vadd.f32 %v7416_v55, %v15530_v59  ;;  %v6769_v46 = vpop.f32.mrb[246].mxu1 }
 0x6a0   :  { %v15698_v1 = vadd.f32 %v7479_v28, %v7447_v29  ;;  %v7417_v60 = vrot.slane %v6769_v46, 2  ;;  %v6771_v32 = vpop.f32.mrb[247].mxu1  ;;  %v16752_v28 = vld [vmem:[#allocation42_spill] sm:$0xff] }
 0x6a1   :  { %v15700_v43 = vadd.f32 %v7480_v47, %v7448_v54  ;;  %v7418_v41 = vrot.slane %v6771_v32, 2  ;;  %v7184_v29 = vrot.slane %v16752_v28, 2  ;;  %v16753_v47 = vld [vmem:[#allocation44_spill] sm:$0xff]  ;;  %v16754_v54 = vld [vmem:[#allocation38_spill] sm:$0xff] }
 0x6a2   :  { %v7449_v6 = vadd.f32 %v7417_v60, %v15540_v35  ;;  %v7187_v46 = vrot.slane %v16754_v54, 2  ;;  %v7486_v60 = vrot.slane %v15654_v7, 2  ;;  %v7192_v7 = vrot.slane %v15510_v23, 2 }
 0x6a3   :  { %v7450_v9 = vadd.f32 %v7418_v41, %v15544_v11  ;;  %v6775_v22 = vpop.f32.mrb[248].mxu1 }
 0x6a4   :  { %v15706_v5 = vadd.f32 %v7481_v45, %v7449_v6  ;;  %v7419_v59 = vrot.slane %v6775_v22, 2  ;;  %v6777_v21 = vpop.f32.mrb[249].mxu1  ;;  %v16755_v45 = vld [vmem:[#allocation47_spill] sm:$0xff] }
 0x6a5   :  { %v15708_v0 = vadd.f32 %v7482_v3, %v7450_v9  ;;  %v7420_v13 = vrot.slane %v6777_v21, 2  ;;  %v7188_v6 = vrot.slane %v16755_v45, 2  ;;  %v7189_v3 = vrot.slane %v15480_v40, 2 }
 0x6a6   :  { %v7451_v17 = vadd.f32 %v7419_v59, %v15554_v44  ;;  %v7485_v44 = vrot.slane %v15650_v62, 2  ;;  %v7190_v62 = vrot.slane %v15484_v42, 2  ;;  %v7529_v4 = vmax.f32 %v15706_v5, 0.0 }
 0x6a7   :  { %v7452_v35 = vadd.f32 %v7420_v13, %v15558_v38  ;;  %v6781_v24 = vpop.f32.mrb[250].mxu1  ;;  %v7186_v38 = vrot.slane %v16753_v47, 2  ;;  %v7194_v13 = vrot.slane %v15524_v14, 2 }
 0x6a8   :  { %v15714_v8 = vadd.f32 %v7483_v39, %v7451_v17  ;;  %v7421_v11 = vrot.slane %v6781_v24, 2  ;;  %v6783_v51 = vpop.f32.mrb[251].mxu1  ;;  %v7195_v17 = vrot.slane %v15534_v49, 2 }
 0x6a9   :  { %v15717_v61 = vadd.f32 %v7484_v19, %v7452_v35  ;;  %v7422_v55 = vrot.slane %v6783_v51, 2  ;;  %v7196_v19 = vrot.slane %v15538_v50, 2 }
 0x6aa   :  { %v7453_v36 = vadd.f32 %v7421_v11, %v15568_v15  ;;  %v7191_v15 = vrot.slane %v15506_v25, 2  ;;  %v16763_v25 = vld [vmem:[#allocation52_spill] sm:$0xff] }
 0x6ab   :  { %v7454_v32 = vadd.f32 %v7422_v55, %v15572_v2  ;;  %v6787_v41 = vpop.f32.mrb[252].mxu1  ;;  %v7193_v2 = vrot.slane %v15520_v53, 2 }
 0x6ac   :  { %v15729_v9 = vadd.f32 %v7485_v44, %v7453_v36  ;;  %v7119_v57 = vrot.slane %v6787_v41, 1  ;;  %v6789_v22 = vpop.f32.mrb[253].mxu1  ;;  %v7520_v36 = vmax.f32 %v15668_v16, 0.0  ;;  %v7526_v16 = vmax.f32 %v15692_v12, 0.0 }
 0x6ad   :  { %v15733_v59 = vadd.f32 %v7486_v60, %v7454_v32  ;;  %v7120_v21 = vrot.slane %v6789_v22, 1  ;;  %v7522_v60 = vmax.f32 %v15676_v33, 0.0  ;;  %v7523_v32 = vmax.f32 %v15682_v20, 0.0  ;;  %v16756_v22 = vld [vmem:[#allocation36_spill] sm:$0xff] }
 0x6ae   :  { %v7151_v39 = vadd.f32 %v7119_v57, %v15574_v56  ;;  %v7521_v56 = vmax.f32 %v15674_v37, 0.0  ;;  %v7524_v57 = vmax.f32 %v15684_v63, 0.0  ;;  %v7527_v33 = vmax.f32 %v15698_v1, 0.0 }
 0x6af   :  { %v7152_v24 = vadd.f32 %v7120_v21, %v15576_v31  ;;  %v6793_v11 = vpop.f32.mrb[254].mxu1  ;;  %v7528_v63 = vmax.f32 %v15700_v43, 0.0 }
 0x6b0   :  { %v7215_v55 = vadd.f32 %v7183_v30, %v7151_v39  ;;  %v7121_v28 = vrot.slane %v6793_v11, 1  ;;  %v6795_v44 = vpop.f32.mrb[255].mxu1 }
 0x6b1   :  { %v7216_v47 = vadd.f32 %v7184_v29, %v7152_v24  ;;  %v7122_v54 = vrot.slane %v6795_v44, 1  ;;  %v16757_v44 = vld [vmem:[#allocation40_spill] sm:$0xff] }
 0x6b2   :  { %v7231_v41 = vmax.f32 %v7215_v55, 0.0  ;;  %v7153_v31 = vadd.f32 %v7121_v28, %v15586_v34 }
 0x6b3   :  { %v7232_v30 = vmax.f32 %v7216_v47, 0.0  ;;  %v7154_v21 = vadd.f32 %v7122_v54, %v16756_v22  ;;  %v6799_v39 = vpop.f32.mrb[0].mxu1  ;;  %v7530_v54 = vmax.f32 %v15708_v0, 0.0 }
 0x6b4   :  { %v7535_v37 = vmax.f32 %v7231_v41, %v7519_v27  ;;  %v7217_v29 = vadd.f32 %v7185_v10, %v7153_v31  ;;  %v7123_v24 = vrot.slane %v6799_v39, 1  ;;  %v6801_v11 = vpop.f32.mrb[1].mxu1  ;;  %v16758_v10 = vld [vmem:[#allocation27_spill] sm:$0xff]  ;;  %v7531_v39 = vmax.f32 %v15714_v8, 0.0 }
 0x6b5   :  { %v7536_v20 = vmax.f32 %v7232_v30, %v7520_v36  ;;  %v7218_v55 = vadd.f32 %v7186_v38, %v7154_v21  ;;  %v7124_v34 = vrot.slane %v6801_v11, 1  ;;  %v16760_v11 = vld [vmem:[#allocation46_spill] sm:$0xff] }
 0x6b6   :  { %v7233_v28 = vmax.f32 %v7217_v29, 0.0  ;;  %v7155_v47 = vadd.f32 %v7123_v24, %v16757_v44 }
 0x6b7   :  { %v7551_v22 = vmax.f32 %v7535_v37, %v7536_v20  ;;  %v7234_v27 = vmax.f32 %v7218_v55, 0.0  ;;  %v7156_v41 = vadd.f32 %v7124_v34, %v16758_v10  ;;  %v6805_v31 = vpop.f32.mrb[2].mxu1  ;;  %v16759_v20 = vld [vmem:[#allocation45_spill] sm:$0xff] }
 0x6b8   :  { %v7537_v36 = vmax.f32 %v7233_v28, %v7521_v56  ;;  %v7219_v38 = vadd.f32 %v7187_v46, %v7155_v47  ;;  %v7125_v30 = vrot.slane %v6805_v31, 1  ;;  %v6807_v21 = vpop.f32.mrb[3].mxu1 }
 0x6b9   :  { %v7538_v44 = vmax.f32 %v7234_v27, %v7522_v60  ;;  %v7220_v37 = vadd.f32 %v7188_v6, %v7156_v41  ;;  %v7126_v34 = vrot.slane %v6807_v21, 1  ;;  %v7589_v10 = vrot.slane %v7551_v22, 1 }
 0x6ba   :  { %v7235_v51 = vmax.f32 %v7219_v38, 0.0  ;;  %v7157_v55 = vadd.f32 %v7125_v30, %v16759_v20  ;;  %v7604_v35 = vrot.slane %v7551_v22, 2  ;;  %v7619_v56 = vrot.slane %v7551_v22, 3 }
 0x6bb   :  { %v7552_v46 = vmax.f32 %v7537_v36, %v7538_v44  ;;  %v6811_v28 = vpop.f32.mrb[4].mxu1  ;;  %v7236_v31 = vmax.f32 %v7220_v37, 0.0  ;;  %v7158_v24 = vadd.f32 %v7126_v34, %v16760_v11  ;;  %v16762_v34 = vld [vmem:[#allocation49_spill] sm:$0xff] }
 0x6bc   :  { %v7539_v47 = vmax.f32 %v7235_v51, %v7523_v32  ;;  %v7221_v29 = vadd.f32 %v7189_v3, %v7157_v55  ;;  %v6813_v60 = vpop.f32.mrb[5].mxu1  ;;  %v7127_v6 = vrot.slane %v6811_v28, 1  ;;  %v16761_v51 = vld [vmem:[#allocation43_spill] sm:$0xff] }
 0x6bd   :  { %v7567_v27 = vrot.slane %v7552_v46, 7  ;;  %v7605_v38 = vrot.slane %v7552_v46, 1  ;;  %v7620_v45 = vrot.slane %v7552_v46, 2  ;;  %v7540_v41 = vmax.f32 %v7236_v31, %v7524_v57 }
 0x6be   :  { %v7237_v30 = vmax.f32 %v7221_v29, 0.0  ;;  %v7222_v21 = vadd.f32 %v7190_v62, %v7158_v24  ;;  %v7128_v20 = vrot.slane %v6813_v60, 1  ;;  %v7159_v32 = vadd.f32 %v7127_v6, %v16761_v51 }
 0x6bf   :  { %v7606_v36 = vsel %vm7568_vm3, %v7605_v38, %v7604_v35  ;;  %v6817_v44 = vpop.f32.mrb[6].mxu1  ;;  %v7569_v40 = vsel %vm7568_vm3, %v7567_v27, %v7551_v22  ;;  %v7590_v3 = vsel %vm7568_vm3, %v7552_v46, %v7589_v10  ;;  %v7553_v11 = vmax.f32 %v7539_v47, %v7540_v41  ;;  %v16764_v27 = vld [vmem:[#allocation39_spill] sm:$0xff] }
 0x6c0   :  { %v7541_v37 = vmax.f32 %v7237_v30, %v7525_v18  ;;  %v7238_v55 = vmax.f32 %v7222_v21, 0.0  ;;  %v7160_v28 = vadd.f32 %v7128_v20, %v16762_v34  ;;  %v6819_v57 = vpop.f32.mrb[7].mxu1  ;;  %v7223_v42 = vadd.f32 %v7191_v15, %v7159_v32  ;;  %v16765_v21 = vld [vmem:[#allocation59_spill] sm:$0xff] }
 0x6c1   :  { %v7129_v62 = vrot.slane %v6817_v44, 1  ;;  %v7130_v29 = vrot.slane %v6819_v57, 1  ;;  %v7621_v35 = vsel %vm7568_vm3, %v7620_v45, %v7619_v56  ;;  %v7570_v24 = vrot.slane %v7553_v11, 6 }
 0x6c2   :  { %v7591_v31 = vrot.slane %v7553_v11, 7  ;;  %v15781_v22 = vsel %vm7571_vm4, %v7553_v11, %v7606_v36  ;;  %v7622_v10 = vrot.slane %v7553_v11, 1  ;;  %v7542_v18 = vmax.f32 %v7238_v55, %v7526_v16 }
 0x6c3   :  { %v7239_v46 = vmax.f32 %v7223_v42, 0.0  ;;  %v7224_v47 = vadd.f32 %v7192_v7, %v7160_v28  ;;  %v7161_v15 = vadd.f32 %v7129_v62, %v16763_v25  ;;  %v6823_v60 = vpop.f32.mrb[8].mxu1  ;;  %v7162_v38 = vadd.f32 %v7130_v29, %v16764_v27 }
 0x6c4   :  { %v7131_v56 = vrot.slane %v6823_v60, 1  ;;  %v6825_v45 = vpop.f32.mrb[9].mxu1  ;;  %v7572_v6 = vsel %vm7571_vm4, %v7570_v24, %v7569_v40  ;;  %v7592_v41 = vsel %vm7571_vm4, %v7591_v31, %v7590_v3  ;;  %v7554_v30 = vmax.f32 %v7541_v37, %v7542_v18 }
 0x6c5   :  { %v7543_v12 = vmax.f32 %v7239_v46, %v7527_v33  ;;  %v7240_v16 = vmax.f32 %v7224_v47, 0.0  ;;  %v7225_v23 = vadd.f32 %v7193_v2, %v7161_v15  ;;  %v7226_v7 = vadd.f32 %v7194_v13, %v7162_v38  ;;  %v16766_v2 = vld [vmem:[#allocation95_spill] sm:$0xff] }
 0x6c6   :  { %v7163_v20 = vadd.f32 %v7131_v56, %v16765_v21  ;;  %v7132_v36 = vrot.slane %v6825_v45, 1  ;;  %v7623_v51 = vsel %vm7571_vm4, %v7622_v10, %v7621_v35  ;;  %v7573_v32 = vrot.slane %v7554_v30, 5  ;;  %v7732_v21 = vld [vmem:[%s16330_s5 + $0x310] sm:$0xff] }
 0x6c7   :  { %v7608_v44 = vrot.slane %v7554_v30, 7  ;;  %v7544_v40 = vmax.f32 %v7240_v16, %v7528_v63  ;;  %v7241_v1 = vmax.f32 %v7225_v23, 0.0  ;;  %v6829_v33 = vpop.f32.mrb[10].mxu1  ;;  %v7242_v3 = vmax.f32 %v7226_v7, 0.0 }
 0x6c8   :  { %v7227_v53 = vadd.f32 %v7195_v17, %v7163_v20  ;;  %v7164_v11 = vadd.f32 %v7132_v36, %v16766_v2  ;;  %v7133_v14 = vrot.slane %v6829_v33, 1  ;;  %v6831_v13 = vpop.f32.mrb[11].mxu1  ;;  %v7575_v28 = vsel %vm7574_vm5, %v7573_v32, %v7572_v6 }
 0x6c9   :  { %v7555_v37 = vmax.f32 %v7543_v12, %v7544_v40  ;;  %v7545_v55 = vmax.f32 %v7241_v1, %v7529_v4  ;;  %v7134_v34 = vrot.slane %v6831_v13, 1  ;;  %v7546_v43 = vmax.f32 %v7242_v3, %v7530_v54  ;;  %v7737_v1 = vld [vmem:[%s16330_s5 + $0x338] sm:$0xff] }
 0x6ca   :  { %v7243_v63 = vmax.f32 %v7227_v53, 0.0  ;;  %v7228_v49 = vadd.f32 %v7196_v19, %v7164_v11  ;;  %v7165_v17 = vadd.f32 %v7133_v14, %v15658_v52  ;;  %v7593_v29 = vrot.slane %v7554_v30, 6  ;;  %v7740_v11 = vld [vmem:[%s16330_s5 + $0x350] sm:$0xff]  ;;  %v7786_v14 = vld [vmem:[%s16330_s5 + $0x4c0] sm:$0xff]  ;;  %v7789_v13 = vld [vmem:[%s16330_s5 + $0x4d8] sm:$0xff] }
 0x6cb   :  { %v7576_v57 = vrot.slane %v7555_v37, 4  ;;  %v7610_v42 = vrot.slane %v7555_v37, 6  ;;  %v7166_v62 = vadd.f32 %v7134_v34, %v15660_v26  ;;  %v7556_v5 = vmax.f32 %v7545_v55, %v7546_v43  ;;  %v7739_v43 = vld [vmem:[%s16330_s5 + $0x348] sm:$0xff] }
 0x6cc   :  { %v7547_v4 = vmax.f32 %v7243_v63, %v7531_v39  ;;  %v7244_v35 = vmax.f32 %v7228_v49, 0.0  ;;  %v16767_v24 = vrot.slane %v15548_v58, 2  ;;  %v16768_v54 = vrot.slane %v15552_v48, 2 }
 0x6cd   :  { %v7578_v19 = vsel %vm7577_vm6, %v7576_v57, %v7575_v28  ;;  %v7594_v52 = vsel %vm7574_vm5, %v7593_v29, %v7592_v41  ;;  %v7595_v31 = vrot.slane %v7555_v37, 5  ;;  %v7579_v10 = vrot.slane %v7556_v5, 3  ;;  %v7736_v28 = vld [vmem:[%s16330_s5 + $0x330] sm:$0xff]  ;;  %v7743_v29 = vld [vmem:[%s16330_s5 + $0x368] sm:$0xff] }
 0x6ce   :  { %v7229_v0 = vadd.f32 %v16767_v24, %v7165_v17  ;;  %v7230_v50 = vadd.f32 %v16768_v54, %v7166_v62  ;;  %v7612_v26 = vrot.slane %v7556_v5, 5  ;;  %v16769_v18 = vmax.f32 %v15717_v61, 0.0  ;;  %v7741_v62 = vld [vmem:[%s16330_s5 + $0x358] sm:$0xff]  ;;  %v7792_v24 = vld [vmem:[%s16330_s5 + $0x4f0] sm:$0xff] }
 0x6cf   :  { %v7596_v47 = vsel %vm7577_vm6, %v7595_v31, %v7594_v52  ;;  %v7597_v58 = vrot.slane %v7556_v5, 4  ;;  %v7624_v25 = vsel %vm7574_vm5, %v7554_v30, %v7623_v51  ;;  %v16770_v48 = vmax.f32 %v15729_v9, 0.0  ;;  %v7730_v30 = vld [vmem:[%s16330_s5 + $0x300] sm:$0xff]  ;;  %v7745_v31 = vld [vmem:[%s16330_s5 + $0x378] sm:$0xff] }
 0x6d0   :  { %v7548_v46 = vmax.f32 %v7244_v35, %v16769_v18  ;;  %v7245_v8 = vmax.f32 %v7229_v0, 0.0  ;;  %v7246_v39 = vmax.f32 %v7230_v50, 0.0  ;;  %v7581_v27 = vsel %vm7580_vm7, %v7579_v10, %v7578_v19  ;;  %v7746_v35 = vld [vmem:[%s16330_s5 + $0x380] sm:$0xff]  ;;  %v7795_v0 = vld [vmem:[%s16330_s5 + $0x508] sm:$0xff]  ;;  %v7744_v18 = vld [vmem:[%s16330_s5 + $0x370] sm:$0xff] }
 0x6d1   :  { %v7625_v38 = vrot.slane %v7555_v37, 7  ;;  %v16771_v56 = vmax.f32 %v15733_v59, 0.0  ;;  %v7598_v61 = vsel %vm7580_vm7, %v7597_v58, %v7596_v47  ;;  %v7627_v6 = vrot.slane %v7556_v5, 6  ;;  %v7733_v59 = vld [vmem:[%s16330_s5 + $0x318] sm:$0xff]  ;;  %v7742_v52 = vld [vmem:[%s16330_s5 + $0x360] sm:$0xff] }
 0x6d2   :  { %v7557_v15 = vmax.f32 %v7547_v4, %v7548_v46  ;;  %v7549_v60 = vmax.f32 %v7245_v8, %v16770_v48  ;;  %v7609_v41 = vsel %vm7574_vm5, %v7608_v44, %v15781_v22  ;;  %v7735_v22 = vld [vmem:[%s16330_s5 + $0x328] sm:$0xff]  ;;  %v9739_v55 = vpack.c.bf16 %v7733_v59, %v7730_v30  ;;  %v7749_v8 = vld [vmem:[%s16330_s5 + $0x398] sm:$0xff]  ;;  %v7798_v47 = vld [vmem:[%s16330_s5 + $0x520] sm:$0xff] }
 0x6d3   :  { %v7550_v45 = vmax.f32 %v7246_v39, %v16771_v56  ;;  %v7626_v9 = vsel %vm7577_vm6, %v7625_v38, %v7624_v25  ;;  %v7611_v36 = vsel %vm7577_vm6, %v7610_v42, %v7609_v41  ;;  %v9835_v34 = vpack.c.bf16 %v7735_v22, %v7732_v21  ;;  %v7738_v42 = vld [vmem:[%s16330_s5 + $0x340] sm:$0xff]  ;;  %v7747_v46 = vld [vmem:[%s16330_s5 + $0x388] sm:$0xff]  ;;  %v7752_v39 = vld [vmem:[%s16330_s5 + $0x3b0] sm:$0xff] }
 0x6d4   :  { %v7582_v12 = vrot.slane %v7557_v15, 2  ;;  %v7599_v16 = vrot.slane %v7557_v15, 3  ;;  %v7629_v23 = vrot.slane %v7557_v15, 5  ;;  %v7628_v20 = vsel %vm7580_vm7, %v7627_v6, %v7626_v9  ;;  %v7801_v58 = vld [vmem:[%s16330_s5 + $0x538] sm:$0xff]  ;;  %v7748_v48 = vld [vmem:[%s16330_s5 + $0x390] sm:$0xff]  ;;  %v7750_v56 = vld [vmem:[%s16330_s5 + $0x3a0] sm:$0xff] }
 0x6d5   :  { %v7558_v7 = vmax.f32 %v7549_v60, %v7550_v45  ;;  %v7614_v51 = vrot.slane %v7557_v15, 4  ;;  %v7613_v33 = vsel %vm7580_vm7, %v7612_v26, %v7611_v36  ;;  %v9741_v5 = vpack.c.bf16 %v7740_v11, %v7737_v1  ;;  %v7751_v60 = vld [vmem:[%s16330_s5 + $0x3a8] sm:$0xff]  ;;  %v7753_v45 = vld [vmem:[%s16330_s5 + $0x3b8] sm:$0xff]  ;;  %v7758_v6 = vld [vmem:[%s16330_s5 + $0x3e0] sm:$0xff] }
 0x6d6   :  { %v7584_v32 = vsel %vm7583_vm8, %v7582_v12, %v7581_v27  ;;  %v7600_v44 = vsel %vm7583_vm8, %v7599_v16, %v7598_v61  ;;  %v7630_v40 = vsel %vm7583_vm8, %v7629_v23, %v7628_v20  ;;  %v9837_v4 = vpack.c.bf16 %v7789_v13, %v7786_v14  ;;  %v7755_v61 = vld [vmem:[%s16330_s5 + $0x3c8] sm:$0xff]  ;;  %v7804_v41 = vld [vmem:[%s16330_s5 + $0x550] sm:$0xff]  ;;  %v7754_v9 = vld [vmem:[%s16330_s5 + $0x3c0] sm:$0xff] }
 0x6d7   :  { %v7585_v3 = vrot.slane %v7558_v7, 1  ;;  %v7601_v53 = vrot.slane %v7558_v7, 2  ;;  %v7631_v2 = vrot.slane %v7558_v7, 4  ;;  %v7615_v37 = vsel %vm7583_vm8, %v7614_v51, %v7613_v33  ;;  %v7807_v12 = vld [vmem:[%s16330_s5 + $0x568] sm:$0xff]  ;;  %v7757_v23 = vld [vmem:[%s16330_s5 + $0x3d8] sm:$0xff]  ;;  %v7756_v21 = vld [vmem:[%s16330_s5 + $0x3d0] sm:$0xff] }
 0x6d8   :  { %v7616_v63 = vrot.slane %v7558_v7, 3  ;;  %v9743_v50 = vpack.c.bf16 %v7739_v43, %v7736_v28  ;;  %v9839_v19 = vpack.c.bf16 %v7741_v62, %v7738_v42  ;;  %v9745_v10 = vpack.c.bf16 %v7746_v35, %v7743_v29  ;;  %v7759_v22 = vld [vmem:[%s16330_s5 + $0x3e8] sm:$0xff]  ;;  %v7761_v20 = vld [vmem:[%s16330_s5 + $0x3f8] sm:$0xff]  ;;  %v7764_v36 = vld [vmem:[%s16330_s5 + $0x410] sm:$0xff] }
 0x6d9   :  { %v7587_v49 = vsel %vm7586_vm9, %v7585_v3, %v7584_v32  ;;  %v7602_v17 = vsel %vm7586_vm9, %v7601_v53, %v7600_v44  ;;  %v7632_v57 = vsel %vm7586_vm9, %v7631_v2, %v7630_v40  ;;  %v9841_v26 = vpack.c.bf16 %v7795_v0, %v7792_v24  ;;  %v7810_v51 = vld [vmem:[%s16330_s5 + $0x580] sm:$0xff]  ;;  %v7813_v32 = vld [vmem:[%s16330_s5 + $0x598] sm:$0xff]  ;;  %v7760_v1 = vld [vmem:[%s16330_s5 + $0x3f0] sm:$0xff] }
 0x6da   :  { %7907 = vmatprep.mubr.f32.mxu1 %v7602_v17  ;;  %8049 = vmatprep.mubr.f32.mxu0 %v7602_v17  ;;  %v15893_v54 = vsel %vm7586_vm9, %v7616_v63, %v7615_v37  ;;  %v9747_v25 = vpack.c.bf16 %v7745_v31, %v7742_v52  ;;  %v9843_v15 = vpack.c.bf16 %v7747_v46, %v7744_v18  ;;  %v7763_v33 = vld [vmem:[%s16330_s5 + $0x408] sm:$0xff]  ;;  %v7762_v2 = vld [vmem:[%s16330_s5 + $0x400] sm:$0xff]  ;;  %v7765_v11 = vld [vmem:[%s16330_s5 + $0x418] sm:$0xff] }
 0x6db   :  { %7908 = vmatmul.mubr.f32.vlgmr.msra.gmra.mrb[12].mxu1 %v7587_v49  ;;  %8050 = vmatmul.mubr.f32.vlgmr.msra.gmra.mrb[68].mxu0 %v7587_v49  ;;  %v9749_v27 = vpack.c.bf16 %v7752_v39, %v7749_v8  ;;  %v9845_v38 = vpack.c.bf16 %v7801_v58, %v7798_v47  ;;  %v9751_v16 = vpack.c.bf16 %v7751_v60, %v7748_v48  ;;  %v7767_v14 = vld [vmem:[%s16330_s5 + $0x428] sm:$0xff]  ;;  %v7770_v13 = vld [vmem:[%s16330_s5 + $0x440] sm:$0xff]  ;;  %v7816_v37 = vld [vmem:[%s16330_s5 + $0x5b0] sm:$0xff] }
 0x6dc   :  { %9740 = vmatpush1.bf16.msra.mxu1 %v9739_v55  ;;  %9836 = vmatpush3.bf16.msra.mxu0 %v9835_v34  ;;  %v9847_v30 = vpack.c.bf16 %v7753_v45, %v7750_v56  ;;  %v9753_v7 = vpack.c.bf16 %v7758_v6, %v7755_v61  ;;  %v9849_v59 = vpack.c.bf16 %v7807_v12, %v7804_v41  ;;  %v7819_v55 = vld [vmem:[%s16330_s5 + $0x5c8] sm:$0xff]  ;;  %v7766_v43 = vld [vmem:[%s16330_s5 + $0x420] sm:$0xff]  ;;  %v7769_v63 = vld [vmem:[%s16330_s5 + $0x438] sm:$0xff] }
 0x6dd   :  { %7978 = vmatprep.mubr.f32.mxu1 %v7632_v57  ;;  %8119 = vmatprep.mubr.f32.mxu0 %v7632_v57  ;;  %v9755_v44 = vpack.c.bf16 %v7757_v23, %v7754_v9  ;;  %v9851_v40 = vpack.c.bf16 %v7759_v22, %v7756_v21  ;;  %v9757_v3 = vpack.c.bf16 %v7764_v36, %v7761_v20  ;;  %v7768_v57 = vld [vmem:[%s16330_s5 + $0x430] sm:$0xff]  ;;  %v7771_v42 = vld [vmem:[%s16330_s5 + $0x448] sm:$0xff]  ;;  %v7773_v62 = vld [vmem:[%s16330_s5 + $0x458] sm:$0xff] }
 0x6de   :  { %9742 = vmatprep.subr.bf16.mxu1 %v9741_v5  ;;  %9838 = vmatprep.subr.bf16.mxu0 %v9837_v4  ;;  %v9853_v53 = vpack.c.bf16 %v7813_v32, %v7810_v51  ;;  %v9759_v34 = vpack.c.bf16 %v7763_v33, %v7760_v1  ;;  %v9855_v28 = vpack.c.bf16 %v7765_v11, %v7762_v2  ;;  %v7776_v29 = vld [vmem:[%s16330_s5 + $0x470] sm:$0xff]  ;;  %v7822_v5 = vld [vmem:[%s16330_s5 + $0x5e0] sm:$0xff]  ;;  %v7825_v4 = vld [vmem:[%s16330_s5 + $0x5f8] sm:$0xff] }
 0x6df   :  { %v9761_v49 = vpack.c.bf16 %v7770_v13, %v7767_v14  ;;  %v9857_v17 = vpack.c.bf16 %v7819_v55, %v7816_v37  ;;  %v9763_v35 = vpack.c.bf16 %v7769_v63, %v7766_v43  ;;  %v9859_v24 = vpack.c.bf16 %v7771_v42, %v7768_v57  ;;  %v7772_v0 = vld [vmem:[%s16330_s5 + $0x450] sm:$0xff]  ;;  %v7775_v52 = vld [vmem:[%s16330_s5 + $0x468] sm:$0xff]  ;;  %v7774_v31 = vld [vmem:[%s16330_s5 + $0x460] sm:$0xff] }
 0x6e0   :  { %9744 = vmatpush1.bf16.msra.mxu1 %v9743_v50  ;;  %9840 = vmatpush3.bf16.msra.mxu0 %v9839_v19  ;;  %v9765_v50 = vpack.c.bf16 %v7776_v29, %v7773_v62  ;;  %v9861_v19 = vpack.c.bf16 %v7825_v4, %v7822_v5  ;;  %v7782_v18 = vld [vmem:[%s16330_s5 + $0x4a0] sm:$0xff]  ;;  %v9767_v46 = vpack.c.bf16 %v7775_v52, %v7772_v0  ;;  %v7781_v58 = vld [vmem:[%s16330_s5 + $0x498] sm:$0xff]  ;;  %v7791_v56 = vld [vmem:[%s16330_s5 + $0x4e8] sm:$0xff]  ;;  %v10162_v42 = vmov 0.0|0.0  }
 0x6e1   :  { %9746 = vmatprep.subr.bf16.mxu1 %v9745_v10  ;;  %9842 = vmatprep.subr.bf16.mxu0 %v9841_v26  ;;  %v7777_v10 = vld [vmem:[%s16330_s5 + $0x478] sm:$0xff]  ;;  %v7779_v26 = vld [vmem:[%s16330_s5 + $0x488] sm:$0xff]  ;;  %v7778_v47 = vld [vmem:[%s16330_s5 + $0x480] sm:$0xff] }
 0x6e2   :  { %v9863_v8 = vpack.c.bf16 %v7777_v10, %v7774_v31  ;;  %v9769_v39 = vpack.c.bf16 %v7782_v18, %v7779_v26  ;;  %v9771_v48 = vpack.c.bf16 %v7781_v58, %v7778_v47  ;;  %v7794_v45 = vld [vmem:[%s16330_s5 + $0x500] sm:$0xff]  ;;  %v7793_v12 = vld [vmem:[%s16330_s5 + $0x4f8] sm:$0xff]  ;;  %v7803_v21 = vld [vmem:[%s16330_s5 + $0x548] sm:$0xff]  ;;  %v16772_v26 = vmov 0.0  }
 0x6e3   :  { %v9777_v6 = vpack.c.bf16 %v7794_v45, %v7791_v56  ;;  %v7790_v41 = vld [vmem:[%s16330_s5 + $0x4e0] sm:$0xff]  ;;  %v7805_v32 = vld [vmem:[%s16330_s5 + $0x558] sm:$0xff]  ;;  %v7815_v2 = vld [vmem:[%s16330_s5 + $0x5a8] sm:$0xff] }
 0x6e4   :  { %9748 = vmatpush1.bf16.msra.mxu1 %v9747_v25  ;;  %9844 = vmatpush3.bf16.msra.mxu0 %v9843_v15  ;;  %v7785_v25 = vld [vmem:[%s16330_s5 + $0x4b8] sm:$0xff]  ;;  %v7788_v15 = vld [vmem:[%s16330_s5 + $0x4d0] sm:$0xff]  ;;  %v9779_v9 = vpack.c.bf16 %v7793_v12, %v7790_v41  ;;  %v7806_v22 = vld [vmem:[%s16330_s5 + $0x560] sm:$0xff] }
 0x6e5   :  { %9750 = vmatprep.subr.bf16.mxu1 %v9749_v27  ;;  %9846 = vmatprep.subr.bf16.mxu0 %v9845_v38  ;;  %v9773_v60 = vpack.c.bf16 %v7788_v15, %v7785_v25  ;;  %v7784_v27 = vld [vmem:[%s16330_s5 + $0x4b0] sm:$0xff]  ;;  %v7787_v38 = vld [vmem:[%s16330_s5 + $0x4c8] sm:$0xff]  ;;  %v9785_v36 = vpack.c.bf16 %v7806_v22, %v7803_v21  ;;  %v7802_v51 = vld [vmem:[%s16330_s5 + $0x540] sm:$0xff] }
 0x6e6   :  { %v9775_v61 = vpack.c.bf16 %v7787_v38, %v7784_v27  ;;  %v9787_v1 = vpack.c.bf16 %v7805_v32, %v7802_v51  ;;  %v7818_v11 = vld [vmem:[%s16330_s5 + $0x5c0] sm:$0xff]  ;;  %v7817_v55 = vld [vmem:[%s16330_s5 + $0x5b8] sm:$0xff]  ;;  %v8161_v29 = vld [vmem:[%s16332_s7 + $0x108] sm:$0xff] }
 0x6e7   :  { %v9793_v13 = vpack.c.bf16 %v7818_v11, %v7815_v2  ;;  %v7814_v37 = vld [vmem:[%s16330_s5 + $0x5a0] sm:$0xff]  ;;  %v8162_v5 = vld [vmem:[%s16332_s7 + $0x110] sm:$0xff]  ;;  %v8165_v0 = vld [vmem:[%s16332_s7 + $0x128] sm:$0xff] }
 0x6e8   :  { %9752 = vmatpush1.bf16.msra.mxu1 %v9751_v16  ;;  %9848 = vmatpush3.bf16.msra.mxu0 %v9847_v30  ;;  %v7797_v16 = vld [vmem:[%s16330_s5 + $0x518] sm:$0xff]  ;;  %v7800_v30 = vld [vmem:[%s16330_s5 + $0x530] sm:$0xff]  ;;  %v9795_v43 = vpack.c.bf16 %v7817_v55, %v7814_v37  ;;  %v8160_v62 = vld [vmem:[%s16332_s7 + $0x100] sm:$0xff] }
 0x6e9   :  { %9754 = vmatprep.subr.bf16.mxu1 %v9753_v7  ;;  %9850 = vmatprep.subr.bf16.mxu0 %v9849_v59  ;;  %v9781_v23 = vpack.c.bf16 %v7800_v30, %v7797_v16  ;;  %v7796_v7 = vld [vmem:[%s16330_s5 + $0x510] sm:$0xff]  ;;  %v7799_v59 = vld [vmem:[%s16330_s5 + $0x528] sm:$0xff]  ;;  %v9898_v4 = vpack.c.bf16 %v8161_v29, %v8160_v62  ;;  %v8167_v52 = vld [vmem:[%s16332_s7 + $0x138] sm:$0xff] }
 0x6ea   :  { %v9783_v20 = vpack.c.bf16 %v7799_v59, %v7796_v7  ;;  %v8144_v31 = vld [vmem:[%s16332_s7 + $0x80] sm:$0xff]  ;;  %v8145_v10 = vld [vmem:[%s16332_s7 + $0x88] sm:$0xff]  ;;  %v8147_v25 = vld [vmem:[%s16332_s7 + $0x98] sm:$0xff] }
 0x6eb   :  { %v9865_v18 = vpack.c.bf16 %v8145_v10, %v8144_v31  ;;  %v8130_v15 = vld [vmem:[%s16332_s7 + $0x10] sm:$0xff]  ;;  %v8148_v27 = vld [vmem:[%s16332_s7 + $0xa0] sm:$0xff]  ;;  %v8149_v38 = vld [vmem:[%s16332_s7 + $0xa8] sm:$0xff] }
 0x6ec   :  { %9756 = vmatpush1.bf16.msra.mxu1 %v9755_v44  ;;  %9852 = vmatpush3.bf16.msra.mxu0 %v9851_v40  ;;  %v7809_v44 = vld [vmem:[%s16330_s5 + $0x578] sm:$0xff]  ;;  %v7812_v40 = vld [vmem:[%s16330_s5 + $0x590] sm:$0xff]  ;;  %v9873_v45 = vpack.c.bf16 %v8149_v38, %v8148_v27  ;;  %v8152_v7 = vld [vmem:[%s16332_s7 + $0xc0] sm:$0xff] }
 0x6ed   :  { %9758 = vmatprep.subr.bf16.mxu1 %v9757_v3  ;;  %9854 = vmatprep.subr.bf16.mxu0 %v9853_v53  ;;  %v9789_v33 = vpack.c.bf16 %v7812_v40, %v7809_v44  ;;  %v7808_v3 = vld [vmem:[%s16330_s5 + $0x570] sm:$0xff]  ;;  %v7811_v53 = vld [vmem:[%s16330_s5 + $0x588] sm:$0xff]  ;;  %v8151_v12 = vld [vmem:[%s16332_s7 + $0xb8] sm:$0xff] }
 0x6ee   :  { %v9791_v14 = vpack.c.bf16 %v7811_v53, %v7808_v3  ;;  %v8150_v41 = vld [vmem:[%s16332_s7 + $0xb0] sm:$0xff]  ;;  %v8153_v59 = vld [vmem:[%s16332_s7 + $0xc8] sm:$0xff]  ;;  %v8155_v32 = vld [vmem:[%s16332_s7 + $0xd8] sm:$0xff] }
 0x6ef   :  { %v9877_v30 = vpack.c.bf16 %v8151_v12, %v8150_v41  ;;  %v9881_v22 = vpack.c.bf16 %v8153_v59, %v8152_v7  ;;  %v8154_v51 = vld [vmem:[%s16332_s7 + $0xd0] sm:$0xff]  ;;  %v8156_v3 = vld [vmem:[%s16332_s7 + $0xe0] sm:$0xff]  ;;  %v8157_v53 = vld [vmem:[%s16332_s7 + $0xe8] sm:$0xff] }
 0x6f0   :  { %9760 = vmatpush1.bf16.msra.mxu1 %v9759_v34  ;;  %9856 = vmatpush3.bf16.msra.mxu0 %v9855_v28  ;;  %v7821_v34 = vld [vmem:[%s16330_s5 + $0x5d8] sm:$0xff]  ;;  %v7824_v28 = vld [vmem:[%s16330_s5 + $0x5f0] sm:$0xff]  ;;  %v9885_v40 = vpack.c.bf16 %v8155_v32, %v8154_v51  ;;  %v9889_v11 = vpack.c.bf16 %v8157_v53, %v8156_v3  ;;  %v7826_v29 = vld [vmem:[%s16333_s6] sm:$0x7] }
 0x6f1   :  { %9762 = vmatprep.subr.bf16.mxu1 %v9761_v49  ;;  %9858 = vmatprep.subr.bf16.mxu0 %v9857_v17  ;;  %v9797_v63 = vpack.c.bf16 %v7824_v28, %v7821_v34  ;;  %v7820_v49 = vld [vmem:[%s16330_s5 + $0x5d0] sm:$0xff]  ;;  %v7823_v17 = vld [vmem:[%s16330_s5 + $0x5e8] sm:$0xff]  ;;  %v8159_v34 = vld [vmem:[%s16332_s7 + $0xf8] sm:$0xff] }
 0x6f2   :  { %v9799_v57 = vpack.c.bf16 %v7823_v17, %v7820_v49  ;;  %v8158_v55 = vld [vmem:[%s16332_s7 + $0xf0] sm:$0xff]  ;;  %v16775_v31 = vld [vmem:[#allocation3_spill] sm:$0xff]  ;;  %v8326_v12 = vld [vmem:[%s16334_s9 + $0x38] sm:$0xff] }
 0x6f3   :  { %v8142_v28 = vld [vmem:[%s16332_s7 + $0x70] sm:$0xff]  ;;  %v7831_v10 = vrot.slane %v7826_v29, %v16775_v31  ;;  %v8330_v59 = vld [vmem:[%s16334_s9 + $0x58] sm:$0xff]  ;;  %v9009_v3 = vld [vmem:[%s16335_s8] ss:$0 sm:$0xff] }
 0x6f4   :  { %9764 = vmatpush1.bf16.msra.mxu1 %v9763_v35  ;;  %9860 = vmatpush3.bf16.msra.mxu0 %v9859_v24  ;;  %v8164_v24 = vld [vmem:[%s16332_s7 + $0x120] sm:$0xff]  ;;  %v8321_v27 = vld [vmem:[%s16334_s9 + $0x10] sm:$0xff]  ;;  %v8334_v32 = vld [vmem:[%s16334_s9 + $0x78] sm:$0xff] }
 0x6f5   :  { %9766 = vmatprep.subr.bf16.mxu1 %v9765_v50  ;;  %9862 = vmatprep.subr.bf16.mxu0 %v9861_v19  ;;  %v8166_v50 = vld [vmem:[%s16332_s7 + $0x130] sm:$0xff]  ;;  %v9904_v19 = vpack.c.bf16 %v8165_v0, %v8164_v24 }
 0x6f6   :  { %v9907_v47 = vpack.c.bf16 %v8167_v52, %v8166_v50  ;;  %v8325_v41 = vld [vmem:[%s16334_s9 + $0x30] sm:$0xff] }
 0x6f7   :  { %v8329_v7 = vld [vmem:[%s16334_s9 + $0x50] sm:$0xff] }
 0x6f8   :  { %9768 = vmatpush1.bf16.msra.mxu1 %v9767_v46  ;;  %9864 = vmatpush3.bf16.msra.mxu0 %v9863_v8  ;;  %v8128_v46 = vld [vmem:[%s16332_s7] sm:$0xff]  ;;  %v8129_v8 = vld [vmem:[%s16332_s7 + $0x8] sm:$0xff] }
 0x6f9   :  { %9770 = vmatprep.subr.bf16.mxu1 %v9769_v39  ;;  %9897 = vmatprep.subr.bf16.mxu0 %v10162_v42  ;;  %v8146_v39 = vld [vmem:[%s16332_s7 + $0x90] sm:$0xff]  ;;  %v9867_v58 = vpack.c.bf16 %v8129_v8, %v8128_v46 }
 0x6fb   :  { %8120 = vmatmul.mubr.f32.vlgmr.msra.gmra.mrb[70].mxu0 %v15893_v54 }
 0x6fc   :  { %9772 = vmatpush1.bf16.msra.mxu1 %v9771_v48  ;;  %9899 = vmatpush3.bf16.msra.mxu0 %v9898_v4  ;;  %v8131_v48 = vld [vmem:[%s16332_s7 + $0x18] sm:$0xff] }
 0x6fd   :  { %9774 = vmatprep.subr.bf16.mxu1 %v9773_v60  ;;  %9900 = vmatprep.subr.bf16.mxu0 %v10162_v42  ;;  %v9869_v60 = vpack.c.bf16 %v8147_v25, %v8146_v39  ;;  %v9871_v56 = vpack.c.bf16 %v8131_v48, %v8130_v15  ;;  %v8319_v48 = vld [vmem:[%s16334_s9] sm:$0xff] }
 0x6fe   :  { %9331 = vmatprep.mubr.msk.f32.mxu0 %vm10163_vm10, %v16772_v26 }
 0x700   :  { %9776 = vmatpush1.bf16.msra.mxu1 %v9775_v61  ;;  %v8132_v61 = vld [vmem:[%s16332_s7 + $0x20] sm:$0xff] }
 0x701   :  { %9778 = vmatprep.subr.bf16.mxu1 %v9777_v6  ;;  %v8133_v6 = vld [vmem:[%s16332_s7 + $0x28] sm:$0xff] }
 0x702   :  { %v9875_v16 = vpack.c.bf16 %v8133_v6, %v8132_v61  ;;  %v8324_v61 = vld [vmem:[%s16334_s9 + $0x28] sm:$0xff] }
 0x704   :  { %9780 = vmatpush1.bf16.msra.mxu1 %v9779_v9  ;;  %v8134_v9 = vld [vmem:[%s16332_s7 + $0x30] sm:$0xff] }
 0x705   :  { %9782 = vmatprep.subr.bf16.mxu1 %v9781_v23  ;;  %v8135_v23 = vld [vmem:[%s16332_s7 + $0x38] sm:$0xff] }
 0x706   :  { %v9879_v21 = vpack.c.bf16 %v8135_v23, %v8134_v9  ;;  %v8328_v9 = vld [vmem:[%s16334_s9 + $0x48] sm:$0xff] }
 0x708   :  { %9784 = vmatpush1.bf16.msra.mxu1 %v9783_v20  ;;  %v8136_v20 = vld [vmem:[%s16332_s7 + $0x40] sm:$0xff] }
 0x709   :  { %9786 = vmatprep.subr.bf16.mxu1 %v9785_v36  ;;  %v8137_v36 = vld [vmem:[%s16332_s7 + $0x48] sm:$0xff] }
 0x70a   :  { %v9883_v44 = vpack.c.bf16 %v8137_v36, %v8136_v20  ;;  %v8332_v20 = vld [vmem:[%s16334_s9 + $0x68] sm:$0xff]  ;;  %v8333_v36 = vld [vmem:[%s16334_s9 + $0x70] sm:$0xff] }
 0x70c   :  { %9788 = vmatpush1.bf16.msra.mxu1 %v9787_v1  ;;  %v8138_v1 = vld [vmem:[%s16332_s7 + $0x50] sm:$0xff] }
 0x70d   :  { %9790 = vmatprep.subr.bf16.mxu1 %v9789_v33  ;;  %v8139_v33 = vld [vmem:[%s16332_s7 + $0x58] sm:$0xff] }
 0x70e   :  { %v9887_v2 = vpack.c.bf16 %v8139_v33, %v8138_v1 }
 0x710   :  { %9792 = vmatpush1.bf16.msra.mxu1 %v9791_v14  ;;  %v8140_v14 = vld [vmem:[%s16332_s7 + $0x60] sm:$0xff] }
 0x711   :  { %9794 = vmatprep.subr.bf16.mxu1 %v9793_v13  ;;  %v8141_v13 = vld [vmem:[%s16332_s7 + $0x68] sm:$0xff] }
 0x712   :  { %v9891_v37 = vpack.c.bf16 %v8141_v13, %v8140_v14 }
 0x714   :  { %9796 = vmatpush1.bf16.msra.mxu1 %v9795_v43  ;;  %v9893_v43 = vpack.c.bf16 %v8159_v34, %v8158_v55 }
 0x715   :  { %9798 = vmatprep.subr.bf16.mxu1 %v9797_v63  ;;  %v8143_v63 = vld [vmem:[%s16332_s7 + $0x78] sm:$0xff] }
 0x716   :  { %v9895_v49 = vpack.c.bf16 %v8143_v63, %v8142_v28 }
 0x718   :  { %9800 = vmatpush1.bf16.msra.mxu1 %v9799_v57 }
 0x719   :  { %9866 = vmatprep.subr.bf16.mxu1 %v9865_v18  ;;  %v16776_v18 = vld [vmem:[#allocation62_spill] sm:$0xff] }
 0x71a   :  { %v7835_v46 = vrot.slane %v7826_v29, %v16776_v18 }
 0x71b   :  { %7979 = vmatmul.mubr.f32.vlgmr.msra.gmra.mrb[12].mxu1 %v15893_v54  ;;  %v8163_v54 = vld [vmem:[%s16332_s7 + $0x118] sm:$0xff] }
 0x71c   :  { %v9901_v35 = vpack.c.bf16 %v8163_v54, %v8162_v5  ;;  %9868 = vmatpush3.bf16.msra.mxu1 %v9867_v58  ;;  %v16773_v5 = vld [vmem:[#allocation2_spill] sm:$0xff] }
 0x71d   :  { %9870 = vmatprep.subr.bf16.mxu1 %v9869_v60  ;;  %v16774_v4 = vsub.s32 2, %v16773_v5  ;;  %v8320_v60 = vld [vmem:[%s16334_s9 + $0x8] sm:$0xff] }
 0x71e   :  { %9902 = vmatpush3.bf16.msra.mxu0 %v9901_v35  ;;  %v9910_v38 = vpack.c.bf16 %v8320_v60, %v8319_v48 }
 0x71f   :  { %9903 = vmatprep.subr.bf16.mxu0 %v10162_v42  ;;  %v7839_v54 = vrot.slane %v7826_v29, %v16774_v4 }
 0x720   :  { %9872 = vmatpush3.bf16.msra.mxu1 %v9871_v56  ;;  %v8322_v56 = vld [vmem:[%s16334_s9 + $0x18] sm:$0xff] }
 0x721   :  { %9874 = vmatprep.subr.bf16.mxu1 %v9873_v45  ;;  %v9913_v45 = vpack.c.bf16 %v8322_v56, %v8321_v27 }
 0x722   :  { %9905 = vmatpush3.bf16.msra.mxu0 %v9904_v19 }
 0x723   :  { %9906 = vmatprep.subr.bf16.mxu0 %v10162_v42 }
 0x724   :  { %9876 = vmatpush3.bf16.msra.mxu1 %v9875_v16  ;;  %v9919_v16 = vpack.c.bf16 %v8326_v12, %v8325_v41 }
 0x725   :  { %9878 = vmatprep.subr.bf16.mxu1 %v9877_v30  ;;  %v8327_v30 = vld [vmem:[%s16334_s9 + $0x40] sm:$0xff] }
 0x726   :  { %9908 = vmatpush3.bf16.msra.mxu0 %v9907_v47  ;;  %v9922_v23 = vpack.c.bf16 %v8328_v9, %v8327_v30 }
 0x728   :  { %9880 = vmatpush3.bf16.msra.mxu1 %v9879_v21  ;;  %v9925_v21 = vpack.c.bf16 %v8330_v59, %v8329_v7 }
 0x729   :  { %9882 = vmatprep.subr.bf16.mxu1 %v9881_v22  ;;  %v8331_v22 = vld [vmem:[%s16334_s9 + $0x60] sm:$0xff] }
 0x72a   :  { %v9928_v51 = vpack.c.bf16 %v8332_v20, %v8331_v22 }
 0x72c   :  { %9884 = vmatpush3.bf16.msra.mxu1 %v9883_v44  ;;  %v9931_v44 = vpack.c.bf16 %v8334_v32, %v8333_v36 }
 0x72d   :  { %9886 = vmatprep.subr.bf16.mxu1 %v9885_v40 }
 0x730   :  { %9888 = vmatpush3.bf16.msra.mxu1 %v9887_v2 }
 0x731   :  { %9890 = vmatprep.subr.bf16.mxu1 %v9889_v11 }
 0x734   :  { %9892 = vmatpush3.bf16.msra.mxu1 %v9891_v37  ;;  %v9011_v37 = vld [vmem:[%s16336_s10] ss:$0 sm:$0xff] }
 0x735   :  { %9894 = vmatprep.subr.bf16.mxu1 %v9893_v43 }
 0x738   :  { %9896 = vmatpush3.bf16.msra.mxu1 %v9895_v49 }
 0x739   :  { %9909 = vmatprep.subr.bf16.mxu1 %v10162_v42 }
 0x7ae   :  { %v9112_v17 = vpop.f32.mrb[68].mxu0 }
 0x7af   :  { %v9113_v57 = vpop.f32.mrb[69].mxu0 }
 0x7b0   :  { %v9114_v62 = vadd.f32 %v9113_v57, %v9112_v17 }
 0x7b2   :  { %v8052_v0 = vadd.f32 %v9114_v62, %v7839_v54 }
 0x7ce   :  { %v9147_v35 = vpop.f32.mrb[70].mxu0 }
 0x7cf   :  { %v9148_v24 = vpop.f32.mrb[71].mxu0 }
 0x7d0   :  { %v9149_v50 = vadd.f32 %v9148_v24, %v9147_v35 }
 0x7d2   :  { %v8122_v19 = vadd.f32 %v9149_v50, %v8052_v0 }
 0x7d4   :  { %v8127_v52 = vmax.f32 %v8122_v19, 0.0 }
 0x7d6   :  { %9332 = vmatmul.mubr.msk.f32.vlgmr.msra.gmra.mrb[72].mxu0 %vm5773_vm2, %v8127_v52 }
 0x7ee   :  { %v7980_v8 = vpop.f32.mrb[12].mxu1 }
 0x7ef   :  { %v9953_v39 = vadd.f32 %v7980_v8, %v7831_v10  ;;  %v7982_v47 = vpop.f32.mrb[13].mxu1 }
 0x7f0   :  { %v9954_v58 = vadd.f32 %v7982_v47, %v7835_v46 }
 0x7f1   :  { %v8125_v15 = vmax.f32 %v9953_v39, 0.0 }
 0x7f2   :  { %v8126_v25 = vmax.f32 %v9954_v58, 0.0 }
 0x7f4   :  { %8242 = vmatprep.mubr.f32.mxu1 %v8126_v25 }
 0x7f5   :  { %8243 = vmatmul.mubr.f32.vlgmr.msra.gmra.mrb[14].mxu1 %v8125_v15 }
 0x7f6   :  { %9366 = vmatprep.mubr.msk.f32.mxu1 %vm10163_vm10, %v16772_v26  ;;  %9911 = vmatpush3.bf16.msra.mxu1 %v9910_v38  ;;  %v8323_v26 = vld [vmem:[%s16334_s9 + $0x20] sm:$0xff] }
 0x7f7   :  { %9912 = vmatprep.subr.bf16.mxu1 %v10162_v42  ;;  %v9916_v6 = vpack.c.bf16 %v8324_v61, %v8323_v26 }
 0x7fa   :  { %9914 = vmatpush3.bf16.msra.mxu1 %v9913_v45 }
 0x7fb   :  { %9915 = vmatprep.subr.bf16.mxu1 %v10162_v42 }
 0x7fe   :  { %9917 = vmatpush3.bf16.msra.mxu1 %v9916_v6 }
 0x7ff   :  { %9918 = vmatprep.subr.bf16.mxu1 %v10162_v42 }
 0x802   :  { %9920 = vmatpush3.bf16.msra.mxu1 %v9919_v16 }
 0x803   :  { %9921 = vmatprep.subr.bf16.mxu1 %v10162_v42 }
 0x806   :  { %9923 = vmatpush3.bf16.msra.mxu1 %v9922_v23 }
 0x807   :  { %9924 = vmatprep.subr.bf16.mxu1 %v10162_v42 }
 0x80a   :  { %9926 = vmatpush3.bf16.msra.mxu1 %v9925_v21 }
 0x80b   :  { %9927 = vmatprep.subr.bf16.mxu1 %v10162_v42 }
 0x80e   :  { %9929 = vmatpush3.bf16.msra.mxu1 %v9928_v51 }
 0x80f   :  { %9930 = vmatprep.subr.bf16.mxu1 %v10162_v42 }
 0x812   :  { %9932 = vmatpush3.bf16.msra.mxu1 %v9931_v44 }
 0x8a9   :  { %v8314_v40 = vpop.f32.mrb[72].mxu0 }
 0x8aa   :  { %v9333_v1 = vpop.f32.mrb[73].mxu0 }
 0x8c8   :  { %v9182_v33 = vpop.f32.mrb[14].mxu1 }
 0x8c9   :  { %v9183_v53 = vpop.f32.mrb[15].mxu1 }
 0x8ca   :  { %v9184_v2 = vadd.f32 %v9183_v53, %v9182_v33 }
 0x8cc   :  { %v8245_v11 = vadd.f32 %v9184_v2, %v9009_v3 }
 0x8ce   :  { %v8315_v14 = vadd.f32 %v8314_v40, %v8245_v11 }
 0x8d0   :  { %v8318_v13 = vmax.f32 %v8315_v14, 0.0 }
 0x8d2   :  { %9367 = vmatmul.mubr.f32.vlgmr.msra.gmra.mrb[16].mxu1 %v8318_v13 }
 0x9a5   :  { %v8408_v55 = vpop.f32.mrb[16].mxu1 }
 0x9a6   :  { %v8409_v42 = vadd.f32 %v9011_v37, %v8408_v55  ;;  %v9368_v34 = vpop.f32.mrb[17].mxu1 }
 0x9a8   :  { %8412 = vst [vmem:[%s16337_s11] sm:$0xff] %v8409_v42 }

</bundles_post_ra>
